<compile_context>
chip_gen: v7x
topology: tpu7x:2x2x1
jax: 0.10.0
libtpu: 0.0.40
codegen_flags: <defaults>
</compile_context>

<pallas_src>
import math
import functools

import jax
import jax.numpy as jnp
from jax.experimental import pallas as pl
from jax.experimental.pallas import tpu as pltpu


# -----------------------------------------------------------------------------
# helpers
# -----------------------------------------------------------------------------
def _pick_block(dim, candidates, min_steps=1):
    """Largest candidate dividing `dim` giving >= min_steps grid steps; falls back to
    any divisor, else the full dim (always legal)."""
    for c in candidates:
        if dim % c == 0 and dim // c >= min_steps:
            return c
    for c in candidates:
        if dim % c == 0:
            return c
    return dim


_BM_CANDIDATES = (256, 128, 64, 32, 16, 8)   # rows per tile
_BN_CANDIDATES = (512, 384, 256, 128)        # output lanes per tile


def _parallel(n):
    return pltpu.CompilerParams(dimension_semantics=("parallel",) * n)


# -----------------------------------------------------------------------------
# GroupNorm + proj_in (1x1 conv) fused kernel: grid over batch.
# -----------------------------------------------------------------------------
def _gn_projin_kernel(x_ref, gmat_ref, gg_ref, gb_ref, w_ref, b_ref, o_ref,
                      *, inv_count, eps):
    x = x_ref[0]                                             # (HW, C)
    csum = jnp.sum(x, axis=0, keepdims=True)                 # per-channel sums (1, C)
    # broadcast per-group stats back to channels with a tiny (C,C) 0/1 matmul (MXU)
    mean = jnp.dot(csum, gmat_ref[...], preferred_element_type=jnp.float32) * inv_count
    xc = x - mean
    csq = jnp.sum(xc * xc, axis=0, keepdims=True)            # centered -> stable
    var = jnp.dot(csq, gmat_ref[...], preferred_element_type=jnp.float32) * inv_count
    xn = xc * jax.lax.rsqrt(var + eps) * gg_ref[...] + gb_ref[...]
    o_ref[0] = (jnp.dot(xn, w_ref[...], preferred_element_type=jnp.float32)
                + b_ref[...]).astype(o_ref.dtype)


def groupnorm_projin_pallas(x_bsc, gn_g, gn_b, wt, b, *, groups, eps=1e-6):
    """x_bsc: (B, HW, C) channels-last.  GroupNorm(groups) + x @ wt + b fused."""
    B, HW, C = x_bsc.shape
    N = wt.shape[1]
    cg = C // groups
    gid = jnp.arange(C) // cg
    gmat = (gid[:, None] == gid[None, :]).astype(jnp.float32)   # same-group mask (C,C)
    kern = functools.partial(_gn_projin_kernel,
                             inv_count=1.0 / float(HW * cg), eps=eps)
    return pl.pallas_call(
        kern,
        out_shape=jax.ShapeDtypeStruct((B, HW, N), x_bsc.dtype),
        grid=(B,),
        in_specs=[
            pl.BlockSpec((1, HW, C), lambda i: (i, 0, 0)),
            pl.BlockSpec((C, C), lambda i: (0, 0)),
            pl.BlockSpec((1, C), lambda i: (0, 0)),
            pl.BlockSpec((1, C), lambda i: (0, 0)),
            pl.BlockSpec((C, N), lambda i: (0, 0)),
            pl.BlockSpec((1, N), lambda i: (0, 0)),
        ],
        out_specs=pl.BlockSpec((1, HW, N), lambda i: (i, 0, 0)),
        compiler_params=_parallel(1),
    )(x_bsc, gmat, gn_g.reshape(1, C), gn_b.reshape(1, C), wt, b.reshape(1, N))


# -----------------------------------------------------------------------------
# Matmul kernels (full-K blocks, no k loop; epilogue / prologue fusions)
# -----------------------------------------------------------------------------
def _matmul_kernel(x_ref, w_ref, o_ref):
    o_ref[...] = jnp.dot(x_ref[...], w_ref[...],
                         preferred_element_type=jnp.float32).astype(o_ref.dtype)


def matmul_pallas(x2d, wt):
    """y = x2d @ wt (bias-free).  wt pre-transposed (K, N)."""
    M, K = x2d.shape
    _, N = wt.shape
    bm = _pick_block(M, _BM_CANDIDATES, min_steps=2)
    bn = _pick_block(N, _BN_CANDIDATES)
    return pl.pallas_call(
        _matmul_kernel,
        out_shape=jax.ShapeDtypeStruct((M, N), x2d.dtype),
        grid=(M // bm, N // bn),
        in_specs=[pl.BlockSpec((bm, K), lambda i, j: (i, 0)),
                  pl.BlockSpec((K, bn), lambda i, j: (0, j))],
        out_specs=pl.BlockSpec((bm, bn), lambda i, j: (i, j)),
        compiler_params=_parallel(2),
    )(x2d, wt)


def _matmul_bias_res_kernel(x_ref, w_ref, b_ref, r_ref, o_ref):
    acc = jnp.dot(x_ref[...], w_ref[...], preferred_element_type=jnp.float32)
    o_ref[...] = (acc + b_ref[...] + r_ref[...]).astype(o_ref.dtype)


def matmul_bias_res_pallas(x2d, wt, b, res):
    """y = x2d @ wt + b + res   (residual fused into the store)."""
    M, K = x2d.shape
    _, N = wt.shape
    bm = _pick_block(M, _BM_CANDIDATES, min_steps=2)
    bn = _pick_block(N, _BN_CANDIDATES)
    return pl.pallas_call(
        _matmul_bias_res_kernel,
        out_shape=jax.ShapeDtypeStruct((M, N), x2d.dtype),
        grid=(M // bm, N // bn),
        in_specs=[pl.BlockSpec((bm, K), lambda i, j: (i, 0)),
                  pl.BlockSpec((K, bn), lambda i, j: (0, j)),
                  pl.BlockSpec((1, bn), lambda i, j: (0, j)),
                  pl.BlockSpec((bm, bn), lambda i, j: (i, j))],
        out_specs=pl.BlockSpec((bm, bn), lambda i, j: (i, j)),
        compiler_params=_parallel(2),
    )(x2d, wt, b.reshape(1, N), res)


def _ln_matmul_kernel(x_ref, g_ref, b_ref, w_ref, o_ref, *, eps):
    x = x_ref[...]
    mean = jnp.mean(x, axis=-1, keepdims=True)
    xc = x - mean
    var = jnp.mean(xc * xc, axis=-1, keepdims=True)
    xn = xc * jax.lax.rsqrt(var + eps) * g_ref[...] + b_ref[...]
    o_ref[...] = jnp.dot(xn, w_ref[...],
                         preferred_element_type=jnp.float32).astype(o_ref.dtype)


def ln_matmul_pallas(x2d, gamma, beta, wt, *, eps=1e-5):
    """y = LayerNorm(x2d) @ wt   (bias-free projection, LN fused as prologue)."""
    M, K = x2d.shape
    _, N = wt.shape
    bm = _pick_block(M, _BM_CANDIDATES, min_steps=2)
    bn = _pick_block(N, _BN_CANDIDATES)
    kern = functools.partial(_ln_matmul_kernel, eps=eps)
    return pl.pallas_call(
        kern,
        out_shape=jax.ShapeDtypeStruct((M, N), x2d.dtype),
        grid=(M // bm, N // bn),
        in_specs=[pl.BlockSpec((bm, K), lambda i, j: (i, 0)),
                  pl.BlockSpec((1, K), lambda i, j: (0, 0)),
                  pl.BlockSpec((1, K), lambda i, j: (0, 0)),
                  pl.BlockSpec((K, bn), lambda i, j: (0, j))],
        out_specs=pl.BlockSpec((bm, bn), lambda i, j: (i, j)),
        compiler_params=_parallel(2),
    )(x2d, gamma.reshape(1, K), beta.reshape(1, K), wt)


def _ln_matmul_geglu_kernel(x_ref, g_ref, b_ref, wa_ref, ba_ref, wg_ref, bg_ref,
                            o_ref, *, eps):
    x = x_ref[...]
    mean = jnp.mean(x, axis=-1, keepdims=True)
    xc = x - mean
    var = jnp.mean(xc * xc, axis=-1, keepdims=True)
    xn = xc * jax.lax.rsqrt(var + eps) * g_ref[...] + b_ref[...]
    a = jnp.dot(xn, wa_ref[...], preferred_element_type=jnp.float32) + ba_ref[...]
    gate = jnp.dot(xn, wg_ref[...], preferred_element_type=jnp.float32) + bg_ref[...]
    o_ref[...] = (a * jax.nn.gelu(gate, approximate=True)).astype(o_ref.dtype)


def ln_matmul_geglu_pallas(x2d, gamma, beta, wa, ba, wg, bg, *, eps=1e-5):
    """y = (LN(x)@Wa + ba) * gelu(LN(x)@Wg + bg)  — LN prologue + GEGLU epilogue."""
    M, K = x2d.shape
    _, F = wa.shape
    bm = _pick_block(M, _BM_CANDIDATES, min_steps=2)
    bn = _pick_block(F, _BN_CANDIDATES)
    kern = functools.partial(_ln_matmul_geglu_kernel, eps=eps)
    return pl.pallas_call(
        kern,
        out_shape=jax.ShapeDtypeStruct((M, F), x2d.dtype),
        grid=(M // bm, F // bn),
        in_specs=[pl.BlockSpec((bm, K), lambda i, j: (i, 0)),
                  pl.BlockSpec((1, K), lambda i, j: (0, 0)),
                  pl.BlockSpec((1, K), lambda i, j: (0, 0)),
                  pl.BlockSpec((K, bn), lambda i, j: (0, j)),
                  pl.BlockSpec((1, bn), lambda i, j: (0, j)),
                  pl.BlockSpec((K, bn), lambda i, j: (0, j)),
                  pl.BlockSpec((1, bn), lambda i, j: (0, j))],
        out_specs=pl.BlockSpec((bm, bn), lambda i, j: (i, j)),
        compiler_params=_parallel(2),
    )(x2d, gamma.reshape(1, K), beta.reshape(1, K),
      wa, ba.reshape(1, F), wg, bg.reshape(1, F))


# -----------------------------------------------------------------------------
# Attention kernels: one batch element per grid step; fused qkv / kv inputs are
# sliced in-kernel at 128-aligned offsets; per-head results stored directly into
# the lane-dense merged-head output block (no concatenate).
# -----------------------------------------------------------------------------
def _attn_heads(q, k, v, o_ref, *, heads, dim_head, scale, col_mask):
    for h in range(heads):                      # static unroll over heads
        sl = slice(h * dim_head, (h + 1) * dim_head)
        qh = q[:, sl] * scale                   # fold scale into q (Nq*dh, not Nq*Nk)
        s = jax.lax.dot_general(qh, k[:, sl], (((1,), (1,)), ((), ())),
                                preferred_element_type=jnp.float32)
        if col_mask is not None:                # static: mask padded context columns
            s = jnp.where(col_mask, s, -1e30)
        s = s - jnp.max(s, axis=-1, keepdims=True)
        p = jnp.exp(s)
        p = p * pl.reciprocal(jnp.sum(p, axis=-1, keepdims=True), approx=True)  # EUP
        oh = jnp.dot(p, v[:, sl], preferred_element_type=jnp.float32)
        o_ref[0, :, sl] = oh.astype(o_ref.dtype)     # write into the open output block


def _self_attn_kernel(qkv_ref, o_ref, *, heads, dim_head, scale):
    D = heads * dim_head
    qkv = qkv_ref[0]                            # (Nq, 3D); 128-aligned free slices
    _attn_heads(qkv[:, :D], qkv[:, D:2 * D], qkv[:, 2 * D:], o_ref,
                heads=heads, dim_head=dim_head, scale=scale, col_mask=None)


def _cross_attn_kernel(q_ref, kv_ref, o_ref, *, heads, dim_head, scale, nk_valid):
    D = heads * dim_head
    q = q_ref[0]                                # (Nq, D)
    kv = kv_ref[0]                              # (Nk_pad, 2D)
    nq, nk = q.shape[0], kv.shape[0]
    col_mask = None
    if nk_valid < nk:
        col = jax.lax.broadcasted_iota(jnp.int32, (nq, nk), 1)
        col_mask = col < nk_valid
    _attn_heads(q, kv[:, :D], kv[:, D:], o_ref,
                heads=heads, dim_head=dim_head, scale=scale, col_mask=col_mask)


def self_attention_pallas(qkv, *, heads, dim_head):
    """qkv: (B, Nq, 3*H*dh) fused projection -> (B, Nq, H*dh) merged-head output."""
    B, Nq, D3 = qkv.shape
    D = heads * dim_head
    kern = functools.partial(_self_attn_kernel, heads=heads, dim_head=dim_head,
                             scale=1.0 / math.sqrt(dim_head))
    return pl.pallas_call(
        kern,
        out_shape=jax.ShapeDtypeStruct((B, Nq, D), qkv.dtype),
        grid=(B,),
        in_specs=[pl.BlockSpec((1, Nq, D3), lambda b: (b, 0, 0))],
        out_specs=pl.BlockSpec((1, Nq, D), lambda b: (b, 0, 0)),
        compiler_params=_parallel(1),
    )(qkv)


def cross_attention_pallas(q, kv, *, heads, dim_head, nk_valid):
    """q: (B, Nq, H*dh); kv: (B, Nk_pad, 2*H*dh) fused K|V; masked for j >= nk_valid."""
    B, Nq, D = q.shape
    Nk = kv.shape[1]
    kern = functools.partial(_cross_attn_kernel, heads=heads, dim_head=dim_head,
                             scale=1.0 / math.sqrt(dim_head), nk_valid=nk_valid)
    return pl.pallas_call(
        kern,
        out_shape=jax.ShapeDtypeStruct((B, Nq, D), q.dtype),
        grid=(B,),
        in_specs=[pl.BlockSpec((1, Nq, D), lambda b: (b, 0, 0)),
                  pl.BlockSpec((1, Nk, 2 * D), lambda b: (b, 0, 0))],
        out_specs=pl.BlockSpec((1, Nq, D), lambda b: (b, 0, 0)),
        compiler_params=_parallel(1),
    )(q, kv)


# -----------------------------------------------------------------------------
# Parameters (weights stored pre-transposed (K, N); QKV / KV fused; GEGLU split)
# -----------------------------------------------------------------------------
def init_params(key, in_channels, context_dim, heads, dim_head, ff_mult=4):
    inner = heads * dim_head
    ff = ff_mult * inner
    keys = iter(jax.random.split(key, 32))
    s = 0.02

    def w(shape):
        return jax.random.normal(next(keys), shape, jnp.float32) * s

    def affine(n):
        return 1.0 + w((n,)), w((n,))

    gn_g, gn_b = affine(in_channels)
    ln1_g, ln1_b = affine(inner)
    ln2_g, ln2_b = affine(inner)
    ln3_g, ln3_b = affine(inner)
    return dict(
        gn_g=gn_g, gn_b=gn_b,
        proj_in_w=w((in_channels, inner)), proj_in_b=w((inner,)),      # 1x1 conv
        ln1_g=ln1_g, ln1_b=ln1_b,
        attn1_wqkv=w((inner, 3 * inner)),                              # fused Q|K|V
        attn1_wo=w((inner, inner)), attn1_bo=w((inner,)),
        ln2_g=ln2_g, ln2_b=ln2_b,
        attn2_wq=w((inner, inner)),
        attn2_wkv=w((context_dim, 2 * inner)),                         # fused K|V
        attn2_wo=w((inner, inner)), attn2_bo=w((inner,)),
        ln3_g=ln3_g, ln3_b=ln3_b,
        ff_wa=w((inner, ff)), ff_ba=w((ff,)),                          # GEGLU value
        ff_wg=w((inner, ff)), ff_bg=w((ff,)),                          # GEGLU gate
        ff_w2=w((ff, inner)), ff_b2=w((inner,)),
        # zero-initialized in PyTorch (zero_module); random here to exercise the path
        proj_out_w=w((inner, in_channels)), proj_out_b=w((in_channels,)),
    )


# -----------------------------------------------------------------------------
# SpatialTransformer forward (Pallas kernels + thin JAX glue)
# -----------------------------------------------------------------------------
def spatial_transformer_forward(x, context, params, *, heads, dim_head, groups=32):
    B, C, Hh, Ww = x.shape
    HW = Hh * Ww
    inner = heads * dim_head
    Nc, ctx_dim = context.shape[1], context.shape[2]

    # single NCHW -> channels-last layout transform; everything below is lane-dense
    xt = jnp.transpose(x, (0, 2, 3, 1)).reshape(B, HW, C)

    # GroupNorm(32, eps=1e-6) fused with the proj_in 1x1 conv
    h = groupnorm_projin_pallas(xt, params['gn_g'], params['gn_b'],
                                params['proj_in_w'], params['proj_in_b'],
                                groups=groups).reshape(B * HW, inner)

    # ---- BasicTransformerBlock (depth=1, dropout=0, mask=None) ----
    # attn1: LN fused into the fused Q|K|V projection; fused qkv goes straight into
    # the attention kernel (q/k/v sliced in-kernel at 128-aligned offsets)
    qkv = ln_matmul_pallas(h, params['ln1_g'], params['ln1_b'], params['attn1_wqkv'])
    a = self_attention_pallas(qkv.reshape(B, HW, 3 * inner),
                              heads=heads, dim_head=dim_head).reshape(B * HW, inner)
    h = matmul_bias_res_pallas(a, params['attn1_wo'], params['attn1_bo'], h)

    # attn2: cross-attention; context zero-padded to a lane-aligned length and masked
    q = ln_matmul_pallas(h, params['ln2_g'], params['ln2_b'], params['attn2_wq'])
    Nc_pad = ((Nc + 127) // 128) * 128
    ctx = context if Nc_pad == Nc else jnp.pad(
        context, ((0, 0), (0, Nc_pad - Nc), (0, 0)))
    kv = matmul_pallas(ctx.reshape(B * Nc_pad, ctx_dim), params['attn2_wkv'])
    a = cross_attention_pallas(q.reshape(B, HW, inner),
                               kv.reshape(B, Nc_pad, 2 * inner),
                               heads=heads, dim_head=dim_head,
                               nk_valid=Nc).reshape(B * HW, inner)
    h = matmul_bias_res_pallas(a, params['attn2_wo'], params['attn2_bo'], h)

    # feed-forward: LN + GEGLU fused into the first projection; residual fused in ff2
    g = ln_matmul_geglu_pallas(h, params['ln3_g'], params['ln3_b'],
                               params['ff_wa'], params['ff_ba'],
                               params['ff_wg'], params['ff_bg'])
    h = matmul_bias_res_pallas(g, params['ff_w2'], params['ff_b2'], h)

    # proj_out (1x1 conv) with the outer residual fused, then back to NCHW
    y = matmul_bias_res_pallas(h, params['proj_out_w'], params['proj_out_b'],
                               xt.reshape(B * HW, C))
    return jnp.transpose(y.reshape(B, Hh, Ww, C), (0, 3, 1, 2))


# -----------------------------------------------------------------------------
# Pure-JAX reference (mirrors the PyTorch forward)
# -----------------------------------------------------------------------------
def reference_forward(x, context, params, *, heads, dim_head, groups=32):
    B, C, Hh, Ww = x.shape
    inner = heads * dim_head

    # GroupNorm(32, C, eps=1e-6)
    xr = x.reshape(B, groups, (C // groups) * Hh * Ww)
    mean = xr.mean(axis=-1, keepdims=True)
    var = xr.var(axis=-1, keepdims=True)
    xn = ((xr - mean) / jnp.sqrt(var + 1e-6)).reshape(B, C, Hh, Ww)
    xn = xn * params['gn_g'].reshape(1, C, 1, 1) + params['gn_b'].reshape(1, C, 1, 1)

    # proj_in 1x1 conv, rearrange to tokens
    t = jnp.transpose(xn, (0, 2, 3, 1)).reshape(B, Hh * Ww, C)
    h = t @ params['proj_in_w'] + params['proj_in_b']

    def layernorm(z, g, b):
        m = z.mean(-1, keepdims=True)
        v = ((z - m) ** 2).mean(-1, keepdims=True)
        return (z - m) / jnp.sqrt(v + 1e-5) * g + b

    def attention(q, k, v):
        Bq, Nq, _ = q.shape
        Nk = k.shape[1]
        scale = dim_head ** -0.5
        qh = q.reshape(Bq, Nq, heads, dim_head).transpose(0, 2, 1, 3)
        kh = k.reshape(Bq, Nk, heads, dim_head).transpose(0, 2, 1, 3)
        vh = v.reshape(Bq, Nk, heads, dim_head).transpose(0, 2, 1, 3)
        s = jnp.einsum('bhqd,bhkd->bhqk', qh, kh) * scale
        p = jax.nn.softmax(s, axis=-1)
        o = jnp.einsum('bhqk,bhkd->bhqd', p, vh)
        return o.transpose(0, 2, 1, 3).reshape(Bq, Nq, inner)

    # attn1 (self)
    hn = layernorm(h, params['ln1_g'], params['ln1_b'])
    qkv = hn @ params['attn1_wqkv']
    q, k, v = qkv[..., :inner], qkv[..., inner:2 * inner], qkv[..., 2 * inner:]
    h = attention(q, k, v) @ params['attn1_wo'] + params['attn1_bo'] + h
    # attn2 (cross)
    hn = layernorm(h, params['ln2_g'], params['ln2_b'])
    q = hn @ params['attn2_wq']
    kv = context @ params['attn2_wkv']
    k, v = kv[..., :inner], kv[..., inner:]
    h = attention(q, k, v) @ params['attn2_wo'] + params['attn2_bo'] + h
    # ff (GEGLU)
    hn = layernorm(h, params['ln3_g'], params['ln3_b'])
    a = hn @ params['ff_wa'] + params['ff_ba']
    gate = hn @ params['ff_wg'] + params['ff_bg']
    g = a * jax.nn.gelu(gate, approximate=True)
    h = g @ params['ff_w2'] + params['ff_b2'] + h
    # proj_out + residual
    y = h @ params['proj_out_w'] + params['proj_out_b']
    y = jnp.transpose(y.reshape(B, Hh, Ww, C), (0, 3, 1, 2))
    return y + x


# -----------------------------------------------------------------------------
if __name__ == "__main__":
    B, C, Hh, Ww = 2, 64, 8, 8          # x: (B, C, H, W)
    heads, dim_head = 4, 32             # inner_dim = 128
    context_dim, ctx_len = 64, 77       # CLIP-style context length
    groups = 32

    key = jax.random.PRNGKey(0)
    kx, kc, kp = jax.random.split(key, 3)
    x = jax.random.normal(kx, (B, C, Hh, Ww), jnp.float32)
    context = jax.random.normal(kc, (B, ctx_len, context_dim), jnp.float32)
    params = init_params(kp, C, context_dim, heads, dim_head)

    fwd = jax.jit(functools.partial(spatial_transformer_forward,
                                    heads=heads, dim_head=dim_head, groups=groups))
    out = jax.block_until_ready(fwd(x, context, params))

    ref = reference_forward(x, context, params,
                            heads=heads, dim_head=dim_head, groups=groups)
    assert out.shape == x.shape, out.shape
    err = float(jnp.max(jnp.abs(out - ref)))
    assert err < 2e-3, err
    print("KERNEL_OK")
</pallas_src>

<mosaic_0001>
module attributes {stable_mosaic.version = 11 : i64} {
  func.func @_gn_projin_kernel(%arg0: i32, %arg1: memref<1x64x64xf32, #tpu.memory_space<vmem>>, %arg2: memref<64x64xf32, #tpu.memory_space<vmem>>, %arg3: memref<1x64xf32, #tpu.memory_space<vmem>>, %arg4: memref<1x64xf32, #tpu.memory_space<vmem>>, %arg5: memref<64x128xf32, #tpu.memory_space<vmem>>, %arg6: memref<1x128xf32, #tpu.memory_space<vmem>>, %arg7: memref<1x64x128xf32, #tpu.memory_space<vmem>>) attributes {dimension_semantics = [#tpu.dimension_semantics<parallel>], iteration_bounds = array<i64: 2>, scalar_prefetch = 0 : i64, scratch_operands = 0 : i64, tpu.core_type = #tpu.core_type<tc>, window_params = [{transform_indices = @transform_0, window_bounds = array<i64: 1, 64, 64>}, {pipeline_mode = #tpu.pipeline_mode<synchronous>, transform_indices = @transform_1, window_bounds = array<i64: 64, 64>}, {pipeline_mode = #tpu.pipeline_mode<synchronous>, transform_indices = @transform_2, window_bounds = array<i64: 1, 64>}, {pipeline_mode = #tpu.pipeline_mode<synchronous>, transform_indices = @transform_3, window_bounds = array<i64: 1, 64>}, {pipeline_mode = #tpu.pipeline_mode<synchronous>, transform_indices = @transform_4, window_bounds = array<i64: 64, 128>}, {pipeline_mode = #tpu.pipeline_mode<synchronous>, transform_indices = @transform_5, window_bounds = array<i64: 1, 128>}, {transform_indices = @transform_6, window_bounds = array<i64: 1, 64, 128>}]} {
    %c0 = arith.constant 0 : index
    %c0_0 = arith.constant 0 : index
    %c0_1 = arith.constant 0 : index
    %0 = vector.load %arg1[%c0, %c0_0, %c0_1] : memref<1x64x64xf32, #tpu.memory_space<vmem>>, vector<1x64x64xf32>
    %1 = vector.shape_cast %0 : vector<1x64x64xf32> to vector<64x64xf32>
    %cst = arith.constant dense<0.000000e+00> : vector<64xf32>
    %2 = vector.multi_reduction <add>, %1, %cst [0] : vector<64x64xf32> to vector<64xf32>
    %3 = vector.shape_cast %2 : vector<64xf32> to vector<1x64xf32>
    %c0_2 = arith.constant 0 : index
    %c0_3 = arith.constant 0 : index
    %4 = vector.load %arg2[%c0_2, %c0_3] : memref<64x64xf32, #tpu.memory_space<vmem>>, vector<64x64xf32>
    %cst_4 = arith.constant dense<0.000000e+00> : vector<1x64xf32>
    %5 = tpu.matmul %3, %4, %cst_4 {dimension_numbers = #tpu.dot_dimension_numbers<[1], [0], [0], [1], [0, 0, 1, 1], [], []>} : vector<1x64xf32>, vector<64x64xf32>, vector<1x64xf32> -> vector<1x64xf32>
    %cst_5 = arith.constant 7.812500e-03 : f32
    %6 = vector.broadcast %cst_5 : f32 to vector<1x64xf32>
    %7 = arith.mulf %5, %6 : vector<1x64xf32>
    %8 = vector.broadcast %7 : vector<1x64xf32> to vector<64x64xf32>
    %9 = arith.subf %1, %8 : vector<64x64xf32>
    %10 = arith.mulf %9, %9 : vector<64x64xf32>
    %cst_6 = arith.constant dense<0.000000e+00> : vector<64xf32>
    %11 = vector.multi_reduction <add>, %10, %cst_6 [0] : vector<64x64xf32> to vector<64xf32>
    %12 = vector.shape_cast %11 : vector<64xf32> to vector<1x64xf32>
    %c0_7 = arith.constant 0 : index
    %c0_8 = arith.constant 0 : index
    %13 = vector.load %arg2[%c0_7, %c0_8] : memref<64x64xf32, #tpu.memory_space<vmem>>, vector<64x64xf32>
    %cst_9 = arith.constant dense<0.000000e+00> : vector<1x64xf32>
    %14 = tpu.matmul %12, %13, %cst_9 {dimension_numbers = #tpu.dot_dimension_numbers<[1], [0], [0], [1], [0, 0, 1, 1], [], []>} : vector<1x64xf32>, vector<64x64xf32>, vector<1x64xf32> -> vector<1x64xf32>
    %cst_10 = arith.constant 7.812500e-03 : f32
    %15 = vector.broadcast %cst_10 : f32 to vector<1x64xf32>
    %16 = arith.mulf %14, %15 : vector<1x64xf32>
    %cst_11 = arith.constant 9.99999997E-7 : f32
    %17 = vector.broadcast %cst_11 : f32 to vector<1x64xf32>
    %18 = arith.addf %16, %17 : vector<1x64xf32>
    %19 = math.rsqrt %18 : vector<1x64xf32>
    %20 = vector.broadcast %19 : vector<1x64xf32> to vector<64x64xf32>
    %21 = arith.mulf %9, %20 : vector<64x64xf32>
    %c0_12 = arith.constant 0 : index
    %c0_13 = arith.constant 0 : index
    %22 = vector.load %arg3[%c0_12, %c0_13] : memref<1x64xf32, #tpu.memory_space<vmem>>, vector<1x64xf32>
    %23 = vector.broadcast %22 : vector<1x64xf32> to vector<64x64xf32>
    %24 = arith.mulf %21, %23 : vector<64x64xf32>
    %c0_14 = arith.constant 0 : index
    %c0_15 = arith.constant 0 : index
    %25 = vector.load %arg4[%c0_14, %c0_15] : memref<1x64xf32, #tpu.memory_space<vmem>>, vector<1x64xf32>
    %26 = vector.broadcast %25 : vector<1x64xf32> to vector<64x64xf32>
    %27 = arith.addf %24, %26 : vector<64x64xf32>
    %c0_16 = arith.constant 0 : index
    %c0_17 = arith.constant 0 : index
    %28 = vector.load %arg5[%c0_16, %c0_17] : memref<64x128xf32, #tpu.memory_space<vmem>>, vector<64x128xf32>
    %cst_18 = arith.constant dense<0.000000e+00> : vector<64x128xf32>
    %29 = tpu.matmul %27, %28, %cst_18 {dimension_numbers = #tpu.dot_dimension_numbers<[1], [0], [0], [1], [0, 0, 1, 1], [], []>} : vector<64x64xf32>, vector<64x128xf32>, vector<64x128xf32> -> vector<64x128xf32>
    %c0_19 = arith.constant 0 : index
    %c0_20 = arith.constant 0 : index
    %30 = vector.load %arg6[%c0_19, %c0_20] : memref<1x128xf32, #tpu.memory_space<vmem>>, vector<1x128xf32>
    %31 = vector.broadcast %30 : vector<1x128xf32> to vector<64x128xf32>
    %32 = arith.addf %29, %31 : vector<64x128xf32>
    %c0_21 = arith.constant 0 : index
    %c0_22 = arith.constant 0 : index
    %c0_23 = arith.constant 0 : index
    %33 = vector.load %arg7[%c0_21, %c0_22, %c0_23] : memref<1x64x128xf32, #tpu.memory_space<vmem>>, vector<1x64x128xf32>
    %34 = vector.shape_cast %33 : vector<1x64x128xf32> to vector<64x128xf32>
    %35 = vector.shape_cast %32 : vector<64x128xf32> to vector<1x64x128xf32>
    tpu.vector_store %arg7[%c0_21, %c0_22, %c0_23], %35 {strides = array<i32>} : memref<1x64x128xf32, #tpu.memory_space<vmem>>, vector<1x64x128xf32>,
    return
  }
  func.func @transform_0(%arg0: i32) -> (i32, i32, i32) {
    %c0_i32 = arith.constant 0 : i32
    %c0_i32_0 = arith.constant 0 : i32
    %c0_i32_1 = arith.constant 0 : i32
    return %arg0, %c0_i32, %c0_i32_0 : i32, i32, i32
  }
  func.func @transform_1(%arg0: i32) -> (i32, i32) {
    %c0_i32 = arith.constant 0 : i32
    %c0_i32_0 = arith.constant 0 : i32
    %c0_i32_1 = arith.constant 0 : i32
    return %c0_i32, %c0_i32_0 : i32, i32
  }
  func.func @transform_2(%arg0: i32) -> (i32, i32) {
    %c0_i32 = arith.constant 0 : i32
    %c0_i32_0 = arith.constant 0 : i32
    %c0_i32_1 = arith.constant 0 : i32
    return %c0_i32, %c0_i32_0 : i32, i32
  }
  func.func @transform_3(%arg0: i32) -> (i32, i32) {
    %c0_i32 = arith.constant 0 : i32
    %c0_i32_0 = arith.constant 0 : i32
    %c0_i32_1 = arith.constant 0 : i32
    return %c0_i32, %c0_i32_0 : i32, i32
  }
  func.func @transform_4(%arg0: i32) -> (i32, i32) {
    %c0_i32 = arith.constant 0 : i32
    %c0_i32_0 = arith.constant 0 : i32
    %c0_i32_1 = arith.constant 0 : i32
    return %c0_i32, %c0_i32_0 : i32, i32
  }
  func.func @transform_5(%arg0: i32) -> (i32, i32) {
    %c0_i32 = arith.constant 0 : i32
    %c0_i32_0 = arith.constant 0 : i32
    %c0_i32_1 = arith.constant 0 : i32
    return %c0_i32, %c0_i32_0 : i32, i32
  }
  func.func @transform_6(%arg0: i32) -> (i32, i32, i32) {
    %c0_i32 = arith.constant 0 : i32
    %c0_i32_0 = arith.constant 0 : i32
    %c0_i32_1 = arith.constant 0 : i32
    return %arg0, %c0_i32, %c0_i32_0 : i32, i32, i32
  }
}

module attributes {stable_mosaic.version = 11 : i64} {
  func.func @_ln_matmul_kernel(%arg0: i32, %arg1: i32, %arg2: memref<64x128xf32, #tpu.memory_space<vmem>>, %arg3: memref<1x128xf32, #tpu.memory_space<vmem>>, %arg4: memref<1x128xf32, #tpu.memory_space<vmem>>, %arg5: memref<128x384xf32, #tpu.memory_space<vmem>>, %arg6: memref<64x384xf32, #tpu.memory_space<vmem>>) attributes {dimension_semantics = [#tpu.dimension_semantics<parallel>, #tpu.dimension_semantics<parallel>], iteration_bounds = array<i64: 2, 1>, scalar_prefetch = 0 : i64, scratch_operands = 0 : i64, tpu.core_type = #tpu.core_type<tc>, window_params = [{transform_indices = @transform_0, window_bounds = array<i64: 64, 128>}, {pipeline_mode = #tpu.pipeline_mode<synchronous>, transform_indices = @transform_1, window_bounds = array<i64: 1, 128>}, {pipeline_mode = #tpu.pipeline_mode<synchronous>, transform_indices = @transform_2, window_bounds = array<i64: 1, 128>}, {transform_indices = @transform_3, window_bounds = array<i64: 128, 384>}, {transform_indices = @transform_4, window_bounds = array<i64: 64, 384>}]} {
    %c0 = arith.constant 0 : index
    %c0_0 = arith.constant 0 : index
    %0 = vector.load %arg2[%c0, %c0_0] : memref<64x128xf32, #tpu.memory_space<vmem>>, vector<64x128xf32>
    %cst = arith.constant dense<0.000000e+00> : vector<64xf32>
    %1 = vector.multi_reduction <add>, %0, %cst [1] : vector<64x128xf32> to vector<64xf32>
    %2 = vector.shape_cast %1 : vector<64xf32> to vector<64x1xf32>
    %cst_1 = arith.constant 1.280000e+02 : f32
    %3 = vector.broadcast %cst_1 : f32 to vector<64x1xf32>
    %4 = arith.divf %2, %3 : vector<64x1xf32>
    %5 = vector.broadcast %4 : vector<64x1xf32> to vector<64x128xf32>
    %6 = arith.subf %0, %5 : vector<64x128xf32>
    %7 = arith.mulf %6, %6 : vector<64x128xf32>
    %cst_2 = arith.constant dense<0.000000e+00> : vector<64xf32>
    %8 = vector.multi_reduction <add>, %7, %cst_2 [1] : vector<64x128xf32> to vector<64xf32>
    %9 = vector.shape_cast %8 : vector<64xf32> to vector<64x1xf32>
    %cst_3 = arith.constant 1.280000e+02 : f32
    %10 = vector.broadcast %cst_3 : f32 to vector<64x1xf32>
    %11 = arith.divf %9, %10 : vector<64x1xf32>
    %cst_4 = arith.constant 9.99999974E-6 : f32
    %12 = vector.broadcast %cst_4 : f32 to vector<64x1xf32>
    %13 = arith.addf %11, %12 : vector<64x1xf32>
    %14 = math.rsqrt %13 : vector<64x1xf32>
    %15 = vector.broadcast %14 : vector<64x1xf32> to vector<64x128xf32>
    %16 = arith.mulf %6, %15 : vector<64x128xf32>
    %c0_5 = arith.constant 0 : index
    %c0_6 = arith.constant 0 : index
    %17 = vector.load %arg3[%c0_5, %c0_6] : memref<1x128xf32, #tpu.memory_space<vmem>>, vector<1x128xf32>
    %18 = vector.broadcast %17 : vector<1x128xf32> to vector<64x128xf32>
    %19 = arith.mulf %16, %18 : vector<64x128xf32>
    %c0_7 = arith.constant 0 : index
    %c0_8 = arith.constant 0 : index
    %20 = vector.load %arg4[%c0_7, %c0_8] : memref<1x128xf32, #tpu.memory_space<vmem>>, vector<1x128xf32>
    %21 = vector.broadcast %20 : vector<1x128xf32> to vector<64x128xf32>
    %22 = arith.addf %19, %21 : vector<64x128xf32>
    %c0_9 = arith.constant 0 : index
    %c0_10 = arith.constant 0 : index
    %23 = vector.load %arg5[%c0_9, %c0_10] : memref<128x384xf32, #tpu.memory_space<vmem>>, vector<128x384xf32>
    %cst_11 = arith.constant dense<0.000000e+00> : vector<64x384xf32>
    %24 = tpu.matmul %22, %23, %cst_11 {dimension_numbers = #tpu.dot_dimension_numbers<[1], [0], [0], [1], [0, 0, 1, 1], [], []>} : vector<64x128xf32>, vector<128x384xf32>, vector<64x384xf32> -> vector<64x384xf32>
    %c0_12 = arith.constant 0 : index
    %c0_13 = arith.constant 0 : index
    %25 = vector.load %arg6[%c0_12, %c0_13] : memref<64x384xf32, #tpu.memory_space<vmem>>, vector<64x384xf32>
    tpu.vector_store %arg6[%c0_12, %c0_13], %24 {strides = array<i32>} : memref<64x384xf32, #tpu.memory_space<vmem>>, vector<64x384xf32>,
    return
  }
  func.func @transform_0(%arg0: i32, %arg1: i32) -> (i32, i32) {
    %c0_i32 = arith.constant 0 : i32
    %c0_i32_0 = arith.constant 0 : i32
    return %arg0, %c0_i32 : i32, i32
  }
  func.func @transform_1(%arg0: i32, %arg1: i32) -> (i32, i32) {
    %c0_i32 = arith.constant 0 : i32
    %c0_i32_0 = arith.constant 0 : i32
    %c0_i32_1 = arith.constant 0 : i32
    return %c0_i32, %c0_i32_0 : i32, i32
  }
  func.func @transform_2(%arg0: i32, %arg1: i32) -> (i32, i32) {
    %c0_i32 = arith.constant 0 : i32
    %c0_i32_0 = arith.constant 0 : i32
    %c0_i32_1 = arith.constant 0 : i32
    return %c0_i32, %c0_i32_0 : i32, i32
  }
  func.func @transform_3(%arg0: i32, %arg1: i32) -> (i32, i32) {
    %c0_i32 = arith.constant 0 : i32
    %c0_i32_0 = arith.constant 0 : i32
    return %c0_i32, %arg1 : i32, i32
  }
  func.func @transform_4(%arg0: i32, %arg1: i32) -> (i32, i32) {
    %c0_i32 = arith.constant 0 : i32
    return %arg0, %arg1 : i32, i32
  }
}

module attributes {stable_mosaic.version = 11 : i64} {
  func.func @_self_attn_kernel(%arg0: i32, %arg1: memref<1x64x384xf32, #tpu.memory_space<vmem>>, %arg2: memref<1x64x128xf32, #tpu.memory_space<vmem>>) attributes {dimension_semantics = [#tpu.dimension_semantics<parallel>], iteration_bounds = array<i64: 2>, scalar_prefetch = 0 : i64, scratch_operands = 0 : i64, tpu.core_type = #tpu.core_type<tc>, window_params = [{transform_indices = @transform_0, window_bounds = array<i64: 1, 64, 384>}, {transform_indices = @transform_1, window_bounds = array<i64: 1, 64, 128>}]} {
    %c0 = arith.constant 0 : index
    %c0_0 = arith.constant 0 : index
    %c0_1 = arith.constant 0 : index
    %0 = vector.load %arg1[%c0, %c0_0, %c0_1] : memref<1x64x384xf32, #tpu.memory_space<vmem>>, vector<1x64x384xf32>
    %1 = vector.shape_cast %0 : vector<1x64x384xf32> to vector<64x384xf32>
    %2 = vector.extract_strided_slice %1 {offsets = [0, 0], sizes = [64, 128], strides = [1, 1]} : vector<64x384xf32> to vector<64x128xf32>
    %3 = vector.extract_strided_slice %1 {offsets = [0, 128], sizes = [64, 128], strides = [1, 1]} : vector<64x384xf32> to vector<64x128xf32>
    %4 = vector.extract_strided_slice %1 {offsets = [0, 256], sizes = [64, 128], strides = [1, 1]} : vector<64x384xf32> to vector<64x128xf32>
    %5 = vector.extract_strided_slice %2 {offsets = [0, 0], sizes = [64, 32], strides = [1, 1]} : vector<64x128xf32> to vector<64x32xf32>
    %cst = arith.constant 0.176776692 : f32
    %6 = vector.broadcast %cst : f32 to vector<64x32xf32>
    %7 = arith.mulf %5, %6 : vector<64x32xf32>
    %8 = vector.extract_strided_slice %3 {offsets = [0, 0], sizes = [64, 32], strides = [1, 1]} : vector<64x128xf32> to vector<64x32xf32>
    %cst_2 = arith.constant dense<0.000000e+00> : vector<64x64xf32>
    %9 = tpu.matmul %7, %8, %cst_2 {dimension_numbers = #tpu.dot_dimension_numbers<[1], [1], [0], [0], [0, 0, 1, 0], [], []>} : vector<64x32xf32>, vector<64x32xf32>, vector<64x64xf32> -> vector<64x64xf32>
    %cst_3 = arith.constant dense<0xFF800000> : vector<64xf32>
    %10 = vector.multi_reduction <maximumf>, %9, %cst_3 [1] : vector<64x64xf32> to vector<64xf32>
    %11 = vector.shape_cast %10 : vector<64xf32> to vector<64x1xf32>
    %12 = vector.broadcast %11 : vector<64x1xf32> to vector<64x64xf32>
    %13 = arith.subf %9, %12 : vector<64x64xf32>
    %14 = math.exp %13 : vector<64x64xf32>
    %cst_4 = arith.constant dense<0.000000e+00> : vector<64xf32>
    %15 = vector.multi_reduction <add>, %14, %cst_4 [1] : vector<64x64xf32> to vector<64xf32>
    %16 = vector.shape_cast %15 : vector<64xf32> to vector<64x1xf32>
    %17 = tpu.reciprocal %16 {approx = true} : vector<64x1xf32> -> vector<64x1xf32>
    %18 = vector.broadcast %17 : vector<64x1xf32> to vector<64x64xf32>
    %19 = arith.mulf %14, %18 : vector<64x64xf32>
    %20 = vector.extract_strided_slice %4 {offsets = [0, 0], sizes = [64, 32], strides = [1, 1]} : vector<64x128xf32> to vector<64x32xf32>
    %cst_5 = arith.constant dense<0.000000e+00> : vector<64x32xf32>
    %21 = tpu.matmul %19, %20, %cst_5 {dimension_numbers = #tpu.dot_dimension_numbers<[1], [0], [0], [1], [0, 0, 1, 1], [], []>} : vector<64x64xf32>, vector<64x32xf32>, vector<64x32xf32> -> vector<64x32xf32>
    %c0_6 = arith.constant 0 : index
    %c0_7 = arith.constant 0 : index
    %c0_8 = arith.constant 0 : index
    %22 = vector.load %arg2[%c0_6, %c0_7, %c0_8] : memref<1x64x128xf32, #tpu.memory_space<vmem>>, vector<1x64x32xf32>
    %23 = vector.shape_cast %22 : vector<1x64x32xf32> to vector<64x32xf32>
    %24 = vector.shape_cast %21 : vector<64x32xf32> to vector<1x64x32xf32>
    tpu.vector_store %arg2[%c0_6, %c0_7, %c0_8], %24 {strides = array<i32>} : memref<1x64x128xf32, #tpu.memory_space<vmem>>, vector<1x64x32xf32>,
    %25 = vector.extract_strided_slice %2 {offsets = [0, 32], sizes = [64, 32], strides = [1, 1]} : vector<64x128xf32> to vector<64x32xf32>
    %cst_9 = arith.constant 0.176776692 : f32
    %26 = vector.broadcast %cst_9 : f32 to vector<64x32xf32>
    %27 = arith.mulf %25, %26 : vector<64x32xf32>
    %28 = vector.extract_strided_slice %3 {offsets = [0, 32], sizes = [64, 32], strides = [1, 1]} : vector<64x128xf32> to vector<64x32xf32>
    %cst_10 = arith.constant dense<0.000000e+00> : vector<64x64xf32>
    %29 = tpu.matmul %27, %28, %cst_10 {dimension_numbers = #tpu.dot_dimension_numbers<[1], [1], [0], [0], [0, 0, 1, 0], [], []>} : vector<64x32xf32>, vector<64x32xf32>, vector<64x64xf32> -> vector<64x64xf32>
    %cst_11 = arith.constant dense<0xFF800000> : vector<64xf32>
    %30 = vector.multi_reduction <maximumf>, %29, %cst_11 [1] : vector<64x64xf32> to vector<64xf32>
    %31 = vector.shape_cast %30 : vector<64xf32> to vector<64x1xf32>
    %32 = vector.broadcast %31 : vector<64x1xf32> to vector<64x64xf32>
    %33 = arith.subf %29, %32 : vector<64x64xf32>
    %34 = math.exp %33 : vector<64x64xf32>
    %cst_12 = arith.constant dense<0.000000e+00> : vector<64xf32>
    %35 = vector.multi_reduction <add>, %34, %cst_12 [1] : vector<64x64xf32> to vector<64xf32>
    %36 = vector.shape_cast %35 : vector<64xf32> to vector<64x1xf32>
    %37 = tpu.reciprocal %36 {approx = true} : vector<64x1xf32> -> vector<64x1xf32>
    %38 = vector.broadcast %37 : vector<64x1xf32> to vector<64x64xf32>
    %39 = arith.mulf %34, %38 : vector<64x64xf32>
    %40 = vector.extract_strided_slice %4 {offsets = [0, 32], sizes = [64, 32], strides = [1, 1]} : vector<64x128xf32> to vector<64x32xf32>
    %cst_13 = arith.constant dense<0.000000e+00> : vector<64x32xf32>
    %41 = tpu.matmul %39, %40, %cst_13 {dimension_numbers = #tpu.dot_dimension_numbers<[1], [0], [0], [1], [0, 0, 1, 1], [], []>} : vector<64x64xf32>, vector<64x32xf32>, vector<64x32xf32> -> vector<64x32xf32>
    %c0_14 = arith.constant 0 : index
    %c0_15 = arith.constant 0 : index
    %c32 = arith.constant 32 : index
    %42 = vector.load %arg2[%c0_14, %c0_15, %c32] : memref<1x64x128xf32, #tpu.memory_space<vmem>>, vector<1x64x32xf32>
    %43 = vector.shape_cast %42 : vector<1x64x32xf32> to vector<64x32xf32>
    %44 = vector.shape_cast %41 : vector<64x32xf32> to vector<1x64x32xf32>
    tpu.vector_store %arg2[%c0_14, %c0_15, %c32], %44 {strides = array<i32>} : memref<1x64x128xf32, #tpu.memory_space<vmem>>, vector<1x64x32xf32>,
    %45 = vector.extract_strided_slice %2 {offsets = [0, 64], sizes = [64, 32], strides = [1, 1]} : vector<64x128xf32> to vector<64x32xf32>
    %cst_16 = arith.constant 0.176776692 : f32
    %46 = vector.broadcast %cst_16 : f32 to vector<64x32xf32>
    %47 = arith.mulf %45, %46 : vector<64x32xf32>
    %48 = vector.extract_strided_slice %3 {offsets = [0, 64], sizes = [64, 32], strides = [1, 1]} : vector<64x128xf32> to vector<64x32xf32>
    %cst_17 = arith.constant dense<0.000000e+00> : vector<64x64xf32>
    %49 = tpu.matmul %47, %48, %cst_17 {dimension_numbers = #tpu.dot_dimension_numbers<[1], [1], [0], [0], [0, 0, 1, 0], [], []>} : vector<64x32xf32>, vector<64x32xf32>, vector<64x64xf32> -> vector<64x64xf32>
    %cst_18 = arith.constant dense<0xFF800000> : vector<64xf32>
    %50 = vector.multi_reduction <maximumf>, %49, %cst_18 [1] : vector<64x64xf32> to vector<64xf32>
    %51 = vector.shape_cast %50 : vector<64xf32> to vector<64x1xf32>
    %52 = vector.broadcast %51 : vector<64x1xf32> to vector<64x64xf32>
    %53 = arith.subf %49, %52 : vector<64x64xf32>
    %54 = math.exp %53 : vector<64x64xf32>
    %cst_19 = arith.constant dense<0.000000e+00> : vector<64xf32>
    %55 = vector.multi_reduction <add>, %54, %cst_19 [1] : vector<64x64xf32> to vector<64xf32>
    %56 = vector.shape_cast %55 : vector<64xf32> to vector<64x1xf32>
    %57 = tpu.reciprocal %56 {approx = true} : vector<64x1xf32> -> vector<64x1xf32>
    %58 = vector.broadcast %57 : vector<64x1xf32> to vector<64x64xf32>
    %59 = arith.mulf %54, %58 : vector<64x64xf32>
    %60 = vector.extract_strided_slice %4 {offsets = [0, 64], sizes = [64, 32], strides = [1, 1]} : vector<64x128xf32> to vector<64x32xf32>
    %cst_20 = arith.constant dense<0.000000e+00> : vector<64x32xf32>
    %61 = tpu.matmul %59, %60, %cst_20 {dimension_numbers = #tpu.dot_dimension_numbers<[1], [0], [0], [1], [0, 0, 1, 1], [], []>} : vector<64x64xf32>, vector<64x32xf32>, vector<64x32xf32> -> vector<64x32xf32>
    %c0_21 = arith.constant 0 : index
    %c0_22 = arith.constant 0 : index
    %c64 = arith.constant 64 : index
    %62 = vector.load %arg2[%c0_21, %c0_22, %c64] : memref<1x64x128xf32, #tpu.memory_space<vmem>>, vector<1x64x32xf32>
    %63 = vector.shape_cast %62 : vector<1x64x32xf32> to vector<64x32xf32>
    %64 = vector.shape_cast %61 : vector<64x32xf32> to vector<1x64x32xf32>
    tpu.vector_store %arg2[%c0_21, %c0_22, %c64], %64 {strides = array<i32>} : memref<1x64x128xf32, #tpu.memory_space<vmem>>, vector<1x64x32xf32>,
    %65 = vector.extract_strided_slice %2 {offsets = [0, 96], sizes = [64, 32], strides = [1, 1]} : vector<64x128xf32> to vector<64x32xf32>
    %cst_23 = arith.constant 0.176776692 : f32
    %66 = vector.broadcast %cst_23 : f32 to vector<64x32xf32>
    %67 = arith.mulf %65, %66 : vector<64x32xf32>
    %68 = vector.extract_strided_slice %3 {offsets = [0, 96], sizes = [64, 32], strides = [1, 1]} : vector<64x128xf32> to vector<64x32xf32>
    %cst_24 = arith.constant dense<0.000000e+00> : vector<64x64xf32>
    %69 = tpu.matmul %67, %68, %cst_24 {dimension_numbers = #tpu.dot_dimension_numbers<[1], [1], [0], [0], [0, 0, 1, 0], [], []>} : vector<64x32xf32>, vector<64x32xf32>, vector<64x64xf32> -> vector<64x64xf32>
    %cst_25 = arith.constant dense<0xFF800000> : vector<64xf32>
    %70 = vector.multi_reduction <maximumf>, %69, %cst_25 [1] : vector<64x64xf32> to vector<64xf32>
    %71 = vector.shape_cast %70 : vector<64xf32> to vector<64x1xf32>
    %72 = vector.broadcast %71 : vector<64x1xf32> to vector<64x64xf32>
    %73 = arith.subf %69, %72 : vector<64x64xf32>
    %74 = math.exp %73 : vector<64x64xf32>
    %cst_26 = arith.constant dense<0.000000e+00> : vector<64xf32>
    %75 = vector.multi_reduction <add>, %74, %cst_26 [1] : vector<64x64xf32> to vector<64xf32>
    %76 = vector.shape_cast %75 : vector<64xf32> to vector<64x1xf32>
    %77 = tpu.reciprocal %76 {approx = true} : vector<64x1xf32> -> vector<64x1xf32>
    %78 = vector.broadcast %77 : vector<64x1xf32> to vector<64x64xf32>
    %79 = arith.mulf %74, %78 : vector<64x64xf32>
    %80 = vector.extract_strided_slice %4 {offsets = [0, 96], sizes = [64, 32], strides = [1, 1]} : vector<64x128xf32> to vector<64x32xf32>
    %cst_27 = arith.constant dense<0.000000e+00> : vector<64x32xf32>
    %81 = tpu.matmul %79, %80, %cst_27 {dimension_numbers = #tpu.dot_dimension_numbers<[1], [0], [0], [1], [0, 0, 1, 1], [], []>} : vector<64x64xf32>, vector<64x32xf32>, vector<64x32xf32> -> vector<64x32xf32>
    %c0_28 = arith.constant 0 : index
    %c0_29 = arith.constant 0 : index
    %c96 = arith.constant 96 : index
    %82 = vector.load %arg2[%c0_28, %c0_29, %c96] : memref<1x64x128xf32, #tpu.memory_space<vmem>>, vector<1x64x32xf32>
    %83 = vector.shape_cast %82 : vector<1x64x32xf32> to vector<64x32xf32>
    %84 = vector.shape_cast %81 : vector<64x32xf32> to vector<1x64x32xf32>
    tpu.vector_store %arg2[%c0_28, %c0_29, %c96], %84 {strides = array<i32>} : memref<1x64x128xf32, #tpu.memory_space<vmem>>, vector<1x64x32xf32>,
    return
  }
  func.func @transform_0(%arg0: i32) -> (i32, i32, i32) {
    %c0_i32 = arith.constant 0 : i32
    %c0_i32_0 = arith.constant 0 : i32
    %c0_i32_1 = arith.constant 0 : i32
    return %arg0, %c0_i32, %c0_i32_0 : i32, i32, i32
  }
  func.func @transform_1(%arg0: i32) -> (i32, i32, i32) {
    %c0_i32 = arith.constant 0 : i32
    %c0_i32_0 = arith.constant 0 : i32
    %c0_i32_1 = arith.constant 0 : i32
    return %arg0, %c0_i32, %c0_i32_0 : i32, i32, i32
  }
}

module attributes {stable_mosaic.version = 11 : i64} {
  func.func @_matmul_bias_res_kernel(%arg0: i32, %arg1: i32, %arg2: memref<64x128xf32, #tpu.memory_space<vmem>>, %arg3: memref<128x128xf32, #tpu.memory_space<vmem>>, %arg4: memref<1x128xf32, #tpu.memory_space<vmem>>, %arg5: memref<64x128xf32, #tpu.memory_space<vmem>>, %arg6: memref<64x128xf32, #tpu.memory_space<vmem>>) attributes {dimension_semantics = [#tpu.dimension_semantics<parallel>, #tpu.dimension_semantics<parallel>], iteration_bounds = array<i64: 2, 1>, scalar_prefetch = 0 : i64, scratch_operands = 0 : i64, tpu.core_type = #tpu.core_type<tc>, window_params = [{transform_indices = @transform_0, window_bounds = array<i64: 64, 128>}, {transform_indices = @transform_1, window_bounds = array<i64: 128, 128>}, {transform_indices = @transform_2, window_bounds = array<i64: 1, 128>}, {transform_indices = @transform_3, window_bounds = array<i64: 64, 128>}, {transform_indices = @transform_4, window_bounds = array<i64: 64, 128>}]} {
    %c0 = arith.constant 0 : index
    %c0_0 = arith.constant 0 : index
    %0 = vector.load %arg2[%c0, %c0_0] : memref<64x128xf32, #tpu.memory_space<vmem>>, vector<64x128xf32>
    %c0_1 = arith.constant 0 : index
    %c0_2 = arith.constant 0 : index
    %1 = vector.load %arg3[%c0_1, %c0_2] : memref<128x128xf32, #tpu.memory_space<vmem>>, vector<128x128xf32>
    %cst = arith.constant dense<0.000000e+00> : vector<64x128xf32>
    %2 = tpu.matmul %0, %1, %cst {dimension_numbers = #tpu.dot_dimension_numbers<[1], [0], [0], [1], [0, 0, 1, 1], [], []>} : vector<64x128xf32>, vector<128x128xf32>, vector<64x128xf32> -> vector<64x128xf32>
    %c0_3 = arith.constant 0 : index
    %c0_4 = arith.constant 0 : index
    %3 = vector.load %arg4[%c0_3, %c0_4] : memref<1x128xf32, #tpu.memory_space<vmem>>, vector<1x128xf32>
    %4 = vector.broadcast %3 : vector<1x128xf32> to vector<64x128xf32>
    %5 = arith.addf %2, %4 : vector<64x128xf32>
    %c0_5 = arith.constant 0 : index
    %c0_6 = arith.constant 0 : index
    %6 = vector.load %arg5[%c0_5, %c0_6] : memref<64x128xf32, #tpu.memory_space<vmem>>, vector<64x128xf32>
    %7 = arith.addf %5, %6 : vector<64x128xf32>
    %c0_7 = arith.constant 0 : index
    %c0_8 = arith.constant 0 : index
    %8 = vector.load %arg6[%c0_7, %c0_8] : memref<64x128xf32, #tpu.memory_space<vmem>>, vector<64x128xf32>
    tpu.vector_store %arg6[%c0_7, %c0_8], %7 {strides = array<i32>} : memref<64x128xf32, #tpu.memory_space<vmem>>, vector<64x128xf32>,
    return
  }
  func.func @transform_0(%arg0: i32, %arg1: i32) -> (i32, i32) {
    %c0_i32 = arith.constant 0 : i32
    %c0_i32_0 = arith.constant 0 : i32
    return %arg0, %c0_i32 : i32, i32
  }
  func.func @transform_1(%arg0: i32, %arg1: i32) -> (i32, i32) {
    %c0_i32 = arith.constant 0 : i32
    %c0_i32_0 = arith.constant 0 : i32
    return %c0_i32, %arg1 : i32, i32
  }
  func.func @transform_2(%arg0: i32, %arg1: i32) -> (i32, i32) {
    %c0_i32 = arith.constant 0 : i32
    %c0_i32_0 = arith.constant 0 : i32
    return %c0_i32, %arg1 : i32, i32
  }
  func.func @transform_3(%arg0: i32, %arg1: i32) -> (i32, i32) {
    %c0_i32 = arith.constant 0 : i32
    return %arg0, %arg1 : i32, i32
  }
  func.func @transform_4(%arg0: i32, %arg1: i32) -> (i32, i32) {
    %c0_i32 = arith.constant 0 : i32
    return %arg0, %arg1 : i32, i32
  }
}

module attributes {stable_mosaic.version = 11 : i64} {
  func.func @_ln_matmul_kernel(%arg0: i32, %arg1: i32, %arg2: memref<64x128xf32, #tpu.memory_space<vmem>>, %arg3: memref<1x128xf32, #tpu.memory_space<vmem>>, %arg4: memref<1x128xf32, #tpu.memory_space<vmem>>, %arg5: memref<128x128xf32, #tpu.memory_space<vmem>>, %arg6: memref<64x128xf32, #tpu.memory_space<vmem>>) attributes {dimension_semantics = [#tpu.dimension_semantics<parallel>, #tpu.dimension_semantics<parallel>], iteration_bounds = array<i64: 2, 1>, scalar_prefetch = 0 : i64, scratch_operands = 0 : i64, tpu.core_type = #tpu.core_type<tc>, window_params = [{transform_indices = @transform_0, window_bounds = array<i64: 64, 128>}, {pipeline_mode = #tpu.pipeline_mode<synchronous>, transform_indices = @transform_1, window_bounds = array<i64: 1, 128>}, {pipeline_mode = #tpu.pipeline_mode<synchronous>, transform_indices = @transform_2, window_bounds = array<i64: 1, 128>}, {transform_indices = @transform_3, window_bounds = array<i64: 128, 128>}, {transform_indices = @transform_4, window_bounds = array<i64: 64, 128>}]} {
    %c0 = arith.constant 0 : index
    %c0_0 = arith.constant 0 : index
    %0 = vector.load %arg2[%c0, %c0_0] : memref<64x128xf32, #tpu.memory_space<vmem>>, vector<64x128xf32>
    %cst = arith.constant dense<0.000000e+00> : vector<64xf32>
    %1 = vector.multi_reduction <add>, %0, %cst [1] : vector<64x128xf32> to vector<64xf32>
    %2 = vector.shape_cast %1 : vector<64xf32> to vector<64x1xf32>
    %cst_1 = arith.constant 1.280000e+02 : f32
    %3 = vector.broadcast %cst_1 : f32 to vector<64x1xf32>
    %4 = arith.divf %2, %3 : vector<64x1xf32>
    %5 = vector.broadcast %4 : vector<64x1xf32> to vector<64x128xf32>
    %6 = arith.subf %0, %5 : vector<64x128xf32>
    %7 = arith.mulf %6, %6 : vector<64x128xf32>
    %cst_2 = arith.constant dense<0.000000e+00> : vector<64xf32>
    %8 = vector.multi_reduction <add>, %7, %cst_2 [1] : vector<64x128xf32> to vector<64xf32>
    %9 = vector.shape_cast %8 : vector<64xf32> to vector<64x1xf32>
    %cst_3 = arith.constant 1.280000e+02 : f32
    %10 = vector.broadcast %cst_3 : f32 to vector<64x1xf32>
    %11 = arith.divf %9, %10 : vector<64x1xf32>
    %cst_4 = arith.constant 9.99999974E-6 : f32
    %12 = vector.broadcast %cst_4 : f32 to vector<64x1xf32>
    %13 = arith.addf %11, %12 : vector<64x1xf32>
    %14 = math.rsqrt %13 : vector<64x1xf32>
    %15 = vector.broadcast %14 : vector<64x1xf32> to vector<64x128xf32>
    %16 = arith.mulf %6, %15 : vector<64x128xf32>
    %c0_5 = arith.constant 0 : index
    %c0_6 = arith.constant 0 : index
    %17 = vector.load %arg3[%c0_5, %c0_6] : memref<1x128xf32, #tpu.memory_space<vmem>>, vector<1x128xf32>
    %18 = vector.broadcast %17 : vector<1x128xf32> to vector<64x128xf32>
    %19 = arith.mulf %16, %18 : vector<64x128xf32>
    %c0_7 = arith.constant 0 : index
    %c0_8 = arith.constant 0 : index
    %20 = vector.load %arg4[%c0_7, %c0_8] : memref<1x128xf32, #tpu.memory_space<vmem>>, vector<1x128xf32>
    %21 = vector.broadcast %20 : vector<1x128xf32> to vector<64x128xf32>
    %22 = arith.addf %19, %21 : vector<64x128xf32>
    %c0_9 = arith.constant 0 : index
    %c0_10 = arith.constant 0 : index
    %23 = vector.load %arg5[%c0_9, %c0_10] : memref<128x128xf32, #tpu.memory_space<vmem>>, vector<128x128xf32>
    %cst_11 = arith.constant dense<0.000000e+00> : vector<64x128xf32>
    %24 = tpu.matmul %22, %23, %cst_11 {dimension_numbers = #tpu.dot_dimension_numbers<[1], [0], [0], [1], [0, 0, 1, 1], [], []>} : vector<64x128xf32>, vector<128x128xf32>, vector<64x128xf32> -> vector<64x128xf32>
    %c0_12 = arith.constant 0 : index
    %c0_13 = arith.constant 0 : index
    %25 = vector.load %arg6[%c0_12, %c0_13] : memref<64x128xf32, #tpu.memory_space<vmem>>, vector<64x128xf32>
    tpu.vector_store %arg6[%c0_12, %c0_13], %24 {strides = array<i32>} : memref<64x128xf32, #tpu.memory_space<vmem>>, vector<64x128xf32>,
    return
  }
  func.func @transform_0(%arg0: i32, %arg1: i32) -> (i32, i32) {
    %c0_i32 = arith.constant 0 : i32
    %c0_i32_0 = arith.constant 0 : i32
    return %arg0, %c0_i32 : i32, i32
  }
  func.func @transform_1(%arg0: i32, %arg1: i32) -> (i32, i32) {
    %c0_i32 = arith.constant 0 : i32
    %c0_i32_0 = arith.constant 0 : i32
    %c0_i32_1 = arith.constant 0 : i32
    return %c0_i32, %c0_i32_0 : i32, i32
  }
  func.func @transform_2(%arg0: i32, %arg1: i32) -> (i32, i32) {
    %c0_i32 = arith.constant 0 : i32
    %c0_i32_0 = arith.constant 0 : i32
    %c0_i32_1 = arith.constant 0 : i32
    return %c0_i32, %c0_i32_0 : i32, i32
  }
  func.func @transform_3(%arg0: i32, %arg1: i32) -> (i32, i32) {
    %c0_i32 = arith.constant 0 : i32
    %c0_i32_0 = arith.constant 0 : i32
    return %c0_i32, %arg1 : i32, i32
  }
  func.func @transform_4(%arg0: i32, %arg1: i32) -> (i32, i32) {
    %c0_i32 = arith.constant 0 : i32
    return %arg0, %arg1 : i32, i32
  }
}

module attributes {stable_mosaic.version = 11 : i64} {
  func.func @_matmul_kernel(%arg0: i32, %arg1: i32, %arg2: memref<128x64xf32, #tpu.memory_space<vmem>>, %arg3: memref<64x256xf32, #tpu.memory_space<vmem>>, %arg4: memref<128x256xf32, #tpu.memory_space<vmem>>) attributes {dimension_semantics = [#tpu.dimension_semantics<parallel>, #tpu.dimension_semantics<parallel>], iteration_bounds = array<i64: 2, 1>, scalar_prefetch = 0 : i64, scratch_operands = 0 : i64, tpu.core_type = #tpu.core_type<tc>, window_params = [{transform_indices = @transform_0, window_bounds = array<i64: 128, 64>}, {transform_indices = @transform_1, window_bounds = array<i64: 64, 256>}, {transform_indices = @transform_2, window_bounds = array<i64: 128, 256>}]} {
    %c0 = arith.constant 0 : index
    %c0_0 = arith.constant 0 : index
    %0 = vector.load %arg2[%c0, %c0_0] : memref<128x64xf32, #tpu.memory_space<vmem>>, vector<128x64xf32>
    %c0_1 = arith.constant 0 : index
    %c0_2 = arith.constant 0 : index
    %1 = vector.load %arg3[%c0_1, %c0_2] : memref<64x256xf32, #tpu.memory_space<vmem>>, vector<64x256xf32>
    %cst = arith.constant dense<0.000000e+00> : vector<128x256xf32>
    %2 = tpu.matmul %0, %1, %cst {dimension_numbers = #tpu.dot_dimension_numbers<[1], [0], [0], [1], [0, 0, 1, 1], [], []>} : vector<128x64xf32>, vector<64x256xf32>, vector<128x256xf32> -> vector<128x256xf32>
    %c0_3 = arith.constant 0 : index
    %c0_4 = arith.constant 0 : index
    %3 = vector.load %arg4[%c0_3, %c0_4] : memref<128x256xf32, #tpu.memory_space<vmem>>, vector<128x256xf32>
    tpu.vector_store %arg4[%c0_3, %c0_4], %2 {strides = array<i32>} : memref<128x256xf32, #tpu.memory_space<vmem>>, vector<128x256xf32>,
    return
  }
  func.func @transform_0(%arg0: i32, %arg1: i32) -> (i32, i32) {
    %c0_i32 = arith.constant 0 : i32
    %c0_i32_0 = arith.constant 0 : i32
    return %arg0, %c0_i32 : i32, i32
  }
  func.func @transform_1(%arg0: i32, %arg1: i32) -> (i32, i32) {
    %c0_i32 = arith.constant 0 : i32
    %c0_i32_0 = arith.constant 0 : i32
    return %c0_i32, %arg1 : i32, i32
  }
  func.func @transform_2(%arg0: i32, %arg1: i32) -> (i32, i32) {
    %c0_i32 = arith.constant 0 : i32
    return %arg0, %arg1 : i32, i32
  }
}

module attributes {stable_mosaic.version = 11 : i64} {
  func.func @_cross_attn_kernel(%arg0: i32, %arg1: memref<1x64x128xf32, #tpu.memory_space<vmem>>, %arg2: memref<1x128x256xf32, #tpu.memory_space<vmem>>, %arg3: memref<1x64x128xf32, #tpu.memory_space<vmem>>) attributes {dimension_semantics = [#tpu.dimension_semantics<parallel>], iteration_bounds = array<i64: 2>, scalar_prefetch = 0 : i64, scratch_operands = 0 : i64, tpu.core_type = #tpu.core_type<tc>, window_params = [{transform_indices = @transform_0, window_bounds = array<i64: 1, 64, 128>}, {transform_indices = @transform_1, window_bounds = array<i64: 1, 128, 256>}, {transform_indices = @transform_2, window_bounds = array<i64: 1, 64, 128>}]} {
    %c0 = arith.constant 0 : index
    %c0_0 = arith.constant 0 : index
    %c0_1 = arith.constant 0 : index
    %0 = vector.load %arg1[%c0, %c0_0, %c0_1] : memref<1x64x128xf32, #tpu.memory_space<vmem>>, vector<1x64x128xf32>
    %1 = vector.shape_cast %0 : vector<1x64x128xf32> to vector<64x128xf32>
    %c0_2 = arith.constant 0 : index
    %c0_3 = arith.constant 0 : index
    %c0_4 = arith.constant 0 : index
    %2 = vector.load %arg2[%c0_2, %c0_3, %c0_4] : memref<1x128x256xf32, #tpu.memory_space<vmem>>, vector<1x128x256xf32>
    %3 = vector.shape_cast %2 : vector<1x128x256xf32> to vector<128x256xf32>
    %4 = tpu.iota {dimensions = array<i32: 1>} : vector<64x128xi32>
    %c77_i32 = arith.constant 77 : i32
    %5 = vector.broadcast %c77_i32 : i32 to vector<64x128xi32>
    %6 = arith.cmpi slt, %4, %5 : vector<64x128xi32>
    %7 = vector.extract_strided_slice %3 {offsets = [0, 0], sizes = [128, 128], strides = [1, 1]} : vector<128x256xf32> to vector<128x128xf32>
    %8 = vector.extract_strided_slice %3 {offsets = [0, 128], sizes = [128, 128], strides = [1, 1]} : vector<128x256xf32> to vector<128x128xf32>
    %9 = vector.extract_strided_slice %1 {offsets = [0, 0], sizes = [64, 32], strides = [1, 1]} : vector<64x128xf32> to vector<64x32xf32>
    %cst = arith.constant 0.176776692 : f32
    %10 = vector.broadcast %cst : f32 to vector<64x32xf32>
    %11 = arith.mulf %9, %10 : vector<64x32xf32>
    %12 = vector.extract_strided_slice %7 {offsets = [0, 0], sizes = [128, 32], strides = [1, 1]} : vector<128x128xf32> to vector<128x32xf32>
    %cst_5 = arith.constant dense<0.000000e+00> : vector<64x128xf32>
    %13 = tpu.matmul %11, %12, %cst_5 {dimension_numbers = #tpu.dot_dimension_numbers<[1], [1], [0], [0], [0, 0, 1, 0], [], []>} : vector<64x32xf32>, vector<128x32xf32>, vector<64x128xf32> -> vector<64x128xf32>
    %cst_6 = arith.constant -1.000000e+30 : f32
    %14 = vector.broadcast %cst_6 : f32 to vector<64x128xf32>
    %15 = arith.select %6, %13, %14 : vector<64x128xi1>, vector<64x128xf32>
    %cst_7 = arith.constant dense<0xFF800000> : vector<64xf32>
    %16 = vector.multi_reduction <maximumf>, %15, %cst_7 [1] : vector<64x128xf32> to vector<64xf32>
    %17 = vector.shape_cast %16 : vector<64xf32> to vector<64x1xf32>
    %18 = vector.broadcast %17 : vector<64x1xf32> to vector<64x128xf32>
    %19 = arith.subf %15, %18 : vector<64x128xf32>
    %20 = math.exp %19 : vector<64x128xf32>
    %cst_8 = arith.constant dense<0.000000e+00> : vector<64xf32>
    %21 = vector.multi_reduction <add>, %20, %cst_8 [1] : vector<64x128xf32> to vector<64xf32>
    %22 = vector.shape_cast %21 : vector<64xf32> to vector<64x1xf32>
    %23 = tpu.reciprocal %22 {approx = true} : vector<64x1xf32> -> vector<64x1xf32>
    %24 = vector.broadcast %23 : vector<64x1xf32> to vector<64x128xf32>
    %25 = arith.mulf %20, %24 : vector<64x128xf32>
    %26 = vector.extract_strided_slice %8 {offsets = [0, 0], sizes = [128, 32], strides = [1, 1]} : vector<128x128xf32> to vector<128x32xf32>
    %cst_9 = arith.constant dense<0.000000e+00> : vector<64x32xf32>
    %27 = tpu.matmul %25, %26, %cst_9 {dimension_numbers = #tpu.dot_dimension_numbers<[1], [0], [0], [1], [0, 0, 1, 1], [], []>} : vector<64x128xf32>, vector<128x32xf32>, vector<64x32xf32> -> vector<64x32xf32>
    %c0_10 = arith.constant 0 : index
    %c0_11 = arith.constant 0 : index
    %c0_12 = arith.constant 0 : index
    %28 = vector.load %arg3[%c0_10, %c0_11, %c0_12] : memref<1x64x128xf32, #tpu.memory_space<vmem>>, vector<1x64x32xf32>
    %29 = vector.shape_cast %28 : vector<1x64x32xf32> to vector<64x32xf32>
    %30 = vector.shape_cast %27 : vector<64x32xf32> to vector<1x64x32xf32>
    tpu.vector_store %arg3[%c0_10, %c0_11, %c0_12], %30 {strides = array<i32>} : memref<1x64x128xf32, #tpu.memory_space<vmem>>, vector<1x64x32xf32>,
    %31 = vector.extract_strided_slice %1 {offsets = [0, 32], sizes = [64, 32], strides = [1, 1]} : vector<64x128xf32> to vector<64x32xf32>
    %cst_13 = arith.constant 0.176776692 : f32
    %32 = vector.broadcast %cst_13 : f32 to vector<64x32xf32>
    %33 = arith.mulf %31, %32 : vector<64x32xf32>
    %34 = vector.extract_strided_slice %7 {offsets = [0, 32], sizes = [128, 32], strides = [1, 1]} : vector<128x128xf32> to vector<128x32xf32>
    %cst_14 = arith.constant dense<0.000000e+00> : vector<64x128xf32>
    %35 = tpu.matmul %33, %34, %cst_14 {dimension_numbers = #tpu.dot_dimension_numbers<[1], [1], [0], [0], [0, 0, 1, 0], [], []>} : vector<64x32xf32>, vector<128x32xf32>, vector<64x128xf32> -> vector<64x128xf32>
    %cst_15 = arith.constant -1.000000e+30 : f32
    %36 = vector.broadcast %cst_15 : f32 to vector<64x128xf32>
    %37 = arith.select %6, %35, %36 : vector<64x128xi1>, vector<64x128xf32>
    %cst_16 = arith.constant dense<0xFF800000> : vector<64xf32>
    %38 = vector.multi_reduction <maximumf>, %37, %cst_16 [1] : vector<64x128xf32> to vector<64xf32>
    %39 = vector.shape_cast %38 : vector<64xf32> to vector<64x1xf32>
    %40 = vector.broadcast %39 : vector<64x1xf32> to vector<64x128xf32>
    %41 = arith.subf %37, %40 : vector<64x128xf32>
    %42 = math.exp %41 : vector<64x128xf32>
    %cst_17 = arith.constant dense<0.000000e+00> : vector<64xf32>
    %43 = vector.multi_reduction <add>, %42, %cst_17 [1] : vector<64x128xf32> to vector<64xf32>
    %44 = vector.shape_cast %43 : vector<64xf32> to vector<64x1xf32>
    %45 = tpu.reciprocal %44 {approx = true} : vector<64x1xf32> -> vector<64x1xf32>
    %46 = vector.broadcast %45 : vector<64x1xf32> to vector<64x128xf32>
    %47 = arith.mulf %42, %46 : vector<64x128xf32>
    %48 = vector.extract_strided_slice %8 {offsets = [0, 32], sizes = [128, 32], strides = [1, 1]} : vector<128x128xf32> to vector<128x32xf32>
    %cst_18 = arith.constant dense<0.000000e+00> : vector<64x32xf32>
    %49 = tpu.matmul %47, %48, %cst_18 {dimension_numbers = #tpu.dot_dimension_numbers<[1], [0], [0], [1], [0, 0, 1, 1], [], []>} : vector<64x128xf32>, vector<128x32xf32>, vector<64x32xf32> -> vector<64x32xf32>
    %c0_19 = arith.constant 0 : index
    %c0_20 = arith.constant 0 : index
    %c32 = arith.constant 32 : index
    %50 = vector.load %arg3[%c0_19, %c0_20, %c32] : memref<1x64x128xf32, #tpu.memory_space<vmem>>, vector<1x64x32xf32>
    %51 = vector.shape_cast %50 : vector<1x64x32xf32> to vector<64x32xf32>
    %52 = vector.shape_cast %49 : vector<64x32xf32> to vector<1x64x32xf32>
    tpu.vector_store %arg3[%c0_19, %c0_20, %c32], %52 {strides = array<i32>} : memref<1x64x128xf32, #tpu.memory_space<vmem>>, vector<1x64x32xf32>,
    %53 = vector.extract_strided_slice %1 {offsets = [0, 64], sizes = [64, 32], strides = [1, 1]} : vector<64x128xf32> to vector<64x32xf32>
    %cst_21 = arith.constant 0.176776692 : f32
    %54 = vector.broadcast %cst_21 : f32 to vector<64x32xf32>
    %55 = arith.mulf %53, %54 : vector<64x32xf32>
    %56 = vector.extract_strided_slice %7 {offsets = [0, 64], sizes = [128, 32], strides = [1, 1]} : vector<128x128xf32> to vector<128x32xf32>
    %cst_22 = arith.constant dense<0.000000e+00> : vector<64x128xf32>
    %57 = tpu.matmul %55, %56, %cst_22 {dimension_numbers = #tpu.dot_dimension_numbers<[1], [1], [0], [0], [0, 0, 1, 0], [], []>} : vector<64x32xf32>, vector<128x32xf32>, vector<64x128xf32> -> vector<64x128xf32>
    %cst_23 = arith.constant -1.000000e+30 : f32
    %58 = vector.broadcast %cst_23 : f32 to vector<64x128xf32>
    %59 = arith.select %6, %57, %58 : vector<64x128xi1>, vector<64x128xf32>
    %cst_24 = arith.constant dense<0xFF800000> : vector<64xf32>
    %60 = vector.multi_reduction <maximumf>, %59, %cst_24 [1] : vector<64x128xf32> to vector<64xf32>
    %61 = vector.shape_cast %60 : vector<64xf32> to vector<64x1xf32>
    %62 = vector.broadcast %61 : vector<64x1xf32> to vector<64x128xf32>
    %63 = arith.subf %59, %62 : vector<64x128xf32>
    %64 = math.exp %63 : vector<64x128xf32>
    %cst_25 = arith.constant dense<0.000000e+00> : vector<64xf32>
    %65 = vector.multi_reduction <add>, %64, %cst_25 [1] : vector<64x128xf32> to vector<64xf32>
    %66 = vector.shape_cast %65 : vector<64xf32> to vector<64x1xf32>
    %67 = tpu.reciprocal %66 {approx = true} : vector<64x1xf32> -> vector<64x1xf32>
    %68 = vector.broadcast %67 : vector<64x1xf32> to vector<64x128xf32>
    %69 = arith.mulf %64, %68 : vector<64x128xf32>
    %70 = vector.extract_strided_slice %8 {offsets = [0, 64], sizes = [128, 32], strides = [1, 1]} : vector<128x128xf32> to vector<128x32xf32>
    %cst_26 = arith.constant dense<0.000000e+00> : vector<64x32xf32>
    %71 = tpu.matmul %69, %70, %cst_26 {dimension_numbers = #tpu.dot_dimension_numbers<[1], [0], [0], [1], [0, 0, 1, 1], [], []>} : vector<64x128xf32>, vector<128x32xf32>, vector<64x32xf32> -> vector<64x32xf32>
    %c0_27 = arith.constant 0 : index
    %c0_28 = arith.constant 0 : index
    %c64 = arith.constant 64 : index
    %72 = vector.load %arg3[%c0_27, %c0_28, %c64] : memref<1x64x128xf32, #tpu.memory_space<vmem>>, vector<1x64x32xf32>
    %73 = vector.shape_cast %72 : vector<1x64x32xf32> to vector<64x32xf32>
    %74 = vector.shape_cast %71 : vector<64x32xf32> to vector<1x64x32xf32>
    tpu.vector_store %arg3[%c0_27, %c0_28, %c64], %74 {strides = array<i32>} : memref<1x64x128xf32, #tpu.memory_space<vmem>>, vector<1x64x32xf32>,
    %75 = vector.extract_strided_slice %1 {offsets = [0, 96], sizes = [64, 32], strides = [1, 1]} : vector<64x128xf32> to vector<64x32xf32>
    %cst_29 = arith.constant 0.176776692 : f32
    %76 = vector.broadcast %cst_29 : f32 to vector<64x32xf32>
    %77 = arith.mulf %75, %76 : vector<64x32xf32>
    %78 = vector.extract_strided_slice %7 {offsets = [0, 96], sizes = [128, 32], strides = [1, 1]} : vector<128x128xf32> to vector<128x32xf32>
    %cst_30 = arith.constant dense<0.000000e+00> : vector<64x128xf32>
    %79 = tpu.matmul %77, %78, %cst_30 {dimension_numbers = #tpu.dot_dimension_numbers<[1], [1], [0], [0], [0, 0, 1, 0], [], []>} : vector<64x32xf32>, vector<128x32xf32>, vector<64x128xf32> -> vector<64x128xf32>
    %cst_31 = arith.constant -1.000000e+30 : f32
    %80 = vector.broadcast %cst_31 : f32 to vector<64x128xf32>
    %81 = arith.select %6, %79, %80 : vector<64x128xi1>, vector<64x128xf32>
    %cst_32 = arith.constant dense<0xFF800000> : vector<64xf32>
    %82 = vector.multi_reduction <maximumf>, %81, %cst_32 [1] : vector<64x128xf32> to vector<64xf32>
    %83 = vector.shape_cast %82 : vector<64xf32> to vector<64x1xf32>
    %84 = vector.broadcast %83 : vector<64x1xf32> to vector<64x128xf32>
    %85 = arith.subf %81, %84 : vector<64x128xf32>
    %86 = math.exp %85 : vector<64x128xf32>
    %cst_33 = arith.constant dense<0.000000e+00> : vector<64xf32>
    %87 = vector.multi_reduction <add>, %86, %cst_33 [1] : vector<64x128xf32> to vector<64xf32>
    %88 = vector.shape_cast %87 : vector<64xf32> to vector<64x1xf32>
    %89 = tpu.reciprocal %88 {approx = true} : vector<64x1xf32> -> vector<64x1xf32>
    %90 = vector.broadcast %89 : vector<64x1xf32> to vector<64x128xf32>
    %91 = arith.mulf %86, %90 : vector<64x128xf32>
    %92 = vector.extract_strided_slice %8 {offsets = [0, 96], sizes = [128, 32], strides = [1, 1]} : vector<128x128xf32> to vector<128x32xf32>
    %cst_34 = arith.constant dense<0.000000e+00> : vector<64x32xf32>
    %93 = tpu.matmul %91, %92, %cst_34 {dimension_numbers = #tpu.dot_dimension_numbers<[1], [0], [0], [1], [0, 0, 1, 1], [], []>} : vector<64x128xf32>, vector<128x32xf32>, vector<64x32xf32> -> vector<64x32xf32>
    %c0_35 = arith.constant 0 : index
    %c0_36 = arith.constant 0 : index
    %c96 = arith.constant 96 : index
    %94 = vector.load %arg3[%c0_35, %c0_36, %c96] : memref<1x64x128xf32, #tpu.memory_space<vmem>>, vector<1x64x32xf32>
    %95 = vector.shape_cast %94 : vector<1x64x32xf32> to vector<64x32xf32>
    %96 = vector.shape_cast %93 : vector<64x32xf32> to vector<1x64x32xf32>
    tpu.vector_store %arg3[%c0_35, %c0_36, %c96], %96 {strides = array<i32>} : memref<1x64x128xf32, #tpu.memory_space<vmem>>, vector<1x64x32xf32>,
    return
  }
  func.func @transform_0(%arg0: i32) -> (i32, i32, i32) {
    %c0_i32 = arith.constant 0 : i32
    %c0_i32_0 = arith.constant 0 : i32
    %c0_i32_1 = arith.constant 0 : i32
    return %arg0, %c0_i32, %c0_i32_0 : i32, i32, i32
  }
  func.func @transform_1(%arg0: i32) -> (i32, i32, i32) {
    %c0_i32 = arith.constant 0 : i32
    %c0_i32_0 = arith.constant 0 : i32
    %c0_i32_1 = arith.constant 0 : i32
    return %arg0, %c0_i32, %c0_i32_0 : i32, i32, i32
  }
  func.func @transform_2(%arg0: i32) -> (i32, i32, i32) {
    %c0_i32 = arith.constant 0 : i32
    %c0_i32_0 = arith.constant 0 : i32
    %c0_i32_1 = arith.constant 0 : i32
    return %arg0, %c0_i32, %c0_i32_0 : i32, i32, i32
  }
}

module attributes {stable_mosaic.version = 11 : i64} {
  func.func @_matmul_bias_res_kernel(%arg0: i32, %arg1: i32, %arg2: memref<64x512xf32, #tpu.memory_space<vmem>>, %arg3: memref<512x128xf32, #tpu.memory_space<vmem>>, %arg4: memref<1x128xf32, #tpu.memory_space<vmem>>, %arg5: memref<64x128xf32, #tpu.memory_space<vmem>>, %arg6: memref<64x128xf32, #tpu.memory_space<vmem>>) attributes {dimension_semantics = [#tpu.dimension_semantics<parallel>, #tpu.dimension_semantics<parallel>], iteration_bounds = array<i64: 2, 1>, scalar_prefetch = 0 : i64, scratch_operands = 0 : i64, tpu.core_type = #tpu.core_type<tc>, window_params = [{transform_indices = @transform_0, window_bounds = array<i64: 64, 512>}, {transform_indices = @transform_1, window_bounds = array<i64: 512, 128>}, {transform_indices = @transform_2, window_bounds = array<i64: 1, 128>}, {transform_indices = @transform_3, window_bounds = array<i64: 64, 128>}, {transform_indices = @transform_4, window_bounds = array<i64: 64, 128>}]} {
    %c0 = arith.constant 0 : index
    %c0_0 = arith.constant 0 : index
    %0 = vector.load %arg2[%c0, %c0_0] : memref<64x512xf32, #tpu.memory_space<vmem>>, vector<64x512xf32>
    %c0_1 = arith.constant 0 : index
    %c0_2 = arith.constant 0 : index
    %1 = vector.load %arg3[%c0_1, %c0_2] : memref<512x128xf32, #tpu.memory_space<vmem>>, vector<512x128xf32>
    %cst = arith.constant dense<0.000000e+00> : vector<64x128xf32>
    %2 = tpu.matmul %0, %1, %cst {dimension_numbers = #tpu.dot_dimension_numbers<[1], [0], [0], [1], [0, 0, 1, 1], [], []>} : vector<64x512xf32>, vector<512x128xf32>, vector<64x128xf32> -> vector<64x128xf32>
    %c0_3 = arith.constant 0 : index
    %c0_4 = arith.constant 0 : index
    %3 = vector.load %arg4[%c0_3, %c0_4] : memref<1x128xf32, #tpu.memory_space<vmem>>, vector<1x128xf32>
    %4 = vector.broadcast %3 : vector<1x128xf32> to vector<64x128xf32>
    %5 = arith.addf %2, %4 : vector<64x128xf32>
    %c0_5 = arith.constant 0 : index
    %c0_6 = arith.constant 0 : index
    %6 = vector.load %arg5[%c0_5, %c0_6] : memref<64x128xf32, #tpu.memory_space<vmem>>, vector<64x128xf32>
    %7 = arith.addf %5, %6 : vector<64x128xf32>
    %c0_7 = arith.constant 0 : index
    %c0_8 = arith.constant 0 : index
    %8 = vector.load %arg6[%c0_7, %c0_8] : memref<64x128xf32, #tpu.memory_space<vmem>>, vector<64x128xf32>
    tpu.vector_store %arg6[%c0_7, %c0_8], %7 {strides = array<i32>} : memref<64x128xf32, #tpu.memory_space<vmem>>, vector<64x128xf32>,
    return
  }
  func.func @transform_0(%arg0: i32, %arg1: i32) -> (i32, i32) {
    %c0_i32 = arith.constant 0 : i32
    %c0_i32_0 = arith.constant 0 : i32
    return %arg0, %c0_i32 : i32, i32
  }
  func.func @transform_1(%arg0: i32, %arg1: i32) -> (i32, i32) {
    %c0_i32 = arith.constant 0 : i32
    %c0_i32_0 = arith.constant 0 : i32
    return %c0_i32, %arg1 : i32, i32
  }
  func.func @transform_2(%arg0: i32, %arg1: i32) -> (i32, i32) {
    %c0_i32 = arith.constant 0 : i32
    %c0_i32_0 = arith.constant 0 : i32
    return %c0_i32, %arg1 : i32, i32
  }
  func.func @transform_3(%arg0: i32, %arg1: i32) -> (i32, i32) {
    %c0_i32 = arith.constant 0 : i32
    return %arg0, %arg1 : i32, i32
  }
  func.func @transform_4(%arg0: i32, %arg1: i32) -> (i32, i32) {
    %c0_i32 = arith.constant 0 : i32
    return %arg0, %arg1 : i32, i32
  }
}

module attributes {stable_mosaic.version = 11 : i64} {
  func.func @_ln_matmul_geglu_kernel(%arg0: i32, %arg1: i32, %arg2: memref<64x128xf32, #tpu.memory_space<vmem>>, %arg3: memref<1x128xf32, #tpu.memory_space<vmem>>, %arg4: memref<1x128xf32, #tpu.memory_space<vmem>>, %arg5: memref<128x512xf32, #tpu.memory_space<vmem>>, %arg6: memref<1x512xf32, #tpu.memory_space<vmem>>, %arg7: memref<128x512xf32, #tpu.memory_space<vmem>>, %arg8: memref<1x512xf32, #tpu.memory_space<vmem>>, %arg9: memref<64x512xf32, #tpu.memory_space<vmem>>) attributes {dimension_semantics = [#tpu.dimension_semantics<parallel>, #tpu.dimension_semantics<parallel>], iteration_bounds = array<i64: 2, 1>, scalar_prefetch = 0 : i64, scratch_operands = 0 : i64, tpu.core_type = #tpu.core_type<tc>, window_params = [{transform_indices = @transform_0, window_bounds = array<i64: 64, 128>}, {pipeline_mode = #tpu.pipeline_mode<synchronous>, transform_indices = @transform_1, window_bounds = array<i64: 1, 128>}, {pipeline_mode = #tpu.pipeline_mode<synchronous>, transform_indices = @transform_2, window_bounds = array<i64: 1, 128>}, {transform_indices = @transform_3, window_bounds = array<i64: 128, 512>}, {transform_indices = @transform_4, window_bounds = array<i64: 1, 512>}, {transform_indices = @transform_5, window_bounds = array<i64: 128, 512>}, {transform_indices = @transform_6, window_bounds = array<i64: 1, 512>}, {transform_indices = @transform_7, window_bounds = array<i64: 64, 512>}]} {
    %c0 = arith.constant 0 : index
    %c0_0 = arith.constant 0 : index
    %0 = vector.load %arg2[%c0, %c0_0] : memref<64x128xf32, #tpu.memory_space<vmem>>, vector<64x128xf32>
    %cst = arith.constant dense<0.000000e+00> : vector<64xf32>
    %1 = vector.multi_reduction <add>, %0, %cst [1] : vector<64x128xf32> to vector<64xf32>
    %2 = vector.shape_cast %1 : vector<64xf32> to vector<64x1xf32>
    %cst_1 = arith.constant 1.280000e+02 : f32
    %3 = vector.broadcast %cst_1 : f32 to vector<64x1xf32>
    %4 = arith.divf %2, %3 : vector<64x1xf32>
    %5 = vector.broadcast %4 : vector<64x1xf32> to vector<64x128xf32>
    %6 = arith.subf %0, %5 : vector<64x128xf32>
    %7 = arith.mulf %6, %6 : vector<64x128xf32>
    %cst_2 = arith.constant dense<0.000000e+00> : vector<64xf32>
    %8 = vector.multi_reduction <add>, %7, %cst_2 [1] : vector<64x128xf32> to vector<64xf32>
    %9 = vector.shape_cast %8 : vector<64xf32> to vector<64x1xf32>
    %cst_3 = arith.constant 1.280000e+02 : f32
    %10 = vector.broadcast %cst_3 : f32 to vector<64x1xf32>
    %11 = arith.divf %9, %10 : vector<64x1xf32>
    %cst_4 = arith.constant 9.99999974E-6 : f32
    %12 = vector.broadcast %cst_4 : f32 to vector<64x1xf32>
    %13 = arith.addf %11, %12 : vector<64x1xf32>
    %14 = math.rsqrt %13 : vector<64x1xf32>
    %15 = vector.broadcast %14 : vector<64x1xf32> to vector<64x128xf32>
    %16 = arith.mulf %6, %15 : vector<64x128xf32>
    %c0_5 = arith.constant 0 : index
    %c0_6 = arith.constant 0 : index
    %17 = vector.load %arg3[%c0_5, %c0_6] : memref<1x128xf32, #tpu.memory_space<vmem>>, vector<1x128xf32>
    %18 = vector.broadcast %17 : vector<1x128xf32> to vector<64x128xf32>
    %19 = arith.mulf %16, %18 : vector<64x128xf32>
    %c0_7 = arith.constant 0 : index
    %c0_8 = arith.constant 0 : index
    %20 = vector.load %arg4[%c0_7, %c0_8] : memref<1x128xf32, #tpu.memory_space<vmem>>, vector<1x128xf32>
    %21 = vector.broadcast %20 : vector<1x128xf32> to vector<64x128xf32>
    %22 = arith.addf %19, %21 : vector<64x128xf32>
    %c0_9 = arith.constant 0 : index
    %c0_10 = arith.constant 0 : index
    %23 = vector.load %arg5[%c0_9, %c0_10] : memref<128x512xf32, #tpu.memory_space<vmem>>, vector<128x512xf32>
    %cst_11 = arith.constant dense<0.000000e+00> : vector<64x512xf32>
    %24 = tpu.matmul %22, %23, %cst_11 {dimension_numbers = #tpu.dot_dimension_numbers<[1], [0], [0], [1], [0, 0, 1, 1], [], []>} : vector<64x128xf32>, vector<128x512xf32>, vector<64x512xf32> -> vector<64x512xf32>
    %c0_12 = arith.constant 0 : index
    %c0_13 = arith.constant 0 : index
    %25 = vector.load %arg6[%c0_12, %c0_13] : memref<1x512xf32, #tpu.memory_space<vmem>>, vector<1x512xf32>
    %26 = vector.broadcast %25 : vector<1x512xf32> to vector<64x512xf32>
    %27 = arith.addf %24, %26 : vector<64x512xf32>
    %c0_14 = arith.constant 0 : index
    %c0_15 = arith.constant 0 : index
    %28 = vector.load %arg7[%c0_14, %c0_15] : memref<128x512xf32, #tpu.memory_space<vmem>>, vector<128x512xf32>
    %cst_16 = arith.constant dense<0.000000e+00> : vector<64x512xf32>
    %29 = tpu.matmul %22, %28, %cst_16 {dimension_numbers = #tpu.dot_dimension_numbers<[1], [0], [0], [1], [0, 0, 1, 1], [], []>} : vector<64x128xf32>, vector<128x512xf32>, vector<64x512xf32> -> vector<64x512xf32>
    %c0_17 = arith.constant 0 : index
    %c0_18 = arith.constant 0 : index
    %30 = vector.load %arg8[%c0_17, %c0_18] : memref<1x512xf32, #tpu.memory_space<vmem>>, vector<1x512xf32>
    %31 = vector.broadcast %30 : vector<1x512xf32> to vector<64x512xf32>
    %32 = arith.addf %29, %31 : vector<64x512xf32>
    %33 = arith.mulf %32, %32 : vector<64x512xf32>
    %34 = arith.mulf %32, %33 : vector<64x512xf32>
    %cst_19 = arith.constant 4.471500e-02 : f32
    %35 = vector.broadcast %cst_19 : f32 to vector<64x512xf32>
    %36 = arith.mulf %35, %34 : vector<64x512xf32>
    %37 = arith.addf %32, %36 : vector<64x512xf32>
    %cst_20 = arith.constant 0.797884583 : f32
    %38 = vector.broadcast %cst_20 : f32 to vector<64x512xf32>
    %39 = arith.mulf %38, %37 : vector<64x512xf32>
    %40 = math.tanh %39 : vector<64x512xf32>
    %cst_21 = arith.constant 1.000000e+00 : f32
    %41 = vector.broadcast %cst_21 : f32 to vector<64x512xf32>
    %42 = arith.addf %41, %40 : vector<64x512xf32>
    %cst_22 = arith.constant 5.000000e-01 : f32
    %43 = vector.broadcast %cst_22 : f32 to vector<64x512xf32>
    %44 = arith.mulf %43, %42 : vector<64x512xf32>
    %45 = arith.mulf %32, %44 : vector<64x512xf32>
    %46 = arith.mulf %27, %45 : vector<64x512xf32>
    %c0_23 = arith.constant 0 : index
    %c0_24 = arith.constant 0 : index
    %47 = vector.load %arg9[%c0_23, %c0_24] : memref<64x512xf32, #tpu.memory_space<vmem>>, vector<64x512xf32>
    tpu.vector_store %arg9[%c0_23, %c0_24], %46 {strides = array<i32>} : memref<64x512xf32, #tpu.memory_space<vmem>>, vector<64x512xf32>,
    return
  }
  func.func @transform_0(%arg0: i32, %arg1: i32) -> (i32, i32) {
    %c0_i32 = arith.constant 0 : i32
    %c0_i32_0 = arith.constant 0 : i32
    return %arg0, %c0_i32 : i32, i32
  }
  func.func @transform_1(%arg0: i32, %arg1: i32) -> (i32, i32) {
    %c0_i32 = arith.constant 0 : i32
    %c0_i32_0 = arith.constant 0 : i32
    %c0_i32_1 = arith.constant 0 : i32
    return %c0_i32, %c0_i32_0 : i32, i32
  }
  func.func @transform_2(%arg0: i32, %arg1: i32) -> (i32, i32) {
    %c0_i32 = arith.constant 0 : i32
    %c0_i32_0 = arith.constant 0 : i32
    %c0_i32_1 = arith.constant 0 : i32
    return %c0_i32, %c0_i32_0 : i32, i32
  }
  func.func @transform_3(%arg0: i32, %arg1: i32) -> (i32, i32) {
    %c0_i32 = arith.constant 0 : i32
    %c0_i32_0 = arith.constant 0 : i32
    return %c0_i32, %arg1 : i32, i32
  }
  func.func @transform_4(%arg0: i32, %arg1: i32) -> (i32, i32) {
    %c0_i32 = arith.constant 0 : i32
    %c0_i32_0 = arith.constant 0 : i32
    return %c0_i32, %arg1 : i32, i32
  }
  func.func @transform_5(%arg0: i32, %arg1: i32) -> (i32, i32) {
    %c0_i32 = arith.constant 0 : i32
    %c0_i32_0 = arith.constant 0 : i32
    return %c0_i32, %arg1 : i32, i32
  }
  func.func @transform_6(%arg0: i32, %arg1: i32) -> (i32, i32) {
    %c0_i32 = arith.constant 0 : i32
    %c0_i32_0 = arith.constant 0 : i32
    return %c0_i32, %arg1 : i32, i32
  }
  func.func @transform_7(%arg0: i32, %arg1: i32) -> (i32, i32) {
    %c0_i32 = arith.constant 0 : i32
    return %arg0, %arg1 : i32, i32
  }
}

module attributes {stable_mosaic.version = 11 : i64} {
  func.func @_matmul_bias_res_kernel(%arg0: i32, %arg1: i32, %arg2: memref<64x128xf32, #tpu.memory_space<vmem>>, %arg3: memref<128x64xf32, #tpu.memory_space<vmem>>, %arg4: memref<1x64xf32, #tpu.memory_space<vmem>>, %arg5: memref<64x64xf32, #tpu.memory_space<vmem>>, %arg6: memref<64x64xf32, #tpu.memory_space<vmem>>) attributes {dimension_semantics = [#tpu.dimension_semantics<parallel>, #tpu.dimension_semantics<parallel>], iteration_bounds = array<i64: 2, 1>, scalar_prefetch = 0 : i64, scratch_operands = 0 : i64, tpu.core_type = #tpu.core_type<tc>, window_params = [{transform_indices = @transform_0, window_bounds = array<i64: 64, 128>}, {transform_indices = @transform_1, window_bounds = array<i64: 128, 64>}, {transform_indices = @transform_2, window_bounds = array<i64: 1, 64>}, {transform_indices = @transform_3, window_bounds = array<i64: 64, 64>}, {transform_indices = @transform_4, window_bounds = array<i64: 64, 64>}]} {
    %c0 = arith.constant 0 : index
    %c0_0 = arith.constant 0 : index
    %0 = vector.load %arg2[%c0, %c0_0] : memref<64x128xf32, #tpu.memory_space<vmem>>, vector<64x128xf32>
    %c0_1 = arith.constant 0 : index
    %c0_2 = arith.constant 0 : index
    %1 = vector.load %arg3[%c0_1, %c0_2] : memref<128x64xf32, #tpu.memory_space<vmem>>, vector<128x64xf32>
    %cst = arith.constant dense<0.000000e+00> : vector<64x64xf32>
    %2 = tpu.matmul %0, %1, %cst {dimension_numbers = #tpu.dot_dimension_numbers<[1], [0], [0], [1], [0, 0, 1, 1], [], []>} : vector<64x128xf32>, vector<128x64xf32>, vector<64x64xf32> -> vector<64x64xf32>
    %c0_3 = arith.constant 0 : index
    %c0_4 = arith.constant 0 : index
    %3 = vector.load %arg4[%c0_3, %c0_4] : memref<1x64xf32, #tpu.memory_space<vmem>>, vector<1x64xf32>
    %4 = vector.broadcast %3 : vector<1x64xf32> to vector<64x64xf32>
    %5 = arith.addf %2, %4 : vector<64x64xf32>
    %c0_5 = arith.constant 0 : index
    %c0_6 = arith.constant 0 : index
    %6 = vector.load %arg5[%c0_5, %c0_6] : memref<64x64xf32, #tpu.memory_space<vmem>>, vector<64x64xf32>
    %7 = arith.addf %5, %6 : vector<64x64xf32>
    %c0_7 = arith.constant 0 : index
    %c0_8 = arith.constant 0 : index
    %8 = vector.load %arg6[%c0_7, %c0_8] : memref<64x64xf32, #tpu.memory_space<vmem>>, vector<64x64xf32>
    tpu.vector_store %arg6[%c0_7, %c0_8], %7 {strides = array<i32>} : memref<64x64xf32, #tpu.memory_space<vmem>>, vector<64x64xf32>,
    return
  }
  func.func @transform_0(%arg0: i32, %arg1: i32) -> (i32, i32) {
    %c0_i32 = arith.constant 0 : i32
    %c0_i32_0 = arith.constant 0 : i32
    return %arg0, %c0_i32 : i32, i32
  }
  func.func @transform_1(%arg0: i32, %arg1: i32) -> (i32, i32) {
    %c0_i32 = arith.constant 0 : i32
    %c0_i32_0 = arith.constant 0 : i32
    return %c0_i32, %arg1 : i32, i32
  }
  func.func @transform_2(%arg0: i32, %arg1: i32) -> (i32, i32) {
    %c0_i32 = arith.constant 0 : i32
    %c0_i32_0 = arith.constant 0 : i32
    return %c0_i32, %arg1 : i32, i32
  }
  func.func @transform_3(%arg0: i32, %arg1: i32) -> (i32, i32) {
    %c0_i32 = arith.constant 0 : i32
    return %arg0, %arg1 : i32, i32
  }
  func.func @transform_4(%arg0: i32, %arg1: i32) -> (i32, i32) {
    %c0_i32 = arith.constant 0 : i32
    return %arg0, %arg1 : i32, i32
  }
}

</mosaic_0001>

<bundles_post_ra>
// kernel: spatial_transformer_forward.12
= control target key start
LH: loop header
LB: loop body
LE: loop exit
PB: predicated region body
PF: predicated region fallthrough
CT: control target
= control target key end

     0   :  { %s1002_s15 = smov 0   ;;  %s1004_s16 = smov 0   ;;  %s1275_s0 = inlined_call_operand.vmem [shape: f32[128,128], index: 0, kind: input, shape index: {}]   ;;  %s1276_s1 = inlined_call_operand.vmem [shape: f32[1,128], index: 1, kind: input, shape index: {}]   ;;  %s1277_s2 = inlined_call_operand.vmem [shape: f32[1,128], index: 2, kind: input, shape index: {}]   ;;  %s1278_s3 = inlined_call_operand.vmem [shape: f32[128,384], index: 3, kind: input, shape index: {}]   ;;  %s1279_s4 = inlined_call_operand.vmem [shape: f32[128,384], index: 4, kind: output, shape index: {}]  }
   0x1   :  { %s1006_s17 = smov 0  }
   0x2 LB: > { %s26_s18 = sadd.s32 1, %s970_s16  ;;  %p769_p0 = scmp.ge.s32.totalorder %s974_s17, 1  ;;  %s974_s17 = sphi %s1006_s17, %s14_s17   ;;  %s970_s16 = sphi %s1004_s16, %s1281_s16   ;;  %s966_s15 = sphi %s1002_s15, %s1280_s15  }
   0x3   : > { %p28_p1 = scmp.ge.s32.totalorder %s26_s18, 2  ;;  %p188_p2 = scmp.lt.s32.totalorder %s974_s17, 3 }
   0x5   : > { %s1283_s18 = smov (%p28_p1, %s26_s18), 0  ;;  %p189_p3 = pnand %p769_p0, %p188_p2 }
   0x6   : > { %s770_s19 = sshll.u32 (!%p189_p3), %s966_s15, 3  ;;  %v376_v8 = vld [vmem:[%s1278_s3 + $0x8] sm:$0xff] (!%p189_p3)  ;;  %v379_v9 = vld [vmem:[%s1278_s3 + $0x20] sm:$0xff] (!%p189_p3)  ;;  %v378_v12 = vld [vmem:[%s1278_s3 + $0x18] sm:$0xff] (!%p189_p3) }
   0x7   : > { %192 = sbr.rel (%p189_p3) target bundleno = 571 (0x23b), region = 36  ;;  %p225_p4 = scmp.lt.s32.totalorder (!%p189_p3), %s770_s19, 15  ;;  %v375_v10 = vld [vmem:[%s1278_s3] sm:$0xff] (!%p189_p3)  ;;  %v846_v11 = vpack.c.bf16 (!%p189_p3), %v379_v9, %v376_v8  ;;  %v382_v13 = vld [vmem:[%s1278_s3 + $0x38] sm:$0xff] (!%p189_p3)  ;;  %v385_v14 = vld [vmem:[%s1278_s3 + $0x50] sm:$0xff] (!%p189_p3) }
   0x8   : > { %v848_v15 = vpack.c.bf16 (!%p189_p3), %v378_v12, %v375_v10  ;;  %v850_v16 = vpack.c.bf16 (!%p189_p3), %v385_v14, %v382_v13  ;;  %v377_v17 = vld [vmem:[%s1278_s3 + $0x10] sm:$0xff] (!%p189_p3)  ;;  %v380_v18 = vld [vmem:[%s1278_s3 + $0x28] sm:$0xff] (!%p189_p3)  ;;  %v391_v23 = vld [vmem:[%s1278_s3 + $0x80] sm:$0xff] (!%p189_p3) }
   0x9   : > { %v381_v19 = vld [vmem:[%s1278_s3 + $0x30] sm:$0xff] (!%p189_p3)  ;;  %847 = vmatprep.subr.bf16.mxu0 (!%p189_p3), %v846_v11  ;;  %v878_v20 = vpack.c.bf16 (!%p189_p3), %v380_v18, %v377_v17  ;;  %v384_v21 = vld [vmem:[%s1278_s3 + $0x48] sm:$0xff] (!%p189_p3)  ;;  %v383_v25 = vld [vmem:[%s1278_s3 + $0x40] sm:$0xff] (!%p189_p3) }
   0xa   : > { %v388_v22 = vld [vmem:[%s1278_s3 + $0x68] sm:$0xff] (!%p189_p3)  ;;  %849 = vmatpush1.bf16.msra.mxu0 (!%p189_p3), %v848_v15  ;;  %v852_v24 = vpack.c.bf16 (!%p189_p3), %v384_v21, %v381_v19  ;;  %v386_v26 = vld [vmem:[%s1278_s3 + $0x58] sm:$0xff] (!%p189_p3)  ;;  %v387_v29 = vld [vmem:[%s1278_s3 + $0x60] sm:$0xff] (!%p189_p3) }
   0xb   : > { %851 = vmatprep.subr.bf16.mxu0 (!%p189_p3), %v850_v16  ;;  %879 = vmatprep.subr.bf16.mxu1 (!%p189_p3), %v878_v20  ;;  %v854_v27 = vpack.c.bf16 (!%p189_p3), %v391_v23, %v388_v22  ;;  %v882_v28 = vpack.c.bf16 (!%p189_p3), %v386_v26, %v383_v25  ;;  %v390_v30 = vld [vmem:[%s1278_s3 + $0x78] sm:$0xff] (!%p189_p3)  ;;  %v400_v9 = vld [vmem:[%s1278_s3 + $0xc8] sm:$0xff] (!%p189_p3)  ;;  %v403_v10 = vld [vmem:[%s1278_s3 + $0xe0] sm:$0xff] (!%p189_p3) }
   0xc   : > { %881 = vmatpush3.bf16.msra.mxu1 (!%p189_p3), %v878_v20  ;;  %v856_v31 = vpack.c.bf16 (!%p189_p3), %v390_v30, %v387_v29  ;;  %v395_v11 = vld [vmem:[%s1278_s3 + $0xa0] sm:$0xff] (!%p189_p3)  ;;  %v862_v12 = vpack.c.bf16 (!%p189_p3), %v403_v10, %v400_v9  ;;  %v398_v13 = vld [vmem:[%s1278_s3 + $0xb8] sm:$0xff] (!%p189_p3)  ;;  %v409_v19 = vld [vmem:[%s1278_s3 + $0x110] sm:$0xff] (!%p189_p3) }
   0xd   : > { %883 = vmatprep.subr.bf16.mxu1 (!%p189_p3), %v882_v28  ;;  %v399_v14 = vld [vmem:[%s1278_s3 + $0xc0] sm:$0xff] (!%p189_p3)  ;;  %v402_v15 = vld [vmem:[%s1278_s3 + $0xd8] sm:$0xff] (!%p189_p3)  ;;  %v890_v16 = vpack.c.bf16 (!%p189_p3), %v398_v13, %v395_v11  ;;  %v401_v20 = vld [vmem:[%s1278_s3 + $0xd0] sm:$0xff] (!%p189_p3) }
   0xe   : > { %s1285_s19 = smov (!%p225_p4, %s770_s19), 15  ;;  %853 = vmatpush1.bf16.msra.mxu0 %v852_v24  ;;  %v864_v17 = vpack.c.bf16 %v402_v15, %v399_v14  ;;  %v406_v18 = vld [vmem:[%s1278_s3 + $0xf8] sm:$0xff]  ;;  %v404_v22 = vld [vmem:[%s1278_s3 + $0xe8] sm:$0xff]  ;;  %v405_v23 = vld [vmem:[%s1278_s3 + $0xf0] sm:$0xff] }
   0xf   : > { %s771_s20 = sshll.u32 %s1285_s19, 3  ;;  %855 = vmatprep.subr.bf16.mxu0 %v854_v27  ;;  %v866_v21 = vpack.c.bf16 %v409_v19, %v406_v18  ;;  %v408_v24 = vld [vmem:[%s1278_s3 + $0x108] sm:$0xff]  ;;  %v894_v25 = vpack.c.bf16 %v404_v22, %v401_v20  ;;  %v407_v29 = vld [vmem:[%s1278_s3 + $0x100] sm:$0xff]  ;;  %s910_s10 = smul.u32 24, %s1285_s19 }
  0x10   : > { %s228_s23 = scalar_lea.vmem %s1275_s0, %s771_s20  ;;  %885 = vmatpush3.bf16.msra.mxu1 %v882_v28  ;;  %v868_v26 = vpack.c.bf16 %v408_v24, %v405_v23  ;;  %v412_v27 = vld [vmem:[%s1278_s3 + $0x128] sm:$0xff]  ;;  %v415_v28 = vld [vmem:[%s1278_s3 + $0x140] sm:$0xff] }
  0x11   : > { %v248_v0 = vld [vmem:[%s228_s23] sm:$0xff]  ;;  %v250_v1 = vld [vmem:[%s228_s23 + $0x10] sm:$0xff]  ;;  %v249_v2 = vld [vmem:[%s228_s23 + $0x8] sm:$0xff]  ;;  %v870_v30 = vpack.c.bf16 %v415_v28, %v412_v27  ;;  %s1240_s13 = scalar_lea.vmem %s1279_s4, %s910_s10 }
  0x12   : > { %256 = vadd.xlane.f32.xlu0 %v248_v0  ;;  %260 = vadd.xlane.f32.xlu1 %v250_v1  ;;  %v251_v3 = vld [vmem:[%s228_s23 + $0x18] sm:$0xff]  ;;  %v252_v4 = vld [vmem:[%s228_s23 + $0x20] sm:$0xff]  ;;  %v1026_v5 = vld [vmem:[%s228_s23 + $0x28] sm:$0xff] }
  0x13   : > { %v1029_v6 = vld [vmem:[%s228_s23 + $0x30] sm:$0xff]  ;;  %v1031_v7 = vld [vmem:[%s228_s23 + $0x38] sm:$0xff]  ;;  %857 = vmatpush1.bf16.msra.mxu0 %v856_v31  ;;  %v774_v15 = vld [vmem:[%s1276_s1] ss:$0 sm:$0xff] }
  0x14   : > { %v410_v31 = vld [vmem:[%s1278_s3 + $0x118] sm:$0xff]  ;;  %v775_v19 = vld [vmem:[%s1277_s2] ss:$0 sm:$0xff] }
  0x16   : > { %258 = vadd.xlane.f32.xlu0 %v249_v2  ;;  %262 = vadd.xlane.f32.xlu1 %v251_v3 }
  0x1a   : > { %264 = vadd.xlane.f32.xlu0 %v252_v4  ;;  %266 = vadd.xlane.f32.xlu1 %v1026_v5 }
  0x1e   : > { %268 = vadd.xlane.f32.xlu0 %v1029_v6  ;;  %270 = vadd.xlane.f32.xlu1 %v1031_v7 }
  0x9f   : > { %v257_v32 = vpop.xlane.xlu0 %256  ;;  %v261_v33 = vpop.xlane.xlu1 %260 }
  0xa0   : > { %v273_v34 = vmul.f32 0.0078125, %v257_v32  ;;  %v275_v35 = vmul.f32 0.0078125, %v261_v33  ;;  %v411_v32 = vld [vmem:[%s1278_s3 + $0x120] sm:$0xff]  ;;  %v414_v33 = vld [vmem:[%s1278_s3 + $0x138] sm:$0xff] }
  0xa2   : > { %v1083_v36 = vsub.f32 %v248_v0, %v273_v34  ;;  %v1085_v37 = vsub.f32 %v250_v1, %v275_v35  ;;  %v394_v0 = vld [vmem:[%s1278_s3 + $0x98] sm:$0xff]  ;;  %v397_v1 = vld [vmem:[%s1278_s3 + $0xb0] sm:$0xff]  ;;  %v898_v34 = vpack.c.bf16 %v410_v31, %v407_v29  ;;  %v872_v35 = vpack.c.bf16 %v414_v33, %v411_v32 }
  0xa3   : > { %v259_v38 = vpop.xlane.xlu0 %258  ;;  %v263_v39 = vpop.xlane.xlu1 %262 }
  0xa4   : > { %v274_v40 = vmul.f32 0.0078125, %v259_v38  ;;  %v289_v41 = vmul.f32 %v1083_v36, %v1083_v36  ;;  %v276_v42 = vmul.f32 0.0078125, %v263_v39  ;;  %v291_v45 = vmul.f32 %v1085_v37, %v1085_v37  ;;  %v418_v38 = vld [vmem:[%s1278_s3 + $0x158] sm:$0xff]  ;;  %v421_v39 = vld [vmem:[%s1278_s3 + $0x170] sm:$0xff] }
  0xa6   : > { %v1089_v43 = vsub.f32 %v249_v2, %v274_v40  ;;  %297 = vadd.xlane.f32.xlu0 %v289_v41  ;;  %v1091_v44 = vsub.f32 %v251_v3, %v276_v42  ;;  %v389_v2 = vld [vmem:[%s1278_s3 + $0x70] sm:$0xff]  ;;  %v858_v3 = vpack.c.bf16 %v397_v1, %v394_v0  ;;  %v874_v41 = vpack.c.bf16 %v421_v39, %v418_v38  ;;  %v416_v42 = vld [vmem:[%s1278_s3 + $0x148] sm:$0xff] }
  0xa7   : > { %v265_v46 = vpop.xlane.xlu0 %264  ;;  %v267_v47 = vpop.xlane.xlu1 %266  ;;  %v413_v40 = vld [vmem:[%s1278_s3 + $0x130] sm:$0xff] }
  0xa8   : > { %v277_v48 = vmul.f32 0.0078125, %v265_v46  ;;  %v290_v49 = vmul.f32 %v1089_v43, %v1089_v43  ;;  %v278_v50 = vmul.f32 0.0078125, %v267_v47  ;;  %v292_v53 = vmul.f32 %v1091_v44, %v1091_v44  ;;  %859 = vmatprep.subr.bf16.mxu0 %v858_v3  ;;  %v420_v46 = vld [vmem:[%s1278_s3 + $0x168] sm:$0xff] }
  0xa9   : > { %v902_v47 = vpack.c.bf16 %v416_v42, %v413_v40 }
  0xaa   : > { %v1097_v51 = vsub.f32 %v252_v4, %v277_v48  ;;  %301 = vadd.xlane.f32.xlu0 %v291_v45  ;;  %299 = vadd.xlane.f32.xlu1 %v290_v49  ;;  %v1100_v52 = vsub.f32 %v1026_v5, %v278_v50  ;;  %v392_v4 = vld [vmem:[%s1278_s3 + $0x88] sm:$0xff]  ;;  %v393_v5 = vld [vmem:[%s1278_s3 + $0x90] sm:$0xff]  ;;  %v419_v49 = vld [vmem:[%s1278_s3 + $0x160] sm:$0xff] }
  0xab   : > { %v269_v54 = vpop.xlane.xlu0 %268  ;;  %v271_v55 = vpop.xlane.xlu1 %270  ;;  %v417_v45 = vld [vmem:[%s1278_s3 + $0x150] sm:$0xff]  ;;  %v422_v50 = vld [vmem:[%s1278_s3 + $0x178] sm:$0xff] }
  0xac   : > { %v279_v56 = vmul.f32 0.0078125, %v269_v54  ;;  %v293_v57 = vmul.f32 %v1097_v51, %v1097_v51  ;;  %v280_v58 = vmul.f32 0.0078125, %v271_v55  ;;  %v294_v61 = vmul.f32 %v1100_v52, %v1100_v52 }
  0xad   : > { %v876_v48 = vpack.c.bf16 %v420_v46, %v417_v45  ;;  %v976_v54 = vmov 0.0  }
  0xae   : > { %v1107_v59 = vsub.f32 %v1029_v6, %v279_v56  ;;  %303 = vadd.xlane.f32.xlu1 %v292_v53  ;;  %305 = vadd.xlane.f32.xlu0 %v293_v57  ;;  %v1110_v60 = vsub.f32 %v1031_v7, %v280_v58  ;;  %v396_v6 = vld [vmem:[%s1278_s3 + $0xa8] sm:$0xff]  ;;  %v886_v7 = vpack.c.bf16 %v392_v4, %v389_v2 }
  0xaf   : > { %v860_v8 = vpack.c.bf16 %v396_v6, %v393_v5  ;;  %v906_v53 = vpack.c.bf16 %v422_v50, %v419_v49  ;;  %487 = vmatprep.mubr.f32.mxu0 %v976_v54 }
  0xb0   : > { %v295_v62 = vmul.f32 %v1107_v59, %v1107_v59  ;;  %v296_v63 = vmul.f32 %v1110_v60, %v1110_v60  ;;  %887 = vmatprep.subr.bf16.mxu1 %v886_v7 }
  0xb1   : > { %861 = vmatpush1.bf16.msra.mxu0 %v860_v8  ;;  %889 = vmatpush3.bf16.msra.mxu1 %v886_v7 }
  0xb2   : > { %307 = vadd.xlane.f32.xlu1 %v294_v61  ;;  %309 = vadd.xlane.f32.xlu0 %v295_v62 }
  0xb3   : > { %863 = vmatprep.subr.bf16.mxu0 %v862_v12  ;;  %891 = vmatprep.subr.bf16.mxu1 %v890_v16 }
  0xb5   : > { %865 = vmatpush1.bf16.msra.mxu0 %v864_v17  ;;  %893 = vmatpush3.bf16.msra.mxu1 %v890_v16 }
  0xb6   : > { %311 = vadd.xlane.f32.xlu1 %v296_v63  ;;  %867 = vmatprep.subr.bf16.mxu0 %v866_v21 }
  0xb7   : > { %895 = vmatprep.subr.bf16.mxu1 %v894_v25 }
  0xb9   : > { %869 = vmatpush1.bf16.msra.mxu0 %v868_v26  ;;  %897 = vmatpush3.bf16.msra.mxu1 %v894_v25 }
  0xba   : > { %871 = vmatprep.subr.bf16.mxu0 %v870_v30  ;;  %899 = vmatprep.subr.bf16.mxu1 %v898_v34 }
  0xbd   : > { %873 = vmatpush1.bf16.msra.mxu0 %v872_v35  ;;  %901 = vmatpush3.bf16.msra.mxu1 %v898_v34 }
  0xbe   : > { %875 = vmatprep.subr.bf16.mxu0 %v874_v41  ;;  %903 = vmatprep.subr.bf16.mxu1 %v902_v47 }
  0xc1   : > { %877 = vmatpush1.bf16.msra.mxu0 %v876_v48  ;;  %905 = vmatpush3.bf16.msra.mxu1 %v902_v47 }
  0xc2   : > { %907 = vmatprep.subr.bf16.mxu1 %v906_v53 }
  0xc5   : > { %909 = vmatpush3.bf16.msra.mxu1 %v906_v53 }
 0x133   : > { %v298_v55 = vpop.xlane.xlu0 %297 }
 0x134   : > { %v313_v56 = vmul.f32 0.0078125, %v298_v55 }
 0x136   : > { %v321_v57 = vadd.f32 1e-05, %v313_v56 }
 0x137   : > { %v300_v58 = vpop.xlane.xlu1 %299  ;;  %v302_v61 = vpop.xlane.xlu0 %301 }
 0x138   : > { %936 = vrsqrt.f32 %v321_v57  ;;  %v314_v62 = vmul.f32 0.0078125, %v300_v58  ;;  %v315_v63 = vmul.f32 0.0078125, %v302_v61 }
 0x13a   : > { %v322_v0 = vadd.f32 1e-05, %v314_v62  ;;  %v323_v1 = vadd.f32 1e-05, %v315_v63 }
 0x13b   : > { %v304_v2 = vpop.xlane.xlu1 %303  ;;  %v306_v3 = vpop.xlane.xlu0 %305 }
 0x13c   : > { %938 = vrsqrt.f32 %v322_v0  ;;  %v316_v4 = vmul.f32 0.0078125, %v304_v2  ;;  %v317_v5 = vmul.f32 0.0078125, %v306_v3 }
 0x13d   : > { %940 = vrsqrt.f32 %v323_v1 }
 0x13e   : > { %v324_v6 = vadd.f32 1e-05, %v316_v4  ;;  %v325_v7 = vadd.f32 1e-05, %v317_v5 }
 0x13f   : > { %v308_v8 = vpop.xlane.xlu1 %307  ;;  %v310_v9 = vpop.xlane.xlu0 %309 }
 0x140   : > { %942 = vrsqrt.f32 %v324_v6  ;;  %v318_v10 = vmul.f32 0.0078125, %v308_v8  ;;  %v319_v11 = vmul.f32 0.0078125, %v310_v9 }
 0x141   : > { %944 = vrsqrt.f32 %v325_v7 }
 0x142   : > { %v937_v12 = vpop.eup %936  ;;  %v326_v13 = vadd.f32 1e-05, %v318_v10  ;;  %v327_v14 = vadd.f32 1e-05, %v319_v11 }
 0x143   : > { %v312_v16 = vpop.xlane.xlu1 %311  ;;  %v337_v17 = vmul.f32 %v937_v12, %v1083_v36 }
 0x144   : > { %946 = vrsqrt.f32 %v326_v13  ;;  %v320_v18 = vmul.f32 0.0078125, %v312_v16 }
 0x145   : > { %948 = vrsqrt.f32 %v327_v14  ;;  %v352_v20 = vmul.f32 %v774_v15, %v337_v17 }
 0x146   : > { %v939_v21 = vpop.eup %938  ;;  %v328_v22 = vadd.f32 1e-05, %v320_v18 }
 0x147   : > { %v941_v23 = vpop.eup %940  ;;  %v367_v24 = vadd.f32 %v775_v19, %v352_v20  ;;  %v338_v25 = vmul.f32 %v939_v21, %v1089_v43 }
 0x148   : > { %950 = vrsqrt.f32 %v328_v22  ;;  %v339_v26 = vmul.f32 %v941_v23, %v1085_v37 }
 0x149   : > { %488 = vmatmul.mubr.f32.vlgmr.msra.gmra.mrb[0].mxu0 %v367_v24  ;;  %834 = vmatprep.mubr.f32.mxu1 %v367_v24  ;;  %v353_v36 = vmul.f32 %v774_v15, %v338_v25 }
 0x14a   : > { %v943_v27 = vpop.eup %942  ;;  %493 = vmatprep.mubr.f32.mxu0 %v976_v54  ;;  %v354_v28 = vmul.f32 %v774_v15, %v339_v26 }
 0x14b   : > { %v945_v29 = vpop.eup %944  ;;  %v368_v30 = vadd.f32 %v775_v19, %v353_v36  ;;  %v340_v31 = vmul.f32 %v943_v27, %v1091_v44 }
 0x14c   : > { %v369_v32 = vadd.f32 %v775_v19, %v354_v28  ;;  %v341_v33 = vmul.f32 %v945_v29, %v1097_v51 }
 0x14d   : > { %494 = vmatmul.mubr.f32.gmra.mrb[2].mxu0 %v368_v30  ;;  %835 = vmatmul.mubr.f32.vlgmr.msra.gmra.mrb[0].mxu1 %v368_v30  ;;  %v355_v43 = vmul.f32 %v774_v15, %v340_v31 }
 0x14e   : > { %v947_v34 = vpop.eup %946  ;;  %837 = vmatprep.mubr.f32.mxu1 %v369_v32  ;;  %499 = vmatprep.mubr.f32.mxu0 %v976_v54  ;;  %v356_v37 = vmul.f32 %v774_v15, %v341_v33 }
 0x14f   : > { %v949_v35 = vpop.eup %948  ;;  %v370_v38 = vadd.f32 %v775_v19, %v355_v43  ;;  %v342_v39 = vmul.f32 %v947_v34, %v1100_v52 }
 0x150   : > { %v371_v40 = vadd.f32 %v775_v19, %v356_v37  ;;  %v343_v41 = vmul.f32 %v949_v35, %v1107_v59 }
 0x151   : > { %500 = vmatmul.mubr.f32.gmra.mrb[4].mxu0 %v369_v32  ;;  %838 = vmatmul.mubr.f32.gmra.mrb[2].mxu1 %v370_v38  ;;  %v357_v44 = vmul.f32 %v774_v15, %v342_v39 }
 0x152   : > { %v951_v42 = vpop.eup %950  ;;  %840 = vmatprep.mubr.f32.mxu1 %v371_v40  ;;  %505 = vmatprep.mubr.f32.mxu0 %v976_v54  ;;  %v358_v51 = vmul.f32 %v774_v15, %v343_v41 }
 0x153   : > { %v372_v45 = vadd.f32 %v775_v19, %v357_v44  ;;  %v344_v46 = vmul.f32 %v951_v42, %v1110_v60 }
 0x154   : > { %v373_v47 = vadd.f32 %v775_v19, %v358_v51 }
 0x155   : > { %506 = vmatmul.mubr.f32.gmra.mrb[6].mxu0 %v370_v38  ;;  %841 = vmatmul.mubr.f32.gmra.mrb[4].mxu1 %v372_v45  ;;  %v359_v48 = vmul.f32 %v774_v15, %v344_v46 }
 0x156   : > { %843 = vmatprep.mubr.f32.mxu1 %v373_v47  ;;  %511 = vmatprep.mubr.f32.mxu0 %v976_v54 }
 0x157   : > { %v374_v52 = vadd.f32 %v775_v19, %v359_v48 }
 0x159   : > { %512 = vmatmul.mubr.f32.gmra.mrb[8].mxu0 %v371_v40  ;;  %844 = vmatmul.mubr.f32.gmra.mrb[6].mxu1 %v374_v52 }
 0x15a   : > { %517 = vmatprep.mubr.f32.mxu0 %v976_v54 }
 0x15d   : > { %518 = vmatmul.mubr.f32.gmra.mrb[10].mxu0 %v372_v45 }
 0x15e   : > { %523 = vmatprep.mubr.f32.mxu0 %v976_v54 }
 0x161   : > { %524 = vmatmul.mubr.f32.gmra.mrb[12].mxu0 %v373_v47 }
 0x162   : > { %529 = vmatprep.mubr.f32.mxu0 %v976_v54 }
 0x165   : > { %530 = vmatmul.mubr.f32.gmra.mrb[14].mxu0 %v374_v52 }
 0x21c   : > { %v489_v59 = vpop.f32.mrb[0].mxu0 }
 0x21d   : > { %641 = vst [vmem:[%s1240_s13] sm:$0xff] %v489_v59  ;;  %v491_v60 = vpop.f32.mrb[1].mxu0 }
 0x21e   : > { %642 = vst [vmem:[%s1240_s13 + $0x8] sm:$0xff] %v491_v60 }
 0x220   : > { %v495_v49 = vpop.f32.mrb[2].mxu0  ;;  %v836_v50 = vpop.f32.mrb[0].mxu1 }
 0x221   : > { %644 = vst [vmem:[%s1240_s13 + $0x18] sm:$0xff] %v495_v49  ;;  %646 = vst [vmem:[%s1240_s13 + $0x28] sm:$0xff] %v836_v50  ;;  %v497_v53 = vpop.f32.mrb[3].mxu0  ;;  %v602_v54 = vpop.f32.mrb[1].mxu1 }
 0x222   : > { %645 = vst [vmem:[%s1240_s13 + $0x20] sm:$0xff] %v497_v53  ;;  %643 = vst [vmem:[%s1240_s13 + $0x10] sm:$0xff] %v602_v54 }
 0x224   : > { %v501_v55 = vpop.f32.mrb[4].mxu0  ;;  %v839_v56 = vpop.f32.mrb[2].mxu1 }
 0x225   : > { %647 = vst [vmem:[%s1240_s13 + $0x30] sm:$0xff] %v501_v55  ;;  %652 = vst [vmem:[%s1240_s13 + $0x58] sm:$0xff] %v839_v56  ;;  %v503_v57 = vpop.f32.mrb[5].mxu0  ;;  %v612_v58 = vpop.f32.mrb[3].mxu1 }
 0x226   : > { %648 = vst [vmem:[%s1240_s13 + $0x38] sm:$0xff] %v503_v57  ;;  %649 = vst [vmem:[%s1240_s13 + $0x40] sm:$0xff] %v612_v58 }
 0x228   : > { %v507_v61 = vpop.f32.mrb[6].mxu0  ;;  %v842_v62 = vpop.f32.mrb[4].mxu1 }
 0x229   : > { %650 = vst [vmem:[%s1240_s13 + $0x48] sm:$0xff] %v507_v61  ;;  %658 = vst [vmem:[%s1240_s13 + $0x88] sm:$0xff] %v842_v62  ;;  %v509_v63 = vpop.f32.mrb[7].mxu0  ;;  %v622_v0 = vpop.f32.mrb[5].mxu1 }
 0x22a   : > { %651 = vst [vmem:[%s1240_s13 + $0x50] sm:$0xff] %v509_v63  ;;  %655 = vst [vmem:[%s1240_s13 + $0x70] sm:$0xff] %v622_v0 }
 0x22c   : > { %v513_v1 = vpop.f32.mrb[8].mxu0  ;;  %v845_v2 = vpop.f32.mrb[6].mxu1 }
 0x22d   : > { %653 = vst [vmem:[%s1240_s13 + $0x60] sm:$0xff] %v513_v1  ;;  %664 = vst [vmem:[%s1240_s13 + $0xb8] sm:$0xff] %v845_v2  ;;  %v515_v3 = vpop.f32.mrb[9].mxu0  ;;  %v632_v4 = vpop.f32.mrb[7].mxu1 }
 0x22e   : > { %654 = vst [vmem:[%s1240_s13 + $0x68] sm:$0xff] %v515_v3  ;;  %661 = vst [vmem:[%s1240_s13 + $0xa0] sm:$0xff] %v632_v4 }
 0x230   : > { %v519_v5 = vpop.f32.mrb[10].mxu0 }
 0x231   : > { %656 = vst [vmem:[%s1240_s13 + $0x78] sm:$0xff] %v519_v5  ;;  %v521_v6 = vpop.f32.mrb[11].mxu0 }
 0x232   : > { %657 = vst [vmem:[%s1240_s13 + $0x80] sm:$0xff] %v521_v6 }
 0x234   : > { %v525_v7 = vpop.f32.mrb[12].mxu0 }
 0x235   : > { %659 = vst [vmem:[%s1240_s13 + $0x90] sm:$0xff] %v525_v7  ;;  %v527_v8 = vpop.f32.mrb[13].mxu0 }
 0x236   : > { %660 = vst [vmem:[%s1240_s13 + $0x98] sm:$0xff] %v527_v8 }
 0x238   : > { %v531_v9 = vpop.f32.mrb[14].mxu0 }
 0x239   : > { %662 = vst [vmem:[%s1240_s13 + $0xa8] sm:$0xff] %v531_v9  ;;  %v533_v10 = vpop.f32.mrb[15].mxu0 }
 0x23a   : > { %663 = vst [vmem:[%s1240_s13 + $0xb0] sm:$0xff] %v533_v10 }
 0x23b PF: > { %s14_s17 = sadd.s32 1, %s974_s17   ;;  %s1280_s15 = smov %s970_s16 }
 0x23c   : > { %p11_p5 = scmp.ge.s32.totalorder %s14_s17, 4   ;;  %s1281_s16 = smov %s1283_s18 }
 0x23e   :  { %13 = sbr.rel (!%p11_p5) target bundleno = 2 (0x2), region = 69 }

// kernel: spatial_transformer_forward.11
= control target key start
LH: loop header
LB: loop body
LE: loop exit
PB: predicated region body
PF: predicated region fallthrough
CT: control target
= control target key end

     0   :  { %11 = vsyncpa [#allocation3], 0  ;;  %s1032_s21 = smov 0   ;;  %s1221_s0 = inlined_call_operand.vmem [shape: f32[2,64,64], index: 0, kind: input, shape index: {}]   ;;  %s1222_s1 = inlined_call_operand.vmem [shape: f32[64,64], index: 1, kind: input, shape index: {}]   ;;  %s1223_s2 = inlined_call_operand.vmem [shape: f32[1,64], index: 2, kind: input, shape index: {}]   ;;  %s1224_s3 = inlined_call_operand.vmem [shape: f32[1,64], index: 3, kind: input, shape index: {}]   ;;  %s1225_s4 = inlined_call_operand.hbm [shape: f32[64,128], index: 4, kind: input, shape index: {}]   ;;  %s1226_s5 = inlined_call_operand.vmem [shape: f32[1,128], index: 5, kind: input, shape index: {}]   ;;  %s1227_s6 = inlined_call_operand.vmem [shape: f32[2,64,128], index: 6, kind: output, shape index: {}]  }
   0x1 LB: > { %s1038_s22 = sadd.s32 4294967295, %s989_s21   ;;  %p759_p0 = scmp.ge.s32.totalorder %s989_s21, 1  ;;  %s989_s21 = sphi %s1032_s21, %s17_s21  }
   0x2   : > { %p179_p1 = scmp.lt.s32.totalorder %s989_s21, 3  ;;  %s991_s23 = smov [#allocation2]  }
   0x3   : > { %s200_s24 = sshll.u32 %s991_s23, 4  ;;  %p1228_p3 = scmp.eq.s32.totalorder %s1038_s22, 0  ;;  %s201_s24 = int_to_ptr.vmem [resolvable:$true] %s200_s24 }
   0x4   : > { %p1042_p2 = pnand %p759_p0, %p179_p1  ;;  %s951_s29 = scalar_lea.hbm %s1225_s4, 1024 }
   0x5   : > { %p952_p6 = scmp.ne.s32.totalorder %s1225_s4, %s951_s29  ;;  %p958_p10 = scmp.lt.u32.totalorder %s951_s29, %s1225_s4 }
   0x6   : > { %s1230_s25 = scalar_select %p1042_p2, 1, 0 }
   0x7   : > { %p929_p4 = pneg %p1042_p2 }
   0x9   : > { %p1051_p5 = pnand %p1228_p3, %p929_p4 }
   0xb   : > { %p953_p7 = pneg %p1051_p5 }
   0xd   : > { %p954_p8 = pnand %p953_p7, %p952_p6 }
   0xf   : > { %p955_p9 = pneg %p954_p8 }
  0x11   : > { %p960_p11 = pnand %p958_p10, %p955_p9 }
  0x13   : > { %963 = shalt.err (!%p960_p11)
}
  0x14   : > { %s964_s10 = scalar_lea.vmem %s201_s24, 1024  ;;  %p972_p1 = scmp.lt.s32.totalorder %s201_s24, %s201_s24 }
  0x15   : > { %p965_p12 = scmp.ne.s32.totalorder %s201_s24, %s964_s10  ;;  %p973_p4 = scmp.lt.s32.totalorder %s964_s10, %s964_s10 }
  0x17   : > { %p967_p13 = pnand %p965_p12, %p953_p7  ;;  %p974_p3 = por %p973_p4, %p972_p1 }
  0x19   : > { %p968_p0 = pneg %p967_p13 }
  0x1b   : > { %p975_p2 = pnand %p974_p3, %p968_p0 }
  0x1d   : > { %978 = shalt.err (!%p975_p2)
}
  0x1e   : > { %s992_s11 = smov 128   ;;  %s993_s12 = smov 8  }
  0x1f   : > { %932 = dma.hbm_to_vmem [thread:$0]  (!%p1051_p5), %s1225_s4, 1024, %s201_s24, [#allocation3], %s992_s11, %s992_s11, %s993_s12  }
  0x20   : > { %p1232_p6 = scmp.ne.s32.totalorder %s1230_s25, 0 }
  0x21   : > { %p1233_p8 = scmp.eq.s32.totalorder (!%p1232_p6), %s1038_s22, 0 }
  0x22   : > { %227 = sbr.rel (%p1232_p6) target bundleno = 786 (0x312), region = 44 }
  0x29   : > { %984 = dma.done.wait (%p1233_p8), [#allocation3], 1024   ;;  %p1234_p7 = pmov %p1233_p8 }
  0x2a   : > { %p257_p2 = scmp.lt.s32.totalorder %s1038_s22, 1  ;;  %v994_v0 = vmov 0.0|0.0   ;;  %vm995_vm0 = vmmov 0   ;;  %v996_v1 = vmov 0.0   ;;  %v297_v2 = vld [vmem:[%s1222_s1] sm:$0xff]  ;;  %v298_v3 = vld [vmem:[%s1222_s1 + $0x8] sm:$0xff]  ;;  %v379_v43 = vlaneseq }
  0x2b   : > { %986 = vsyncadd (%p1234_p7), [#allocation3], 4294966272  ;;  %885 = vmatprep.subr.bf16.mxu1 %v994_v0  ;;  %835 = vmatprep.mubr.msk.f32.mxu1 %vm995_vm0, %v996_v1  ;;  %v299_v4 = vld [vmem:[%s1222_s1 + $0x10] sm:$0xff]  ;;  %vm275_vm1 = vcmask 523264   ;;  %v886_v5 = vpack.c.bf16 %v298_v3, %v297_v2  ;;  %v300_v6 = vld [vmem:[%s1222_s1 + $0x18] sm:$0xff] }
  0x2c   : > { %s1236_s22 = smov (!%p257_p2, %s1038_s22), 1  ;;  %v889_v8 = vpack.c.bf16 %v300_v6, %v299_v4  ;;  %v301_v13 = vld [vmem:[%s1222_s1 + $0x20] sm:$0xff]  ;;  %v302_v14 = vld [vmem:[%s1222_s1 + $0x28] sm:$0xff]  ;;  %v303_v23 = vld [vmem:[%s1222_s1 + $0x30] sm:$0xff]  ;;  %v1140_v44 = vshrl.u32 %v379_v43, 7 }
  0x2d   : > { %s783_s15 = sshll.u32 %s1236_s22, 6  ;;  %887 = vmatpush3.bf16.msra.mxu1 %v886_v5  ;;  %v892_v20 = vpack.c.bf16 %v302_v14, %v301_v13  ;;  %v304_v24 = vld [vmem:[%s1222_s1 + $0x38] sm:$0xff] }
  0x2e   : > { %s1089_s18 = scalar_lea.vmem %s1221_s0, %s783_s15  ;;  %888 = vmatprep.subr.bf16.mxu1 %v994_v0  ;;  %v895_v29 = vpack.c.bf16 %v304_v24, %v303_v23  ;;  %v381_v45 = vsub.s32 0, %v1140_v44  ;;  %v538_v23 = vld [vmem:[#allocation2] sm:$0xff]  ;;  %v539_v24 = vld [vmem:[#allocation2 + $0x8] sm:$0xff]  ;;  %s266_s24 = scalar_lea.vmem %s1227_s6, %s783_s15 }
  0x2f   : > { %v267_v7 = vld [vmem:[%s1089_s18] sm:$0xff]  ;;  %v268_v9 = vld [vmem:[%s1089_s18 + $0x8] sm:$0xff]  ;;  %v269_v10 = vld [vmem:[%s1089_s18 + $0x10] sm:$0xff] }
  0x30   : > { %v270_v11 = vld [vmem:[%s1089_s18 + $0x18] sm:$0xff]  ;;  %v276_v12 = vsel %vm275_vm1, %v267_v7, 0.0  ;;  %v277_v15 = vsel %vm275_vm1, %v268_v9, 0.0  ;;  %v279_v16 = vsel %vm275_vm1, %v269_v10, 0.0  ;;  %v271_v17 = vld [vmem:[%s1089_s18 + $0x20] sm:$0xff]  ;;  %v272_v21 = vld [vmem:[%s1089_s18 + $0x28] sm:$0xff] }
  0x31   : > { %v278_v18 = vadd.f32 %v277_v15, %v276_v12  ;;  %v281_v19 = vsel %vm275_vm1, %v270_v11, 0.0  ;;  %890 = vmatpush3.bf16.msra.mxu1 %v889_v8  ;;  %v283_v25 = vsel %vm275_vm1, %v271_v17, 0.0  ;;  %v273_v26 = vld [vmem:[%s1089_s18 + $0x30] sm:$0xff]  ;;  %v285_v28 = vsel %vm275_vm1, %v272_v21, 0.0  ;;  %v274_v30 = vld [vmem:[%s1089_s18 + $0x38] sm:$0xff] }
  0x32   : > { %891 = vmatprep.subr.bf16.mxu1 %v994_v0  ;;  %v287_v32 = vsel %vm275_vm1, %v273_v26, 0.0  ;;  %v289_v34 = vsel %vm275_vm1, %v274_v30, 0.0 }
  0x33   : > { %v280_v22 = vadd.f32 %v279_v16, %v278_v18 }
  0x35   : > { %v282_v27 = vadd.f32 %v281_v19, %v280_v22  ;;  %893 = vmatpush3.bf16.msra.mxu1 %v892_v20 }
  0x36   : > { %894 = vmatprep.subr.bf16.mxu1 %v994_v0 }
  0x37   : > { %v284_v31 = vadd.f32 %v283_v25, %v282_v27  ;;  %v909_v25 = vpack.c.bf16 %v539_v24, %v538_v23  ;;  %v541_v27 = vld [vmem:[#allocation2 + $0x18] sm:$0xff] }
  0x39   : > { %v286_v33 = vadd.f32 %v285_v28, %v284_v31  ;;  %896 = vmatpush3.bf16.msra.mxu1 %v895_v29  ;;  %910 = vmatprep.subr.bf16.mxu0 %v909_v25  ;;  %v544_v31 = vld [vmem:[#allocation2 + $0x30] sm:$0xff] }
  0x3a   : > { %897 = vmatprep.subr.bf16.mxu1 %v994_v0  ;;  %912 = vmatpush3.bf16.msra.mxu0 %v909_v25 }
  0x3b   : > { %v288_v35 = vadd.f32 %v287_v32, %v286_v33  ;;  %v545_v33 = vld [vmem:[#allocation2 + $0x38] sm:$0xff] }
  0x3d   : > { %v290_v36 = vadd.f32 %v289_v34, %v288_v35  ;;  %v921_v34 = vpack.c.bf16 %v545_v33, %v544_v31 }
  0x3f   : > { %v291_v37 = vrot.slane %v290_v36, 4 }
  0x41   : > { %v292_v38 = vadd.f32 %v291_v37, %v290_v36 }
  0x43   : > { %v293_v39 = vrot.slane %v292_v38, 2 }
  0x45   : > { %v294_v40 = vadd.f32 %v293_v39, %v292_v38 }
  0x47   : > { %v295_v41 = vrot.slane %v294_v40, 1 }
  0x49   : > { %v296_v42 = vadd.f32 %v295_v41, %v294_v40  ;;  %v770_v41 = vld [vmem:[%s1223_s2] ss:$0 sm:$0xff] }
  0x4b   : > { %836 = vmatmul.mubr.msk.f32.vlgmr.msra.gmra.mrb[0].mxu1 %vm275_vm1, %v296_v42 }
  0x4c   : > { %899 = vmatpush3.bf16.msra.mxu1 %v886_v5  ;;  %854 = vmatprep.mubr.msk.f32.mxu1 %vm995_vm0, %v996_v1 }
  0x4d   : > { %900 = vmatprep.subr.bf16.mxu1 %v994_v0 }
  0x50   : > { %902 = vmatpush3.bf16.msra.mxu1 %v889_v8 }
  0x51   : > { %903 = vmatprep.subr.bf16.mxu1 %v994_v0 }
  0x54   : > { %905 = vmatpush3.bf16.msra.mxu1 %v892_v20 }
  0x55   : > { %906 = vmatprep.subr.bf16.mxu1 %v994_v0 }
  0x58   : > { %908 = vmatpush3.bf16.msra.mxu1 %v895_v29  ;;  %v542_v29 = vld [vmem:[#allocation2 + $0x20] sm:$0xff] }
 0x11e   : > { %v374_v46 = vpop.f32.mrb[0].mxu1 }
 0x11f   : > { %v378_v47 = vmul.f32 0.0078125, %v374_v46  ;;  %v837_v48 = vpop.f32.mrb[1].mxu1 }
 0x121   : > { %v382_v49 = vrot.slane %v378_v47, %v381_v45  ;;  %v771_v47 = vld [vmem:[%s1224_s3] ss:$0 sm:$0xff] }
 0x123   : > { %v1145_v50 = vsub.f32 %v267_v7, %v382_v49  ;;  %v1147_v51 = vsub.f32 %v268_v9, %v382_v49  ;;  %v1149_v52 = vsub.f32 %v269_v10, %v382_v49  ;;  %v1151_v53 = vsub.f32 %v270_v11, %v382_v49 }
 0x124   : > { %v1153_v54 = vsub.f32 %v271_v17, %v382_v49  ;;  %v1161_v58 = vsub.f32 %v272_v21, %v382_v49  ;;  %v1167_v63 = vsub.f32 %v273_v26, %v382_v49  ;;  %v1172_v3 = vsub.f32 %v274_v30, %v382_v49  ;;  %v540_v26 = vld [vmem:[#allocation2 + $0x10] sm:$0xff]  ;;  %v543_v30 = vld [vmem:[#allocation2 + $0x28] sm:$0xff] }
 0x125   : > { %v391_v55 = vmul.f32 %v1145_v50, %v1145_v50  ;;  %v392_v56 = vmul.f32 %v1147_v51, %v1147_v51  ;;  %v393_v57 = vmul.f32 %v1149_v52, %v1149_v52  ;;  %v394_v59 = vmul.f32 %v1151_v53, %v1151_v53 }
 0x126   : > { %v395_v0 = vmul.f32 %v1153_v54, %v1153_v54  ;;  %v396_v4 = vmul.f32 %v1161_v58, %v1161_v58  ;;  %v397_v7 = vmul.f32 %v1167_v63, %v1167_v63  ;;  %v398_v10 = vmul.f32 %v1172_v3, %v1172_v3 }
 0x127   : > { %v399_v60 = vsel %vm275_vm1, %v391_v55, 0.0  ;;  %v400_v61 = vsel %vm275_vm1, %v392_v56, 0.0  ;;  %v402_v1 = vsel %vm275_vm1, %v393_v57, 0.0  ;;  %v404_v5 = vsel %vm275_vm1, %v394_v59, 0.0 }
 0x128   : > { %v401_v62 = vadd.f32 %v400_v61, %v399_v60  ;;  %v406_v8 = vsel %vm275_vm1, %v395_v0, 0.0  ;;  %v408_v11 = vsel %vm275_vm1, %v396_v4, 0.0  ;;  %v410_v13 = vsel %vm275_vm1, %v397_v7, 0.0 }
 0x129   : > { %v412_v15 = vsel %vm275_vm1, %v398_v10, 0.0  ;;  %v913_v28 = vpack.c.bf16 %v541_v27, %v540_v26  ;;  %v917_v32 = vpack.c.bf16 %v543_v30, %v542_v29 }
 0x12a   : > { %v403_v2 = vadd.f32 %v402_v1, %v401_v62 }
 0x12b   : > { %914 = vmatprep.subr.bf16.mxu0 %v913_v28 }
 0x12c   : > { %v405_v6 = vadd.f32 %v404_v5, %v403_v2  ;;  %916 = vmatpush3.bf16.msra.mxu0 %v913_v28 }
 0x12d   : > { %918 = vmatprep.subr.bf16.mxu0 %v917_v32 }
 0x12e   : > { %v407_v9 = vadd.f32 %v406_v8, %v405_v6 }
 0x130   : > { %v409_v12 = vadd.f32 %v408_v11, %v407_v9  ;;  %920 = vmatpush3.bf16.msra.mxu0 %v917_v32 }
 0x131   : > { %922 = vmatprep.subr.bf16.mxu0 %v921_v34 }
 0x132   : > { %v411_v14 = vadd.f32 %v410_v13, %v409_v12 }
 0x134   : > { %v413_v16 = vadd.f32 %v412_v15, %v411_v14  ;;  %924 = vmatpush3.bf16.msra.mxu0 %v921_v34 }
 0x136   : > { %v414_v17 = vrot.slane %v413_v16, 4 }
 0x138   : > { %v415_v18 = vadd.f32 %v414_v17, %v413_v16 }
 0x13a   : > { %v416_v19 = vrot.slane %v415_v18, 2 }
 0x13c   : > { %v417_v20 = vadd.f32 %v416_v19, %v415_v18 }
 0x13e   : > { %v418_v21 = vrot.slane %v417_v20, 1 }
 0x140   : > { %v419_v22 = vadd.f32 %v418_v21, %v417_v20 }
 0x142   : > { %855 = vmatmul.mubr.msk.f32.vlgmr.msra.gmra.mrb[2].mxu1 %vm275_vm1, %v419_v22 }
 0x215   : > { %v489_v35 = vpop.f32.mrb[2].mxu1 }
 0x216   : > { %v493_v36 = vmul.f32 0.0078125, %v489_v35  ;;  %v856_v37 = vpop.f32.mrb[3].mxu1 }
 0x218   : > { %v494_v38 = vadd.f32 1e-06, %v493_v36 }
 0x21a   : > { %949 = vrsqrt.f32 %v494_v38 }
 0x224   : > { %v950_v39 = vpop.eup %949 }
 0x225   : > { %v499_v40 = vrot.slane %v950_v39, %v381_v45 }
 0x227   : > { %v500_v42 = vmul.f32 %v499_v40, %v1145_v50  ;;  %v501_v43 = vmul.f32 %v499_v40, %v1147_v51  ;;  %v502_v46 = vmul.f32 %v499_v40, %v1149_v52  ;;  %v503_v48 = vmul.f32 %v499_v40, %v1151_v53 }
 0x228   : > { %v504_v45 = vmul.f32 %v499_v40, %v1153_v54  ;;  %v505_v50 = vmul.f32 %v499_v40, %v1161_v58  ;;  %v506_v60 = vmul.f32 %v499_v40, %v1167_v63  ;;  %v507_v54 = vmul.f32 %v499_v40, %v1172_v3  ;;  %v772_v3 = vld [vmem:[%s1226_s5] ss:$0 sm:$0xff] }
 0x229   : > { %v515_v49 = vmul.f32 %v770_v41, %v500_v42  ;;  %v516_v55 = vmul.f32 %v770_v41, %v501_v43  ;;  %v517_v44 = vmul.f32 %v770_v41, %v502_v46  ;;  %v518_v59 = vmul.f32 %v770_v41, %v503_v48 }
 0x22a   : > { %v519_v52 = vmul.f32 %v770_v41, %v504_v45  ;;  %v520_v61 = vmul.f32 %v770_v41, %v505_v50  ;;  %v521_v0 = vmul.f32 %v770_v41, %v506_v60  ;;  %v522_v1 = vmul.f32 %v770_v41, %v507_v54 }
 0x22b   : > { %v530_v56 = vadd.f32 %v771_v47, %v515_v49  ;;  %v531_v57 = vadd.f32 %v771_v47, %v516_v55  ;;  %v532_v51 = vadd.f32 %v771_v47, %v517_v44  ;;  %v533_v53 = vadd.f32 %v771_v47, %v518_v59 }
 0x22c   : > { %v534_v62 = vadd.f32 %v771_v47, %v519_v52  ;;  %v535_v58 = vadd.f32 %v771_v47, %v520_v61  ;;  %v536_v2 = vadd.f32 %v771_v47, %v521_v0  ;;  %v537_v63 = vadd.f32 %v771_v47, %v522_v1 }
 0x22d   : > { %873 = vmatprep.mubr.msk.f32.mxu0 %vm275_vm1, %v530_v56 }
 0x22e   : > { %874 = vmatmul.mubr.msk.f32.vlgmr.msra.gmra.mrb[0].mxu0 %vm275_vm1, %v531_v57 }
 0x22f   : > { %876 = vmatprep.mubr.msk.f32.mxu0 %vm275_vm1, %v532_v51 }
 0x232   : > { %877 = vmatmul.mubr.msk.f32.gmra.mrb[2].mxu0 %vm275_vm1, %v533_v53 }
 0x233   : > { %879 = vmatprep.mubr.msk.f32.mxu0 %vm275_vm1, %v534_v62 }
 0x236   : > { %880 = vmatmul.mubr.msk.f32.gmra.mrb[4].mxu0 %vm275_vm1, %v535_v58 }
 0x237   : > { %882 = vmatprep.mubr.msk.f32.mxu0 %vm275_vm1, %v536_v2 }
 0x23a   : > { %883 = vmatmul.mubr.msk.f32.gmra.mrb[6].mxu0 %vm275_vm1, %v537_v63 }
 0x301   : > { %v875_v4 = vpop.f32.mrb[0].mxu0 }
 0x302   : > { %v649_v5 = vadd.f32 %v875_v4, %v772_v3  ;;  %v643_v6 = vpop.f32.mrb[1].mxu0 }
 0x303   : > { %v644_v7 = vadd.f32 %v772_v3, %v643_v6 }
 0x304   : > { %683 = vst [vmem:[%s266_s24 + $0x8] sm:$0xff] %v649_v5 }
 0x305   : > { %682 = vst [vmem:[%s266_s24] sm:$0xff] %v644_v7  ;;  %v878_v8 = vpop.f32.mrb[2].mxu0 }
 0x306   : > { %v659_v9 = vadd.f32 %v878_v8, %v772_v3  ;;  %v653_v10 = vpop.f32.mrb[3].mxu0 }
 0x307   : > { %v654_v11 = vadd.f32 %v772_v3, %v653_v10 }
 0x308   : > { %685 = vst [vmem:[%s266_s24 + $0x18] sm:$0xff] %v659_v9 }
 0x309   : > { %684 = vst [vmem:[%s266_s24 + $0x10] sm:$0xff] %v654_v11  ;;  %v881_v12 = vpop.f32.mrb[4].mxu0 }
 0x30a   : > { %v669_v13 = vadd.f32 %v881_v12, %v772_v3  ;;  %v663_v14 = vpop.f32.mrb[5].mxu0 }
 0x30b   : > { %v664_v15 = vadd.f32 %v772_v3, %v663_v14 }
 0x30c   : > { %687 = vst [vmem:[%s266_s24 + $0x28] sm:$0xff] %v669_v13 }
 0x30d   : > { %686 = vst [vmem:[%s266_s24 + $0x20] sm:$0xff] %v664_v15  ;;  %v884_v16 = vpop.f32.mrb[6].mxu0 }
 0x30e   : > { %v679_v17 = vadd.f32 %v884_v16, %v772_v3  ;;  %v673_v18 = vpop.f32.mrb[7].mxu0 }
 0x30f   : > { %v674_v19 = vadd.f32 %v772_v3, %v673_v18 }
 0x310   : > { %689 = vst [vmem:[%s266_s24 + $0x38] sm:$0xff] %v679_v17 }
 0x311   : > { %688 = vst [vmem:[%s266_s24 + $0x30] sm:$0xff] %v674_v19 }
 0x312 PF: > { %s17_s21 = sadd.s32 1, %s989_s21  }
 0x313   : > { %p14_p3 = scmp.ge.s32.totalorder %s17_s21, 4  }
 0x315   :  { %16 = sbr.rel (!%p14_p3) target bundleno = 1 (0x1), region = 79 }
 0x31c   :  { %711 = vsyncpa [#allocation3], 1 }
 0x31d   :  { %713 = vsyncpa [#allocation3 + $0x1], 1 }

// kernel: spatial_transformer_forward.14
= control target key start
LH: loop header
LB: loop body
LE: loop exit
PB: predicated region body
PF: predicated region fallthrough
CT: control target
= control target key end

     0   :  { %s767_s15 = smov 0   ;;  %s769_s16 = smov 0   ;;  %s869_s0 = inlined_call_operand.vmem [shape: f32[128,128], index: 0, kind: input, shape index: {}]   ;;  %s870_s1 = inlined_call_operand.vmem [shape: f32[128,128], index: 1, kind: input, shape index: {}]   ;;  %s871_s2 = inlined_call_operand.vmem [shape: f32[1,128], index: 2, kind: input, shape index: {}]   ;;  %s872_s3 = inlined_call_operand.vmem [shape: f32[128,128], index: 3, kind: input, shape index: {}]   ;;  %s873_s4 = inlined_call_operand.vmem [shape: f32[128,128], index: 4, kind: output, shape index: {}]  }
   0x1   :  { %s771_s17 = smov 0  }
   0x2 LB: > { %s26_s18 = sadd.s32 1, %s736_s16  ;;  %p568_p0 = scmp.ge.s32.totalorder %s740_s17, 1  ;;  %s740_s17 = sphi %s771_s17, %s14_s17   ;;  %s736_s16 = sphi %s769_s16, %s875_s16   ;;  %s732_s15 = sphi %s767_s15, %s874_s15  }
   0x3   : > { %p28_p1 = scmp.ge.s32.totalorder %s26_s18, 2  ;;  %p210_p2 = scmp.lt.s32.totalorder %s740_s17, 3 }
   0x5   : > { %s877_s18 = smov (%p28_p1, %s26_s18), 0  ;;  %p211_p3 = pnand %p568_p0, %p210_p2 }
   0x6   : > { %v293_v0 = vld [vmem:[%s870_s1] sm:$0xff] (!%p211_p3)  ;;  %v294_v1 = vld [vmem:[%s870_s1 + $0x8] sm:$0xff] (!%p211_p3)  ;;  %v295_v2 = vld [vmem:[%s870_s1 + $0x10] sm:$0xff] (!%p211_p3)  ;;  %s569_s25 = sshll.u32 (!%p211_p3), %s732_s15, 3 }
   0x7   : > { %214 = sbr.rel (%p211_p3) target bundleno = 264 (0x108), region = 36  ;;  %v646_v3 = vpack.c.bf16 (!%p211_p3), %v294_v1, %v293_v0  ;;  %v296_v4 = vld [vmem:[%s870_s1 + $0x18] sm:$0xff] (!%p211_p3)  ;;  %p255_p4 = scmp.lt.s32.totalorder (!%p211_p3), %s569_s25, 15  ;;  %v297_v6 = vld [vmem:[%s870_s1 + $0x20] sm:$0xff] (!%p211_p3)  ;;  %v298_v7 = vld [vmem:[%s870_s1 + $0x28] sm:$0xff] (!%p211_p3) }
   0x8   : > { %v650_v5 = vpack.c.bf16 (!%p211_p3), %v296_v4, %v295_v2  ;;  %v654_v8 = vpack.c.bf16 (!%p211_p3), %v298_v7, %v297_v6  ;;  %v299_v9 = vld [vmem:[%s870_s1 + $0x30] sm:$0xff] (!%p211_p3)  ;;  %v300_v10 = vld [vmem:[%s870_s1 + $0x38] sm:$0xff] (!%p211_p3)  ;;  %v301_v14 = vld [vmem:[%s870_s1 + $0x40] sm:$0xff] (!%p211_p3) }
   0x9   : > { %647 = vmatprep.subr.bf16.mxu0 (!%p211_p3), %v646_v3  ;;  %678 = vmatprep.subr.bf16.mxu1 (!%p211_p3), %v646_v3  ;;  %v658_v13 = vpack.c.bf16 (!%p211_p3), %v300_v10, %v299_v9  ;;  %v302_v15 = vld [vmem:[%s870_s1 + $0x48] sm:$0xff] (!%p211_p3)  ;;  %v303_v17 = vld [vmem:[%s870_s1 + $0x50] sm:$0xff] (!%p211_p3)  ;;  %v304_v18 = vld [vmem:[%s870_s1 + $0x58] sm:$0xff] (!%p211_p3) }
   0xa   : > { %649 = vmatpush3.bf16.msra.mxu0 (!%p211_p3), %v646_v3  ;;  %686 = vmatpush3.bf16.msra.mxu1 (!%p211_p3), %v646_v3  ;;  %v662_v16 = vpack.c.bf16 (!%p211_p3), %v302_v15, %v301_v14  ;;  %v666_v19 = vpack.c.bf16 (!%p211_p3), %v304_v18, %v303_v17  ;;  %v305_v20 = vld [vmem:[%s870_s1 + $0x60] sm:$0xff] (!%p211_p3)  ;;  %v306_v21 = vld [vmem:[%s870_s1 + $0x68] sm:$0xff] (!%p211_p3)  ;;  %v307_v23 = vld [vmem:[%s870_s1 + $0x70] sm:$0xff] (!%p211_p3) }
   0xb   : > { %651 = vmatprep.subr.bf16.mxu0 (!%p211_p3), %v650_v5  ;;  %679 = vmatprep.subr.bf16.mxu1 (!%p211_p3), %v650_v5  ;;  %v670_v22 = vpack.c.bf16 (!%p211_p3), %v306_v21, %v305_v20  ;;  %v308_v24 = vld [vmem:[%s870_s1 + $0x78] sm:$0xff] (!%p211_p3)  ;;  %v575_v32 = vld [vmem:[%s871_s2] ss:$0 sm:$0xff] (!%p211_p3) }
   0xc   : > { %v674_v25 = vpack.c.bf16 (!%p211_p3), %v308_v24, %v307_v23 }
   0xe   : > { %s879_s25 = smov (!%p255_p4, %s569_s25), 15  ;;  %653 = vmatpush3.bf16.msra.mxu0 %v650_v5  ;;  %687 = vmatpush3.bf16.msra.mxu1 %v650_v5 }
   0xf   : > { %s803_s6 = sshll.u32 %s879_s25, 3  ;;  %655 = vmatprep.subr.bf16.mxu0 %v654_v8  ;;  %680 = vmatprep.subr.bf16.mxu1 %v654_v8 }
  0x10   : > { %s815_s13 = scalar_lea.vmem %s869_s0, %s803_s6  ;;  %s274_s10 = scalar_lea.vmem %s872_s3, %s803_s6 }
  0x11   : > { %v285_v11 = vld [vmem:[%s815_s13] sm:$0xff]  ;;  %v286_v26 = vld [vmem:[%s815_s13 + $0x8] sm:$0xff]  ;;  %v287_v28 = vld [vmem:[%s815_s13 + $0x10] sm:$0xff]  ;;  %s283_s15 = scalar_lea.vmem %s873_s4, %s803_s6 }
  0x12   : > { %v289_v12 = vld [vmem:[%s815_s13 + $0x20] sm:$0xff]  ;;  %634 = vmatprep.mubr.f32.mxu0 %v285_v11  ;;  %657 = vmatpush3.bf16.msra.mxu0 %v654_v8  ;;  %v290_v27 = vld [vmem:[%s815_s13 + $0x28] sm:$0xff]  ;;  %v291_v29 = vld [vmem:[%s815_s13 + $0x30] sm:$0xff] }
  0x13   : > { %640 = vmatprep.mubr.f32.mxu1 %v289_v12  ;;  %688 = vmatpush3.bf16.msra.mxu1 %v654_v8  ;;  %v288_v30 = vld [vmem:[%s815_s13 + $0x18] sm:$0xff]  ;;  %v422_v34 = vld [vmem:[%s274_s10 + $0x8] sm:$0xff]  ;;  %v421_v40 = vld [vmem:[%s274_s10] sm:$0xff] }
  0x14   : > { %659 = vmatprep.subr.bf16.mxu0 %v658_v13  ;;  %681 = vmatprep.subr.bf16.mxu1 %v658_v13  ;;  %v292_v31 = vld [vmem:[%s815_s13 + $0x38] sm:$0xff]  ;;  %v426_v36 = vld [vmem:[%s274_s10 + $0x28] sm:$0xff]  ;;  %v425_v42 = vld [vmem:[%s274_s10 + $0x20] sm:$0xff] }
  0x15   : > { %v424_v50 = vld [vmem:[%s274_s10 + $0x18] sm:$0xff]  ;;  %v423_v56 = vld [vmem:[%s274_s10 + $0x10] sm:$0xff] }
  0x16   : > { %661 = vmatpush3.bf16.msra.mxu0 %v658_v13  ;;  %v428_v52 = vld [vmem:[%s274_s10 + $0x38] sm:$0xff]  ;;  %v427_v58 = vld [vmem:[%s274_s10 + $0x30] sm:$0xff] }
  0x17   : > { %689 = vmatpush3.bf16.msra.mxu1 %v658_v13  ;;  %663 = vmatprep.subr.bf16.mxu0 %v662_v16 }
  0x18   : > { %682 = vmatprep.subr.bf16.mxu1 %v662_v16 }
  0x1a   : > { %665 = vmatpush3.bf16.msra.mxu0 %v662_v16 }
  0x1b   : > { %690 = vmatpush3.bf16.msra.mxu1 %v662_v16  ;;  %667 = vmatprep.subr.bf16.mxu0 %v666_v19 }
  0x1c   : > { %683 = vmatprep.subr.bf16.mxu1 %v666_v19 }
  0x1e   : > { %669 = vmatpush3.bf16.msra.mxu0 %v666_v19 }
  0x1f   : > { %691 = vmatpush3.bf16.msra.mxu1 %v666_v19  ;;  %671 = vmatprep.subr.bf16.mxu0 %v670_v22 }
  0x20   : > { %684 = vmatprep.subr.bf16.mxu1 %v670_v22 }
  0x22   : > { %673 = vmatpush3.bf16.msra.mxu0 %v670_v22 }
  0x23   : > { %692 = vmatpush3.bf16.msra.mxu1 %v670_v22  ;;  %675 = vmatprep.subr.bf16.mxu0 %v674_v25 }
  0x24   : > { %685 = vmatprep.subr.bf16.mxu1 %v674_v25 }
  0x26   : > { %677 = vmatpush3.bf16.msra.mxu0 %v674_v25 }
  0x27   : > { %693 = vmatpush3.bf16.msra.mxu1 %v674_v25 }
  0x29   : > { %635 = vmatmul.mubr.f32.vlgmr.msra.gmra.mrb[0].mxu0 %v286_v26 }
  0x2a   : > { %641 = vmatmul.mubr.f32.vlgmr.msra.gmra.mrb[0].mxu1 %v290_v27  ;;  %637 = vmatprep.mubr.f32.mxu0 %v287_v28 }
  0x2b   : > { %643 = vmatprep.mubr.f32.mxu1 %v291_v29 }
  0x2d   : > { %638 = vmatmul.mubr.f32.gmra.mrb[2].mxu0 %v288_v30 }
  0x2e   : > { %644 = vmatmul.mubr.f32.gmra.mrb[2].mxu1 %v292_v31 }
  0xfc   : > { %v636_v33 = vpop.f32.mrb[0].mxu0 }
  0xfd   : > { %v642_v35 = vpop.f32.mrb[0].mxu1  ;;  %v388_v37 = vadd.f32 %v636_v33, %v575_v32  ;;  %v382_v39 = vpop.f32.mrb[1].mxu0 }
  0xfe   : > { %v408_v38 = vadd.f32 %v642_v35, %v575_v32  ;;  %v402_v41 = vpop.f32.mrb[1].mxu1  ;;  %v383_v43 = vadd.f32 %v575_v32, %v382_v39 }
  0xff   : > { %v403_v44 = vadd.f32 %v575_v32, %v402_v41  ;;  %v430_v45 = vadd.f32 %v422_v34, %v388_v37 }
 0x100   : > { %v434_v46 = vadd.f32 %v426_v36, %v408_v38  ;;  %v429_v47 = vadd.f32 %v421_v40, %v383_v43  ;;  %v639_v49 = vpop.f32.mrb[2].mxu0 }
 0x101   : > { %v433_v48 = vadd.f32 %v425_v42, %v403_v44  ;;  %v645_v51 = vpop.f32.mrb[2].mxu1  ;;  %438 = vst [vmem:[%s283_s15 + $0x8] sm:$0xff] %v430_v45  ;;  %v398_v53 = vadd.f32 %v639_v49, %v575_v32  ;;  %v392_v55 = vpop.f32.mrb[3].mxu0 }
 0x102   : > { %442 = vst [vmem:[%s283_s15 + $0x28] sm:$0xff] %v434_v46  ;;  %v418_v54 = vadd.f32 %v645_v51, %v575_v32  ;;  %v412_v57 = vpop.f32.mrb[3].mxu1  ;;  %437 = vst [vmem:[%s283_s15] sm:$0xff] %v429_v47  ;;  %v393_v59 = vadd.f32 %v575_v32, %v392_v55 }
 0x103   : > { %441 = vst [vmem:[%s283_s15 + $0x20] sm:$0xff] %v433_v48  ;;  %v413_v60 = vadd.f32 %v575_v32, %v412_v57  ;;  %v432_v61 = vadd.f32 %v424_v50, %v398_v53 }
 0x104   : > { %v436_v62 = vadd.f32 %v428_v52, %v418_v54  ;;  %v431_v63 = vadd.f32 %v423_v56, %v393_v59 }
 0x105   : > { %v435_v0 = vadd.f32 %v427_v58, %v413_v60  ;;  %440 = vst [vmem:[%s283_s15 + $0x18] sm:$0xff] %v432_v61 }
 0x106   : > { %444 = vst [vmem:[%s283_s15 + $0x38] sm:$0xff] %v436_v62  ;;  %439 = vst [vmem:[%s283_s15 + $0x10] sm:$0xff] %v431_v63 }
 0x107   : > { %443 = vst [vmem:[%s283_s15 + $0x30] sm:$0xff] %v435_v0 }
 0x108 PF: > { %s14_s17 = sadd.s32 1, %s740_s17   ;;  %s874_s15 = smov %s736_s16 }
 0x109   : > { %p11_p5 = scmp.ge.s32.totalorder %s14_s17, 4   ;;  %s875_s16 = smov %s877_s18 }
 0x10b   :  { %13 = sbr.rel (!%p11_p5) target bundleno = 2 (0x2), region = 75 }

// kernel: spatial_transformer_forward.13
= control target key start
LH: loop header
LB: loop body
LE: loop exit
PB: predicated region body
PF: predicated region fallthrough
CT: control target
= control target key end

     0   :  { %s2857_s6 = smov 0   ;;  %s3609_s0 = inlined_call_operand.vmem [shape: f32[2,64,384], index: 0, kind: input, shape index: {}]   ;;  %s3610_s1 = inlined_call_operand.vmem [shape: f32[2,64,128], index: 1, kind: output, shape index: {}]  }
   0x1 LB: > { %s1945_s7 = sadd.s32 4294967295, %s2842_s6   ;;  %p1949_p0 = scmp.ge.s32.totalorder %s2842_s6, 1  ;;  %s2842_s6 = sphi %s2857_s6, %s11_s6  }
   0x2   : > { %p87_p1 = scmp.lt.s32.totalorder %s2842_s6, 3 }
   0x4   : > { %p88_p2 = pnand %p1949_p0, %p87_p1 }
   0x5   : > { %p107_p3 = scmp.lt.s32.totalorder (!%p88_p2), %s1945_s7, 1  ;;  %vm149_vm0 = vcmask (!%p88_p2), 261120   ;;  %vm303_vm2 = vcmask (!%p88_p2), 523264   ;;  %s2844_s12 = smov (!%p88_p2), 96   ;;  %vm979_vm3 = vcmask (!%p88_p2), 523520   ;;  %vm1430_vm4 = vcmask (!%p88_p2), 785920  }
   0x6   : > { %91 = sbr.rel (%p88_p2) target bundleno = 2775 (0xad7), region = 24  ;;  %vm2875_vm1 = vmpackc.low (!%p88_p2), %vm149_vm0, %vm149_vm0  ;;  %s2845_s17 = smov (!%p88_p2), 64   ;;  %vm1881_vm5 = vcmask (!%p88_p2), 1048320  }
   0x7   : > { %s2846_s18 = smov (!%p88_p2), 32  }
   0xd   : > { %s3614_s7 = smov (!%p107_p3, %s1945_s7), 1 }
   0xe   : > { %s2564_s8 = smul.u32 192, %s3614_s7  ;;  %s2051_s13 = sshll.u32 %s3614_s7, 6 }
   0xf   : > { %s3139_s16 = scalar_lea.vmem %s3610_s1, %s2051_s13 }
  0x10   : > { %s2871_s11 = scalar_lea.vmem %s3609_s0, %s2564_s8 }
  0x11   : > { %v2880_v1 = vld [vmem:[%s2871_s11 + $0x8] sm:$0xff]  ;;  %v2883_v2 = vld [vmem:[%s2871_s11 + $0x20] sm:$0xff]  ;;  %v2886_v3 = vld [vmem:[%s2871_s11 + $0x38] sm:$0xff] }
  0x12   : > { %v2404_v4 = vpack.c.bf16 %v2883_v2, %v2880_v1  ;;  %v2891_v5 = vld [vmem:[%s2871_s11 + $0x50] sm:$0xff]  ;;  %v117_v7 = vld [vmem:[%s2871_s11] sm:$0xff]  ;;  %v2907_v9 = vld [vmem:[%s2871_s11 + $0x68] sm:$0xff] }
  0x13   : > { %v2410_v6 = vpack.c.bf16 %v2891_v5, %v2886_v3  ;;  %v2898_v8 = vmul.f32 0.17677669, %v117_v7  ;;  %v2910_v10 = vld [vmem:[%s2871_s11 + $0x80] sm:$0xff]  ;;  %v2919_v12 = vld [vmem:[%s2871_s11 + $0x98] sm:$0xff]  ;;  %v2922_v13 = vld [vmem:[%s2871_s11 + $0xb0] sm:$0xff] }
  0x14   : > { %2406 = vmatprep.subr.msk.bf16.mxu0 %vm2875_vm1, %v2404_v4  ;;  %v2416_v11 = vpack.c.bf16 %v2910_v10, %v2907_v9  ;;  %v2422_v14 = vpack.c.bf16 %v2922_v13, %v2919_v12  ;;  %v120_v15 = vld [vmem:[%s2871_s11 + $0x18] sm:$0xff]  ;;  %v123_v16 = vld [vmem:[%s2871_s11 + $0x30] sm:$0xff]  ;;  %v126_v19 = vld [vmem:[%s2871_s11 + $0x48] sm:$0xff] }
  0x15   : > { %2409 = vmatpush3.bf16.xpose.msk.msra.mxu0 %vm2875_vm1, %v2404_v4  ;;  %2196 = vmatprep.mubr.msk.f32.mxu0 %vm149_vm0, %v2898_v8  ;;  %v2934_v17 = vmul.f32 0.17677669, %v120_v15  ;;  %v2936_v18 = vmul.f32 0.17677669, %v123_v16  ;;  %v129_v20 = vld [vmem:[%s2871_s11 + $0x60] sm:$0xff]  ;;  %v132_v23 = vld [vmem:[%s2871_s11 + $0x78] sm:$0xff]  ;;  %v3021_v4 = vpack.i.bf16 %v2891_v5, %v2886_v3 }
  0x16   : > { %2412 = vmatprep.subr.msk.bf16.mxu0 %vm2875_vm1, %v2410_v6  ;;  %v2942_v21 = vmul.f32 0.17677669, %v126_v19  ;;  %v2946_v22 = vmul.f32 0.17677669, %v129_v20  ;;  %v135_v24 = vld [vmem:[%s2871_s11 + $0x90] sm:$0xff]  ;;  %v138_v27 = vld [vmem:[%s2871_s11 + $0xa8] sm:$0xff] }
  0x17   : > { %v2952_v25 = vmul.f32 0.17677669, %v132_v23  ;;  %v2956_v26 = vmul.f32 0.17677669, %v135_v24  ;;  %v2961_v28 = vmul.f32 0.17677669, %v138_v27 }
  0x18   : > { %v2988_v51 = vld [vmem:[%s2871_s11 + $0x10] sm:$0xff]  ;;  %v2991_v52 = vld [vmem:[%s2871_s11 + $0x28] sm:$0xff]  ;;  %v2994_v53 = vld [vmem:[%s2871_s11 + $0x40] sm:$0xff] }
  0x19   : > { %v2428_v54 = vpack.c.bf16 %v2991_v52, %v2988_v51  ;;  %v2999_v55 = vld [vmem:[%s2871_s11 + $0x58] sm:$0xff]  ;;  %v3012_v61 = vld [vmem:[%s2871_s11 + $0x70] sm:$0xff]  ;;  %v3015_v62 = vld [vmem:[%s2871_s11 + $0x88] sm:$0xff] }
  0x1a   : > { %v2432_v56 = vpack.c.bf16 %v2999_v55, %v2994_v53  ;;  %v2436_v63 = vpack.c.bf16 %v3015_v62, %v3012_v61  ;;  %v3028_v7 = vld [vmem:[%s2871_s11 + $0xa0] sm:$0xff] }
  0x1b   : > { %2429 = vmatprep.subr.bf16.mxu1 %v2428_v54 }
  0x1c   : > { %2431 = vmatpush3.bf16.msra.mxu1 %v2428_v54 }
  0x1d   : > { %2415 = vmatpush3.bf16.xpose.msk.msra.mxu0 %vm2875_vm1, %v2410_v6  ;;  %2433 = vmatprep.subr.bf16.mxu1 %v2432_v56  ;;  %v3025_v6 = vpack.i.bf16 %v2883_v2, %v2880_v1 }
  0x1e   : > { %2418 = vmatprep.subr.msk.bf16.mxu0 %vm2875_vm1, %v2416_v11 }
  0x20   : > { %2435 = vmatpush3.bf16.msra.mxu1 %v2432_v56 }
  0x21   : > { %2437 = vmatprep.subr.bf16.mxu1 %v2436_v63 }
  0x24   : > { %2439 = vmatpush3.bf16.msra.mxu1 %v2436_v63 }
  0x25   : > { %2421 = vmatpush3.bf16.xpose.msk.msra.mxu0 %vm2875_vm1, %v2416_v11  ;;  %v3031_v11 = vld [vmem:[%s2871_s11 + $0xb8] sm:$0xff] }
  0x26   : > { %2424 = vmatprep.subr.msk.bf16.mxu0 %vm2875_vm1, %v2422_v14 }
  0x2d   : > { %2427 = vmatpush3.bf16.xpose.msk.msra.mxu0 %vm2875_vm1, %v2422_v14  ;;  %v2440_v14 = vpack.c.bf16 %v3031_v11, %v3028_v7 }
  0x2f   : > { %2441 = vmatprep.subr.bf16.mxu1 %v2440_v14 }
  0x30   : > { %2443 = vmatpush3.bf16.msra.mxu1 %v2440_v14 }
  0x34   : > { %2197 = vmatmul.mubr.msk.f32.vlgmr.msra.gmra.mrb[0].mxu0 %vm149_vm0, %v2934_v17 }
  0x35   : > { %2199 = vmatprep.mubr.msk.f32.mxu0 %vm149_vm0, %v2936_v18 }
  0x38   : > { %2200 = vmatmul.mubr.msk.f32.gmra.mrb[2].mxu0 %vm149_vm0, %v2942_v21 }
  0x39   : > { %2202 = vmatprep.mubr.msk.f32.mxu0 %vm149_vm0, %v2946_v22 }
  0x3c   : > { %2203 = vmatmul.mubr.msk.f32.gmra.mrb[4].mxu0 %vm149_vm0, %v2952_v25 }
  0x3d   : > { %2205 = vmatprep.mubr.msk.f32.mxu0 %vm149_vm0, %v2956_v26 }
  0x40   : > { %2206 = vmatmul.mubr.msk.f32.gmra.mrb[6].mxu0 %vm149_vm0, %v2961_v28 }
 0x107   : > { %v2198_v29 = vpop.f32.mrb[0].mxu0 }
 0x108   : > { %v264_v30 = vpop.f32.mrb[1].mxu0  ;;  %v307_v35 = vsel %vm303_vm2, %v2198_v29, -inf }
 0x109   : > { %v304_v31 = vsel %vm303_vm2, %v264_v30, -inf }
 0x10a   : > { %305 = vmax.xlane.f32.xlu0 %v304_v31 }
 0x10b   : > { %v2968_v32 = vpop.f32.mrb[2].mxu0 }
 0x10c   : > { %v313_v33 = vsel %vm303_vm2, %v2968_v32, -inf  ;;  %v274_v34 = vpop.f32.mrb[3].mxu0 }
 0x10d   : > { %314 = vmax.xlane.f32.xlu1 %v313_v33  ;;  %v310_v36 = vsel %vm303_vm2, %v274_v34, -inf }
 0x10e   : > { %308 = vmax.xlane.f32.xlu0 %v307_v35 }
 0x10f   : > { %v2974_v37 = vpop.f32.mrb[4].mxu0 }
 0x110   : > { %v284_v38 = vpop.f32.mrb[5].mxu0  ;;  %v319_v40 = vsel %vm303_vm2, %v2974_v37, -inf }
 0x111   : > { %311 = vmax.xlane.f32.xlu1 %v310_v36  ;;  %v316_v39 = vsel %vm303_vm2, %v284_v38, -inf }
 0x112   : > { %317 = vmax.xlane.f32.xlu0 %v316_v39  ;;  %v3063_v39 = vpack.i.bf16 %v2910_v10, %v2907_v9 }
 0x113   : > { %v2979_v41 = vpop.f32.mrb[6].mxu0 }
 0x114   : > { %v2981_v42 = vpop.f32.mrb[7].mxu0  ;;  %v325_v44 = vsel %vm303_vm2, %v2979_v41, -inf }
 0x115   : > { %320 = vmax.xlane.f32.xlu1 %v319_v40  ;;  %v322_v43 = vsel %vm303_vm2, %v2981_v42, -inf }
 0x116   : > { %323 = vmax.xlane.f32.xlu0 %v322_v43 }
 0x119   : > { %326 = vmax.xlane.f32.xlu1 %v325_v44 }
 0x197   : > { %v306_v45 = vpop.xlane.xlu0 %305 }
 0x198   : > { %v328_v46 = vsub.f32 %v264_v30, %v306_v45 }
 0x19a   : > { %v336_v47 = vmul.f32 1.442695, %v328_v46  ;;  %v315_v3 = vpop.xlane.xlu1 %314 }
 0x19b   : > { %v309_v48 = vpop.xlane.xlu0 %308  ;;  %v331_v15 = vsub.f32 %v2968_v32, %v315_v3 }
 0x19c   : > { %2696 = vpow2.f32 %v336_v47  ;;  %v329_v49 = vsub.f32 %v2198_v29, %v309_v48 }
 0x19d   : > { %v342_v23 = vmul.f32 1.442695, %v331_v15 }
 0x19e   : > { %v338_v50 = vmul.f32 1.442695, %v329_v49  ;;  %v312_v1 = vpop.xlane.xlu1 %311 }
 0x19f   : > { %v330_v2 = vsub.f32 %v274_v34, %v312_v1  ;;  %v318_v5 = vpop.xlane.xlu0 %317 }
 0x1a0   : > { %2698 = vpow2.f32 %v338_v50  ;;  %v332_v19 = vsub.f32 %v284_v38, %v318_v5  ;;  %v3059_v38 = vpack.i.bf16 %v2922_v13, %v2919_v12 }
 0x1a1   : > { %v340_v16 = vmul.f32 1.442695, %v330_v2 }
 0x1a2   : > { %v321_v20 = vpop.xlane.xlu1 %320  ;;  %v344_v24 = vmul.f32 1.442695, %v332_v19 }
 0x1a3   : > { %2700 = vpow2.f32 %v340_v16  ;;  %v333_v27 = vsub.f32 %v2974_v37, %v321_v20  ;;  %v324_v9 = vpop.xlane.xlu0 %323 }
 0x1a4   : > { %2702 = vpow2.f32 %v342_v23  ;;  %v334_v10 = vsub.f32 %v2981_v42, %v324_v9 }
 0x1a5   : > { %2704 = vpow2.f32 %v344_v24  ;;  %v346_v29 = vmul.f32 1.442695, %v333_v27 }
 0x1a6   : > { %v3003_v57 = vpop.eup %2696  ;;  %v327_v40 = vpop.xlane.xlu1 %326  ;;  %v348_v43 = vmul.f32 1.442695, %v334_v10 }
 0x1a7   : > { %v352_v58 = vsel %vm303_vm2, %v3003_v57, 0.0  ;;  %2706 = vpow2.f32 %v346_v29  ;;  %v335_v12 = vsub.f32 %v2979_v41, %v327_v40 }
 0x1a8   : > { %353 = vadd.xlane.f32.xlu0 %v352_v58 }
 0x1a9   : > { %v350_v13 = vmul.f32 1.442695, %v335_v12 }
 0x1aa   : > { %v3007_v59 = vpop.eup %2698 }
 0x1ab   : > { %v355_v60 = vsel %vm303_vm2, %v3007_v59, 0.0  ;;  %2708 = vpow2.f32 %v350_v13 }
 0x1ac   : > { %356 = vadd.xlane.f32.xlu1 %v355_v60  ;;  %2710 = vpow2.f32 %v348_v43 }
 0x1ad   : > { %v3041_v30 = vpop.eup %2700 }
 0x1ae   : > { %v3043_v31 = vpop.eup %2702  ;;  %v358_v33 = vsel %vm303_vm2, %v3041_v30, 0.0 }
 0x1af   : > { %v3047_v32 = vpop.eup %2704  ;;  %v361_v34 = vsel %vm303_vm2, %v3043_v31, 0.0 }
 0x1b0   : > { %v364_v35 = vsel %vm303_vm2, %v3047_v32, 0.0 }
 0x1b1   : > { %v3053_v36 = vpop.eup %2706 }
 0x1b2   : > { %v367_v37 = vsel %vm303_vm2, %v3053_v36, 0.0 }
 0x1b5   : > { %v3079_v44 = vpop.eup %2708 }
 0x1b6   : > { %v373_v45 = vsel %vm303_vm2, %v3079_v44, 0.0  ;;  %v3083_v46 = vpop.eup %2710 }
 0x1b7   : > { %v370_v41 = vsel %vm303_vm2, %v3083_v46, 0.0 }
 0x1bd   : > { %2582 = vrot.lane.b32.xlu1 %v3021_v4, %s2844_s12 }
 0x1be   : > { %2577 = vrot.lane.b32.xlu0 %v3025_v6, %s2844_s12 }
 0x1dd   : > { %359 = vadd.xlane.f32.xlu0 %v358_v33 }
 0x1e1   : > { %362 = vadd.xlane.f32.xlu1 %v361_v34  ;;  %365 = vadd.xlane.f32.xlu0 %v364_v35 }
 0x1e5   : > { %368 = vadd.xlane.f32.xlu1 %v367_v37 }
 0x1f6   : > { %2592 = vrot.lane.b32.xlu1 %v3059_v38, %s2844_s12 }
 0x1f7   : > { %2587 = vrot.lane.b32.xlu0 %v3063_v39, %s2844_s12 }
 0x1fb   : > { %529 = vrot.lane.b32.xlu0 %v2898_v8, %s2844_s12 }
 0x1ff   : > { %533 = vrot.lane.b32.xlu0 %v2936_v18, %s2844_s12 }
 0x203   : > { %537 = vrot.lane.b32.xlu0 %v2946_v22, %s2844_s12 }
 0x207   : > { %541 = vrot.lane.b32.xlu0 %v2956_v26, %s2844_s12 }
 0x21a   : > { %374 = vadd.xlane.f32.xlu1 %v373_v45 }
 0x21e   : > { %371 = vadd.xlane.f32.xlu1 %v370_v41 }
 0x22f   : > { %531 = vrot.lane.b32.xlu1 %v2934_v17, %s2844_s12 }
 0x233   : > { %535 = vrot.lane.b32.xlu1 %v2942_v21, %s2844_s12 }
 0x235   : > { %v354_v42 = vpop.xlane.xlu0 %353 }
 0x236   : > { %2712 = vrcp.f32 %v354_v42 }
 0x237   : > { %539 = vrot.lane.b32.xlu1 %v2952_v25, %s2844_s12 }
 0x239   : > { %v357_v47 = vpop.xlane.xlu1 %356  ;;  %v2578_v48 = vpop.permute.xlu0 %2577 }
 0x23a   : > { %2714 = vrcp.f32 %v357_v47  ;;  %v2580_v49 = vunpack.i.h.bf16 %v2578_v48  ;;  %v2579_v50 = vunpack.i.l.bf16 %v2578_v48 }
 0x23b   : > { %543 = vrot.lane.b32.xlu1 %v2961_v28, %s2844_s12 }
 0x23c   : > { %v2444_v54 = vpack.c.bf16 %v2580_v49, %v2579_v50 }
 0x23d   : > { %v2583_v58 = vpop.permute.xlu1 %2582 }
 0x23e   : > { %2446 = vmatprep.subr.msk.bf16.mxu1 %vm2875_vm1, %v2444_v54  ;;  %v2585_v63 = vunpack.i.h.bf16 %v2583_v58  ;;  %v2584_v14 = vunpack.i.l.bf16 %v2583_v58 }
 0x240   : > { %v2713_v56 = vpop.eup %2712  ;;  %v2450_v2 = vpack.c.bf16 %v2585_v63, %v2584_v14 }
 0x241   : > { %v384_v60 = vmul.f32 %v2713_v56, %v3003_v57 }
 0x243   : > { %2224 = vmatprep.mubr.msk.f32.mxu1 %vm303_vm2, %v384_v60 }
 0x244   : > { %v2715_v3 = vpop.eup %2714 }
 0x245   : > { %v385_v1 = vmul.f32 %v2715_v3, %v3007_v59 }
 0x247   : > { %2225 = vmatmul.mubr.msk.f32.vlgmr.msra.gmra.mrb[0].mxu1 %vm303_vm2, %v385_v1 }
 0x248   : > { %2449 = vmatpush3.bf16.xpose.msk.msra.mxu1 %vm2875_vm1, %v2444_v54 }
 0x249   : > { %2452 = vmatprep.subr.msk.bf16.mxu1 %vm2875_vm1, %v2450_v2 }
 0x250   : > { %2455 = vmatpush3.bf16.xpose.msk.msra.mxu1 %vm2875_vm1, %v2450_v2 }
 0x26a   : > { %v360_v57 = vpop.xlane.xlu0 %359 }
 0x26b   : > { %2716 = vrcp.f32 %v360_v57 }
 0x26e   : > { %v363_v5 = vpop.xlane.xlu1 %362  ;;  %v366_v15 = vpop.xlane.xlu0 %365 }
 0x26f   : > { %2718 = vrcp.f32 %v363_v5 }
 0x270   : > { %2720 = vrcp.f32 %v366_v15 }
 0x272   : > { %v369_v16 = vpop.xlane.xlu1 %368  ;;  %v2588_v59 = vpop.permute.xlu0 %2587 }
 0x273   : > { %2722 = vrcp.f32 %v369_v16  ;;  %v2590_v19 = vunpack.i.h.bf16 %v2588_v59  ;;  %v2589_v20 = vunpack.i.l.bf16 %v2588_v59 }
 0x275   : > { %v2717_v23 = vpop.eup %2716  ;;  %v2456_v24 = vpack.c.bf16 %v2590_v19, %v2589_v20 }
 0x276   : > { %v2593_v27 = vpop.permute.xlu1 %2592  ;;  %v386_v29 = vmul.f32 %v2717_v23, %v3041_v30  ;;  %v530_v43 = vpop.permute.xlu0 %529 }
 0x277   : > { %v2595_v33 = vunpack.i.h.bf16 %v2593_v27  ;;  %v2594_v34 = vunpack.i.l.bf16 %v2593_v27  ;;  %2458 = vmatprep.subr.msk.bf16.mxu1 %vm2875_vm1, %v2456_v24 }
 0x278   : > { %2227 = vmatprep.mubr.msk.f32.mxu1 %vm303_vm2, %v386_v29  ;;  %2461 = vmatpush3.bf16.xpose.msk.msra.mxu1 %vm2875_vm1, %v2456_v24 }
 0x279   : > { %v2719_v35 = vpop.eup %2718  ;;  %v2462_v37 = vpack.c.bf16 %v2595_v33, %v2594_v34 }
 0x27a   : > { %v2721_v40 = vpop.eup %2720  ;;  %v387_v12 = vmul.f32 %v2719_v35, %v3043_v31  ;;  %v534_v48 = vpop.permute.xlu0 %533 }
 0x27b   : > { %2464 = vmatprep.subr.msk.bf16.mxu1 %vm2875_vm1, %v2462_v37  ;;  %v388_v30 = vmul.f32 %v2721_v40, %v3047_v32  ;;  %v3173_v40 = vpack.i.bf16 %v2999_v55, %v2994_v53 }
 0x27c   : > { %2228 = vmatmul.mubr.msk.f32.gmra.mrb[2].mxu1 %vm303_vm2, %v387_v12  ;;  %v3179_v12 = vpack.i.bf16 %v3015_v62, %v3012_v61 }
 0x27d   : > { %v2723_v9 = vpop.eup %2722  ;;  %2230 = vmatprep.mubr.msk.f32.mxu1 %vm303_vm2, %v388_v30  ;;  %v3185_v30 = vpack.i.bf16 %v3031_v11, %v3028_v7 }
 0x27e   : > { %v389_v10 = vmul.f32 %v2723_v9, %v3053_v36  ;;  %v538_v49 = vpop.permute.xlu0 %537  ;;  %v3189_v9 = vpack.i.bf16 %v2991_v52, %v2988_v51 }
 0x280   : > { %2231 = vmatmul.mubr.msk.f32.gmra.mrb[4].mxu1 %vm303_vm2, %v389_v10 }
 0x281   : > { %2467 = vmatpush3.bf16.xpose.msk.msra.mxu1 %vm2875_vm1, %v2462_v37 }
 0x2a7   : > { %v375_v13 = vpop.xlane.xlu1 %374 }
 0x2a8   : > { %2724 = vrcp.f32 %v375_v13 }
 0x2ab   : > { %v372_v31 = vpop.xlane.xlu1 %371 }
 0x2ac   : > { %2726 = vrcp.f32 %v372_v31 }
 0x2af   : > { %v532_v41 = vpop.permute.xlu1 %531 }
 0x2b2   : > { %v2725_v45 = vpop.eup %2724 }
 0x2b3   : > { %v391_v47 = vmul.f32 %v2725_v45, %v3079_v44  ;;  %v536_v36 = vpop.permute.xlu1 %535  ;;  %v542_v44 = vpop.permute.xlu0 %541 }
 0x2b6   : > { %v2727_v32 = vpop.eup %2726 }
 0x2b7   : > { %v390_v42 = vmul.f32 %v2727_v32, %v3083_v46  ;;  %v540_v50 = vpop.permute.xlu1 %539 }
 0x2b9   : > { %2233 = vmatprep.mubr.msk.f32.mxu1 %vm303_vm2, %v390_v42 }
 0x2ba   : > { %2234 = vmatmul.mubr.msk.f32.gmra.mrb[6].mxu1 %vm303_vm2, %v391_v47 }
 0x2bb   : > { %2252 = vmatprep.mubr.msk.f32.mxu1 %vm149_vm0, %v530_v43  ;;  %v544_v46 = vpop.permute.xlu1 %543 }
 0x2be   : > { %2253 = vmatmul.mubr.msk.f32.vlgmr.msra.gmra.mrb[8].mxu1 %vm149_vm0, %v532_v41 }
 0x2bf   : > { %2255 = vmatprep.mubr.msk.f32.mxu1 %vm149_vm0, %v534_v48 }
 0x2c2   : > { %2256 = vmatmul.mubr.msk.f32.gmra.mrb[10].mxu1 %vm149_vm0, %v536_v36 }
 0x2c3   : > { %2258 = vmatprep.mubr.msk.f32.mxu1 %vm149_vm0, %v538_v49 }
 0x2c6   : > { %2259 = vmatmul.mubr.msk.f32.gmra.mrb[12].mxu1 %vm149_vm0, %v540_v50 }
 0x2c7   : > { %2261 = vmatprep.mubr.msk.f32.mxu1 %vm149_vm0, %v542_v44 }
 0x2ca   : > { %2262 = vmatmul.mubr.msk.f32.gmra.mrb[14].mxu1 %vm149_vm0, %v544_v46 }
 0x31a   : > { %v2226_v54 = vpop.f32.mrb[0].mxu1 }
 0x31b   : > { %522 = vst.msk [vmem:[%s3139_s16 + $0x8] sm:$0xff] %vm149_vm0, %v2226_v54  ;;  %v482_v56 = vpop.f32.mrb[1].mxu1 }
 0x31c   : > { %521 = vst.msk [vmem:[%s3139_s16] sm:$0xff] %vm149_vm0, %v482_v56 }
 0x34f   : > { %v2229_v58 = vpop.f32.mrb[2].mxu1 }
 0x350   : > { %524 = vst.msk [vmem:[%s3139_s16 + $0x18] sm:$0xff] %vm149_vm0, %v2229_v58  ;;  %v492_v60 = vpop.f32.mrb[3].mxu1 }
 0x351   : > { %523 = vst.msk [vmem:[%s3139_s16 + $0x10] sm:$0xff] %vm149_vm0, %v492_v60 }
 0x353   : > { %v2232_v63 = vpop.f32.mrb[4].mxu1 }
 0x354   : > { %526 = vst.msk [vmem:[%s3139_s16 + $0x28] sm:$0xff] %vm149_vm0, %v2232_v63  ;;  %v502_v14 = vpop.f32.mrb[5].mxu1 }
 0x355   : > { %525 = vst.msk [vmem:[%s3139_s16 + $0x20] sm:$0xff] %vm149_vm0, %v502_v14 }
 0x38d   : > { %v2235_v3 = vpop.f32.mrb[6].mxu1 }
 0x38e   : > { %528 = vst.msk [vmem:[%s3139_s16 + $0x38] sm:$0xff] %vm149_vm0, %v2235_v3  ;;  %v512_v1 = vpop.f32.mrb[7].mxu1 }
 0x38f   : > { %527 = vst.msk [vmem:[%s3139_s16 + $0x30] sm:$0xff] %vm149_vm0, %v512_v1 }
 0x391   : > { %v2254_v2 = vpop.f32.mrb[8].mxu1 }
 0x392   : > { %v659_v57 = vpop.f32.mrb[9].mxu1  ;;  %v701_v5 = vsel %vm303_vm2, %v2254_v2, -inf }
 0x393   : > { %702 = vmax.xlane.f32.xlu1 %v701_v5  ;;  %v698_v15 = vsel %vm303_vm2, %v659_v57, -inf }
 0x394   : > { %699 = vmax.xlane.f32.xlu0 %v698_v15 }
 0x395   : > { %v2257_v16 = vpop.f32.mrb[10].mxu1 }
 0x396   : > { %v669_v59 = vpop.f32.mrb[11].mxu1  ;;  %v707_v19 = vsel %vm303_vm2, %v2257_v16, -inf }
 0x397   : > { %v704_v27 = vsel %vm303_vm2, %v669_v59, -inf }
 0x398   : > { %708 = vmax.xlane.f32.xlu0 %v707_v19 }
 0x399   : > { %v2260_v20 = vpop.f32.mrb[12].mxu1 }
 0x39a   : > { %v713_v23 = vsel %vm303_vm2, %v2260_v20, -inf  ;;  %v679_v24 = vpop.f32.mrb[13].mxu1 }
 0x39b   : > { %714 = vmax.xlane.f32.xlu1 %v713_v23  ;;  %v710_v33 = vsel %vm303_vm2, %v679_v24, -inf }
 0x39c   : > { %705 = vmax.xlane.f32.xlu0 %v704_v27 }
 0x39d   : > { %v3162_v29 = vpop.f32.mrb[14].mxu1 }
 0x39e   : > { %v719_v34 = vsel %vm303_vm2, %v3162_v29, -inf  ;;  %v3167_v35 = vpop.f32.mrb[15].mxu1 }
 0x39f   : > { %720 = vmax.xlane.f32.xlu1 %v719_v34  ;;  %v716_v37 = vsel %vm303_vm2, %v3167_v35, -inf }
 0x3a0   : > { %711 = vmax.xlane.f32.xlu0 %v710_v33 }
 0x3a4   : > { %717 = vmax.xlane.f32.xlu0 %v716_v37 }
 0x3b0   : > { %2602 = vrot.lane.b32.xlu1 %v3173_v40, %s2844_s12 }
 0x3b4   : > { %2607 = vrot.lane.b32.xlu1 %v3179_v12, %s2844_s12 }
 0x3b8   : > { %2612 = vrot.lane.b32.xlu1 %v3185_v30, %s2844_s12 }
 0x3ba   : > { %2597 = vrot.lane.b32.xlu0 %v3189_v9, %s2844_s12 }
 0x3bc   : > { %2622 = vrot.lane.b32.xlu1 %v3021_v4, %s2845_s17 }
 0x3be   : > { %2617 = vrot.lane.b32.xlu0 %v3025_v6, %s2845_s17 }
 0x420   : > { %v703_v53 = vpop.xlane.xlu1 %702 }
 0x421   : > { %v723_v55 = vsub.f32 %v2254_v2, %v703_v53  ;;  %v700_v61 = vpop.xlane.xlu0 %699 }
 0x422   : > { %v722_v62 = vsub.f32 %v659_v57, %v700_v61 }
 0x423   : > { %v732_v7 = vmul.f32 1.442695, %v723_v55 }
 0x424   : > { %v730_v51 = vmul.f32 1.442695, %v722_v62 }
 0x425   : > { %2728 = vpow2.f32 %v732_v7  ;;  %v709_v52 = vpop.xlane.xlu0 %708 }
 0x426   : > { %2730 = vpow2.f32 %v730_v51  ;;  %v725_v11 = vsub.f32 %v2257_v16, %v709_v52 }
 0x428   : > { %v736_v10 = vmul.f32 1.442695, %v725_v11  ;;  %v715_v13 = vpop.xlane.xlu1 %714 }
 0x429   : > { %v727_v31 = vsub.f32 %v2260_v20, %v715_v13  ;;  %v706_v43 = vpop.xlane.xlu0 %705 }
 0x42a   : > { %2732 = vpow2.f32 %v736_v10  ;;  %v724_v45 = vsub.f32 %v669_v59, %v706_v43 }
 0x42b   : > { %v740_v41 = vmul.f32 1.442695, %v727_v31 }
 0x42c   : > { %v734_v32 = vmul.f32 1.442695, %v724_v45  ;;  %v721_v42 = vpop.xlane.xlu1 %720 }
 0x42d   : > { %v712_v47 = vpop.xlane.xlu0 %711  ;;  %v729_v11 = vsub.f32 %v3162_v29, %v721_v42 }
 0x42e   : > { %2734 = vpow2.f32 %v734_v32  ;;  %v726_v48 = vsub.f32 %v679_v24, %v712_v47 }
 0x42f   : > { %v3199_v36 = vpop.eup %2728  ;;  %2736 = vpow2.f32 %v740_v41  ;;  %v744_v10 = vmul.f32 1.442695, %v729_v11 }
 0x430   : > { %v3201_v49 = vpop.eup %2730  ;;  %v738_v50 = vmul.f32 1.442695, %v726_v48  ;;  %v749_v44 = vsel %vm303_vm2, %v3199_v36, 0.0  ;;  %v2603_v46 = vpop.permute.xlu1 %2602 }
 0x431   : > { %750 = vadd.xlane.f32.xlu1 %v749_v44  ;;  %v718_v54 = vpop.xlane.xlu0 %717  ;;  %v746_v56 = vsel %vm303_vm2, %v3201_v49, 0.0  ;;  %v2605_v60 = vunpack.i.h.bf16 %v2603_v46  ;;  %v2604_v63 = vunpack.i.l.bf16 %v2603_v46 }
 0x432   : > { %747 = vadd.xlane.f32.xlu0 %v746_v56  ;;  %2738 = vpow2.f32 %v738_v50  ;;  %v728_v13 = vsub.f32 %v3167_v35, %v718_v54 }
 0x433   : > { %v2472_v19 = vpack.c.bf16 %v2605_v60, %v2604_v63  ;;  %2740 = vpow2.f32 %v744_v10 }
 0x434   : > { %v3207_v58 = vpop.eup %2732  ;;  %v2608_v14 = vpop.permute.xlu1 %2607  ;;  %v742_v31 = vmul.f32 1.442695, %v728_v13 }
 0x435   : > { %v755_v3 = vsel %vm303_vm2, %v3207_v58, 0.0  ;;  %v2598_v1 = vpop.permute.xlu0 %2597  ;;  %v2610_v16 = vunpack.i.h.bf16 %v2608_v14  ;;  %v2609_v59 = vunpack.i.l.bf16 %v2608_v14 }
 0x436   : > { %756 = vadd.xlane.f32.xlu1 %v755_v3  ;;  %v2600_v2 = vunpack.i.h.bf16 %v2598_v1  ;;  %v2599_v57 = vunpack.i.l.bf16 %v2598_v1  ;;  %2742 = vpow2.f32 %v742_v31 }
 0x437   : > { %v2476_v34 = vpack.c.bf16 %v2610_v16, %v2609_v59 }
 0x438   : > { %v3211_v5 = vpop.eup %2734  ;;  %v2468_v15 = vpack.c.bf16 %v2600_v2, %v2599_v57  ;;  %v2613_v23 = vpop.permute.xlu1 %2612 }
 0x439   : > { %v752_v20 = vsel %vm303_vm2, %v3211_v5, 0.0  ;;  %v3215_v24 = vpop.eup %2736  ;;  %v2615_v27 = vunpack.i.h.bf16 %v2613_v23  ;;  %v2614_v33 = vunpack.i.l.bf16 %v2613_v23  ;;  %v2618_v53 = vpop.permute.xlu0 %2617 }
 0x43a   : > { %753 = vadd.xlane.f32.xlu0 %v752_v20  ;;  %2469 = vmatprep.subr.bf16.mxu0 %v2468_v15  ;;  %v761_v37 = vsel %vm303_vm2, %v3215_v24, 0.0  ;;  %v2620_v62 = vunpack.i.h.bf16 %v2618_v53  ;;  %v2619_v7 = vunpack.i.l.bf16 %v2618_v53 }
 0x43b   : > { %2471 = vmatpush3.bf16.msra.mxu0 %v2468_v15  ;;  %v2480_v61 = vpack.c.bf16 %v2615_v27, %v2614_v33 }
 0x43c   : > { %2473 = vmatprep.subr.bf16.mxu0 %v2472_v19  ;;  %v3219_v55 = vpop.eup %2738  ;;  %v2484_v52 = vpack.c.bf16 %v2620_v62, %v2619_v7  ;;  %v2623_v43 = vpop.permute.xlu1 %2622 }
 0x43d   : > { %v758_v51 = vsel %vm303_vm2, %v3219_v55, 0.0  ;;  %v2625_v50 = vunpack.i.h.bf16 %v2623_v43  ;;  %v2624_v44 = vunpack.i.l.bf16 %v2623_v43 }
 0x43e   : > { %762 = vadd.xlane.f32.xlu0 %v761_v37 }
 0x43f   : > { %2475 = vmatpush3.bf16.msra.mxu0 %v2472_v19  ;;  %v2490_v60 = vpack.c.bf16 %v2625_v50, %v2624_v44 }
 0x440   : > { %2477 = vmatprep.subr.bf16.mxu0 %v2476_v34 }
 0x442   : > { %759 = vadd.xlane.f32.xlu0 %v758_v51 }
 0x443   : > { %2479 = vmatpush3.bf16.msra.mxu0 %v2476_v34 }
 0x444   : > { %2481 = vmatprep.subr.bf16.mxu0 %v2480_v61 }
 0x447   : > { %2632 = vrot.lane.b32.xlu1 %v3059_v38, %s2845_s17  ;;  %2483 = vmatpush3.bf16.msra.mxu0 %v2480_v61  ;;  %v3237_v38 = vpop.eup %2740 }
 0x448   : > { %2486 = vmatprep.subr.msk.bf16.mxu0 %vm2875_vm1, %v2484_v52  ;;  %v3243_v29 = vpop.eup %2742 }
 0x449   : > { %v764_v35 = vsel %vm303_vm2, %v3243_v29, 0.0 }
 0x458   : > { %2627 = vrot.lane.b32.xlu0 %v3063_v39, %s2845_s17  ;;  %v767_v39 = vsel %vm303_vm2, %v3237_v38, 0.0 }
 0x45c   : > { %988 = vrot.lane.b32.xlu0 %v2898_v8, %s2845_s17 }
 0x460   : > { %992 = vrot.lane.b32.xlu0 %v2936_v18, %s2845_s17 }
 0x464   : > { %996 = vrot.lane.b32.xlu0 %v2946_v22, %s2845_s17 }
 0x468   : > { %1000 = vrot.lane.b32.xlu0 %v2956_v26, %s2845_s17 }
 0x46b   : > { %768 = vadd.xlane.f32.xlu1 %v767_v39 }
 0x46f   : > { %765 = vadd.xlane.f32.xlu1 %v764_v35 }
 0x480   : > { %990 = vrot.lane.b32.xlu1 %v2934_v17, %s2845_s17 }
 0x484   : > { %994 = vrot.lane.b32.xlu1 %v2942_v21, %s2845_s17 }
 0x488   : > { %998 = vrot.lane.b32.xlu1 %v2952_v25, %s2845_s17 }
 0x48c   : > { %1002 = vrot.lane.b32.xlu1 %v2961_v28, %s2845_s17 }
 0x4be   : > { %v751_v45 = vpop.xlane.xlu1 %750 }
 0x4bf   : > { %2744 = vrcp.f32 %v751_v45  ;;  %v748_v41 = vpop.xlane.xlu0 %747 }
 0x4c0   : > { %2746 = vrcp.f32 %v748_v41 }
 0x4c3   : > { %v757_v32 = vpop.xlane.xlu1 %756 }
 0x4c4   : > { %2748 = vrcp.f32 %v757_v32 }
 0x4c7   : > { %v754_v42 = vpop.xlane.xlu0 %753  ;;  %v2633_v16 = vpop.permute.xlu1 %2632 }
 0x4c8   : > { %2750 = vrcp.f32 %v754_v42  ;;  %v2634_v20 = vunpack.i.l.bf16 %v2633_v16 }
 0x4c9   : > { %v2745_v47 = vpop.eup %2744 }
 0x4ca   : > { %v2747_v48 = vpop.eup %2746  ;;  %v779_v56 = vmul.f32 %v2745_v47, %v3199_v36 }
 0x4cb   : > { %v763_v46 = vpop.xlane.xlu0 %762  ;;  %v778_v54 = vmul.f32 %v2747_v48, %v3201_v49 }
 0x4cc   : > { %2752 = vrcp.f32 %v763_v46 }
 0x4cd   : > { %2280 = vmatprep.mubr.msk.f32.mxu0 %vm303_vm2, %v778_v54 }
 0x4ce   : > { %2281 = vmatmul.mubr.msk.f32.vlgmr.msra.gmra.mrb[8].mxu0 %vm303_vm2, %v779_v56  ;;  %v2749_v14 = vpop.eup %2748 }
 0x4cf   : > { %2489 = vmatpush3.bf16.xpose.msk.msra.mxu0 %vm2875_vm1, %v2484_v52  ;;  %v760_v63 = vpop.xlane.xlu0 %759  ;;  %v781_v36 = vmul.f32 %v2749_v14, %v3207_v58 }
 0x4d0   : > { %2754 = vrcp.f32 %v760_v63  ;;  %2492 = vmatprep.subr.msk.bf16.mxu0 %vm2875_vm1, %v2490_v60 }
 0x4d2   : > { %v2751_v3 = vpop.eup %2750 }
 0x4d3   : > { %v780_v49 = vmul.f32 %v2751_v3, %v3211_v5  ;;  %v2628_v1 = vpop.permute.xlu0 %2627  ;;  %v2635_v5 = vunpack.i.h.bf16 %v2633_v16 }
 0x4d4   : > { %v2630_v2 = vunpack.i.h.bf16 %v2628_v1  ;;  %v2629_v57 = vunpack.i.l.bf16 %v2628_v1 }
 0x4d5   : > { %2283 = vmatprep.mubr.msk.f32.mxu0 %vm303_vm2, %v780_v49  ;;  %v2502_v27 = vpack.c.bf16 %v2635_v5, %v2634_v20 }
 0x4d6   : > { %2284 = vmatmul.mubr.msk.f32.gmra.mrb[10].mxu0 %vm303_vm2, %v781_v36  ;;  %v2496_v15 = vpack.c.bf16 %v2630_v2, %v2629_v57  ;;  %v2753_v59 = vpop.eup %2752 }
 0x4d7   : > { %2495 = vmatpush3.bf16.xpose.msk.msra.mxu0 %vm2875_vm1, %v2490_v60  ;;  %v783_v23 = vmul.f32 %v2753_v59, %v3215_v24  ;;  %v989_v37 = vpop.permute.xlu0 %988 }
 0x4d8   : > { %2498 = vmatprep.subr.msk.bf16.mxu0 %vm2875_vm1, %v2496_v15 }
 0x4da   : > { %v2755_v19 = vpop.eup %2754 }
 0x4db   : > { %v782_v58 = vmul.f32 %v2755_v19, %v3219_v55  ;;  %v993_v7 = vpop.permute.xlu0 %992 }
 0x4dd   : > { %2286 = vmatprep.mubr.msk.f32.mxu0 %vm303_vm2, %v782_v58 }
 0x4de   : > { %2287 = vmatmul.mubr.msk.f32.gmra.mrb[12].mxu0 %vm303_vm2, %v783_v23 }
 0x4df   : > { %2501 = vmatpush3.bf16.xpose.msk.msra.mxu0 %vm2875_vm1, %v2496_v15  ;;  %v997_v52 = vpop.permute.xlu0 %996 }
 0x4e0   : > { %2504 = vmatprep.subr.msk.bf16.mxu0 %vm2875_vm1, %v2502_v27 }
 0x4e3   : > { %v1001_v10 = vpop.permute.xlu0 %1000 }
 0x4e7   : > { %2507 = vmatpush3.bf16.xpose.msk.msra.mxu0 %vm2875_vm1, %v2502_v27 }
 0x4f8   : > { %v769_v33 = vpop.xlane.xlu1 %768 }
 0x4f9   : > { %2756 = vrcp.f32 %v769_v33 }
 0x4fc   : > { %v766_v34 = vpop.xlane.xlu1 %765 }
 0x4fd   : > { %2758 = vrcp.f32 %v766_v34 }
 0x500   : > { %v991_v53 = vpop.permute.xlu1 %990 }
 0x503   : > { %v2757_v24 = vpop.eup %2756 }
 0x504   : > { %v785_v62 = vmul.f32 %v2757_v24, %v3237_v38  ;;  %v995_v51 = vpop.permute.xlu1 %994 }
 0x507   : > { %v2759_v55 = vpop.eup %2758 }
 0x508   : > { %v784_v61 = vmul.f32 %v2759_v55, %v3243_v29  ;;  %v999_v11 = vpop.permute.xlu1 %998 }
 0x50a   : > { %2289 = vmatprep.mubr.msk.f32.mxu0 %vm303_vm2, %v784_v61 }
 0x50b   : > { %2290 = vmatmul.mubr.msk.f32.gmra.mrb[14].mxu0 %vm303_vm2, %v785_v62 }
 0x50c   : > { %2308 = vmatprep.mubr.msk.f32.mxu0 %vm149_vm0, %v989_v37  ;;  %v1003_v13 = vpop.permute.xlu1 %1002 }
 0x50f   : > { %2309 = vmatmul.mubr.msk.f32.vlgmr.msra.gmra.mrb[16].mxu0 %vm149_vm0, %v991_v53 }
 0x510   : > { %2311 = vmatprep.mubr.msk.f32.mxu0 %vm149_vm0, %v993_v7 }
 0x513   : > { %2312 = vmatmul.mubr.msk.f32.gmra.mrb[18].mxu0 %vm149_vm0, %v995_v51 }
 0x514   : > { %2314 = vmatprep.mubr.msk.f32.mxu0 %vm149_vm0, %v997_v52 }
 0x517   : > { %2315 = vmatmul.mubr.msk.f32.gmra.mrb[20].mxu0 %vm149_vm0, %v999_v11 }
 0x518   : > { %2317 = vmatprep.mubr.msk.f32.mxu0 %vm149_vm0, %v1001_v10 }
 0x51b   : > { %2318 = vmatmul.mubr.msk.f32.gmra.mrb[22].mxu0 %vm149_vm0, %v1003_v13 }
 0x5a1   : > { %v3293_v31 = vpop.f32.mrb[8].mxu0 }
 0x5a2   : > { %v3295_v38 = vpop.f32.mrb[9].mxu0 }
 0x5a9   : > { %v3297_v39 = vpop.f32.mrb[10].mxu0 }
 0x5aa   : > { %v3299_v29 = vpop.f32.mrb[11].mxu0 }
 0x5b1   : > { %v3301_v35 = vpop.f32.mrb[12].mxu0 }
 0x5b2   : > { %v3303_v43 = vpop.f32.mrb[13].mxu0 }
 0x5de   : > { %v3305_v45 = vpop.f32.mrb[14].mxu0 }
 0x5df   : > { %v3307_v41 = vpop.f32.mrb[15].mxu0 }
 0x5e2   : > { %v2310_v32 = vpop.f32.mrb[16].mxu0 }
 0x5e3   : > { %v1118_v42 = vpop.f32.mrb[17].mxu0  ;;  %v1160_v47 = vsel %vm303_vm2, %v2310_v32, -inf }
 0x5e4   : > { %1161 = vmax.xlane.f32.xlu1 %v1160_v47  ;;  %v1157_v48 = vsel %vm303_vm2, %v1118_v42, -inf }
 0x5e5   : > { %1158 = vmax.xlane.f32.xlu0 %v1157_v48 }
 0x5e6   : > { %v2313_v50 = vpop.f32.mrb[18].mxu0 }
 0x5e7   : > { %v1128_v44 = vpop.f32.mrb[19].mxu0  ;;  %v1166_v46 = vsel %vm303_vm2, %v2313_v50, -inf }
 0x5e8   : > { %v1163_v63 = vsel %vm303_vm2, %v1128_v44, -inf }
 0x5e9   : > { %1167 = vmax.xlane.f32.xlu0 %v1166_v46 }
 0x5ea   : > { %v2316_v54 = vpop.f32.mrb[20].mxu0 }
 0x5eb   : > { %v1172_v56 = vsel %vm303_vm2, %v2316_v54, -inf  ;;  %v1138_v60 = vpop.f32.mrb[21].mxu0 }
 0x5ec   : > { %1173 = vmax.xlane.f32.xlu1 %v1172_v56  ;;  %v1169_v3 = vsel %vm303_vm2, %v1138_v60, -inf }
 0x5ed   : > { %1164 = vmax.xlane.f32.xlu0 %v1163_v63 }
 0x5ee   : > { %v3314_v14 = vpop.f32.mrb[22].mxu0 }
 0x5ef   : > { %v1178_v49 = vsel %vm303_vm2, %v3314_v14, -inf  ;;  %v3319_v1 = vpop.f32.mrb[23].mxu0 }
 0x5f0   : > { %1179 = vmax.xlane.f32.xlu1 %v1178_v49  ;;  %v1175_v36 = vsel %vm303_vm2, %v3319_v1, -inf }
 0x5f1   : > { %1170 = vmax.xlane.f32.xlu0 %v1169_v3 }
 0x5f5   : > { %1176 = vmax.xlane.f32.xlu0 %v1175_v36 }
 0x601   : > { %2642 = vrot.lane.b32.xlu1 %v3173_v40, %s2845_s17 }
 0x605   : > { %2647 = vrot.lane.b32.xlu1 %v3179_v12, %s2845_s17 }
 0x609   : > { %2652 = vrot.lane.b32.xlu1 %v3185_v30, %s2845_s17 }
 0x60b   : > { %2637 = vrot.lane.b32.xlu0 %v3189_v9, %s2845_s17 }
 0x60d   : > { %2662 = vrot.lane.b32.xlu1 %v3021_v4, %s2846_s18 }
 0x60f   : > { %2657 = vrot.lane.b32.xlu0 %v3025_v6, %s2846_s18 }
 0x671   : > { %v1162_v2 = vpop.xlane.xlu1 %1161 }
 0x672   : > { %v1182_v57 = vsub.f32 %v2310_v32, %v1162_v2  ;;  %v1159_v15 = vpop.xlane.xlu0 %1158 }
 0x673   : > { %v1181_v40 = vsub.f32 %v1118_v42, %v1159_v15 }
 0x674   : > { %v1191_v16 = vmul.f32 1.442695, %v1182_v57 }
 0x675   : > { %v1189_v59 = vmul.f32 1.442695, %v1181_v40 }
 0x676   : > { %2760 = vpow2.f32 %v1191_v16  ;;  %v1168_v12 = vpop.xlane.xlu0 %1167 }
 0x677   : > { %2762 = vpow2.f32 %v1189_v59  ;;  %v1184_v30 = vsub.f32 %v2313_v50, %v1168_v12  ;;  %v2824_v12 = vld [vmem:[%s2871_s11 + $0x98] sm:$0xff] }
 0x679   : > { %v1195_v19 = vmul.f32 1.442695, %v1184_v30  ;;  %v1174_v5 = vpop.xlane.xlu1 %1173  ;;  %v2825_v30 = vld [vmem:[%s2871_s11 + $0xb0] sm:$0xff] }
 0x67a   : > { %v1186_v9 = vsub.f32 %v2316_v54, %v1174_v5  ;;  %v1165_v20 = vpop.xlane.xlu0 %1164 }
 0x67b   : > { %2764 = vpow2.f32 %v1195_v19  ;;  %v1183_v58 = vsub.f32 %v1128_v44, %v1165_v20  ;;  %v2671_v19 = vpack.i.bf16 %v2825_v30, %v2824_v12  ;;  %v2827_v20 = vld [vmem:[%s2871_s11 + $0x80] sm:$0xff] }
 0x67c   : > { %v1199_v4 = vmul.f32 1.442695, %v1186_v9  ;;  %v2826_v9 = vld [vmem:[%s2871_s11 + $0x68] sm:$0xff] }
 0x67d   : > { %v1193_v23 = vmul.f32 1.442695, %v1183_v58  ;;  %v3335_v27 = vpop.xlane.xlu1 %1179  ;;  %v2666_v58 = vpack.i.bf16 %v2827_v20, %v2826_v9 }
 0x67e   : > { %v1171_v6 = vpop.xlane.xlu0 %1170 }
 0x67f   : > { %2766 = vpow2.f32 %v1193_v23  ;;  %v1185_v33 = vsub.f32 %v1138_v60, %v1171_v6 }
 0x680   : > { %v3337_v34 = vpop.eup %2760  ;;  %2768 = vpow2.f32 %v1199_v4  ;;  %v1188_v4 = vsub.f32 %v3314_v14, %v3335_v27 }
 0x681   : > { %v3339_v37 = vpop.eup %2762  ;;  %v1197_v24 = vmul.f32 1.442695, %v1185_v33  ;;  %v1208_v53 = vsel %vm303_vm2, %v3337_v34, 0.0  ;;  %v2643_v55 = vpop.permute.xlu1 %2642 }
 0x682   : > { %1209 = vadd.xlane.f32.xlu1 %v1208_v53  ;;  %v1177_v61 = vpop.xlane.xlu0 %1176  ;;  %v1205_v62 = vsel %vm303_vm2, %v3339_v37, 0.0  ;;  %v2645_v51 = vunpack.i.h.bf16 %v2643_v55  ;;  %v2644_v52 = vunpack.i.l.bf16 %v2643_v55  ;;  %v1203_v23 = vmul.f32 1.442695, %v1188_v4 }
 0x683   : > { %1206 = vadd.xlane.f32.xlu0 %v1205_v62  ;;  %2770 = vpow2.f32 %v1197_v24  ;;  %v1187_v6 = vsub.f32 %v3319_v1, %v1177_v61 }
 0x684   : > { %v2512_v50 = vpack.c.bf16 %v2645_v51, %v2644_v52  ;;  %2772 = vpow2.f32 %v1203_v23 }
 0x685   : > { %v3345_v7 = vpop.eup %2764  ;;  %v2648_v11 = vpop.permute.xlu1 %2647  ;;  %v1201_v33 = vmul.f32 1.442695, %v1187_v6 }
 0x686   : > { %v1214_v10 = vsel %vm303_vm2, %v3345_v7, 0.0  ;;  %v2638_v13 = vpop.permute.xlu0 %2637  ;;  %v2650_v44 = vunpack.i.h.bf16 %v2648_v11  ;;  %v2649_v46 = vunpack.i.l.bf16 %v2648_v11 }
 0x687   : > { %1215 = vadd.xlane.f32.xlu1 %v1214_v10  ;;  %v2640_v32 = vunpack.i.h.bf16 %v2638_v13  ;;  %v2639_v42 = vunpack.i.l.bf16 %v2638_v13  ;;  %2774 = vpow2.f32 %v1201_v33 }
 0x688   : > { %v2516_v63 = vpack.c.bf16 %v2650_v44, %v2649_v46 }
 0x689   : > { %v3349_v47 = vpop.eup %2766  ;;  %v2508_v48 = vpack.c.bf16 %v2640_v32, %v2639_v42  ;;  %v2653_v56 = vpop.permute.xlu1 %2652 }
 0x68a   : > { %v1211_v54 = vsel %vm303_vm2, %v3349_v47, 0.0  ;;  %v3353_v60 = vpop.eup %2768  ;;  %v2655_v3 = vunpack.i.h.bf16 %v2653_v56  ;;  %v2654_v49 = vunpack.i.l.bf16 %v2653_v56  ;;  %v2658_v2 = vpop.permute.xlu0 %2657 }
 0x68b   : > { %1212 = vadd.xlane.f32.xlu0 %v1211_v54  ;;  %2509 = vmatprep.subr.bf16.mxu1 %v2508_v48  ;;  %v1220_v36 = vsel %vm303_vm2, %v3353_v60, 0.0  ;;  %v2660_v40 = vunpack.i.h.bf16 %v2658_v2  ;;  %v2659_v16 = vunpack.i.l.bf16 %v2658_v2 }
 0x68c   : > { %2511 = vmatpush3.bf16.msra.mxu1 %v2508_v48  ;;  %v2520_v15 = vpack.c.bf16 %v2655_v3, %v2654_v49 }
 0x68d   : > { %2513 = vmatprep.subr.bf16.mxu1 %v2512_v50  ;;  %v3357_v57 = vpop.eup %2770  ;;  %v2524_v5 = vpack.c.bf16 %v2660_v40, %v2659_v16 }
 0x68e   : > { %v1217_v59 = vsel %vm303_vm2, %v3357_v57, 0.0 }
 0x68f   : > { %1221 = vadd.xlane.f32.xlu0 %v1220_v36 }
 0x690   : > { %2515 = vmatpush3.bf16.msra.mxu1 %v2512_v50 }
 0x691   : > { %2517 = vmatprep.subr.bf16.mxu1 %v2516_v63 }
 0x693   : > { %1218 = vadd.xlane.f32.xlu0 %v1217_v59 }
 0x694   : > { %2519 = vmatpush3.bf16.msra.mxu1 %v2516_v63 }
 0x695   : > { %2521 = vmatprep.subr.bf16.mxu1 %v2520_v15 }
 0x698   : > { %2672 = vrot.lane.b32.xlu1 %v2671_v19, %s2846_s18  ;;  %2523 = vmatpush3.bf16.msra.mxu1 %v2520_v15 }
 0x699   : > { %2526 = vmatprep.subr.msk.bf16.mxu1 %vm2875_vm1, %v2524_v5 }
 0x69c   : > { %1441 = vrot.lane.b32.xlu1 %v2934_v17, %s2846_s18  ;;  %v3382_v17 = vpop.eup %2772 }
 0x69d   : > { %v3386_v14 = vpop.eup %2774 }
 0x6a9   : > { %2667 = vrot.lane.b32.xlu0 %v2666_v58, %s2846_s18 }
 0x6ad   : > { %1439 = vrot.lane.b32.xlu0 %v2898_v8, %s2846_s18  ;;  %v1226_v8 = vsel %vm303_vm2, %v3382_v17, 0.0 }
 0x6b1   : > { %1443 = vrot.lane.b32.xlu0 %v2936_v18, %s2846_s18  ;;  %v1223_v18 = vsel %vm303_vm2, %v3386_v14, 0.0 }
 0x6b5   : > { %1447 = vrot.lane.b32.xlu0 %v2946_v22, %s2846_s18  ;;  %v2663_v22 = vpop.permute.xlu1 %2662 }
 0x6b6   : > { %v2665_v61 = vunpack.i.h.bf16 %v2663_v22  ;;  %v2664_v62 = vunpack.i.l.bf16 %v2663_v22 }
 0x6b9   : > { %1451 = vrot.lane.b32.xlu0 %v2956_v26, %s2846_s18 }
 0x6c0   : > { %1227 = vadd.xlane.f32.xlu1 %v1226_v8 }
 0x6c4   : > { %1224 = vadd.xlane.f32.xlu1 %v1223_v18 }
 0x6d5   : > { %1445 = vrot.lane.b32.xlu1 %v2942_v21, %s2846_s18 }
 0x6d9   : > { %1449 = vrot.lane.b32.xlu1 %v2952_v25, %s2846_s18 }
 0x6dd   : > { %1453 = vrot.lane.b32.xlu1 %v2961_v28, %s2846_s18  ;;  %v2530_v28 = vpack.c.bf16 %v2665_v61, %v2664_v62 }
 0x70f   : > { %v1210_v26 = vpop.xlane.xlu1 %1209 }
 0x710   : > { %2776 = vrcp.f32 %v1210_v26  ;;  %v1207_v1 = vpop.xlane.xlu0 %1206 }
 0x711   : > { %2778 = vrcp.f32 %v1207_v1 }
 0x714   : > { %v1216_v27 = vpop.xlane.xlu1 %1215 }
 0x715   : > { %2780 = vrcp.f32 %v1216_v27 }
 0x718   : > { %v1213_v24 = vpop.xlane.xlu0 %1212  ;;  %v2673_v50 = vpop.permute.xlu1 %2672 }
 0x719   : > { %2782 = vrcp.f32 %v1213_v24  ;;  %v2674_v54 = vunpack.i.l.bf16 %v2673_v50 }
 0x71a   : > { %v2777_v53 = vpop.eup %2776 }
 0x71b   : > { %v2779_v55 = vpop.eup %2778  ;;  %v1238_v25 = vmul.f32 %v2777_v53, %v3337_v34 }
 0x71c   : > { %v1222_v21 = vpop.xlane.xlu0 %1221  ;;  %v1237_v51 = vmul.f32 %v2779_v55, %v3339_v37  ;;  %v1442_v3 = vpop.permute.xlu1 %1441 }
 0x71d   : > { %2784 = vrcp.f32 %v1222_v21 }
 0x71e   : > { %2336 = vmatprep.mubr.msk.f32.mxu1 %vm303_vm2, %v1237_v51 }
 0x71f   : > { %2337 = vmatmul.mubr.msk.f32.vlgmr.msra.gmra.mrb[16].mxu1 %vm303_vm2, %v1238_v25  ;;  %v2781_v11 = vpop.eup %2780 }
 0x720   : > { %2529 = vmatpush3.bf16.xpose.msk.msra.mxu1 %vm2875_vm1, %v2524_v5  ;;  %v1219_v52 = vpop.xlane.xlu0 %1218  ;;  %v1240_v34 = vmul.f32 %v2781_v11, %v3345_v7 }
 0x721   : > { %2786 = vrcp.f32 %v1219_v52  ;;  %2532 = vmatprep.subr.msk.bf16.mxu1 %vm2875_vm1, %v2530_v28  ;;  %v2829_v52 = vld [vmem:[%s2871_s11 + $0x58] sm:$0xff] }
 0x723   : > { %v2783_v10 = vpop.eup %2782 }
 0x724   : > { %v1239_v37 = vmul.f32 %v2783_v10, %v3349_v47  ;;  %v2668_v13 = vpop.permute.xlu0 %2667  ;;  %v2675_v47 = vunpack.i.h.bf16 %v2673_v50  ;;  %v2830_v10 = vld [vmem:[%s2871_s11 + $0x10] sm:$0xff] }
 0x725   : > { %v2670_v32 = vunpack.i.h.bf16 %v2668_v13  ;;  %v2669_v42 = vunpack.i.l.bf16 %v2668_v13 }
 0x726   : > { %2339 = vmatprep.mubr.msk.f32.mxu1 %vm303_vm2, %v1239_v37  ;;  %v2542_v63 = vpack.c.bf16 %v2675_v47, %v2674_v54  ;;  %v2831_v37 = vld [vmem:[%s2871_s11 + $0x28] sm:$0xff] }
 0x727   : > { %2340 = vmatmul.mubr.msk.f32.gmra.mrb[18].mxu1 %vm303_vm2, %v1240_v34  ;;  %v2536_v48 = vpack.c.bf16 %v2670_v32, %v2669_v42  ;;  %v2785_v44 = vpop.eup %2784  ;;  %v2676_v13 = vpack.i.bf16 %v2831_v37, %v2830_v10 }
 0x728   : > { %2535 = vmatpush3.bf16.xpose.msk.msra.mxu1 %vm2875_vm1, %v2530_v28  ;;  %v1242_v56 = vmul.f32 %v2785_v44, %v3353_v60  ;;  %v1440_v60 = vpop.permute.xlu0 %1439  ;;  %v2828_v28 = vld [vmem:[%s2871_s11 + $0x40] sm:$0xff] }
 0x729   : > { %2538 = vmatprep.subr.msk.bf16.mxu1 %vm2875_vm1, %v2536_v48  ;;  %v2681_v11 = vpack.i.bf16 %v2829_v52, %v2828_v28 }
 0x72b   : > { %v2787_v46 = vpop.eup %2786 }
 0x72c   : > { %v1241_v7 = vmul.f32 %v2787_v46, %v3357_v57  ;;  %v1444_v16 = vpop.permute.xlu0 %1443 }
 0x72e   : > { %2342 = vmatprep.mubr.msk.f32.mxu1 %vm303_vm2, %v1241_v7 }
 0x72f   : > { %2343 = vmatmul.mubr.msk.f32.gmra.mrb[20].mxu1 %vm303_vm2, %v1242_v56 }
 0x730   : > { %2541 = vmatpush3.bf16.xpose.msk.msra.mxu1 %vm2875_vm1, %v2536_v48  ;;  %v1448_v59 = vpop.permute.xlu0 %1447 }
 0x731   : > { %2544 = vmatprep.subr.msk.bf16.mxu1 %vm2875_vm1, %v2542_v63 }
 0x734   : > { %v1452_v30 = vpop.permute.xlu0 %1451 }
 0x738   : > { %2547 = vmatpush3.bf16.xpose.msk.msra.mxu1 %vm2875_vm1, %v2542_v63 }
 0x74d   : > { %v1228_v49 = vpop.xlane.xlu1 %1227 }
 0x74e   : > { %2788 = vrcp.f32 %v1228_v49 }
 0x751   : > { %v1225_v36 = vpop.xlane.xlu1 %1224 }
 0x752   : > { %2790 = vrcp.f32 %v1225_v36 }
 0x755   : > { %v1446_v0 = vpop.permute.xlu1 %1445 }
 0x758   : > { %v2789_v2 = vpop.eup %2788 }
 0x759   : > { %v1244_v40 = vmul.f32 %v2789_v2, %v3382_v17  ;;  %v1450_v12 = vpop.permute.xlu1 %1449 }
 0x75c   : > { %v2791_v57 = vpop.eup %2790 }
 0x75d   : > { %v1243_v15 = vmul.f32 %v2791_v57, %v3386_v14  ;;  %v1454_v19 = vpop.permute.xlu1 %1453 }
 0x75f   : > { %2345 = vmatprep.mubr.msk.f32.mxu1 %vm303_vm2, %v1243_v15 }
 0x760   : > { %2346 = vmatmul.mubr.msk.f32.gmra.mrb[22].mxu1 %vm303_vm2, %v1244_v40 }
 0x761   : > { %2364 = vmatprep.mubr.msk.f32.mxu1 %vm149_vm0, %v1440_v60 }
 0x764   : > { %2365 = vmatmul.mubr.msk.f32.vlgmr.msra.gmra.mrb[24].mxu1 %vm149_vm0, %v1442_v3 }
 0x765   : > { %2367 = vmatprep.mubr.msk.f32.mxu1 %vm149_vm0, %v1444_v16 }
 0x768   : > { %2368 = vmatmul.mubr.msk.f32.gmra.mrb[26].mxu1 %vm149_vm0, %v1446_v0 }
 0x769   : > { %2370 = vmatprep.mubr.msk.f32.mxu1 %vm149_vm0, %v1448_v59 }
 0x76c   : > { %2371 = vmatmul.mubr.msk.f32.gmra.mrb[28].mxu1 %vm149_vm0, %v1450_v12 }
 0x76d   : > { %2373 = vmatprep.mubr.msk.f32.mxu1 %vm149_vm0, %v1452_v30 }
 0x770   : > { %2374 = vmatmul.mubr.msk.f32.gmra.mrb[30].mxu1 %vm149_vm0, %v1454_v19 }
 0x7f2   : > { %v3434_v5 = vpop.f32.mrb[16].mxu1 }
 0x7f3   : > { %v3436_v9 = vpop.f32.mrb[17].mxu1 }
 0x7fa   : > { %v3438_v20 = vpop.f32.mrb[18].mxu1 }
 0x7fb   : > { %v3440_v58 = vpop.f32.mrb[19].mxu1 }
 0x802   : > { %v3442_v4 = vpop.f32.mrb[20].mxu1 }
 0x803   : > { %v3444_v23 = vpop.f32.mrb[21].mxu1 }
 0x833   : > { %v3446_v6 = vpop.f32.mrb[22].mxu1 }
 0x834   : > { %v3448_v33 = vpop.f32.mrb[23].mxu1 }
 0x837   : > { %v2366_v17 = vpop.f32.mrb[24].mxu1 }
 0x838   : > { %v1569_v8 = vpop.f32.mrb[25].mxu1  ;;  %v1611_v14 = vsel %vm303_vm2, %v2366_v17, -inf }
 0x839   : > { %1612 = vmax.xlane.f32.xlu1 %v1611_v14  ;;  %v1608_v18 = vsel %vm303_vm2, %v1569_v8, -inf }
 0x83a   : > { %1609 = vmax.xlane.f32.xlu0 %v1608_v18 }
 0x83b   : > { %v2369_v22 = vpop.f32.mrb[26].mxu1 }
 0x83c   : > { %v1579_v26 = vpop.f32.mrb[27].mxu1  ;;  %v1617_v1 = vsel %vm303_vm2, %v2369_v22, -inf }
 0x83d   : > { %v1614_v55 = vsel %vm303_vm2, %v1579_v26, -inf }
 0x83e   : > { %1618 = vmax.xlane.f32.xlu0 %v1617_v1 }
 0x83f   : > { %v2372_v27 = vpop.f32.mrb[28].mxu1 }
 0x840   : > { %v1589_v24 = vpop.f32.mrb[29].mxu1  ;;  %v1623_v53 = vsel %vm303_vm2, %v2372_v27, -inf }
 0x841   : > { %1624 = vmax.xlane.f32.xlu1 %v1623_v53  ;;  %v1620_v51 = vsel %vm303_vm2, %v1589_v24, -inf }
 0x842   : > { %1615 = vmax.xlane.f32.xlu0 %v1614_v55 }
 0x843   : > { %v2375_v61 = vpop.f32.mrb[30].mxu1 }
 0x844   : > { %v1599_v62 = vpop.f32.mrb[31].mxu1  ;;  %v1629_v21 = vsel %vm303_vm2, %v2375_v61, -inf }
 0x845   : > { %1630 = vmax.xlane.f32.xlu1 %v1629_v21  ;;  %v1626_v25 = vsel %vm303_vm2, %v1599_v62, -inf }
 0x846   : > { %1621 = vmax.xlane.f32.xlu0 %v1620_v51 }
 0x84a   : > { %1627 = vmax.xlane.f32.xlu0 %v1626_v25 }
 0x856   : > { %2682 = vrot.lane.b32.xlu1 %v2681_v11, %s2846_s18 }
 0x860   : > { %2677 = vrot.lane.b32.xlu0 %v2676_v13, %s2846_s18 }
 0x8c6   : > { %v1613_v34 = vpop.xlane.xlu1 %1612 }
 0x8c7   : > { %v1633_v32 = vsub.f32 %v2366_v17, %v1613_v34  ;;  %v1610_v42 = vpop.xlane.xlu0 %1609  ;;  %v2832_v34 = vld [vmem:[%s2871_s11 + $0xa0] sm:$0xff] }
 0x8c8   : > { %v1632_v48 = vsub.f32 %v1569_v8, %v1610_v42 }
 0x8c9   : > { %v1642_v50 = vmul.f32 1.442695, %v1633_v32  ;;  %v2833_v32 = vld [vmem:[%s2871_s11 + $0xb8] sm:$0xff] }
 0x8ca   : > { %v1640_v44 = vmul.f32 1.442695, %v1632_v48  ;;  %v2691_v42 = vpack.i.bf16 %v2833_v32, %v2832_v34  ;;  %v2834_v48 = vld [vmem:[%s2871_s11 + $0x70] sm:$0xff] }
 0x8cb   : > { %2792 = vpow2.f32 %v1642_v50  ;;  %v1619_v46 = vpop.xlane.xlu0 %1618  ;;  %v2835_v50 = vld [vmem:[%s2871_s11 + $0x88] sm:$0xff] }
 0x8cc   : > { %2794 = vpow2.f32 %v1640_v44  ;;  %v1635_v47 = vsub.f32 %v2369_v22, %v1619_v46  ;;  %v2686_v44 = vpack.i.bf16 %v2835_v50, %v2834_v48 }
 0x8ce   : > { %v1646_v54 = vmul.f32 1.442695, %v1635_v47  ;;  %v1625_v7 = vpop.xlane.xlu1 %1624 }
 0x8cf   : > { %v1637_v56 = vsub.f32 %v2372_v27, %v1625_v7  ;;  %v1616_v63 = vpop.xlane.xlu0 %1615 }
 0x8d0   : > { %2796 = vpow2.f32 %v1646_v54  ;;  %v1634_v3 = vsub.f32 %v1579_v26, %v1616_v63 }
 0x8d1   : > { %v1650_v49 = vmul.f32 1.442695, %v1637_v56 }
 0x8d2   : > { %v1644_v36 = vmul.f32 1.442695, %v1634_v3  ;;  %v1631_v60 = vpop.xlane.xlu1 %1630 }
 0x8d3   : > { %2798 = vpow2.f32 %v1650_v49  ;;  %v1639_v2 = vsub.f32 %v2375_v61, %v1631_v60  ;;  %v1622_v57 = vpop.xlane.xlu0 %1621 }
 0x8d4   : > { %2800 = vpow2.f32 %v1644_v36  ;;  %v1636_v15 = vsub.f32 %v1589_v24, %v1622_v57 }
 0x8d5   : > { %v3464_v40 = vpop.eup %2792  ;;  %v1654_v16 = vmul.f32 1.442695, %v1639_v2 }
 0x8d6   : > { %v3466_v0 = vpop.eup %2794  ;;  %v1648_v59 = vmul.f32 1.442695, %v1636_v15  ;;  %v1659_v12 = vsel %vm303_vm2, %v3464_v40, 0.0  ;;  %v2683_v8 = vpop.permute.xlu1 %2682 }
 0x8d7   : > { %2802 = vpow2.f32 %v1654_v16  ;;  %1660 = vadd.xlane.f32.xlu1 %v1659_v12  ;;  %v1628_v30 = vpop.xlane.xlu0 %1627  ;;  %v1656_v19 = vsel %vm303_vm2, %v3466_v0, 0.0  ;;  %v2685_v1 = vunpack.i.h.bf16 %v2683_v8  ;;  %v2684_v27 = vunpack.i.l.bf16 %v2683_v8 }
 0x8d8   : > { %2804 = vpow2.f32 %v1648_v59  ;;  %v1638_v17 = vsub.f32 %v1599_v62, %v1628_v30  ;;  %1657 = vadd.xlane.f32.xlu0 %v1656_v19 }
 0x8d9   : > { %v2552_v25 = vpack.c.bf16 %v2685_v1, %v2684_v27 }
 0x8da   : > { %v3472_v14 = vpop.eup %2796  ;;  %v1652_v18 = vmul.f32 1.442695, %v1638_v17 }
 0x8db   : > { %v1665_v22 = vsel %vm303_vm2, %v3472_v14, 0.0  ;;  %v2678_v26 = vpop.permute.xlu0 %2677 }
 0x8dc   : > { %2806 = vpow2.f32 %v1652_v18  ;;  %1666 = vadd.xlane.f32.xlu1 %v1665_v22  ;;  %v2680_v24 = vunpack.i.h.bf16 %v2678_v26  ;;  %v2679_v53 = vunpack.i.l.bf16 %v2678_v26 }
 0x8dd   : > { %v3476_v55 = vpop.eup %2798 }
 0x8de   : > { %v3478_v61 = vpop.eup %2800  ;;  %v1671_v62 = vsel %vm303_vm2, %v3476_v55, 0.0  ;;  %v2548_v21 = vpack.c.bf16 %v2680_v24, %v2679_v53 }
 0x8df   : > { %v1662_v51 = vsel %vm303_vm2, %v3478_v61, 0.0 }
 0x8e0   : > { %1672 = vadd.xlane.f32.xlu1 %v1671_v62  ;;  %1663 = vadd.xlane.f32.xlu0 %v1662_v51 }
 0x8e1   : > { %v3484_v28 = vpop.eup %2802  ;;  %2549 = vmatprep.subr.bf16.mxu0 %v2548_v21 }
 0x8e2   : > { %v3486_v52 = vpop.eup %2804  ;;  %v1677_v11 = vsel %vm303_vm2, %v3484_v28, 0.0  ;;  %2551 = vmatpush3.bf16.msra.mxu0 %v2548_v21 }
 0x8e3   : > { %v1668_v10 = vsel %vm303_vm2, %v3486_v52, 0.0  ;;  %2553 = vmatprep.subr.bf16.mxu0 %v2552_v25 }
 0x8e4   : > { %1678 = vadd.xlane.f32.xlu1 %v1677_v11  ;;  %1669 = vadd.xlane.f32.xlu0 %v1668_v10 }
 0x8e6   : > { %v3492_v37 = vpop.eup %2806  ;;  %2555 = vmatpush3.bf16.msra.mxu0 %v2552_v25 }
 0x8e7   : > { %v1674_v13 = vsel %vm303_vm2, %v3492_v37, 0.0 }
 0x8e8   : > { %1675 = vadd.xlane.f32.xlu1 %v1674_v13 }
 0x8f9   : > { %2692 = vrot.lane.b32.xlu1 %v2691_v42, %s2846_s18 }
 0x8fa   : > { %2687 = vrot.lane.b32.xlu0 %v2686_v44, %s2846_s18 }
 0x8fd   : > { %957 = vrot.lane.b32.xlu1 %v3293_v31, %s2846_s18 }
 0x8fe   : > { %955 = vrot.lane.b32.xlu0 %v3295_v38, %s2846_s18 }
 0x901   : > { %961 = vrot.lane.b32.xlu1 %v3297_v39, %s2846_s18 }
 0x902   : > { %959 = vrot.lane.b32.xlu0 %v3299_v29, %s2846_s18 }
 0x905   : > { %965 = vrot.lane.b32.xlu1 %v3301_v35, %s2846_s18 }
 0x906   : > { %963 = vrot.lane.b32.xlu0 %v3303_v43, %s2846_s18 }
 0x909   : > { %969 = vrot.lane.b32.xlu1 %v3305_v45, %s2846_s18 }
 0x90a   : > { %967 = vrot.lane.b32.xlu0 %v3307_v41, %s2846_s18 }
 0x90d   : > { %1408 = vrot.lane.b32.xlu1 %v3434_v5, %s2845_s17 }
 0x90e   : > { %1406 = vrot.lane.b32.xlu0 %v3436_v9, %s2845_s17 }
 0x911   : > { %1412 = vrot.lane.b32.xlu1 %v3438_v20, %s2845_s17 }
 0x912   : > { %1410 = vrot.lane.b32.xlu0 %v3440_v58, %s2845_s17 }
 0x915   : > { %1416 = vrot.lane.b32.xlu1 %v3442_v4, %s2845_s17 }
 0x916   : > { %1414 = vrot.lane.b32.xlu0 %v3444_v23, %s2845_s17 }
 0x919   : > { %1420 = vrot.lane.b32.xlu1 %v3446_v6, %s2845_s17 }
 0x91a   : > { %1418 = vrot.lane.b32.xlu0 %v3448_v33, %s2845_s17 }
 0x964   : > { %v1661_v31 = vpop.xlane.xlu1 %1660 }
 0x965   : > { %v1658_v38 = vpop.xlane.xlu0 %1657 }
 0x966   : > { %2808 = vrcp.f32 %v1658_v38 }
 0x967   : > { %2810 = vrcp.f32 %v1661_v31 }
 0x969   : > { %v1667_v39 = vpop.xlane.xlu1 %1666 }
 0x96d   : > { %v1673_v29 = vpop.xlane.xlu1 %1672  ;;  %v1664_v35 = vpop.xlane.xlu0 %1663 }
 0x96e   : > { %2812 = vrcp.f32 %v1664_v35 }
 0x96f   : > { %2814 = vrcp.f32 %v1667_v39 }
 0x970   : > { %v2809_v43 = vpop.eup %2808 }
 0x971   : > { %v1679_v45 = vpop.xlane.xlu1 %1678  ;;  %v1670_v41 = vpop.xlane.xlu0 %1669  ;;  %v1688_v5 = vmul.f32 %v2809_v43, %v3466_v0 }
 0x972   : > { %2816 = vrcp.f32 %v1670_v41  ;;  %v2811_v7 = vpop.eup %2810 }
 0x973   : > { %2392 = vmatprep.mubr.msk.f32.mxu0 %vm303_vm2, %v1688_v5  ;;  %2818 = vrcp.f32 %v1673_v29  ;;  %v1689_v49 = vmul.f32 %v2811_v7, %v3464_v40 }
 0x975   : > { %v1676_v9 = vpop.xlane.xlu1 %1675  ;;  %v2688_v20 = vpop.permute.xlu0 %2687 }
 0x976   : > { %v2690_v58 = vunpack.i.h.bf16 %v2688_v20  ;;  %v2689_v4 = vunpack.i.l.bf16 %v2688_v20  ;;  %2820 = vrcp.f32 %v1676_v9 }
 0x977   : > { %2822 = vrcp.f32 %v1679_v45 }
 0x978   : > { %v2556_v23 = vpack.c.bf16 %v2690_v58, %v2689_v4  ;;  %v2813_v3 = vpop.eup %2812 }
 0x979   : > { %v2693_v6 = vpop.permute.xlu1 %2692  ;;  %v956_v33 = vpop.permute.xlu0 %955  ;;  %v1690_v57 = vmul.f32 %v2813_v3, %v3478_v61 }
 0x97a   : > { %v2695_v46 = vunpack.i.h.bf16 %v2693_v6  ;;  %v2694_v47 = vunpack.i.l.bf16 %v2693_v6  ;;  %980 = vst.msk [vmem:[%s3139_s16] sm:$0xff] %vm979_vm3, %v956_v33  ;;  %2557 = vmatprep.subr.bf16.mxu0 %v2556_v23  ;;  %v2815_v36 = vpop.eup %2814 }
 0x97b   : > { %2559 = vmatpush3.bf16.msra.mxu0 %v2556_v23  ;;  %v1691_v16 = vmul.f32 %v2815_v36, %v3472_v14 }
 0x97c   : > { %v2560_v54 = vpack.c.bf16 %v2695_v46, %v2694_v47  ;;  %v2817_v15 = vpop.eup %2816 }
 0x97d   : > { %v958_v56 = vpop.permute.xlu1 %957  ;;  %v960_v63 = vpop.permute.xlu0 %959  ;;  %v1692_v12 = vmul.f32 %v2817_v15, %v3486_v52 }
 0x97e   : > { %981 = vst.msk [vmem:[%s3139_s16 + $0x8] sm:$0xff] %vm979_vm3, %v958_v56  ;;  %982 = vst.msk [vmem:[%s3139_s16 + $0x10] sm:$0xff] %vm979_vm3, %v960_v63  ;;  %2561 = vmatprep.subr.bf16.mxu0 %v2560_v54  ;;  %v2819_v40 = vpop.eup %2818 }
 0x97f   : > { %2563 = vmatpush3.bf16.msra.mxu0 %v2560_v54  ;;  %v1693_v19 = vmul.f32 %v2819_v40, %v3476_v55 }
 0x980   : > { %v2821_v30 = vpop.eup %2820 }
 0x981   : > { %v962_v60 = vpop.permute.xlu1 %961  ;;  %v964_v2 = vpop.permute.xlu0 %963  ;;  %v1694_v18 = vmul.f32 %v2821_v30, %v3492_v37 }
 0x982   : > { %983 = vst.msk [vmem:[%s3139_s16 + $0x18] sm:$0xff] %vm979_vm3, %v962_v60  ;;  %984 = vst.msk [vmem:[%s3139_s16 + $0x20] sm:$0xff] %vm979_vm3, %v964_v2  ;;  %2393 = vmatmul.mubr.msk.f32.vlgmr.msra.gmra.mrb[24].mxu0 %vm303_vm2, %v1689_v49  ;;  %v2823_v17 = vpop.eup %2822 }
 0x983   : > { %2395 = vmatprep.mubr.msk.f32.mxu0 %vm303_vm2, %v1690_v57  ;;  %v1695_v22 = vmul.f32 %v2823_v17, %v3484_v28 }
 0x985   : > { %v966_v0 = vpop.permute.xlu1 %965  ;;  %v968_v59 = vpop.permute.xlu0 %967 }
 0x986   : > { %985 = vst.msk [vmem:[%s3139_s16 + $0x28] sm:$0xff] %vm979_vm3, %v966_v0  ;;  %986 = vst.msk [vmem:[%s3139_s16 + $0x30] sm:$0xff] %vm979_vm3, %v968_v59  ;;  %2396 = vmatmul.mubr.msk.f32.gmra.mrb[26].mxu0 %vm303_vm2, %v1691_v16 }
 0x987   : > { %2398 = vmatprep.mubr.msk.f32.mxu0 %vm303_vm2, %v1692_v12 }
 0x989   : > { %v970_v8 = vpop.permute.xlu1 %969  ;;  %v1407_v14 = vpop.permute.xlu0 %1406 }
 0x98a   : > { %987 = vst.msk [vmem:[%s3139_s16 + $0x38] sm:$0xff] %vm979_vm3, %v970_v8  ;;  %2399 = vmatmul.mubr.msk.f32.gmra.mrb[28].mxu0 %vm303_vm2, %v1693_v19 }
 0x98b   : > { %1431 = vst.msk [vmem:[%s3139_s16] sm:$0xff] %vm1430_vm4, %v1407_v14  ;;  %2401 = vmatprep.mubr.msk.f32.mxu0 %vm303_vm2, %v1694_v18 }
 0x98d   : > { %v1409_v26 = vpop.permute.xlu1 %1408  ;;  %v1411_v1 = vpop.permute.xlu0 %1410 }
 0x98e   : > { %1432 = vst.msk [vmem:[%s3139_s16 + $0x8] sm:$0xff] %vm1430_vm4, %v1409_v26  ;;  %1433 = vst.msk [vmem:[%s3139_s16 + $0x10] sm:$0xff] %vm1430_vm4, %v1411_v1  ;;  %2402 = vmatmul.mubr.msk.f32.gmra.mrb[30].mxu0 %vm303_vm2, %v1695_v22 }
 0x991   : > { %v1413_v27 = vpop.permute.xlu1 %1412  ;;  %v1415_v24 = vpop.permute.xlu0 %1414 }
 0x992   : > { %1434 = vst.msk [vmem:[%s3139_s16 + $0x18] sm:$0xff] %vm1430_vm4, %v1413_v27  ;;  %1435 = vst.msk [vmem:[%s3139_s16 + $0x20] sm:$0xff] %vm1430_vm4, %v1415_v24 }
 0x995   : > { %v1417_v53 = vpop.permute.xlu1 %1416  ;;  %v1419_v55 = vpop.permute.xlu0 %1418 }
 0x996   : > { %1436 = vst.msk [vmem:[%s3139_s16 + $0x28] sm:$0xff] %vm1430_vm4, %v1417_v53  ;;  %1437 = vst.msk [vmem:[%s3139_s16 + $0x30] sm:$0xff] %vm1430_vm4, %v1419_v55 }
 0x999   : > { %v1421_v61 = vpop.permute.xlu1 %1420 }
 0x99a   : > { %1438 = vst.msk [vmem:[%s3139_s16 + $0x38] sm:$0xff] %vm1430_vm4, %v1421_v61 }
 0xa55   : > { %v2394_v62 = vpop.f32.mrb[24].mxu0 }
 0xa56   : > { %1859 = vrot.lane.b32.xlu1 %v2394_v62, %s2844_s12  ;;  %v1810_v21 = vpop.f32.mrb[25].mxu0 }
 0xa57   : > { %1857 = vrot.lane.b32.xlu0 %v1810_v21, %s2844_s12 }
 0xa59   : > { %v2397_v51 = vpop.f32.mrb[26].mxu0 }
 0xa5a   : > { %1863 = vrot.lane.b32.xlu1 %v2397_v51, %s2844_s12  ;;  %v1820_v25 = vpop.f32.mrb[27].mxu0 }
 0xa5b   : > { %1861 = vrot.lane.b32.xlu0 %v1820_v25, %s2844_s12 }
 0xa5d   : > { %v2400_v28 = vpop.f32.mrb[28].mxu0 }
 0xa5e   : > { %1867 = vrot.lane.b32.xlu1 %v2400_v28, %s2844_s12  ;;  %v1830_v52 = vpop.f32.mrb[29].mxu0 }
 0xa5f   : > { %1865 = vrot.lane.b32.xlu0 %v1830_v52, %s2844_s12 }
 0xa61   : > { %v2403_v11 = vpop.f32.mrb[30].mxu0 }
 0xa62   : > { %1871 = vrot.lane.b32.xlu1 %v2403_v11, %s2844_s12  ;;  %v1840_v10 = vpop.f32.mrb[31].mxu0 }
 0xa63   : > { %1869 = vrot.lane.b32.xlu0 %v1840_v10, %s2844_s12 }
 0xac8   : > { %v1860_v37 = vpop.permute.xlu1 %1859 }
 0xac9   : > { %1883 = vst.msk [vmem:[%s3139_s16 + $0x8] sm:$0xff] %vm1881_vm5, %v1860_v37  ;;  %v1858_v13 = vpop.permute.xlu0 %1857 }
 0xaca   : > { %1882 = vst.msk [vmem:[%s3139_s16] sm:$0xff] %vm1881_vm5, %v1858_v13 }
 0xacc   : > { %v1864_v34 = vpop.permute.xlu1 %1863 }
 0xacd   : > { %1885 = vst.msk [vmem:[%s3139_s16 + $0x18] sm:$0xff] %vm1881_vm5, %v1864_v34  ;;  %v1862_v32 = vpop.permute.xlu0 %1861 }
 0xace   : > { %1884 = vst.msk [vmem:[%s3139_s16 + $0x10] sm:$0xff] %vm1881_vm5, %v1862_v32 }
 0xad0   : > { %v1868_v42 = vpop.permute.xlu1 %1867 }
 0xad1   : > { %1887 = vst.msk [vmem:[%s3139_s16 + $0x28] sm:$0xff] %vm1881_vm5, %v1868_v42  ;;  %v1866_v48 = vpop.permute.xlu0 %1865 }
 0xad2   : > { %1886 = vst.msk [vmem:[%s3139_s16 + $0x20] sm:$0xff] %vm1881_vm5, %v1866_v48 }
 0xad4   : > { %v1872_v50 = vpop.permute.xlu1 %1871 }
 0xad5   : > { %1889 = vst.msk [vmem:[%s3139_s16 + $0x38] sm:$0xff] %vm1881_vm5, %v1872_v50  ;;  %v1870_v44 = vpop.permute.xlu0 %1869 }
 0xad6   : > { %1888 = vst.msk [vmem:[%s3139_s16 + $0x30] sm:$0xff] %vm1881_vm5, %v1870_v44 }
 0xad7 PF: > { %s11_s6 = sadd.s32 1, %s2842_s6  }
 0xad8   : > { %p8_p4 = scmp.ge.s32.totalorder %s11_s6, 4  }
 0xada   :  { %10 = sbr.rel (!%p8_p4) target bundleno = 1 (0x1), region = 54 }

// kernel: spatial_transformer_forward.15
= control target key start
LH: loop header
LB: loop body
LE: loop exit
PB: predicated region body
PF: predicated region fallthrough
CT: control target
= control target key end

     0   :  { %s803_s15 = smov 0   ;;  %s805_s16 = smov 0   ;;  %s937_s0 = inlined_call_operand.vmem [shape: f32[128,128], index: 0, kind: input, shape index: {}]   ;;  %s938_s1 = inlined_call_operand.vmem [shape: f32[1,128], index: 1, kind: input, shape index: {}]   ;;  %s939_s2 = inlined_call_operand.vmem [shape: f32[1,128], index: 2, kind: input, shape index: {}]   ;;  %s940_s3 = inlined_call_operand.vmem [shape: f32[128,128], index: 3, kind: input, shape index: {}]   ;;  %s941_s4 = inlined_call_operand.vmem [shape: f32[128,128], index: 4, kind: output, shape index: {}]  }
   0x1   :  { %s807_s17 = smov 0  }
   0x2 LB: > { %s26_s18 = sadd.s32 1, %s772_s16  ;;  %p589_p0 = scmp.ge.s32.totalorder %s776_s17, 1  ;;  %s776_s17 = sphi %s807_s17, %s14_s17   ;;  %s772_s16 = sphi %s805_s16, %s943_s16   ;;  %s768_s15 = sphi %s803_s15, %s942_s15  }
   0x3   : > { %p28_p1 = scmp.ge.s32.totalorder %s26_s18, 2  ;;  %p186_p2 = scmp.lt.s32.totalorder %s776_s17, 3 }
   0x5   : > { %s945_s18 = smov (%p28_p1, %s26_s18), 0  ;;  %p187_p3 = pnand %p589_p0, %p186_p2 }
   0x6   : > { %s590_s19 = sshll.u32 (!%p187_p3), %s768_s15, 3  ;;  %v365_v8 = vld [vmem:[%s940_s3] sm:$0xff] (!%p187_p3)  ;;  %v366_v9 = vld [vmem:[%s940_s3 + $0x8] sm:$0xff] (!%p187_p3)  ;;  %v367_v10 = vld [vmem:[%s940_s3 + $0x10] sm:$0xff] (!%p187_p3) }
   0x7   : > { %190 = sbr.rel (%p187_p3) target bundleno = 559 (0x22f), region = 36  ;;  %p220_p4 = scmp.lt.s32.totalorder (!%p187_p3), %s590_s19, 15  ;;  %v666_v11 = vpack.c.bf16 (!%p187_p3), %v366_v9, %v365_v8  ;;  %v368_v12 = vld [vmem:[%s940_s3 + $0x18] sm:$0xff] (!%p187_p3)  ;;  %v369_v46 = vld [vmem:[%s940_s3 + $0x20] sm:$0xff] (!%p187_p3)  ;;  %v370_v47 = vld [vmem:[%s940_s3 + $0x28] sm:$0xff] (!%p187_p3) }
   0x8   : > { %v670_v13 = vpack.c.bf16 (!%p187_p3), %v368_v12, %v367_v10  ;;  %v674_v48 = vpack.c.bf16 (!%p187_p3), %v370_v47, %v369_v46  ;;  %v371_v49 = vld [vmem:[%s940_s3 + $0x30] sm:$0xff] (!%p187_p3)  ;;  %v372_v50 = vld [vmem:[%s940_s3 + $0x38] sm:$0xff] (!%p187_p3)  ;;  %v373_v52 = vld [vmem:[%s940_s3 + $0x40] sm:$0xff] (!%p187_p3) }
   0x9   : > { %667 = vmatprep.subr.bf16.mxu0 (!%p187_p3), %v666_v11  ;;  %698 = vmatprep.subr.bf16.mxu1 (!%p187_p3), %v666_v11  ;;  %v678_v51 = vpack.c.bf16 (!%p187_p3), %v372_v50, %v371_v49  ;;  %v374_v53 = vld [vmem:[%s940_s3 + $0x48] sm:$0xff] (!%p187_p3)  ;;  %v375_v55 = vld [vmem:[%s940_s3 + $0x50] sm:$0xff] (!%p187_p3)  ;;  %v376_v56 = vld [vmem:[%s940_s3 + $0x58] sm:$0xff] (!%p187_p3) }
   0xa   : > { %669 = vmatpush3.bf16.msra.mxu0 (!%p187_p3), %v666_v11  ;;  %706 = vmatpush3.bf16.msra.mxu1 (!%p187_p3), %v666_v11  ;;  %v682_v54 = vpack.c.bf16 (!%p187_p3), %v374_v53, %v373_v52  ;;  %v686_v57 = vpack.c.bf16 (!%p187_p3), %v376_v56, %v375_v55  ;;  %v377_v58 = vld [vmem:[%s940_s3 + $0x60] sm:$0xff] (!%p187_p3)  ;;  %v378_v59 = vld [vmem:[%s940_s3 + $0x68] sm:$0xff] (!%p187_p3)  ;;  %v379_v61 = vld [vmem:[%s940_s3 + $0x70] sm:$0xff] (!%p187_p3) }
   0xb   : > { %671 = vmatprep.subr.bf16.mxu0 (!%p187_p3), %v670_v13  ;;  %699 = vmatprep.subr.bf16.mxu1 (!%p187_p3), %v670_v13  ;;  %v690_v60 = vpack.c.bf16 (!%p187_p3), %v378_v59, %v377_v58  ;;  %v380_v62 = vld [vmem:[%s940_s3 + $0x78] sm:$0xff] (!%p187_p3) }
   0xc   : > { %v694_v63 = vpack.c.bf16 (!%p187_p3), %v380_v62, %v379_v61 }
   0xe   : > { %s947_s19 = smov (!%p220_p4, %s590_s19), 15  ;;  %673 = vmatpush3.bf16.msra.mxu0 %v670_v13  ;;  %707 = vmatpush3.bf16.msra.mxu1 %v670_v13 }
   0xf   : > { %s591_s20 = sshll.u32 %s947_s19, 3  ;;  %675 = vmatprep.subr.bf16.mxu0 %v674_v48  ;;  %700 = vmatprep.subr.bf16.mxu1 %v674_v48 }
  0x10   : > { %s223_s23 = scalar_lea.vmem %s937_s0, %s591_s20  ;;  %s236_s15 = scalar_lea.vmem %s941_s4, %s591_s20 }
  0x11   : > { %v238_v0 = vld [vmem:[%s223_s23] sm:$0xff]  ;;  %v239_v1 = vld [vmem:[%s223_s23 + $0x8] sm:$0xff]  ;;  %v240_v4 = vld [vmem:[%s223_s23 + $0x10] sm:$0xff] }
  0x12   : > { %246 = vadd.xlane.f32.xlu0 %v238_v0  ;;  %248 = vadd.xlane.f32.xlu1 %v239_v1  ;;  %v242_v2 = vld [vmem:[%s223_s23 + $0x20] sm:$0xff]  ;;  %v243_v3 = vld [vmem:[%s223_s23 + $0x28] sm:$0xff]  ;;  %v244_v5 = vld [vmem:[%s223_s23 + $0x30] sm:$0xff] }
  0x13   : > { %v241_v6 = vld [vmem:[%s223_s23 + $0x18] sm:$0xff]  ;;  %677 = vmatpush3.bf16.msra.mxu0 %v674_v48  ;;  %708 = vmatpush3.bf16.msra.mxu1 %v674_v48 }
  0x14   : > { %v245_v7 = vld [vmem:[%s223_s23 + $0x38] sm:$0xff]  ;;  %679 = vmatprep.subr.bf16.mxu0 %v678_v51  ;;  %701 = vmatprep.subr.bf16.mxu1 %v678_v51 }
  0x16   : > { %254 = vadd.xlane.f32.xlu0 %v242_v2  ;;  %256 = vadd.xlane.f32.xlu1 %v243_v3 }
  0x17   : > { %681 = vmatpush3.bf16.msra.mxu0 %v678_v51  ;;  %709 = vmatpush3.bf16.msra.mxu1 %v678_v51 }
  0x18   : > { %683 = vmatprep.subr.bf16.mxu0 %v682_v54  ;;  %702 = vmatprep.subr.bf16.mxu1 %v682_v54 }
  0x1a   : > { %250 = vadd.xlane.f32.xlu0 %v240_v4  ;;  %258 = vadd.xlane.f32.xlu1 %v244_v5 }
  0x1b   : > { %685 = vmatpush3.bf16.msra.mxu0 %v682_v54  ;;  %710 = vmatpush3.bf16.msra.mxu1 %v682_v54 }
  0x1c   : > { %687 = vmatprep.subr.bf16.mxu0 %v686_v57  ;;  %703 = vmatprep.subr.bf16.mxu1 %v686_v57 }
  0x1e   : > { %252 = vadd.xlane.f32.xlu0 %v241_v6  ;;  %260 = vadd.xlane.f32.xlu1 %v245_v7 }
  0x1f   : > { %689 = vmatpush3.bf16.msra.mxu0 %v686_v57  ;;  %711 = vmatpush3.bf16.msra.mxu1 %v686_v57 }
  0x20   : > { %691 = vmatprep.subr.bf16.mxu0 %v690_v60  ;;  %704 = vmatprep.subr.bf16.mxu1 %v690_v60 }
  0x23   : > { %693 = vmatpush3.bf16.msra.mxu0 %v690_v60  ;;  %712 = vmatpush3.bf16.msra.mxu1 %v690_v60 }
  0x24   : > { %695 = vmatprep.subr.bf16.mxu0 %v694_v63  ;;  %705 = vmatprep.subr.bf16.mxu1 %v694_v63 }
  0x27   : > { %697 = vmatpush3.bf16.msra.mxu0 %v694_v63  ;;  %713 = vmatpush3.bf16.msra.mxu1 %v694_v63 }
  0x9f   : > { %v247_v14 = vpop.xlane.xlu0 %246  ;;  %v249_v15 = vpop.xlane.xlu1 %248 }
  0xa0   : > { %v263_v16 = vmul.f32 0.0078125, %v247_v14  ;;  %v264_v17 = vmul.f32 0.0078125, %v249_v15 }
  0xa2   : > { %v841_v18 = vsub.f32 %v238_v0, %v263_v16  ;;  %v843_v19 = vsub.f32 %v239_v1, %v264_v17 }
  0xa3   : > { %v255_v20 = vpop.xlane.xlu0 %254  ;;  %v257_v21 = vpop.xlane.xlu1 %256 }
  0xa4   : > { %v267_v22 = vmul.f32 0.0078125, %v255_v20  ;;  %v279_v23 = vmul.f32 %v841_v18, %v841_v18  ;;  %v268_v24 = vmul.f32 0.0078125, %v257_v21  ;;  %v280_v27 = vmul.f32 %v843_v19, %v843_v19 }
  0xa6   : > { %v847_v25 = vsub.f32 %v242_v2, %v267_v22  ;;  %287 = vadd.xlane.f32.xlu0 %v279_v23  ;;  %v849_v26 = vsub.f32 %v243_v3, %v268_v24  ;;  %v594_v24 = vld [vmem:[%s938_s1] ss:$0 sm:$0xff] }
  0xa7   : > { %v251_v28 = vpop.xlane.xlu0 %250  ;;  %v259_v29 = vpop.xlane.xlu1 %258 }
  0xa8   : > { %v265_v30 = vmul.f32 0.0078125, %v251_v28  ;;  %v283_v31 = vmul.f32 %v847_v25, %v847_v25  ;;  %v269_v32 = vmul.f32 0.0078125, %v259_v29  ;;  %v284_v35 = vmul.f32 %v849_v26, %v849_v26 }
  0xaa   : > { %v855_v33 = vsub.f32 %v240_v4, %v265_v30  ;;  %289 = vadd.xlane.f32.xlu0 %v280_v27  ;;  %295 = vadd.xlane.f32.xlu1 %v283_v31  ;;  %v857_v34 = vsub.f32 %v244_v5, %v269_v32  ;;  %v595_v30 = vld [vmem:[%s939_s2] ss:$0 sm:$0xff] }
  0xab   : > { %v253_v36 = vpop.xlane.xlu0 %252  ;;  %v261_v37 = vpop.xlane.xlu1 %260 }
  0xac   : > { %v266_v38 = vmul.f32 0.0078125, %v253_v36  ;;  %v281_v39 = vmul.f32 %v855_v33, %v855_v33  ;;  %v270_v40 = vmul.f32 0.0078125, %v261_v37  ;;  %v285_v43 = vmul.f32 %v857_v34, %v857_v34 }
  0xae   : > { %v863_v41 = vsub.f32 %v241_v6, %v266_v38  ;;  %297 = vadd.xlane.f32.xlu1 %v284_v35  ;;  %291 = vadd.xlane.f32.xlu0 %v281_v39  ;;  %v865_v42 = vsub.f32 %v245_v7, %v270_v40 }
  0xb0   : > { %v282_v44 = vmul.f32 %v863_v41, %v863_v41  ;;  %v286_v45 = vmul.f32 %v865_v42, %v865_v42 }
  0xb2   : > { %299 = vadd.xlane.f32.xlu1 %v285_v43  ;;  %293 = vadd.xlane.f32.xlu0 %v282_v44 }
  0xb6   : > { %301 = vadd.xlane.f32.xlu1 %v286_v45 }
 0x133   : > { %v288_v0 = vpop.xlane.xlu0 %287 }
 0x134   : > { %v303_v1 = vmul.f32 0.0078125, %v288_v0 }
 0x136   : > { %v311_v2 = vadd.f32 1e-05, %v303_v1 }
 0x137   : > { %v296_v3 = vpop.xlane.xlu1 %295  ;;  %v290_v4 = vpop.xlane.xlu0 %289 }
 0x138   : > { %738 = vrsqrt.f32 %v311_v2  ;;  %v307_v5 = vmul.f32 0.0078125, %v296_v3  ;;  %v304_v6 = vmul.f32 0.0078125, %v290_v4 }
 0x13a   : > { %v315_v7 = vadd.f32 1e-05, %v307_v5  ;;  %v312_v8 = vadd.f32 1e-05, %v304_v6 }
 0x13b   : > { %v298_v9 = vpop.xlane.xlu1 %297  ;;  %v292_v10 = vpop.xlane.xlu0 %291 }
 0x13c   : > { %740 = vrsqrt.f32 %v315_v7  ;;  %v308_v11 = vmul.f32 0.0078125, %v298_v9  ;;  %v305_v12 = vmul.f32 0.0078125, %v292_v10 }
 0x13d   : > { %742 = vrsqrt.f32 %v312_v8 }
 0x13e   : > { %v316_v13 = vadd.f32 1e-05, %v308_v11  ;;  %v313_v14 = vadd.f32 1e-05, %v305_v12 }
 0x13f   : > { %v300_v15 = vpop.xlane.xlu1 %299  ;;  %v294_v16 = vpop.xlane.xlu0 %293 }
 0x140   : > { %744 = vrsqrt.f32 %v316_v13  ;;  %v309_v17 = vmul.f32 0.0078125, %v300_v15  ;;  %v306_v20 = vmul.f32 0.0078125, %v294_v16 }
 0x141   : > { %746 = vrsqrt.f32 %v313_v14 }
 0x142   : > { %v739_v21 = vpop.eup %738  ;;  %v317_v22 = vadd.f32 1e-05, %v309_v17  ;;  %v314_v23 = vadd.f32 1e-05, %v306_v20 }
 0x143   : > { %v302_v27 = vpop.xlane.xlu1 %301  ;;  %v327_v28 = vmul.f32 %v739_v21, %v841_v18 }
 0x144   : > { %748 = vrsqrt.f32 %v317_v22  ;;  %v310_v29 = vmul.f32 0.0078125, %v302_v27 }
 0x145   : > { %750 = vrsqrt.f32 %v314_v23  ;;  %v342_v31 = vmul.f32 %v594_v24, %v327_v28 }
 0x146   : > { %v741_v32 = vpop.eup %740  ;;  %v318_v35 = vadd.f32 1e-05, %v310_v29 }
 0x147   : > { %v743_v36 = vpop.eup %742  ;;  %v357_v37 = vadd.f32 %v595_v30, %v342_v31  ;;  %v331_v38 = vmul.f32 %v741_v32, %v847_v25 }
 0x148   : > { %752 = vrsqrt.f32 %v318_v35  ;;  %v328_v39 = vmul.f32 %v743_v36, %v843_v19 }
 0x149   : > { %654 = vmatprep.mubr.f32.mxu0 %v357_v37  ;;  %v346_v40 = vmul.f32 %v594_v24, %v331_v38 }
 0x14a   : > { %v745_v18 = vpop.eup %744  ;;  %v343_v43 = vmul.f32 %v594_v24, %v328_v39 }
 0x14b   : > { %v747_v44 = vpop.eup %746  ;;  %v361_v45 = vadd.f32 %v595_v30, %v346_v40  ;;  %v332_v46 = vmul.f32 %v745_v18, %v849_v26 }
 0x14c   : > { %v358_v47 = vadd.f32 %v595_v30, %v343_v43  ;;  %v329_v48 = vmul.f32 %v747_v44, %v855_v33 }
 0x14d   : > { %660 = vmatprep.mubr.f32.mxu1 %v361_v45  ;;  %v347_v49 = vmul.f32 %v594_v24, %v332_v46 }
 0x14e   : > { %v749_v50 = vpop.eup %748  ;;  %655 = vmatmul.mubr.f32.vlgmr.msra.gmra.mrb[0].mxu0 %v358_v47  ;;  %v344_v51 = vmul.f32 %v594_v24, %v329_v48 }
 0x14f   : > { %v751_v25 = vpop.eup %750  ;;  %v362_v52 = vadd.f32 %v595_v30, %v347_v49  ;;  %v333_v19 = vmul.f32 %v749_v50, %v857_v34 }
 0x150   : > { %v359_v53 = vadd.f32 %v595_v30, %v344_v51  ;;  %v330_v54 = vmul.f32 %v751_v25, %v863_v41 }
 0x151   : > { %661 = vmatmul.mubr.f32.vlgmr.msra.gmra.mrb[0].mxu1 %v362_v52  ;;  %v348_v55 = vmul.f32 %v594_v24, %v333_v19 }
 0x152   : > { %v753_v56 = vpop.eup %752  ;;  %657 = vmatprep.mubr.f32.mxu0 %v359_v53  ;;  %v345_v26 = vmul.f32 %v594_v24, %v330_v54 }
 0x153   : > { %v363_v57 = vadd.f32 %v595_v30, %v348_v55  ;;  %v334_v33 = vmul.f32 %v753_v56, %v865_v42 }
 0x154   : > { %v360_v58 = vadd.f32 %v595_v30, %v345_v26 }
 0x155   : > { %663 = vmatprep.mubr.f32.mxu1 %v363_v57  ;;  %v349_v59 = vmul.f32 %v594_v24, %v334_v33 }
 0x156   : > { %658 = vmatmul.mubr.f32.gmra.mrb[2].mxu0 %v360_v58 }
 0x157   : > { %v364_v60 = vadd.f32 %v595_v30, %v349_v59 }
 0x159   : > { %664 = vmatmul.mubr.f32.gmra.mrb[2].mxu1 %v364_v60 }
 0x221   : > { %v656_v34 = vpop.f32.mrb[0].mxu0 }
 0x222   : > { %487 = vst [vmem:[%s236_s15 + $0x8] sm:$0xff] %v656_v34  ;;  %v447_v41 = vpop.f32.mrb[1].mxu0 }
 0x223   : > { %486 = vst [vmem:[%s236_s15] sm:$0xff] %v447_v41 }
 0x224   : > { %v662_v61 = vpop.f32.mrb[0].mxu1 }
 0x225   : > { %491 = vst [vmem:[%s236_s15 + $0x28] sm:$0xff] %v662_v61  ;;  %v467_v62 = vpop.f32.mrb[1].mxu1 }
 0x226   : > { %490 = vst [vmem:[%s236_s15 + $0x20] sm:$0xff] %v467_v62 }
 0x229   : > { %v659_v42 = vpop.f32.mrb[2].mxu0 }
 0x22a   : > { %489 = vst [vmem:[%s236_s15 + $0x18] sm:$0xff] %v659_v42  ;;  %v457_v63 = vpop.f32.mrb[3].mxu0 }
 0x22b   : > { %488 = vst [vmem:[%s236_s15 + $0x10] sm:$0xff] %v457_v63 }
 0x22c   : > { %v665_v0 = vpop.f32.mrb[2].mxu1 }
 0x22d   : > { %493 = vst [vmem:[%s236_s15 + $0x38] sm:$0xff] %v665_v0  ;;  %v477_v1 = vpop.f32.mrb[3].mxu1 }
 0x22e   : > { %492 = vst [vmem:[%s236_s15 + $0x30] sm:$0xff] %v477_v1 }
 0x22f PF: > { %s14_s17 = sadd.s32 1, %s776_s17   ;;  %s942_s15 = smov %s772_s16 }
 0x230   : > { %p11_p5 = scmp.ge.s32.totalorder %s14_s17, 4   ;;  %s943_s16 = smov %s945_s18 }
 0x232   :  { %13 = sbr.rel (!%p11_p5) target bundleno = 2 (0x2), region = 69 }

// kernel: spatial_transformer_forward.16
= control target key start
LH: loop header
LB: loop body
LE: loop exit
PB: predicated region body
PF: predicated region fallthrough
CT: control target
= control target key end

     0   :  { %s686_s9 = smov 0   ;;  %s688_s10 = smov 0   ;;  %s864_s0 = inlined_call_operand.vmem [shape: f32[256,64], index: 0, kind: input, shape index: {}]   ;;  %s865_s1 = inlined_call_operand.vmem [shape: f32[64,256], index: 1, kind: input, shape index: {}]   ;;  %s866_s2 = inlined_call_operand.vmem [shape: f32[256,256], index: 2, kind: output, shape index: {}]  }
   0x1   :  { %s690_s11 = smov 0  }
   0x2 LB: > { %s24_s12 = sadd.s32 1, %s664_s10  ;;  %p572_p0 = scmp.ge.s32.totalorder %s668_s11, 1  ;;  %s668_s11 = sphi %s690_s11, %s12_s11   ;;  %s664_s10 = sphi %s688_s10, %s869_s10   ;;  %s660_s9 = sphi %s686_s9, %s868_s9  }
   0x3   : > { %p26_p1 = scmp.ge.s32.totalorder %s24_s12, 2  ;;  %p138_p2 = scmp.lt.s32.totalorder %s668_s11, 3 }
   0x5   : > { %s871_s12 = smov (%p26_p1, %s24_s12), 0  ;;  %p139_p3 = pnand %p572_p0, %p138_p2 }
   0x6   : > { %v211_v0 = vld [vmem:[%s865_s1 + $0x8] sm:$0xff] (!%p139_p3)  ;;  %v213_v1 = vld [vmem:[%s865_s1 + $0x18] sm:$0xff] (!%p139_p3)  ;;  %v210_v2 = vld [vmem:[%s865_s1] sm:$0xff] (!%p139_p3)  ;;  %s573_s19 = sshll.u32 (!%p139_p3), %s660_s9, 4  ;;  %v670_v7 = vmov (!%p139_p3), 0.0   ;;  %vm226_vm0 = vcmask (!%p139_p3), 523264  }
   0x7   : > { %142 = sbr.rel (%p139_p3) target bundleno = 267 (0x10b), region = 28  ;;  %v597_v3 = vpack.c.bf16 (!%p139_p3), %v213_v1, %v211_v0  ;;  %v212_v4 = vld [vmem:[%s865_s1 + $0x10] sm:$0xff] (!%p139_p3)  ;;  %v215_v5 = vld [vmem:[%s865_s1 + $0x28] sm:$0xff] (!%p139_p3)  ;;  %v217_v6 = vld [vmem:[%s865_s1 + $0x38] sm:$0xff] (!%p139_p3)  ;;  %339 = vmatprep.mubr.f32.mxu0 (!%p139_p3), %v670_v7  ;;  %387 = vmatprep.mubr.f32.mxu1 (!%p139_p3), %v670_v7  ;;  %p736_p4 = scmp.lt.s32.totalorder (!%p139_p3), %s573_s19, 31 }
   0x8   : > { %v599_v8 = vpack.c.bf16 (!%p139_p3), %v212_v4, %v210_v2  ;;  %v601_v9 = vpack.c.bf16 (!%p139_p3), %v217_v6, %v215_v5  ;;  %v214_v10 = vld [vmem:[%s865_s1 + $0x20] sm:$0xff] (!%p139_p3)  ;;  %v216_v11 = vld [vmem:[%s865_s1 + $0x30] sm:$0xff] (!%p139_p3)  ;;  %v219_v12 = vld [vmem:[%s865_s1 + $0x48] sm:$0xff] (!%p139_p3) }
   0x9   : > { %598 = vmatprep.subr.bf16.mxu0 (!%p139_p3), %v597_v3  ;;  %613 = vmatprep.subr.bf16.mxu1 (!%p139_p3), %v597_v3  ;;  %v221_v13 = vld [vmem:[%s865_s1 + $0x58] sm:$0xff] (!%p139_p3)  ;;  %v603_v14 = vpack.c.bf16 (!%p139_p3), %v216_v11, %v214_v10  ;;  %v218_v16 = vld [vmem:[%s865_s1 + $0x40] sm:$0xff] (!%p139_p3)  ;;  %v220_v17 = vld [vmem:[%s865_s1 + $0x50] sm:$0xff] (!%p139_p3) }
   0xa   : > { %600 = vmatpush1.bf16.msra.mxu0 (!%p139_p3), %v599_v8  ;;  %617 = vmatpush1.bf16.msra.mxu1 (!%p139_p3), %v599_v8  ;;  %v605_v15 = vpack.c.bf16 (!%p139_p3), %v221_v13, %v219_v12  ;;  %v223_v18 = vld [vmem:[%s865_s1 + $0x68] sm:$0xff] (!%p139_p3)  ;;  %v225_v19 = vld [vmem:[%s865_s1 + $0x78] sm:$0xff] (!%p139_p3)  ;;  %v607_v20 = vpack.c.bf16 (!%p139_p3), %v220_v17, %v218_v16  ;;  %v222_v22 = vld [vmem:[%s865_s1 + $0x60] sm:$0xff] (!%p139_p3) }
   0xb   : > { %602 = vmatprep.subr.bf16.mxu0 (!%p139_p3), %v601_v9  ;;  %614 = vmatprep.subr.bf16.mxu1 (!%p139_p3), %v601_v9  ;;  %v609_v21 = vpack.c.bf16 (!%p139_p3), %v225_v19, %v223_v18  ;;  %v224_v23 = vld [vmem:[%s865_s1 + $0x70] sm:$0xff] (!%p139_p3) }
   0xc   : > { %v611_v24 = vpack.c.bf16 (!%p139_p3), %v224_v23, %v222_v22 }
   0xe   : > { %s873_s19 = smov (!%p736_p4, %s573_s19), 31  ;;  %604 = vmatpush1.bf16.msra.mxu0 %v603_v14  ;;  %618 = vmatpush1.bf16.msra.mxu1 %v603_v14 }
   0xf   : > { %606 = vmatprep.subr.bf16.mxu0 %v605_v15  ;;  %615 = vmatprep.subr.bf16.mxu1 %v605_v15  ;;  %s574_s23 = sshll.u32 %s873_s19, 3  ;;  %s596_s27 = sshll.u32 %s873_s19, 4 }
  0x10   : > { %s769_s26 = scalar_lea.vmem %s864_s0, %s574_s23  ;;  %s821_s30 = scalar_lea.vmem %s866_s2, %s596_s27 }
  0x11   : > { %v194_v25 = vld [vmem:[%s769_s26] sm:$0xff]  ;;  %v195_v27 = vld [vmem:[%s769_s26 + $0x8] sm:$0xff]  ;;  %v196_v29 = vld [vmem:[%s769_s26 + $0x10] sm:$0xff] }
  0x12   : > { %608 = vmatpush1.bf16.msra.mxu0 %v607_v20  ;;  %619 = vmatpush1.bf16.msra.mxu1 %v607_v20  ;;  %v202_v26 = vld [vmem:[%s769_s26 + $0x40] sm:$0xff]  ;;  %v203_v28 = vld [vmem:[%s769_s26 + $0x48] sm:$0xff]  ;;  %v204_v30 = vld [vmem:[%s769_s26 + $0x50] sm:$0xff] }
  0x13   : > { %610 = vmatprep.subr.bf16.mxu0 %v609_v21  ;;  %616 = vmatprep.subr.bf16.mxu1 %v609_v21  ;;  %v197_v31 = vld [vmem:[%s769_s26 + $0x18] sm:$0xff]  ;;  %v198_v33 = vld [vmem:[%s769_s26 + $0x20] sm:$0xff]  ;;  %v199_v35 = vld [vmem:[%s769_s26 + $0x28] sm:$0xff] }
  0x14   : > { %v205_v32 = vld [vmem:[%s769_s26 + $0x58] sm:$0xff]  ;;  %v206_v34 = vld [vmem:[%s769_s26 + $0x60] sm:$0xff]  ;;  %v207_v36 = vld [vmem:[%s769_s26 + $0x68] sm:$0xff] }
  0x15   : > { %v200_v37 = vld [vmem:[%s769_s26 + $0x30] sm:$0xff]  ;;  %v201_v39 = vld [vmem:[%s769_s26 + $0x38] sm:$0xff] }
  0x16   : > { %612 = vmatpush1.bf16.msra.mxu0 %v611_v24  ;;  %620 = vmatpush1.bf16.msra.mxu1 %v611_v24  ;;  %v208_v38 = vld [vmem:[%s769_s26 + $0x70] sm:$0xff]  ;;  %v209_v40 = vld [vmem:[%s769_s26 + $0x78] sm:$0xff] }
  0x19   : > { %578 = vmatmul.mubr.msk.f32.vlgmr.msra.gmra.mrb[0].mxu0 %vm226_vm0, %v194_v25  ;;  %586 = vmatmul.mubr.msk.f32.vlgmr.msra.gmra.mrb[0].mxu1 %vm226_vm0, %v202_v26 }
  0x1a   : > { %345 = vmatprep.mubr.f32.mxu0 %v670_v7  ;;  %393 = vmatprep.mubr.f32.mxu1 %v670_v7 }
  0x1d   : > { %579 = vmatmul.mubr.msk.f32.gmra.mrb[2].mxu0 %vm226_vm0, %v195_v27  ;;  %587 = vmatmul.mubr.msk.f32.gmra.mrb[2].mxu1 %vm226_vm0, %v203_v28 }
  0x1e   : > { %351 = vmatprep.mubr.f32.mxu0 %v670_v7  ;;  %399 = vmatprep.mubr.f32.mxu1 %v670_v7 }
  0x21   : > { %580 = vmatmul.mubr.msk.f32.gmra.mrb[4].mxu0 %vm226_vm0, %v196_v29  ;;  %588 = vmatmul.mubr.msk.f32.gmra.mrb[4].mxu1 %vm226_vm0, %v204_v30 }
  0x22   : > { %357 = vmatprep.mubr.f32.mxu0 %v670_v7  ;;  %405 = vmatprep.mubr.f32.mxu1 %v670_v7 }
  0x25   : > { %581 = vmatmul.mubr.msk.f32.gmra.mrb[6].mxu0 %vm226_vm0, %v197_v31  ;;  %589 = vmatmul.mubr.msk.f32.gmra.mrb[6].mxu1 %vm226_vm0, %v205_v32 }
  0x26   : > { %363 = vmatprep.mubr.f32.mxu0 %v670_v7  ;;  %411 = vmatprep.mubr.f32.mxu1 %v670_v7 }
  0x29   : > { %582 = vmatmul.mubr.msk.f32.gmra.mrb[8].mxu0 %vm226_vm0, %v198_v33  ;;  %590 = vmatmul.mubr.msk.f32.gmra.mrb[8].mxu1 %vm226_vm0, %v206_v34 }
  0x2a   : > { %369 = vmatprep.mubr.f32.mxu0 %v670_v7  ;;  %417 = vmatprep.mubr.f32.mxu1 %v670_v7 }
  0x2d   : > { %583 = vmatmul.mubr.msk.f32.gmra.mrb[10].mxu0 %vm226_vm0, %v199_v35  ;;  %591 = vmatmul.mubr.msk.f32.gmra.mrb[10].mxu1 %vm226_vm0, %v207_v36 }
  0x2e   : > { %375 = vmatprep.mubr.f32.mxu0 %v670_v7  ;;  %423 = vmatprep.mubr.f32.mxu1 %v670_v7 }
  0x31   : > { %584 = vmatmul.mubr.msk.f32.gmra.mrb[12].mxu0 %vm226_vm0, %v200_v37  ;;  %592 = vmatmul.mubr.msk.f32.gmra.mrb[12].mxu1 %vm226_vm0, %v208_v38 }
  0x32   : > { %381 = vmatprep.mubr.f32.mxu0 %v670_v7  ;;  %429 = vmatprep.mubr.f32.mxu1 %v670_v7 }
  0x35   : > { %585 = vmatmul.mubr.msk.f32.gmra.mrb[14].mxu0 %vm226_vm0, %v201_v39  ;;  %593 = vmatmul.mubr.msk.f32.gmra.mrb[14].mxu1 %vm226_vm0, %v209_v40 }
  0xec   : > { %v341_v41 = vpop.f32.mrb[0].mxu0  ;;  %v389_v42 = vpop.f32.mrb[0].mxu1 }
  0xed   : > { %436 = vst [vmem:[%s821_s30] sm:$0xff] %v341_v41  ;;  %452 = vst [vmem:[%s821_s30 + $0x80] sm:$0xff] %v389_v42  ;;  %v343_v43 = vpop.f32.mrb[1].mxu0  ;;  %v391_v44 = vpop.f32.mrb[1].mxu1 }
  0xee   : > { %437 = vst [vmem:[%s821_s30 + $0x8] sm:$0xff] %v343_v43  ;;  %453 = vst [vmem:[%s821_s30 + $0x88] sm:$0xff] %v391_v44 }
  0xf0   : > { %v347_v45 = vpop.f32.mrb[2].mxu0  ;;  %v395_v46 = vpop.f32.mrb[2].mxu1 }
  0xf1   : > { %438 = vst [vmem:[%s821_s30 + $0x10] sm:$0xff] %v347_v45  ;;  %454 = vst [vmem:[%s821_s30 + $0x90] sm:$0xff] %v395_v46  ;;  %v349_v47 = vpop.f32.mrb[3].mxu0  ;;  %v397_v48 = vpop.f32.mrb[3].mxu1 }
  0xf2   : > { %439 = vst [vmem:[%s821_s30 + $0x18] sm:$0xff] %v349_v47  ;;  %455 = vst [vmem:[%s821_s30 + $0x98] sm:$0xff] %v397_v48 }
  0xf4   : > { %v353_v49 = vpop.f32.mrb[4].mxu0  ;;  %v401_v50 = vpop.f32.mrb[4].mxu1 }
  0xf5   : > { %440 = vst [vmem:[%s821_s30 + $0x20] sm:$0xff] %v353_v49  ;;  %456 = vst [vmem:[%s821_s30 + $0xa0] sm:$0xff] %v401_v50  ;;  %v355_v51 = vpop.f32.mrb[5].mxu0  ;;  %v403_v52 = vpop.f32.mrb[5].mxu1 }
  0xf6   : > { %441 = vst [vmem:[%s821_s30 + $0x28] sm:$0xff] %v355_v51  ;;  %457 = vst [vmem:[%s821_s30 + $0xa8] sm:$0xff] %v403_v52 }
  0xf8   : > { %v359_v53 = vpop.f32.mrb[6].mxu0  ;;  %v407_v54 = vpop.f32.mrb[6].mxu1 }
  0xf9   : > { %442 = vst [vmem:[%s821_s30 + $0x30] sm:$0xff] %v359_v53  ;;  %458 = vst [vmem:[%s821_s30 + $0xb0] sm:$0xff] %v407_v54  ;;  %v361_v55 = vpop.f32.mrb[7].mxu0  ;;  %v409_v56 = vpop.f32.mrb[7].mxu1 }
  0xfa   : > { %443 = vst [vmem:[%s821_s30 + $0x38] sm:$0xff] %v361_v55  ;;  %459 = vst [vmem:[%s821_s30 + $0xb8] sm:$0xff] %v409_v56 }
  0xfc   : > { %v365_v57 = vpop.f32.mrb[8].mxu0  ;;  %v413_v58 = vpop.f32.mrb[8].mxu1 }
  0xfd   : > { %444 = vst [vmem:[%s821_s30 + $0x40] sm:$0xff] %v365_v57  ;;  %460 = vst [vmem:[%s821_s30 + $0xc0] sm:$0xff] %v413_v58  ;;  %v367_v59 = vpop.f32.mrb[9].mxu0  ;;  %v415_v60 = vpop.f32.mrb[9].mxu1 }
  0xfe   : > { %445 = vst [vmem:[%s821_s30 + $0x48] sm:$0xff] %v367_v59  ;;  %461 = vst [vmem:[%s821_s30 + $0xc8] sm:$0xff] %v415_v60 }
 0x100   : > { %v371_v61 = vpop.f32.mrb[10].mxu0  ;;  %v419_v62 = vpop.f32.mrb[10].mxu1 }
 0x101   : > { %446 = vst [vmem:[%s821_s30 + $0x50] sm:$0xff] %v371_v61  ;;  %462 = vst [vmem:[%s821_s30 + $0xd0] sm:$0xff] %v419_v62  ;;  %v373_v63 = vpop.f32.mrb[11].mxu0  ;;  %v421_v0 = vpop.f32.mrb[11].mxu1 }
 0x102   : > { %447 = vst [vmem:[%s821_s30 + $0x58] sm:$0xff] %v373_v63  ;;  %463 = vst [vmem:[%s821_s30 + $0xd8] sm:$0xff] %v421_v0 }
 0x104   : > { %v377_v1 = vpop.f32.mrb[12].mxu0  ;;  %v425_v2 = vpop.f32.mrb[12].mxu1 }
 0x105   : > { %448 = vst [vmem:[%s821_s30 + $0x60] sm:$0xff] %v377_v1  ;;  %464 = vst [vmem:[%s821_s30 + $0xe0] sm:$0xff] %v425_v2  ;;  %v379_v3 = vpop.f32.mrb[13].mxu0  ;;  %v427_v4 = vpop.f32.mrb[13].mxu1 }
 0x106   : > { %449 = vst [vmem:[%s821_s30 + $0x68] sm:$0xff] %v379_v3  ;;  %465 = vst [vmem:[%s821_s30 + $0xe8] sm:$0xff] %v427_v4 }
 0x108   : > { %v383_v5 = vpop.f32.mrb[14].mxu0  ;;  %v431_v6 = vpop.f32.mrb[14].mxu1 }
 0x109   : > { %450 = vst [vmem:[%s821_s30 + $0x70] sm:$0xff] %v383_v5  ;;  %466 = vst [vmem:[%s821_s30 + $0xf0] sm:$0xff] %v431_v6  ;;  %v385_v7 = vpop.f32.mrb[15].mxu0  ;;  %v433_v8 = vpop.f32.mrb[15].mxu1 }
 0x10a   : > { %451 = vst [vmem:[%s821_s30 + $0x78] sm:$0xff] %v385_v7  ;;  %467 = vst [vmem:[%s821_s30 + $0xf8] sm:$0xff] %v433_v8 }
 0x10b PF: > { %s12_s11 = sadd.s32 1, %s668_s11   ;;  %s868_s9 = smov %s664_s10 }
 0x10c   : > { %p9_p5 = scmp.ge.s32.totalorder %s12_s11, 4   ;;  %s869_s10 = smov %s871_s12 }
 0x10e   :  { %11 = sbr.rel (!%p9_p5) target bundleno = 2 (0x2), region = 61 }

// kernel: spatial_transformer_forward.17
= control target key start
LH: loop header
LB: loop body
LE: loop exit
PB: predicated region body
PF: predicated region fallthrough
CT: control target
= control target key end

     0   :  { %s3507_s9 = smov 0   ;;  %s4458_s0 = inlined_call_operand.vmem [shape: f32[2,64,128], index: 0, kind: input, shape index: {}]   ;;  %s4459_s1 = inlined_call_operand.vmem [shape: f32[2,128,256], index: 1, kind: input, shape index: {}]   ;;  %s4460_s2 = inlined_call_operand.vmem [shape: f32[2,64,128], index: 2, kind: output, shape index: {}]  }
   0x1 LB: > { %s2094_s10 = sadd.s32 4294967295, %s3487_s9   ;;  %p2098_p0 = scmp.ge.s32.totalorder %s3487_s9, 1  ;;  %s3487_s9 = sphi %s3507_s9, %s12_s9  }
   0x2   : > { %p122_p1 = scmp.lt.s32.totalorder %s3487_s9, 3 }
   0x4   : > { %p123_p2 = pnand %p2098_p0, %p122_p1 }
   0x5   : > { %p149_p3 = scmp.lt.s32.totalorder (!%p123_p2), %s2094_s10, 1  ;;  %vm215_vm0 = vcmask (!%p123_p2), 261120   ;;  %v204_v41 = vlaneseq (!%p123_p2)  ;;  %s3489_s19 = smov (!%p123_p2), 96   ;;  %vm1068_vm3 = vcmask (!%p123_p2), 523520   ;;  %vm1543_vm4 = vcmask (!%p123_p2), 785920  }
   0x6   : > { %126 = sbr.rel (%p123_p2) target bundleno = 2816 (0xb00), region = 28  ;;  %vm3525_vm1 = vmpackc.low (!%p123_p2), %vm215_vm0, %vm215_vm0  ;;  %s3490_s20 = smov (!%p123_p2), 64   ;;  %vm2018_vm5 = vcmask (!%p123_p2), 1048320  }
   0x7   : > { %v3673_v42 = vand.u32 (!%p123_p2), 127, %v204_v41  ;;  %s3491_s24 = smov (!%p123_p2), 32  }
   0x9   : > { %vm206_vm2 = vcmp.lt.s32.totalorder (!%p123_p2), %v3673_v42, 77 }
   0xd   : > { %s4464_s10 = smov (!%p149_p3, %s2094_s10), 1 }
   0xe   : > { %s2204_s11 = sshll.u32 %s4464_s10, 8  ;;  %s2203_s15 = sshll.u32 %s4464_s10, 6 }
   0xf   : > { %s3521_s14 = scalar_lea.vmem %s4459_s1, %s2204_s11  ;;  %s3551_s18 = scalar_lea.vmem %s4458_s0, %s2203_s15 }
  0x10   : > { %v3531_v1 = vld [vmem:[%s3521_s14] sm:$0xff]  ;;  %v3534_v2 = vld [vmem:[%s3521_s14 + $0x10] sm:$0xff]  ;;  %v165_v27 = vld [vmem:[%s3551_s18 + $0x8] sm:$0xff]  ;;  %s3975_s23 = scalar_lea.vmem %s4460_s2, %s2203_s15 }
  0x11   : > { %v3537_v3 = vld [vmem:[%s3521_s14 + $0x20] sm:$0xff]  ;;  %v2750_v4 = vpack.c.bf16 %v3534_v2, %v3531_v1  ;;  %v3542_v5 = vld [vmem:[%s3521_s14 + $0x30] sm:$0xff]  ;;  %v3640_v29 = vmul.f32 0.17677669, %v165_v27  ;;  %v167_v31 = vld [vmem:[%s3551_s18 + $0x18] sm:$0xff]  ;;  %v3716_v60 = vpack.i.bf16 %v3534_v2, %v3531_v1 }
  0x12   : > { %v2756_v6 = vpack.c.bf16 %v3542_v5, %v3537_v3  ;;  %v164_v7 = vld [vmem:[%s3551_s18] sm:$0xff]  ;;  %v3564_v9 = vld [vmem:[%s3521_s14 + $0x50] sm:$0xff]  ;;  %v3648_v33 = vmul.f32 0.17677669, %v167_v31  ;;  %v169_v35 = vld [vmem:[%s3551_s18 + $0x28] sm:$0xff]  ;;  %v3712_v59 = vpack.i.bf16 %v3542_v5, %v3537_v3 }
  0x13   : > { %2752 = vmatprep.subr.msk.bf16.mxu0 %vm3525_vm1, %v2750_v4  ;;  %v3561_v8 = vld [vmem:[%s3521_s14 + $0x40] sm:$0xff]  ;;  %v3566_v10 = vmul.f32 0.17677669, %v164_v7  ;;  %v3580_v13 = vld [vmem:[%s3521_s14 + $0x70] sm:$0xff]  ;;  %v3658_v37 = vmul.f32 0.17677669, %v169_v35 }
  0x14   : > { %2755 = vmatpush3.bf16.xpose.msk.msra.mxu0 %vm3525_vm1, %v2750_v4  ;;  %v2762_v11 = vpack.c.bf16 %v3564_v9, %v3561_v8  ;;  %v3577_v12 = vld [vmem:[%s3521_s14 + $0x60] sm:$0xff]  ;;  %v3592_v16 = vld [vmem:[%s3521_s14 + $0x90] sm:$0xff]  ;;  %v171_v39 = vld [vmem:[%s3551_s18 + $0x38] sm:$0xff]  ;;  %v3722_v61 = vpack.i.bf16 %v3564_v9, %v3561_v8 }
  0x15   : > { %2758 = vmatprep.subr.msk.bf16.mxu0 %vm3525_vm1, %v2756_v6  ;;  %2430 = vmatprep.mubr.msk.f32.mxu0 %vm215_vm0, %v3566_v10  ;;  %v2768_v14 = vpack.c.bf16 %v3580_v13, %v3577_v12  ;;  %v3589_v15 = vld [vmem:[%s3521_s14 + $0x80] sm:$0xff]  ;;  %v3604_v19 = vld [vmem:[%s3521_s14 + $0xb0] sm:$0xff]  ;;  %v3667_v40 = vmul.f32 0.17677669, %v171_v39  ;;  %v3730_v62 = vpack.i.bf16 %v3580_v13, %v3577_v12  ;;  %v3735_v63 = vld [vmem:[%s3521_s14 + $0x8] sm:$0xff] }
  0x16   : > { %v2774_v17 = vpack.c.bf16 %v3592_v16, %v3589_v15  ;;  %v3601_v18 = vld [vmem:[%s3521_s14 + $0xa0] sm:$0xff]  ;;  %v3616_v22 = vld [vmem:[%s3521_s14 + $0xd0] sm:$0xff]  ;;  %v3738_v1 = vld [vmem:[%s3521_s14 + $0x18] sm:$0xff] }
  0x17   : > { %v2780_v20 = vpack.c.bf16 %v3604_v19, %v3601_v18  ;;  %v3613_v21 = vld [vmem:[%s3521_s14 + $0xc0] sm:$0xff]  ;;  %v3628_v25 = vld [vmem:[%s3521_s14 + $0xf0] sm:$0xff]  ;;  %v3741_v2 = vld [vmem:[%s3521_s14 + $0x28] sm:$0xff]  ;;  %v2798_v3 = vpack.c.bf16 %v3738_v1, %v3735_v63 }
  0x18   : > { %v2786_v23 = vpack.c.bf16 %v3616_v22, %v3613_v21  ;;  %v3625_v24 = vld [vmem:[%s3521_s14 + $0xe0] sm:$0xff]  ;;  %v166_v28 = vld [vmem:[%s3551_s18 + $0x10] sm:$0xff]  ;;  %v3746_v4 = vld [vmem:[%s3521_s14 + $0x38] sm:$0xff] }
  0x19   : > { %v2792_v26 = vpack.c.bf16 %v3628_v25, %v3625_v24  ;;  %v3642_v30 = vmul.f32 0.17677669, %v166_v28  ;;  %v168_v32 = vld [vmem:[%s3551_s18 + $0x20] sm:$0xff]  ;;  %v170_v36 = vld [vmem:[%s3551_s18 + $0x30] sm:$0xff]  ;;  %v2802_v5 = vpack.c.bf16 %v3746_v4, %v3741_v2  ;;  %2799 = vmatprep.subr.bf16.mxu1 %v2798_v3  ;;  %v3754_v7 = vld [vmem:[%s3521_s14 + $0x58] sm:$0xff] }
  0x1a   : > { %v3652_v34 = vmul.f32 0.17677669, %v168_v32  ;;  %v3662_v38 = vmul.f32 0.17677669, %v170_v36  ;;  %2801 = vmatpush3.bf16.msra.mxu1 %v2798_v3  ;;  %v3759_v12 = vld [vmem:[%s3521_s14 + $0x68] sm:$0xff]  ;;  %v3762_v13 = vld [vmem:[%s3521_s14 + $0x78] sm:$0xff] }
  0x1b   : > { %2803 = vmatprep.subr.bf16.mxu1 %v2802_v5  ;;  %v3775_v28 = vld [vmem:[%s3521_s14 + $0xa8] sm:$0xff]  ;;  %v3778_v31 = vld [vmem:[%s3521_s14 + $0xb8] sm:$0xff] }
  0x1c   : > { %2761 = vmatpush3.bf16.xpose.msk.msra.mxu0 %vm3525_vm1, %v2756_v6  ;;  %v3751_v6 = vld [vmem:[%s3521_s14 + $0x48] sm:$0xff]  ;;  %v2818_v36 = vpack.c.bf16 %v3778_v31, %v3775_v28 }
  0x1d   : > { %2764 = vmatprep.subr.msk.bf16.mxu0 %vm3525_vm1, %v2762_v11  ;;  %v2806_v8 = vpack.c.bf16 %v3754_v7, %v3751_v6  ;;  %v3783_v41 = vld [vmem:[%s3521_s14 + $0xc8] sm:$0xff] }
  0x1e   : > { %2805 = vmatpush3.bf16.msra.mxu1 %v2802_v5  ;;  %v3471_v42 = vld [vmem:[%s3521_s14 + $0x48] sm:$0xff] }
  0x1f   : > { %2807 = vmatprep.subr.bf16.mxu1 %v2806_v8 }
  0x22   : > { %2809 = vmatpush3.bf16.msra.mxu1 %v2806_v8  ;;  %v3811_v8 = vpack.i.bf16 %v3604_v19, %v3601_v18 }
  0x24   : > { %2767 = vmatpush3.bf16.xpose.msk.msra.mxu0 %vm3525_vm1, %v2762_v11 }
  0x25   : > { %2770 = vmatprep.subr.msk.bf16.mxu0 %vm3525_vm1, %v2768_v14 }
  0x2c   : > { %2773 = vmatpush3.bf16.xpose.msk.msra.mxu0 %vm3525_vm1, %v2768_v14  ;;  %v3765_v14 = vld [vmem:[%s3521_s14 + $0x88] sm:$0xff] }
  0x2d   : > { %2776 = vmatprep.subr.msk.bf16.mxu0 %vm3525_vm1, %v2774_v17 }
  0x34   : > { %2779 = vmatpush3.bf16.xpose.msk.msra.mxu0 %vm3525_vm1, %v2774_v17 }
  0x35   : > { %2782 = vmatprep.subr.msk.bf16.mxu0 %vm3525_vm1, %v2780_v20 }
  0x3c   : > { %2785 = vmatpush3.bf16.xpose.msk.msra.mxu0 %vm3525_vm1, %v2780_v20  ;;  %v2810_v20 = vpack.c.bf16 %v3762_v13, %v3759_v12 }
  0x3d   : > { %2788 = vmatprep.subr.msk.bf16.mxu0 %vm3525_vm1, %v2786_v23 }
  0x3e   : > { %2811 = vmatprep.subr.bf16.mxu1 %v2810_v20 }
  0x3f   : > { %2813 = vmatpush3.bf16.msra.mxu1 %v2810_v20 }
  0x44   : > { %2791 = vmatpush3.bf16.xpose.msk.msra.mxu0 %vm3525_vm1, %v2786_v23  ;;  %v3770_v23 = vld [vmem:[%s3521_s14 + $0x98] sm:$0xff] }
  0x45   : > { %2794 = vmatprep.subr.msk.bf16.mxu0 %vm3525_vm1, %v2792_v26  ;;  %v2814_v27 = vpack.c.bf16 %v3770_v23, %v3765_v14 }
  0x47   : > { %2815 = vmatprep.subr.bf16.mxu1 %v2814_v27 }
  0x48   : > { %2817 = vmatpush3.bf16.msra.mxu1 %v2814_v27 }
  0x49   : > { %2819 = vmatprep.subr.bf16.mxu1 %v2818_v36 }
  0x4c   : > { %2797 = vmatpush3.bf16.xpose.msk.msra.mxu0 %vm3525_vm1, %v2792_v26  ;;  %2821 = vmatpush3.bf16.msra.mxu1 %v2818_v36 }
  0x53   : > { %2431 = vmatmul.mubr.msk.f32.vlgmr.msra.gmra.mrb[0].mxu0 %vm215_vm0, %v3640_v29 }
  0x54   : > { %2433 = vmatprep.mubr.msk.f32.mxu0 %vm215_vm0, %v3642_v30 }
  0x57   : > { %2434 = vmatmul.mubr.msk.f32.gmra.mrb[2].mxu0 %vm215_vm0, %v3648_v33 }
  0x58   : > { %2436 = vmatprep.mubr.msk.f32.mxu0 %vm215_vm0, %v3652_v34 }
  0x5b   : > { %2437 = vmatmul.mubr.msk.f32.gmra.mrb[4].mxu0 %vm215_vm0, %v3658_v37 }
  0x5c   : > { %2439 = vmatprep.mubr.msk.f32.mxu0 %vm215_vm0, %v3662_v38 }
  0x5f   : > { %2440 = vmatmul.mubr.msk.f32.gmra.mrb[6].mxu0 %vm215_vm0, %v3667_v40 }
 0x126   : > { %v2432_v43 = vpop.f32.mrb[0].mxu0 }
 0x127   : > { %v354_v44 = vpop.f32.mrb[1].mxu0  ;;  %v394_v49 = vsel %vm206_vm2, %v2432_v43, -1e+30  ;;  %v3786_v43 = vld [vmem:[%s3521_s14 + $0xd8] sm:$0xff] }
 0x128   : > { %v393_v45 = vsel %vm206_vm2, %v354_v44, -1e+30  ;;  %v2822_v44 = vpack.c.bf16 %v3786_v43, %v3783_v41 }
 0x129   : > { %401 = vmax.xlane.f32.xlu0 %v393_v45 }
 0x12a   : > { %v2435_v46 = vpop.f32.mrb[2].mxu0  ;;  %2823 = vmatprep.subr.bf16.mxu1 %v2822_v44 }
 0x12b   : > { %v3680_v47 = vsel %vm206_vm2, %v2435_v46, -1e+30  ;;  %v364_v48 = vpop.f32.mrb[3].mxu0  ;;  %v3791_v46 = vld [vmem:[%s3521_s14 + $0xe8] sm:$0xff]  ;;  %2825 = vmatpush3.bf16.msra.mxu1 %v2822_v44 }
 0x12c   : > { %407 = vmax.xlane.f32.xlu1 %v3680_v47  ;;  %v3687_v50 = vsel %vm206_vm2, %v364_v48, -1e+30  ;;  %v3794_v48 = vld [vmem:[%s3521_s14 + $0xf8] sm:$0xff] }
 0x12d   : > { %403 = vmax.xlane.f32.xlu0 %v394_v49 }
 0x12e   : > { %v2438_v51 = vpop.f32.mrb[4].mxu0 }
 0x12f   : > { %v374_v52 = vpop.f32.mrb[5].mxu0  ;;  %v3697_v54 = vsel %vm206_vm2, %v2438_v51, -1e+30  ;;  %v2826_v51 = vpack.c.bf16 %v3794_v48, %v3791_v46 }
 0x130   : > { %405 = vmax.xlane.f32.xlu1 %v3687_v50  ;;  %v3692_v53 = vsel %vm206_vm2, %v374_v52, -1e+30 }
 0x131   : > { %409 = vmax.xlane.f32.xlu0 %v3692_v53  ;;  %2827 = vmatprep.subr.bf16.mxu1 %v2826_v51 }
 0x132   : > { %v2441_v55 = vpop.f32.mrb[6].mxu0  ;;  %2829 = vmatpush3.bf16.msra.mxu1 %v2826_v51 }
 0x133   : > { %v384_v56 = vpop.f32.mrb[7].mxu0  ;;  %v3707_v58 = vsel %vm206_vm2, %v2441_v55, -1e+30 }
 0x134   : > { %411 = vmax.xlane.f32.xlu1 %v3697_v54  ;;  %v3702_v57 = vsel %vm206_vm2, %v384_v56, -1e+30 }
 0x135   : > { %413 = vmax.xlane.f32.xlu0 %v3702_v57 }
 0x138   : > { %415 = vmax.xlane.f32.xlu1 %v3707_v58 }
 0x149   : > { %3087 = vrot.lane.b32.xlu1 %v3712_v59, %s3489_s19 }
 0x14b   : > { %3082 = vrot.lane.b32.xlu0 %v3716_v60, %s3489_s19 }
 0x14d   : > { %3092 = vrot.lane.b32.xlu1 %v3722_v61, %s3489_s19 }
 0x151   : > { %3097 = vrot.lane.b32.xlu1 %v3730_v62, %s3489_s19 }
 0x1b6   : > { %v402_v9 = vpop.xlane.xlu0 %401 }
 0x1b7   : > { %v417_v11 = vsub.f32 %v393_v45, %v402_v9  ;;  %v3815_v9 = vpack.i.bf16 %v3592_v16, %v3589_v15 }
 0x1b9   : > { %v425_v17 = vmul.f32 1.442695, %v417_v11  ;;  %v408_v11 = vpop.xlane.xlu1 %407 }
 0x1ba   : > { %v404_v26 = vpop.xlane.xlu0 %403  ;;  %v420_v27 = vsub.f32 %v3680_v47, %v408_v11 }
 0x1bb   : > { %3321 = vpow2.f32 %v425_v17  ;;  %v418_v32 = vsub.f32 %v394_v49, %v404_v26 }
 0x1bc   : > { %v431_v19 = vmul.f32 1.442695, %v420_v27 }
 0x1bd   : > { %v427_v35 = vmul.f32 1.442695, %v418_v32  ;;  %v406_v17 = vpop.xlane.xlu1 %405 }
 0x1be   : > { %v410_v39 = vpop.xlane.xlu0 %409  ;;  %v419_v20 = vsub.f32 %v3687_v50, %v406_v17 }
 0x1bf   : > { %3323 = vpow2.f32 %v427_v35  ;;  %v421_v15 = vsub.f32 %v3692_v53, %v410_v39  ;;  %v3839_v53 = vpack.i.bf16 %v3628_v25, %v3625_v24 }
 0x1c0   : > { %v429_v32 = vmul.f32 1.442695, %v419_v20 }
 0x1c1   : > { %v412_v26 = vpop.xlane.xlu1 %411  ;;  %v433_v35 = vmul.f32 1.442695, %v421_v15 }
 0x1c2   : > { %v414_v45 = vpop.xlane.xlu0 %413  ;;  %v422_v18 = vsub.f32 %v3697_v54, %v412_v26  ;;  %3325 = vpow2.f32 %v429_v32  ;;  %v3845_v54 = vpack.i.bf16 %v3616_v22, %v3613_v21 }
 0x1c3   : > { %3327 = vpow2.f32 %v431_v19  ;;  %v423_v24 = vsub.f32 %v3702_v57, %v414_v45 }
 0x1c4   : > { %v435_v16 = vmul.f32 1.442695, %v422_v18 }
 0x1c5   : > { %v3796_v49 = vpop.eup %3321  ;;  %v416_v39 = vpop.xlane.xlu1 %415  ;;  %v437_v21 = vmul.f32 1.442695, %v423_v24 }
 0x1c6   : > { %441 = vadd.xlane.f32.xlu0 %v3796_v49  ;;  %v3083_v52 = vpop.permute.xlu0 %3082  ;;  %3329 = vpow2.f32 %v435_v16  ;;  %v424_v51 = vsub.f32 %v3707_v58, %v416_v39 }
 0x1c7   : > { %v3085_v55 = vunpack.i.h.bf16 %v3083_v52  ;;  %v3084_v56 = vunpack.i.l.bf16 %v3083_v52  ;;  %3331 = vpow2.f32 %v433_v35 }
 0x1c8   : > { %v439_v25 = vmul.f32 1.442695, %v424_v51 }
 0x1c9   : > { %v3801_v3 = vpop.eup %3323  ;;  %v3803_v5 = vpack.c.bf16 %v3085_v55, %v3084_v56  ;;  %v3088_v52 = vpop.permute.xlu1 %3087 }
 0x1ca   : > { %443 = vadd.xlane.f32.xlu1 %v3801_v3  ;;  %3333 = vpow2.f32 %v439_v25  ;;  %v3090_v20 = vunpack.i.h.bf16 %v3088_v52  ;;  %v3089_v26 = vunpack.i.l.bf16 %v3088_v52 }
 0x1cb   : > { %2832 = vmatprep.subr.msk.bf16.mxu1 %vm3525_vm1, %v3803_v5  ;;  %3335 = vpow2.f32 %v437_v21 }
 0x1cc   : > { %v3825_v36 = vpop.eup %3325  ;;  %v2836_v18 = vpack.c.bf16 %v3090_v20, %v3089_v26 }
 0x1cd   : > { %v3828_v50 = vpop.eup %3327  ;;  %v3093_v57 = vpop.permute.xlu1 %3092 }
 0x1ce   : > { %v3095_v19 = vunpack.i.h.bf16 %v3093_v57  ;;  %v3094_v15 = vunpack.i.l.bf16 %v3093_v57 }
 0x1d0   : > { %v3830_v44 = vpop.eup %3329  ;;  %v2842_v16 = vpack.c.bf16 %v3095_v19, %v3094_v15 }
 0x1d1   : > { %v3834_v47 = vpop.eup %3331  ;;  %v3098_v45 = vpop.permute.xlu1 %3097 }
 0x1d4   : > { %v3859_v22 = vpop.eup %3333 }
 0x1d5   : > { %v3862_v58 = vpop.eup %3335 }
 0x1db   : > { %3107 = vrot.lane.b32.xlu1 %v3811_v8, %s3489_s19 }
 0x1dc   : > { %3102 = vrot.lane.b32.xlu0 %v3815_v9, %s3489_s19 }
 0x1fb   : > { %445 = vadd.xlane.f32.xlu0 %v3825_v36 }
 0x1ff   : > { %447 = vadd.xlane.f32.xlu1 %v3828_v50  ;;  %451 = vadd.xlane.f32.xlu0 %v3830_v44 }
 0x203   : > { %449 = vadd.xlane.f32.xlu0 %v3834_v47 }
 0x210   : > { %3117 = vrot.lane.b32.xlu1 %v3839_v53, %s3489_s19 }
 0x219   : > { %3112 = vrot.lane.b32.xlu0 %v3845_v54, %s3489_s19 }
 0x21d   : > { %586 = vrot.lane.b32.xlu0 %v3566_v10, %s3489_s19 }
 0x221   : > { %590 = vrot.lane.b32.xlu0 %v3642_v30, %s3489_s19 }
 0x225   : > { %594 = vrot.lane.b32.xlu0 %v3652_v34, %s3489_s19 }
 0x229   : > { %598 = vrot.lane.b32.xlu0 %v3662_v38, %s3489_s19 }
 0x234   : > { %455 = vadd.xlane.f32.xlu1 %v3859_v22 }
 0x238   : > { %453 = vadd.xlane.f32.xlu1 %v3862_v58 }
 0x249   : > { %588 = vrot.lane.b32.xlu1 %v3640_v29, %s3489_s19 }
 0x24d   : > { %592 = vrot.lane.b32.xlu1 %v3648_v33, %s3489_s19 }
 0x251   : > { %596 = vrot.lane.b32.xlu1 %v3658_v37, %s3489_s19 }
 0x253   : > { %v442_v55 = vpop.xlane.xlu0 %441 }
 0x254   : > { %3337 = vrcp.f32 %v442_v55 }
 0x255   : > { %600 = vrot.lane.b32.xlu1 %v3667_v40, %s3489_s19 }
 0x257   : > { %v444_v56 = vpop.xlane.xlu1 %443  ;;  %v3103_v35 = vpop.permute.xlu0 %3102 }
 0x258   : > { %3339 = vrcp.f32 %v444_v56  ;;  %v3104_v51 = vunpack.i.l.bf16 %v3103_v35 }
 0x25b   : > { %v3108_v25 = vpop.permute.xlu1 %3107 }
 0x25c   : > { %v3110_v21 = vunpack.i.h.bf16 %v3108_v25  ;;  %v3109_v52 = vunpack.i.l.bf16 %v3108_v25 }
 0x25e   : > { %v3338_v11 = vpop.eup %3337  ;;  %v2860_v57 = vpack.c.bf16 %v3110_v21, %v3109_v52 }
 0x25f   : > { %v465_v17 = vmul.f32 %v3338_v11, %v3796_v49  ;;  %v3100_v49 = vunpack.i.h.bf16 %v3098_v45 }
 0x261   : > { %2474 = vmatprep.mubr.f32.mxu1 %v465_v17 }
 0x262   : > { %v3340_v27 = vpop.eup %3339 }
 0x263   : > { %v466_v32 = vmul.f32 %v3340_v27, %v3801_v3  ;;  %v3099_v3 = vunpack.i.l.bf16 %v3098_v45 }
 0x265   : > { %2475 = vmatmul.mubr.f32.vlgmr.msra.gmra.mrb[0].mxu1 %v466_v32  ;;  %v2848_v39 = vpack.c.bf16 %v3100_v49, %v3099_v3 }
 0x266   : > { %2835 = vmatpush3.bf16.xpose.msk.msra.mxu1 %vm3525_vm1, %v3803_v5  ;;  %v3105_v5 = vunpack.i.h.bf16 %v3103_v35 }
 0x267   : > { %2838 = vmatprep.subr.msk.bf16.mxu1 %vm3525_vm1, %v2836_v18 }
 0x268   : > { %v2854_v24 = vpack.c.bf16 %v3105_v5, %v3104_v51 }
 0x26e   : > { %2841 = vmatpush3.bf16.xpose.msk.msra.mxu1 %vm3525_vm1, %v2836_v18 }
 0x26f   : > { %2844 = vmatprep.subr.msk.bf16.mxu1 %vm3525_vm1, %v2842_v16 }
 0x276   : > { %2847 = vmatpush3.bf16.xpose.msk.msra.mxu1 %vm3525_vm1, %v2842_v16 }
 0x277   : > { %2850 = vmatprep.subr.msk.bf16.mxu1 %vm3525_vm1, %v2848_v39 }
 0x27e   : > { %2853 = vmatpush3.bf16.xpose.msk.msra.mxu1 %vm3525_vm1, %v2848_v39 }
 0x27f   : > { %2856 = vmatprep.subr.msk.bf16.mxu1 %vm3525_vm1, %v2854_v24 }
 0x286   : > { %2859 = vmatpush3.bf16.xpose.msk.msra.mxu1 %vm3525_vm1, %v2854_v24 }
 0x287   : > { %2862 = vmatprep.subr.msk.bf16.mxu1 %vm3525_vm1, %v2860_v57 }
 0x288   : > { %v446_v45 = vpop.xlane.xlu0 %445 }
 0x289   : > { %3341 = vrcp.f32 %v446_v45 }
 0x28c   : > { %v448_v55 = vpop.xlane.xlu1 %447  ;;  %v452_v56 = vpop.xlane.xlu0 %451 }
 0x28d   : > { %3343 = vrcp.f32 %v448_v55 }
 0x28e   : > { %2865 = vmatpush3.bf16.xpose.msk.msra.mxu1 %vm3525_vm1, %v2860_v57  ;;  %3345 = vrcp.f32 %v452_v56 }
 0x290   : > { %v450_v11 = vpop.xlane.xlu0 %449  ;;  %v3118_v20 = vpop.permute.xlu1 %3117 }
 0x291   : > { %3347 = vrcp.f32 %v450_v11  ;;  %v3120_v19 = vunpack.i.h.bf16 %v3118_v20  ;;  %v3119_v15 = vunpack.i.l.bf16 %v3118_v20  ;;  %v3928_v11 = vpack.i.bf16 %v3746_v4, %v3741_v2 }
 0x292   : > { %v3938_v20 = vpack.i.bf16 %v3762_v13, %v3759_v12  ;;  %v3950_v2 = vpack.i.bf16 %v3770_v23, %v3765_v14  ;;  %v3956_v4 = vpack.i.bf16 %v3786_v43, %v3783_v41 }
 0x293   : > { %v3342_v17 = vpop.eup %3341  ;;  %v2872_v39 = vpack.c.bf16 %v3120_v19, %v3119_v15  ;;  %3127 = vrot.lane.b32.xlu1 %v3928_v11, %s3489_s19 }
 0x294   : > { %v3113_v26 = vpop.permute.xlu0 %3112  ;;  %v467_v27 = vmul.f32 %v3342_v17, %v3825_v36  ;;  %v3934_v17 = vpack.i.bf16 %v3754_v7, %v3751_v6  ;;  %v3964_v6 = vpack.i.bf16 %v3794_v48, %v3791_v46 }
 0x295   : > { %v3115_v32 = vunpack.i.h.bf16 %v3113_v26  ;;  %v3114_v18 = vunpack.i.l.bf16 %v3113_v26  ;;  %v3944_v26 = vpack.i.bf16 %v3778_v31, %v3775_v28 }
 0x296   : > { %2477 = vmatprep.mubr.f32.mxu1 %v467_v27 }
 0x297   : > { %v3344_v16 = vpop.eup %3343  ;;  %v2866_v49 = vpack.c.bf16 %v3115_v32, %v3114_v18  ;;  %3132 = vrot.lane.b32.xlu1 %v3934_v17, %s3489_s19 }
 0x298   : > { %v468_v3 = vmul.f32 %v3344_v16, %v3828_v50  ;;  %v3346_v35 = vpop.eup %3345  ;;  %v3912_v50 = vpack.i.bf16 %v3738_v1, %v3735_v63  ;;  %v587_v21 = vpop.permute.xlu0 %586 }
 0x299   : > { %2868 = vmatprep.subr.msk.bf16.mxu1 %vm3525_vm1, %v2866_v49  ;;  %v470_v51 = vmul.f32 %v3346_v35, %v3830_v44 }
 0x29a   : > { %2478 = vmatmul.mubr.f32.gmra.mrb[2].mxu1 %v468_v3  ;;  %3122 = vrot.lane.b32.xlu0 %v3912_v50, %s3489_s19 }
 0x29b   : > { %v3348_v5 = vpop.eup %3347  ;;  %2871 = vmatpush3.bf16.xpose.msk.msra.mxu1 %vm3525_vm1, %v2866_v49  ;;  %3147 = vrot.lane.b32.xlu1 %v3944_v26, %s3489_s19 }
 0x29c   : > { %2874 = vmatprep.subr.msk.bf16.mxu1 %vm3525_vm1, %v2872_v39  ;;  %v469_v36 = vmul.f32 %v3348_v5, %v3834_v47  ;;  %v591_v55 = vpop.permute.xlu0 %590 }
 0x29e   : > { %2480 = vmatprep.mubr.f32.mxu1 %v469_v36  ;;  %3137 = vrot.lane.b32.xlu0 %v3938_v20, %s3489_s19 }
 0x29f   : > { %2481 = vmatmul.mubr.f32.gmra.mrb[4].mxu1 %v470_v51  ;;  %3152 = vrot.lane.b32.xlu1 %v3956_v4, %s3489_s19 }
 0x2a0   : > { %v595_v1 = vpop.permute.xlu0 %594 }
 0x2a2   : > { %3142 = vrot.lane.b32.xlu0 %v3950_v2, %s3489_s19 }
 0x2a3   : > { %2877 = vmatpush3.bf16.xpose.msk.msra.mxu1 %vm3525_vm1, %v2872_v39  ;;  %3157 = vrot.lane.b32.xlu1 %v3964_v6, %s3489_s19 }
 0x2a6   : > { %3162 = vrot.lane.b32.xlu0 %v3716_v60, %s3490_s20 }
 0x2c1   : > { %v456_v24 = vpop.xlane.xlu1 %455 }
 0x2c2   : > { %3349 = vrcp.f32 %v456_v24 }
 0x2c5   : > { %v454_v25 = vpop.xlane.xlu1 %453 }
 0x2c6   : > { %3351 = vrcp.f32 %v454_v25 }
 0x2c9   : > { %v589_v57 = vpop.permute.xlu1 %588 }
 0x2cc   : > { %v3350_v47 = vpop.eup %3349 }
 0x2cd   : > { %v472_v45 = vmul.f32 %v3350_v47, %v3859_v22  ;;  %v593_v63 = vpop.permute.xlu1 %592 }
 0x2d0   : > { %v3352_v52 = vpop.eup %3351 }
 0x2d1   : > { %v471_v44 = vmul.f32 %v3352_v52, %v3862_v58  ;;  %v597_v56 = vpop.permute.xlu1 %596  ;;  %v599_v58 = vpop.permute.xlu0 %598 }
 0x2d3   : > { %2483 = vmatprep.mubr.f32.mxu1 %v471_v44 }
 0x2d4   : > { %2484 = vmatmul.mubr.f32.gmra.mrb[6].mxu1 %v472_v45 }
 0x2d5   : > { %2518 = vmatprep.mubr.msk.f32.mxu1 %vm215_vm0, %v587_v21  ;;  %v601_v22 = vpop.permute.xlu1 %600 }
 0x2d8   : > { %2519 = vmatmul.mubr.msk.f32.vlgmr.msra.gmra.mrb[8].mxu1 %vm215_vm0, %v589_v57 }
 0x2d9   : > { %2521 = vmatprep.mubr.msk.f32.mxu1 %vm215_vm0, %v591_v55 }
 0x2dc   : > { %2522 = vmatmul.mubr.msk.f32.gmra.mrb[10].mxu1 %vm215_vm0, %v593_v63 }
 0x2dd   : > { %2524 = vmatprep.mubr.msk.f32.mxu1 %vm215_vm0, %v595_v1 }
 0x2e0   : > { %2525 = vmatmul.mubr.msk.f32.gmra.mrb[12].mxu1 %vm215_vm0, %v597_v56 }
 0x2e1   : > { %2527 = vmatprep.mubr.msk.f32.mxu1 %vm215_vm0, %v599_v58 }
 0x2e4   : > { %2528 = vmatmul.mubr.msk.f32.gmra.mrb[14].mxu1 %vm215_vm0, %v601_v22 }
 0x305   : > { %v3128_v28 = vpop.permute.xlu1 %3127 }
 0x306   : > { %v3130_v31 = vunpack.i.h.bf16 %v3128_v28  ;;  %v3129_v41 = vunpack.i.l.bf16 %v3128_v28 }
 0x308   : > { %v2882_v43 = vpack.c.bf16 %v3130_v31, %v3129_v41 }
 0x309   : > { %v3133_v46 = vpop.permute.xlu1 %3132 }
 0x30a   : > { %v3135_v48 = vunpack.i.h.bf16 %v3133_v46  ;;  %v3134_v27 = vunpack.i.l.bf16 %v3133_v46 }
 0x30c   : > { %v3123_v13 = vpop.permute.xlu0 %3122  ;;  %v2886_v15 = vpack.c.bf16 %v3135_v48, %v3134_v27 }
 0x30d   : > { %v3125_v14 = vunpack.i.h.bf16 %v3123_v13  ;;  %v3124_v60 = vunpack.i.l.bf16 %v3123_v13  ;;  %v3148_v49 = vpop.permute.xlu1 %3147 }
 0x30e   : > { %v3150_v51 = vunpack.i.h.bf16 %v3148_v49  ;;  %v3149_v24 = vunpack.i.l.bf16 %v3148_v49 }
 0x30f   : > { %v2878_v23 = vpack.c.bf16 %v3125_v14, %v3124_v60 }
 0x310   : > { %v3138_v32 = vpop.permute.xlu0 %3137  ;;  %v2898_v57 = vpack.c.bf16 %v3150_v51, %v3149_v24 }
 0x311   : > { %2879 = vmatprep.subr.bf16.mxu0 %v2878_v23  ;;  %v3140_v18 = vunpack.i.h.bf16 %v3138_v32  ;;  %v3139_v19 = vunpack.i.l.bf16 %v3138_v32  ;;  %v3153_v21 = vpop.permute.xlu1 %3152 }
 0x312   : > { %2881 = vmatpush3.bf16.msra.mxu0 %v2878_v23  ;;  %v3155_v52 = vunpack.i.h.bf16 %v3153_v21  ;;  %v3154_v44 = vunpack.i.l.bf16 %v3153_v21 }
 0x313   : > { %2883 = vmatprep.subr.bf16.mxu0 %v2882_v43  ;;  %v2890_v16 = vpack.c.bf16 %v3140_v18, %v3139_v19 }
 0x314   : > { %v3143_v3 = vpop.permute.xlu0 %3142  ;;  %v2902_v56 = vpack.c.bf16 %v3155_v52, %v3154_v44 }
 0x315   : > { %v3145_v39 = vunpack.i.h.bf16 %v3143_v3  ;;  %v3144_v5 = vunpack.i.l.bf16 %v3143_v3  ;;  %v3158_v55 = vpop.permute.xlu1 %3157 }
 0x316   : > { %2885 = vmatpush3.bf16.msra.mxu0 %v2882_v43  ;;  %v3160_v63 = vunpack.i.h.bf16 %v3158_v55  ;;  %v3159_v1 = vunpack.i.l.bf16 %v3158_v55 }
 0x317   : > { %2887 = vmatprep.subr.bf16.mxu0 %v2886_v15  ;;  %v2894_v25 = vpack.c.bf16 %v3145_v39, %v3144_v5 }
 0x318   : > { %v3163_v58 = vpop.permute.xlu0 %3162  ;;  %v2906_v22 = vpack.c.bf16 %v3160_v63, %v3159_v1 }
 0x31a   : > { %2889 = vmatpush3.bf16.msra.mxu0 %v2886_v15 }
 0x31b   : > { %2891 = vmatprep.subr.bf16.mxu0 %v2890_v16 }
 0x31e   : > { %2893 = vmatpush3.bf16.msra.mxu0 %v2890_v16 }
 0x31f   : > { %2895 = vmatprep.subr.bf16.mxu0 %v2894_v25 }
 0x322   : > { %2897 = vmatpush3.bf16.msra.mxu0 %v2894_v25 }
 0x323   : > { %2899 = vmatprep.subr.bf16.mxu0 %v2898_v57 }
 0x326   : > { %2901 = vmatpush3.bf16.msra.mxu0 %v2898_v57 }
 0x327   : > { %2903 = vmatprep.subr.bf16.mxu0 %v2902_v56 }
 0x32a   : > { %2905 = vmatpush3.bf16.msra.mxu0 %v2902_v56 }
 0x32b   : > { %2907 = vmatprep.subr.bf16.mxu0 %v2906_v22 }
 0x32e   : > { %2909 = vmatpush3.bf16.msra.mxu0 %v2906_v22 }
 0x338   : > { %v2476_v7 = vpop.f32.mrb[0].mxu1 }
 0x339   : > { %579 = vst.msk [vmem:[%s3975_s23 + $0x8] sm:$0xff] %vm215_vm0, %v2476_v7  ;;  %v539_v12 = vpop.f32.mrb[1].mxu1  ;;  %v3165_v7 = vunpack.i.h.bf16 %v3163_v58 }
 0x33a   : > { %578 = vst.msk [vmem:[%s3975_s23] sm:$0xff] %vm215_vm0, %v539_v12  ;;  %v3164_v12 = vunpack.i.l.bf16 %v3163_v58 }
 0x33c   : > { %v3989_v13 = vpack.c.bf16 %v3165_v7, %v3164_v12 }
 0x33e   : > { %2912 = vmatprep.subr.msk.bf16.mxu0 %vm3525_vm1, %v3989_v13 }
 0x36d   : > { %v2479_v35 = vpop.f32.mrb[2].mxu1 }
 0x36e   : > { %581 = vst.msk [vmem:[%s3975_s23 + $0x18] sm:$0xff] %vm215_vm0, %v2479_v35  ;;  %v549_v36 = vpop.f32.mrb[3].mxu1 }
 0x36f   : > { %580 = vst.msk [vmem:[%s3975_s23 + $0x10] sm:$0xff] %vm215_vm0, %v549_v36 }
 0x372   : > { %v2482_v47 = vpop.f32.mrb[4].mxu1 }
 0x373   : > { %583 = vst.msk [vmem:[%s3975_s23 + $0x28] sm:$0xff] %vm215_vm0, %v2482_v47  ;;  %v559_v45 = vpop.f32.mrb[5].mxu1 }
 0x374   : > { %582 = vst.msk [vmem:[%s3975_s23 + $0x20] sm:$0xff] %vm215_vm0, %v559_v45 }
 0x3a7   : > { %v2485_v14 = vpop.f32.mrb[6].mxu1 }
 0x3a8   : > { %585 = vst.msk [vmem:[%s3975_s23 + $0x38] sm:$0xff] %vm215_vm0, %v2485_v14  ;;  %v569_v60 = vpop.f32.mrb[7].mxu1 }
 0x3a9   : > { %584 = vst.msk [vmem:[%s3975_s23 + $0x30] sm:$0xff] %vm215_vm0, %v569_v60 }
 0x3ab   : > { %v2520_v23 = vpop.f32.mrb[8].mxu1 }
 0x3ac   : > { %v748_v28 = vpop.f32.mrb[9].mxu1  ;;  %v788_v31 = vsel %vm206_vm2, %v2520_v23, -1e+30 }
 0x3ad   : > { %797 = vmax.xlane.f32.xlu1 %v788_v31  ;;  %v787_v41 = vsel %vm206_vm2, %v748_v28, -1e+30 }
 0x3ae   : > { %795 = vmax.xlane.f32.xlu0 %v787_v41 }
 0x3af   : > { %v2523_v43 = vpop.f32.mrb[10].mxu1 }
 0x3b0   : > { %v790_v46 = vsel %vm206_vm2, %v2523_v43, -1e+30  ;;  %v758_v48 = vpop.f32.mrb[11].mxu1 }
 0x3b1   : > { %v789_v27 = vsel %vm206_vm2, %v758_v48, -1e+30 }
 0x3b2   : > { %801 = vmax.xlane.f32.xlu0 %v790_v46 }
 0x3b3   : > { %v2526_v32 = vpop.f32.mrb[12].mxu1 }
 0x3b4   : > { %v768_v18 = vpop.f32.mrb[13].mxu1  ;;  %v792_v3 = vsel %vm206_vm2, %v2526_v32, -1e+30 }
 0x3b5   : > { %v791_v19 = vsel %vm206_vm2, %v768_v18, -1e+30 }
 0x3b6   : > { %799 = vmax.xlane.f32.xlu0 %v789_v27 }
 0x3b7   : > { %v2529_v15 = vpop.f32.mrb[14].mxu1 }
 0x3b8   : > { %v778_v16 = vpop.f32.mrb[15].mxu1  ;;  %v794_v35 = vsel %vm206_vm2, %v2529_v15, -1e+30 }
 0x3b9   : > { %v793_v49 = vsel %vm206_vm2, %v778_v16, -1e+30 }
 0x3ba   : > { %803 = vmax.xlane.f32.xlu0 %v791_v19 }
 0x3be   : > { %3167 = vrot.lane.b32.xlu1 %v3712_v59, %s3490_s20  ;;  %807 = vmax.xlane.f32.xlu0 %v793_v49 }
 0x3d4   : > { %3172 = vrot.lane.b32.xlu0 %v3722_v61, %s3490_s20 }
 0x3e2   : > { %805 = vmax.xlane.f32.xlu1 %v792_v3 }
 0x3e6   : > { %809 = vmax.xlane.f32.xlu1 %v794_v35 }
 0x3f7   : > { %3177 = vrot.lane.b32.xlu1 %v3730_v62, %s3490_s20 }
 0x3fb   : > { %3187 = vrot.lane.b32.xlu1 %v3811_v8, %s3490_s20 }
 0x43a   : > { %v798_v39 = vpop.xlane.xlu1 %797 }
 0x43b   : > { %v812_v59 = vsub.f32 %v788_v31, %v798_v39  ;;  %v796_v5 = vpop.xlane.xlu0 %795 }
 0x43c   : > { %v811_v36 = vsub.f32 %v787_v41, %v796_v5 }
 0x43d   : > { %v821_v51 = vmul.f32 1.442695, %v812_v59 }
 0x43e   : > { %v819_v61 = vmul.f32 1.442695, %v811_v36  ;;  %v3168_v44 = vpop.permute.xlu1 %3167 }
 0x43f   : > { %3353 = vpow2.f32 %v821_v51  ;;  %v802_v24 = vpop.xlane.xlu0 %801  ;;  %v3170_v15 = vunpack.i.h.bf16 %v3168_v44  ;;  %v3169_v16 = vunpack.i.l.bf16 %v3168_v44 }
 0x440   : > { %3355 = vpow2.f32 %v819_v61  ;;  %v814_v25 = vsub.f32 %v790_v46, %v802_v24 }
 0x442   : > { %v825_v21 = vmul.f32 1.442695, %v814_v25 }
 0x443   : > { %v800_v8 = vpop.xlane.xlu0 %799 }
 0x444   : > { %3357 = vpow2.f32 %v825_v21  ;;  %v813_v57 = vsub.f32 %v789_v27, %v800_v8 }
 0x446   : > { %v823_v63 = vmul.f32 1.442695, %v813_v57 }
 0x447   : > { %v804_v45 = vpop.xlane.xlu0 %803 }
 0x448   : > { %3359 = vpow2.f32 %v823_v63  ;;  %v815_v7 = vsub.f32 %v791_v19, %v804_v45 }
 0x449   : > { %v3354_v47 = vpop.eup %3353 }
 0x44a   : > { %v3356_v52 = vpop.eup %3355  ;;  %837 = vadd.xlane.f32.xlu0 %v3354_v47 }
 0x44b   : > { %835 = vadd.xlane.f32.xlu1 %v3356_v52  ;;  %v808_v56 = vpop.xlane.xlu0 %807 }
 0x44c   : > { %v817_v14 = vsub.f32 %v793_v49, %v808_v56 }
 0x44e   : > { %v4022_v62 = vpop.eup %3357  ;;  %v831_v23 = vmul.f32 1.442695, %v817_v14 }
 0x44f   : > { %841 = vadd.xlane.f32.xlu1 %v4022_v62  ;;  %v3173_v46 = vpop.permute.xlu0 %3172 }
 0x450   : > { %v3175_v39 = vunpack.i.h.bf16 %v3173_v46  ;;  %v3174_v59 = vunpack.i.l.bf16 %v3173_v46 }
 0x452   : > { %v2922_v5 = vpack.c.bf16 %v3175_v39, %v3174_v59  ;;  %v3449_v59 = vld [vmem:[%s3521_s14] sm:$0xff] }
 0x460   : > { %3197 = vrot.lane.b32.xlu1 %v3839_v53, %s3490_s20  ;;  %3182 = vrot.lane.b32.xlu0 %v3815_v9, %s3490_s20  ;;  %v827_v53 = vmul.f32 1.442695, %v815_v7  ;;  %v4029_v9 = vpop.eup %3359 }
 0x46f   : > { %v806_v55 = vpop.xlane.xlu1 %805 }
 0x470   : > { %v816_v1 = vsub.f32 %v792_v3, %v806_v55 }
 0x472   : > { %v829_v58 = vmul.f32 1.442695, %v816_v1 }
 0x473   : > { %v810_v22 = vpop.xlane.xlu1 %809 }
 0x474   : > { %v818_v12 = vsub.f32 %v794_v35, %v810_v22  ;;  %3361 = vpow2.f32 %v829_v58  ;;  %v2916_v35 = vpack.c.bf16 %v3170_v15, %v3169_v16 }
 0x476   : > { %v833_v60 = vmul.f32 1.442695, %v818_v12 }
 0x478   : > { %3363 = vpow2.f32 %v833_v60 }
 0x479   : > { %3365 = vpow2.f32 %v827_v53 }
 0x47a   : > { %3367 = vpow2.f32 %v831_v23 }
 0x47e   : > { %v4032_v28 = vpop.eup %3361 }
 0x47f   : > { %839 = vadd.xlane.f32.xlu0 %v4029_v9 }
 0x482   : > { %v4034_v31 = vpop.eup %3363 }
 0x483   : > { %845 = vadd.xlane.f32.xlu0 %v4032_v28  ;;  %v4038_v41 = vpop.eup %3365 }
 0x484   : > { %849 = vadd.xlane.f32.xlu1 %v4034_v31  ;;  %v4040_v43 = vpop.eup %3367 }
 0x487   : > { %843 = vadd.xlane.f32.xlu0 %v4038_v41 }
 0x488   : > { %847 = vadd.xlane.f32.xlu1 %v4040_v43 }
 0x499   : > { %1079 = vrot.lane.b32.xlu1 %v3640_v29, %s3490_s20 }
 0x49d   : > { %3192 = vrot.lane.b32.xlu0 %v3845_v54, %s3490_s20  ;;  %1083 = vrot.lane.b32.xlu1 %v3648_v33, %s3490_s20  ;;  %v3178_v54 = vpop.permute.xlu1 %3177 }
 0x49e   : > { %v3180_v36 = vunpack.i.h.bf16 %v3178_v54  ;;  %v3179_v51 = vunpack.i.l.bf16 %v3178_v54 }
 0x4a0   : > { %v2928_v61 = vpack.c.bf16 %v3180_v36, %v3179_v51 }
 0x4a1   : > { %1077 = vrot.lane.b32.xlu0 %v3566_v10, %s3490_s20  ;;  %1087 = vrot.lane.b32.xlu1 %v3658_v37, %s3490_s20  ;;  %v3188_v48 = vpop.permute.xlu1 %3187 }
 0x4a5   : > { %1081 = vrot.lane.b32.xlu0 %v3642_v30, %s3490_s20  ;;  %1091 = vrot.lane.b32.xlu1 %v3667_v40, %s3490_s20 }
 0x4a9   : > { %1085 = vrot.lane.b32.xlu0 %v3652_v34, %s3490_s20  ;;  %3207 = vrot.lane.b32.xlu1 %v3928_v11, %s3490_s20 }
 0x4ad   : > { %1089 = vrot.lane.b32.xlu0 %v3662_v38, %s3490_s20  ;;  %3212 = vrot.lane.b32.xlu1 %v3934_v17, %s3490_s20 }
 0x4b1   : > { %3202 = vrot.lane.b32.xlu0 %v3912_v50, %s3490_s20  ;;  %3227 = vrot.lane.b32.xlu1 %v3944_v26, %s3490_s20 }
 0x4b5   : > { %3217 = vrot.lane.b32.xlu0 %v3938_v20, %s3490_s20  ;;  %3232 = vrot.lane.b32.xlu1 %v3956_v4, %s3490_s20 }
 0x4b9   : > { %3222 = vrot.lane.b32.xlu0 %v3950_v2, %s3490_s20  ;;  %3237 = vrot.lane.b32.xlu1 %v3964_v6, %s3490_s20 }
 0x4d7   : > { %v838_v27 = vpop.xlane.xlu0 %837 }
 0x4d8   : > { %3369 = vrcp.f32 %v838_v27  ;;  %v836_v32 = vpop.xlane.xlu1 %835 }
 0x4d9   : > { %3371 = vrcp.f32 %v836_v32 }
 0x4db   : > { %v3183_v24 = vpop.permute.xlu0 %3182 }
 0x4dc   : > { %v3184_v25 = vunpack.i.l.bf16 %v3183_v24  ;;  %v842_v44 = vpop.xlane.xlu1 %841 }
 0x4dd   : > { %3373 = vrcp.f32 %v842_v44 }
 0x4e0   : > { %v3198_v45 = vpop.permute.xlu1 %3197 }
 0x4e1   : > { %v3200_v7 = vunpack.i.h.bf16 %v3198_v45  ;;  %v3199_v60 = vunpack.i.l.bf16 %v3198_v45 }
 0x4e2   : > { %v3370_v18 = vpop.eup %3369 }
 0x4e3   : > { %v3372_v19 = vpop.eup %3371  ;;  %v860_v3 = vmul.f32 %v3370_v18, %v3354_v47  ;;  %v3190_v47 = vunpack.i.h.bf16 %v3188_v48 }
 0x4e4   : > { %v859_v49 = vmul.f32 %v3372_v19, %v3356_v52  ;;  %v3189_v52 = vunpack.i.l.bf16 %v3188_v48  ;;  %v2952_v48 = vpack.c.bf16 %v3200_v7, %v3199_v60 }
 0x4e6   : > { %2562 = vmatprep.mubr.f32.mxu0 %v859_v49  ;;  %v2940_v8 = vpack.c.bf16 %v3190_v47, %v3189_v52 }
 0x4e7   : > { %2563 = vmatmul.mubr.f32.vlgmr.msra.gmra.mrb[8].mxu0 %v860_v3  ;;  %v3374_v58 = vpop.eup %3373 }
 0x4e8   : > { %2915 = vmatpush3.bf16.xpose.msk.msra.mxu0 %vm3525_vm1, %v3989_v13  ;;  %v3185_v13 = vunpack.i.h.bf16 %v3183_v24  ;;  %v862_v54 = vmul.f32 %v3374_v58, %v4022_v62 }
 0x4e9   : > { %2918 = vmatprep.subr.msk.bf16.mxu0 %vm3525_vm1, %v2916_v35 }
 0x4ea   : > { %v2934_v21 = vpack.c.bf16 %v3185_v13, %v3184_v25 }
 0x4f0   : > { %2921 = vmatpush3.bf16.xpose.msk.msra.mxu0 %vm3525_vm1, %v2916_v35 }
 0x4f1   : > { %2924 = vmatprep.subr.msk.bf16.mxu0 %vm3525_vm1, %v2922_v5 }
 0x4f8   : > { %2927 = vmatpush3.bf16.xpose.msk.msra.mxu0 %vm3525_vm1, %v2922_v5  ;;  %v3450_v5 = vld [vmem:[%s3521_s14 + $0x10] sm:$0xff] }
 0x4f9   : > { %2930 = vmatprep.subr.msk.bf16.mxu0 %vm3525_vm1, %v2928_v61  ;;  %v3241_v36 = vpack.i.bf16 %v3450_v5, %v3449_v59 }
 0x4fb   : > { %3242 = vrot.lane.b32.xlu0 %v3241_v36, %s3491_s24 }
 0x500   : > { %2933 = vmatpush3.bf16.xpose.msk.msra.mxu0 %vm3525_vm1, %v2928_v61 }
 0x501   : > { %2936 = vmatprep.subr.msk.bf16.mxu0 %vm3525_vm1, %v2934_v21 }
 0x508   : > { %2939 = vmatpush3.bf16.xpose.msk.msra.mxu0 %vm3525_vm1, %v2934_v21 }
 0x509   : > { %2942 = vmatprep.subr.msk.bf16.mxu0 %vm3525_vm1, %v2940_v8 }
 0x50c   : > { %v840_v57 = vpop.xlane.xlu0 %839 }
 0x50d   : > { %3375 = vrcp.f32 %v840_v57 }
 0x510   : > { %2945 = vmatpush3.bf16.xpose.msk.msra.mxu0 %vm3525_vm1, %v2940_v8  ;;  %v846_v55 = vpop.xlane.xlu0 %845 }
 0x511   : > { %v850_v63 = vpop.xlane.xlu1 %849  ;;  %3377 = vrcp.f32 %v846_v55 }
 0x514   : > { %v844_v1 = vpop.xlane.xlu0 %843 }
 0x515   : > { %3379 = vrcp.f32 %v844_v1  ;;  %v848_v56 = vpop.xlane.xlu1 %847 }
 0x516   : > { %3381 = vrcp.f32 %v848_v56 }
 0x517   : > { %v3376_v22 = vpop.eup %3375  ;;  %3383 = vrcp.f32 %v850_v63 }
 0x518   : > { %v3193_v12 = vpop.permute.xlu0 %3192  ;;  %v861_v14 = vmul.f32 %v3376_v22, %v4029_v9 }
 0x519   : > { %v3195_v53 = vunpack.i.h.bf16 %v3193_v12  ;;  %v3194_v23 = vunpack.i.l.bf16 %v3193_v12  ;;  %v1080_v3 = vpop.permute.xlu1 %1079 }
 0x51a   : > { %2565 = vmatprep.mubr.f32.mxu0 %v861_v14 }
 0x51b   : > { %v2946_v46 = vpack.c.bf16 %v3195_v53, %v3194_v23  ;;  %2566 = vmatmul.mubr.f32.gmra.mrb[10].mxu0 %v862_v54  ;;  %v3378_v27 = vpop.eup %3377 }
 0x51c   : > { %v864_v62 = vmul.f32 %v3378_v27, %v4032_v28  ;;  %v1078_v16 = vpop.permute.xlu0 %1077 }
 0x51d   : > { %2948 = vmatprep.subr.msk.bf16.mxu0 %vm3525_vm1, %v2946_v46 }
 0x51e   : > { %2951 = vmatpush3.bf16.xpose.msk.msra.mxu0 %vm3525_vm1, %v2946_v46 }
 0x51f   : > { %v3380_v32 = vpop.eup %3379  ;;  %2954 = vmatprep.subr.msk.bf16.mxu0 %vm3525_vm1, %v2952_v48 }
 0x520   : > { %v3382_v9 = vpop.eup %3381  ;;  %v863_v18 = vmul.f32 %v3380_v32, %v4038_v41  ;;  %v1082_v35 = vpop.permute.xlu0 %1081 }
 0x521   : > { %v865_v19 = vmul.f32 %v3382_v9, %v4040_v43  ;;  %v3384_v15 = vpop.eup %3383  ;;  %v1084_v41 = vpop.permute.xlu1 %1083 }
 0x522   : > { %2568 = vmatprep.mubr.f32.mxu0 %v863_v18  ;;  %v866_v49 = vmul.f32 %v3384_v15, %v4034_v31 }
 0x523   : > { %2569 = vmatmul.mubr.f32.gmra.mrb[12].mxu0 %v864_v62 }
 0x524   : > { %2571 = vmatprep.mubr.f32.mxu0 %v865_v19  ;;  %v1086_v28 = vpop.permute.xlu0 %1085 }
 0x525   : > { %v1088_v43 = vpop.permute.xlu1 %1087 }
 0x526   : > { %2957 = vmatpush3.bf16.xpose.msk.msra.mxu0 %vm3525_vm1, %v2952_v48 }
 0x527   : > { %2572 = vmatmul.mubr.f32.gmra.mrb[14].mxu0 %v866_v49 }
 0x528   : > { %2606 = vmatprep.mubr.msk.f32.mxu0 %vm215_vm0, %v1078_v16  ;;  %v1090_v31 = vpop.permute.xlu0 %1089 }
 0x529   : > { %v1092_v39 = vpop.permute.xlu1 %1091 }
 0x52c   : > { %v3203_v50 = vpop.permute.xlu0 %3202 }
 0x52d   : > { %2607 = vmatmul.mubr.msk.f32.vlgmr.msra.gmra.mrb[16].mxu0 %vm215_vm0, %v1080_v3  ;;  %v3208_v11 = vpop.permute.xlu1 %3207  ;;  %v3205_v17 = vunpack.i.h.bf16 %v3203_v50  ;;  %v3204_v20 = vunpack.i.l.bf16 %v3203_v50 }
 0x52e   : > { %2609 = vmatprep.mubr.msk.f32.mxu0 %vm215_vm0, %v1082_v35  ;;  %v3210_v2 = vunpack.i.h.bf16 %v3208_v11  ;;  %v3209_v51 = vunpack.i.l.bf16 %v3208_v11 }
 0x52f   : > { %v2958_v61 = vpack.c.bf16 %v3205_v17, %v3204_v20  ;;  %v3451_v20 = vld [vmem:[%s3521_s14 + $0x20] sm:$0xff] }
 0x530   : > { %v2962_v26 = vpack.c.bf16 %v3210_v2, %v3209_v51  ;;  %v3218_v6 = vpop.permute.xlu0 %3217  ;;  %v3452_v2 = vld [vmem:[%s3521_s14 + $0x30] sm:$0xff] }
 0x531   : > { %2610 = vmatmul.mubr.msk.f32.gmra.mrb[18].mxu0 %vm215_vm0, %v1084_v41  ;;  %2959 = vmatprep.subr.bf16.mxu1 %v2958_v61  ;;  %v3213_v24 = vpop.permute.xlu1 %3212  ;;  %v3220_v52 = vunpack.i.h.bf16 %v3218_v6  ;;  %v3219_v8 = vunpack.i.l.bf16 %v3218_v6  ;;  %v3246_v51 = vpack.i.bf16 %v3452_v2, %v3451_v20  ;;  %v3455_v6 = vld [vmem:[%s3521_s14 + $0x60] sm:$0xff] }
 0x532   : > { %2612 = vmatprep.mubr.msk.f32.mxu0 %vm215_vm0, %v1086_v28  ;;  %2961 = vmatpush3.bf16.msra.mxu1 %v2958_v61  ;;  %v3215_v13 = vunpack.i.h.bf16 %v3213_v24  ;;  %v3214_v4 = vunpack.i.l.bf16 %v3213_v24  ;;  %v3454_v24 = vld [vmem:[%s3521_s14 + $0x50] sm:$0xff] }
 0x533   : > { %2963 = vmatprep.subr.bf16.mxu1 %v2962_v26  ;;  %v2970_v57 = vpack.c.bf16 %v3220_v52, %v3219_v8  ;;  %v3456_v52 = vld [vmem:[%s3521_s14 + $0x70] sm:$0xff] }
 0x534   : > { %v2966_v21 = vpack.c.bf16 %v3215_v13, %v3214_v4  ;;  %v3223_v63 = vpop.permute.xlu0 %3222  ;;  %v3256_v8 = vpack.i.bf16 %v3456_v52, %v3455_v6  ;;  %v3464_v6 = vld [vmem:[%s3521_s14 + $0xd0] sm:$0xff] }
 0x535   : > { %2613 = vmatmul.mubr.msk.f32.gmra.mrb[20].mxu0 %vm215_vm0, %v1088_v43  ;;  %v3228_v44 = vpop.permute.xlu1 %3227  ;;  %v3225_v1 = vunpack.i.h.bf16 %v3223_v63  ;;  %v3224_v56 = vunpack.i.l.bf16 %v3223_v63 }
 0x536   : > { %2615 = vmatprep.mubr.msk.f32.mxu0 %vm215_vm0, %v1090_v31  ;;  %2965 = vmatpush3.bf16.msra.mxu1 %v2962_v26  ;;  %v3230_v45 = vunpack.i.h.bf16 %v3228_v44  ;;  %v3229_v55 = vunpack.i.l.bf16 %v3228_v44  ;;  %v3453_v26 = vld [vmem:[%s3521_s14 + $0x40] sm:$0xff] }
 0x537   : > { %2967 = vmatprep.subr.bf16.mxu1 %v2966_v21  ;;  %v2974_v22 = vpack.c.bf16 %v3225_v1, %v3224_v56  ;;  %v3251_v13 = vpack.i.bf16 %v3454_v24, %v3453_v26  ;;  %v3457_v44 = vld [vmem:[%s3521_s14 + $0xa0] sm:$0xff] }
 0x538   : > { %v2978_v7 = vpack.c.bf16 %v3230_v45, %v3229_v55 }
 0x539   : > { %2616 = vmatmul.mubr.msk.f32.gmra.mrb[22].mxu0 %vm215_vm0, %v1092_v39  ;;  %v3233_v58 = vpop.permute.xlu1 %3232 }
 0x53a   : > { %2969 = vmatpush3.bf16.msra.mxu1 %v2966_v21  ;;  %v3235_v12 = vunpack.i.h.bf16 %v3233_v58  ;;  %v3234_v14 = vunpack.i.l.bf16 %v3233_v58 }
 0x53b   : > { %2971 = vmatprep.subr.bf16.mxu1 %v2970_v57 }
 0x53c   : > { %v2982_v53 = vpack.c.bf16 %v3235_v12, %v3234_v14 }
 0x53d   : > { %v3238_v60 = vpop.permute.xlu1 %3237 }
 0x53e   : > { %2973 = vmatpush3.bf16.msra.mxu1 %v2970_v57  ;;  %v3240_v23 = vunpack.i.h.bf16 %v3238_v60  ;;  %v3239_v54 = vunpack.i.l.bf16 %v3238_v60  ;;  %v3458_v57 = vld [vmem:[%s3521_s14 + $0xb0] sm:$0xff] }
 0x53f   : > { %2975 = vmatprep.subr.bf16.mxu1 %v2974_v22  ;;  %v3266_v45 = vpack.i.bf16 %v3458_v57, %v3457_v44 }
 0x540   : > { %v2986_v48 = vpack.c.bf16 %v3240_v23, %v3239_v54  ;;  %v3459_v54 = vld [vmem:[%s3521_s14 + $0xe0] sm:$0xff] }
 0x542   : > { %2977 = vmatpush3.bf16.msra.mxu1 %v2974_v22 }
 0x543   : > { %2979 = vmatprep.subr.bf16.mxu1 %v2978_v7 }
 0x546   : > { %2981 = vmatpush3.bf16.msra.mxu1 %v2978_v7 }
 0x547   : > { %2983 = vmatprep.subr.bf16.mxu1 %v2982_v53 }
 0x54a   : > { %2985 = vmatpush3.bf16.msra.mxu1 %v2982_v53 }
 0x54b   : > { %2987 = vmatprep.subr.bf16.mxu1 %v2986_v48 }
 0x54e   : > { %2989 = vmatpush3.bf16.msra.mxu1 %v2986_v48 }
 0x56d   : > { %v3243_v46 = vpop.permute.xlu0 %3242 }
 0x56e   : > { %v3245_v27 = vunpack.i.h.bf16 %v3243_v46  ;;  %v3244_v32 = vunpack.i.l.bf16 %v3243_v46  ;;  %v3460_v46 = vld [vmem:[%s3521_s14 + $0xf0] sm:$0xff] }
 0x56f   : > { %v3276_v48 = vpack.i.bf16 %v3460_v46, %v3459_v54 }
 0x570   : > { %v4130_v9 = vpack.c.bf16 %v3245_v27, %v3244_v32  ;;  %v3461_v27 = vld [vmem:[%s3521_s14 + $0x80] sm:$0xff]  ;;  %v3462_v32 = vld [vmem:[%s3521_s14 + $0x90] sm:$0xff] }
 0x572   : > { %2992 = vmatprep.subr.msk.bf16.mxu1 %vm3525_vm1, %v4130_v9 }
 0x5ba   : > { %v4126_v25 = vpop.f32.mrb[8].mxu0 }
 0x5bb   : > { %v4128_v47 = vpop.f32.mrb[9].mxu0 }
 0x5ee   : > { %v4135_v18 = vpop.f32.mrb[10].mxu0 }
 0x5ef   : > { %v4137_v62 = vpop.f32.mrb[11].mxu0 }
 0x5f6   : > { %v4139_v19 = vpop.f32.mrb[12].mxu0 }
 0x5f7   : > { %v4141_v15 = vpop.f32.mrb[13].mxu0 }
 0x5fa   : > { %v4143_v16 = vpop.f32.mrb[14].mxu0 }
 0x5fb   : > { %v4145_v49 = vpop.f32.mrb[15].mxu0 }
 0x600   : > { %v2608_v3 = vpop.f32.mrb[16].mxu0 }
 0x601   : > { %v1239_v35 = vpop.f32.mrb[17].mxu0  ;;  %v1279_v41 = vsel %vm206_vm2, %v2608_v3, -1e+30  ;;  %v3261_v3 = vpack.i.bf16 %v3462_v32, %v3461_v27 }
 0x602   : > { %1288 = vmax.xlane.f32.xlu1 %v1279_v41  ;;  %v1278_v28 = vsel %vm206_vm2, %v1239_v35, -1e+30 }
 0x603   : > { %1286 = vmax.xlane.f32.xlu0 %v1278_v28 }
 0x604   : > { %v2611_v43 = vpop.f32.mrb[18].mxu0 }
 0x605   : > { %v1249_v31 = vpop.f32.mrb[19].mxu0  ;;  %v1281_v39 = vsel %vm206_vm2, %v2611_v43, -1e+30 }
 0x606   : > { %v1280_v36 = vsel %vm206_vm2, %v1249_v31, -1e+30 }
 0x607   : > { %1292 = vmax.xlane.f32.xlu0 %v1281_v39 }
 0x608   : > { %v2614_v59 = vpop.f32.mrb[20].mxu0 }
 0x609   : > { %v1259_v5 = vpop.f32.mrb[21].mxu0  ;;  %v1283_v4 = vsel %vm206_vm2, %v2614_v59, -1e+30 }
 0x60a   : > { %v4157_v50 = vsel %vm206_vm2, %v1259_v5, -1e+30 }
 0x60b   : > { %1290 = vmax.xlane.f32.xlu0 %v1280_v36 }
 0x60c   : > { %v2617_v11 = vpop.f32.mrb[22].mxu0 }
 0x60d   : > { %v1269_v17 = vpop.f32.mrb[23].mxu0  ;;  %v1285_v21 = vsel %vm206_vm2, %v2617_v11, -1e+30 }
 0x60e   : > { %v4164_v61 = vsel %vm206_vm2, %v1269_v17, -1e+30 }
 0x60f   : > { %1294 = vmax.xlane.f32.xlu0 %v4157_v50 }
 0x613   : > { %3247 = vrot.lane.b32.xlu1 %v3246_v51, %s3491_s24  ;;  %1298 = vmax.xlane.f32.xlu0 %v4164_v61 }
 0x629   : > { %3252 = vrot.lane.b32.xlu0 %v3251_v13, %s3491_s24 }
 0x637   : > { %1296 = vmax.xlane.f32.xlu1 %v1283_v4 }
 0x63b   : > { %1300 = vmax.xlane.f32.xlu1 %v1285_v21 }
 0x64c   : > { %3257 = vrot.lane.b32.xlu1 %v3256_v8, %s3491_s24 }
 0x650   : > { %3267 = vrot.lane.b32.xlu1 %v3266_v45, %s3491_s24 }
 0x68f   : > { %v1289_v55 = vpop.xlane.xlu1 %1288 }
 0x690   : > { %v1303_v63 = vsub.f32 %v1279_v41, %v1289_v55  ;;  %v1287_v1 = vpop.xlane.xlu0 %1286 }
 0x691   : > { %v1302_v56 = vsub.f32 %v1278_v28, %v1287_v1 }
 0x692   : > { %v1312_v58 = vmul.f32 1.442695, %v1303_v63 }
 0x693   : > { %v1310_v22 = vmul.f32 1.442695, %v1302_v56  ;;  %v3248_v41 = vpop.permute.xlu1 %3247 }
 0x694   : > { %3385 = vpow2.f32 %v1312_v58  ;;  %v1293_v7 = vpop.xlane.xlu0 %1292  ;;  %v3250_v55 = vunpack.i.h.bf16 %v3248_v41 }
 0x695   : > { %3387 = vpow2.f32 %v1310_v22  ;;  %v1305_v12 = vsub.f32 %v1281_v39, %v1293_v7 }
 0x697   : > { %v1316_v14 = vmul.f32 1.442695, %v1305_v12 }
 0x698   : > { %v1291_v35 = vpop.xlane.xlu0 %1290 }
 0x699   : > { %3389 = vpow2.f32 %v1316_v14  ;;  %v1304_v28 = vsub.f32 %v1280_v36, %v1291_v35 }
 0x69b   : > { %v1314_v31 = vmul.f32 1.442695, %v1304_v28 }
 0x69c   : > { %v1295_v39 = vpop.xlane.xlu0 %1294 }
 0x69d   : > { %3391 = vpow2.f32 %v1314_v31  ;;  %v1306_v11 = vsub.f32 %v4157_v50, %v1295_v39 }
 0x69e   : > { %v4181_v60 = vpop.eup %3385 }
 0x69f   : > { %v4183_v53 = vpop.eup %3387  ;;  %1328 = vadd.xlane.f32.xlu0 %v4181_v60  ;;  %v1318_v51 = vmul.f32 1.442695, %v1306_v11 }
 0x6a0   : > { %1326 = vadd.xlane.f32.xlu1 %v4183_v53  ;;  %v1299_v2 = vpop.xlane.xlu0 %1298 }
 0x6a1   : > { %v1308_v26 = vsub.f32 %v4164_v61, %v1299_v2 }
 0x6a3   : > { %v4187_v23 = vpop.eup %3389  ;;  %v1322_v36 = vmul.f32 1.442695, %v1308_v26 }
 0x6a4   : > { %1332 = vadd.xlane.f32.xlu1 %v4187_v23 }
 0x6a7   : > { %v4200_v24 = vpop.eup %3391 }
 0x6b5   : > { %3277 = vrot.lane.b32.xlu1 %v3276_v48, %s3491_s24  ;;  %3262 = vrot.lane.b32.xlu0 %v3261_v3, %s3491_s24 }
 0x6b9   : > { %1554 = vrot.lane.b32.xlu1 %v3640_v29, %s3491_s24 }
 0x6c4   : > { %v1297_v43 = vpop.xlane.xlu1 %1296 }
 0x6c5   : > { %v1307_v59 = vsub.f32 %v1283_v4, %v1297_v43 }
 0x6c7   : > { %v1320_v17 = vmul.f32 1.442695, %v1307_v59 }
 0x6c8   : > { %v1301_v5 = vpop.xlane.xlu1 %1300 }
 0x6c9   : > { %v1309_v20 = vsub.f32 %v1285_v21, %v1301_v5  ;;  %3393 = vpow2.f32 %v1320_v17  ;;  %v3463_v21 = vld [vmem:[%s3521_s14 + $0xc0] sm:$0xff] }
 0x6ca   : > { %3395 = vpow2.f32 %v1318_v51  ;;  %v3271_v52 = vpack.i.bf16 %v3464_v6, %v3463_v21 }
 0x6cb   : > { %v1324_v29 = vmul.f32 1.442695, %v1309_v20 }
 0x6cc   : > { %v3258_v8 = vpop.permute.xlu1 %3257 }
 0x6cd   : > { %3397 = vpow2.f32 %v1324_v29  ;;  %v3260_v58 = vunpack.i.h.bf16 %v3258_v8  ;;  %v3259_v22 = vunpack.i.l.bf16 %v3258_v8 }
 0x6ce   : > { %3399 = vpow2.f32 %v1322_v36 }
 0x6cf   : > { %v3008_v7 = vpack.c.bf16 %v3260_v58, %v3259_v22 }
 0x6d0   : > { %v3268_v44 = vpop.permute.xlu1 %3267 }
 0x6d1   : > { %v3269_v54 = vunpack.i.l.bf16 %v3268_v44 }
 0x6d3   : > { %v4203_v13 = vpop.eup %3393 }
 0x6d4   : > { %1330 = vadd.xlane.f32.xlu0 %v4200_v24  ;;  %v4206_v50 = vpop.eup %3395 }
 0x6d7   : > { %v4208_v4 = vpop.eup %3397 }
 0x6d8   : > { %1336 = vadd.xlane.f32.xlu0 %v4203_v13  ;;  %v4212_v61 = vpop.eup %3399 }
 0x6dc   : > { %1334 = vadd.xlane.f32.xlu0 %v4206_v50 }
 0x6dd   : > { %1340 = vadd.xlane.f32.xlu1 %v4208_v4 }
 0x6e1   : > { %1338 = vadd.xlane.f32.xlu1 %v4212_v61 }
 0x6f2   : > { %3272 = vrot.lane.b32.xlu0 %v3271_v52, %s3491_s24  ;;  %1558 = vrot.lane.b32.xlu1 %v3648_v33, %s3491_s24  ;;  %v3253_v33 = vpop.permute.xlu0 %3252 }
 0x6f3   : > { %v3254_v1 = vunpack.i.l.bf16 %v3253_v33 }
 0x6f6   : > { %1552 = vrot.lane.b32.xlu0 %v3566_v10, %s3491_s24  ;;  %1562 = vrot.lane.b32.xlu1 %v3658_v37, %s3491_s24 }
 0x6fa   : > { %1556 = vrot.lane.b32.xlu0 %v3642_v30, %s3491_s24  ;;  %1566 = vrot.lane.b32.xlu1 %v3667_v40, %s3491_s24  ;;  %v3249_v30 = vunpack.i.l.bf16 %v3248_v41 }
 0x6fe   : > { %1560 = vrot.lane.b32.xlu0 %v3652_v34, %s3491_s24  ;;  %v2996_v34 = vpack.c.bf16 %v3250_v55, %v3249_v30 }
 0x702   : > { %1564 = vrot.lane.b32.xlu0 %v3662_v38, %s3491_s24  ;;  %v3255_v38 = vunpack.i.h.bf16 %v3253_v33 }
 0x704   : > { %v3002_v56 = vpack.c.bf16 %v3255_v38, %v3254_v1 }
 0x72c   : > { %v1329_v57 = vpop.xlane.xlu0 %1328 }
 0x72d   : > { %3401 = vrcp.f32 %v1329_v57  ;;  %v1327_v10 = vpop.xlane.xlu1 %1326 }
 0x72e   : > { %3403 = vrcp.f32 %v1327_v10 }
 0x730   : > { %v3263_v12 = vpop.permute.xlu0 %3262 }
 0x731   : > { %v3264_v14 = vunpack.i.l.bf16 %v3263_v12  ;;  %v1333_v46 = vpop.xlane.xlu1 %1332 }
 0x732   : > { %3405 = vrcp.f32 %v1333_v46 }
 0x735   : > { %v3278_v27 = vpop.permute.xlu1 %3277 }
 0x736   : > { %v3280_v39 = vunpack.i.h.bf16 %v3278_v27  ;;  %v3279_v59 = vunpack.i.l.bf16 %v3278_v27 }
 0x737   : > { %v3402_v37 = vpop.eup %3401 }
 0x738   : > { %v3404_v45 = vpop.eup %3403  ;;  %v1351_v40 = vmul.f32 %v3402_v37, %v4181_v60  ;;  %v3032_v29 = vpack.c.bf16 %v3280_v39, %v3279_v59  ;;  %v3469_v39 = vld [vmem:[%s3521_s14 + $0x8] sm:$0xff]  ;;  %v3470_v59 = vld [vmem:[%s3521_s14 + $0x18] sm:$0xff] }
 0x739   : > { %v1350_v63 = vmul.f32 %v3404_v45, %v4183_v53  ;;  %v3270_v53 = vunpack.i.h.bf16 %v3268_v44  ;;  %v1555_v35 = vpop.permute.xlu1 %1554 }
 0x73b   : > { %2650 = vmatprep.mubr.f32.mxu1 %v1350_v63  ;;  %v3020_v48 = vpack.c.bf16 %v3270_v53, %v3269_v54 }
 0x73c   : > { %2651 = vmatmul.mubr.f32.vlgmr.msra.gmra.mrb[16].mxu1 %v1351_v40  ;;  %v3406_v43 = vpop.eup %3405 }
 0x73d   : > { %2995 = vmatpush3.bf16.xpose.msk.msra.mxu1 %vm3525_vm1, %v4130_v9  ;;  %v3265_v9 = vunpack.i.h.bf16 %v3263_v12  ;;  %v1353_v51 = vmul.f32 %v3406_v43, %v4187_v23  ;;  %v3468_v43 = vld [vmem:[%s3521_s14 + $0x78] sm:$0xff] }
 0x73e   : > { %2998 = vmatprep.subr.msk.bf16.mxu1 %vm3525_vm1, %v2996_v34 }
 0x73f   : > { %v3014_v60 = vpack.c.bf16 %v3265_v9, %v3264_v14 }
 0x745   : > { %3001 = vmatpush3.bf16.xpose.msk.msra.mxu1 %vm3525_vm1, %v2996_v34 }
 0x746   : > { %3004 = vmatprep.subr.msk.bf16.mxu1 %vm3525_vm1, %v3002_v56 }
 0x74d   : > { %3007 = vmatpush3.bf16.xpose.msk.msra.mxu1 %vm3525_vm1, %v3002_v56 }
 0x74e   : > { %3010 = vmatprep.subr.msk.bf16.mxu1 %vm3525_vm1, %v3008_v7 }
 0x755   : > { %3013 = vmatpush3.bf16.xpose.msk.msra.mxu1 %vm3525_vm1, %v3008_v7 }
 0x756   : > { %3016 = vmatprep.subr.msk.bf16.mxu1 %vm3525_vm1, %v3014_v60 }
 0x75d   : > { %3019 = vmatpush3.bf16.xpose.msk.msra.mxu1 %vm3525_vm1, %v3014_v60 }
 0x75e   : > { %3022 = vmatprep.subr.msk.bf16.mxu1 %vm3525_vm1, %v3020_v48 }
 0x761   : > { %v1331_v32 = vpop.xlane.xlu0 %1330 }
 0x762   : > { %3407 = vrcp.f32 %v1331_v32 }
 0x765   : > { %3025 = vmatpush3.bf16.xpose.msk.msra.mxu1 %vm3525_vm1, %v3020_v48  ;;  %v1337_v3 = vpop.xlane.xlu0 %1336 }
 0x766   : > { %3409 = vrcp.f32 %v1337_v3  ;;  %v3465_v3 = vld [vmem:[%s3521_s14 + $0x28] sm:$0xff] }
 0x769   : > { %v1335_v41 = vpop.xlane.xlu0 %1334 }
 0x76a   : > { %3411 = vrcp.f32 %v1335_v41  ;;  %v1341_v28 = vpop.xlane.xlu1 %1340 }
 0x76b   : > { %3413 = vrcp.f32 %v1341_v28  ;;  %v3467_v28 = vld [vmem:[%s3521_s14 + $0x68] sm:$0xff] }
 0x76c   : > { %v3408_v31 = vpop.eup %3407 }
 0x76d   : > { %v3273_v5 = vpop.permute.xlu0 %3272  ;;  %v1352_v11 = vmul.f32 %v3408_v31, %v4200_v24  ;;  %v3296_v31 = vpack.i.bf16 %v3468_v43, %v3467_v28 }
 0x76e   : > { %v3275_v17 = vunpack.i.h.bf16 %v3273_v5  ;;  %v3274_v20 = vunpack.i.l.bf16 %v3273_v5  ;;  %v1339_v2 = vpop.xlane.xlu1 %1338  ;;  %v3281_v5 = vpack.i.bf16 %v3470_v59, %v3469_v39 }
 0x76f   : > { %3415 = vrcp.f32 %v1339_v2  ;;  %2653 = vmatprep.mubr.f32.mxu1 %v1352_v11  ;;  %v3472_v11 = vld [vmem:[%s3521_s14 + $0x58] sm:$0xff] }
 0x770   : > { %v3026_v26 = vpack.c.bf16 %v3275_v17, %v3274_v20  ;;  %2654 = vmatmul.mubr.f32.gmra.mrb[18].mxu1 %v1353_v51  ;;  %v3410_v36 = vpop.eup %3409  ;;  %v3291_v17 = vpack.i.bf16 %v3472_v11, %v3471_v42  ;;  %v3473_v20 = vld [vmem:[%s3521_s14 + $0x88] sm:$0xff]  ;;  %v3474_v2 = vld [vmem:[%s3521_s14 + $0x98] sm:$0xff] }
 0x771   : > { %v1355_v23 = vmul.f32 %v3410_v36, %v4203_v13  ;;  %v1553_v6 = vpop.permute.xlu0 %1552  ;;  %v3301_v51 = vpack.i.bf16 %v3474_v2, %v3473_v20 }
 0x772   : > { %3028 = vmatprep.subr.msk.bf16.mxu1 %vm3525_vm1, %v3026_v26 }
 0x773   : > { %3031 = vmatpush3.bf16.xpose.msk.msra.mxu1 %vm3525_vm1, %v3026_v26 }
 0x774   : > { %v3412_v21 = vpop.eup %3411  ;;  %3034 = vmatprep.subr.msk.bf16.mxu1 %vm3525_vm1, %v3032_v29 }
 0x775   : > { %v1354_v24 = vmul.f32 %v3412_v21, %v4206_v50  ;;  %v3414_v52 = vpop.eup %3413  ;;  %v1557_v57 = vpop.permute.xlu0 %1556 }
 0x776   : > { %v1357_v44 = vmul.f32 %v3414_v52, %v4208_v4  ;;  %v1559_v50 = vpop.permute.xlu1 %1558 }
 0x777   : > { %2656 = vmatprep.mubr.f32.mxu1 %v1354_v24 }
 0x778   : > { %2657 = vmatmul.mubr.f32.gmra.mrb[20].mxu1 %v1355_v23 }
 0x779   : > { %v3416_v8 = vpop.eup %3415  ;;  %v1561_v13 = vpop.permute.xlu0 %1560 }
 0x77a   : > { %v1356_v33 = vmul.f32 %v3416_v8, %v4212_v61  ;;  %v1563_v10 = vpop.permute.xlu1 %1562 }
 0x77b   : > { %3037 = vmatpush3.bf16.xpose.msk.msra.mxu1 %vm3525_vm1, %v3032_v29 }
 0x77c   : > { %2659 = vmatprep.mubr.f32.mxu1 %v1356_v33 }
 0x77d   : > { %2660 = vmatmul.mubr.f32.gmra.mrb[22].mxu1 %v1357_v44  ;;  %v1565_v0 = vpop.permute.xlu0 %1564 }
 0x77e   : > { %2694 = vmatprep.mubr.msk.f32.mxu1 %vm215_vm0, %v1553_v6  ;;  %v1567_v4 = vpop.permute.xlu1 %1566 }
 0x782   : > { %2695 = vmatmul.mubr.msk.f32.vlgmr.msra.gmra.mrb[24].mxu1 %vm215_vm0, %v1555_v35  ;;  %v3466_v35 = vld [vmem:[%s3521_s14 + $0x38] sm:$0xff] }
 0x783   : > { %2697 = vmatprep.mubr.msk.f32.mxu1 %vm215_vm0, %v1557_v57  ;;  %v3286_v41 = vpack.i.bf16 %v3466_v35, %v3465_v3 }
 0x786   : > { %2698 = vmatmul.mubr.msk.f32.gmra.mrb[26].mxu1 %vm215_vm0, %v1559_v50 }
 0x787   : > { %2700 = vmatprep.mubr.msk.f32.mxu1 %vm215_vm0, %v1561_v13 }
 0x78a   : > { %2701 = vmatmul.mubr.msk.f32.gmra.mrb[28].mxu1 %vm215_vm0, %v1563_v10 }
 0x78b   : > { %2703 = vmatprep.mubr.msk.f32.mxu1 %vm215_vm0, %v1565_v0 }
 0x78e   : > { %2704 = vmatmul.mubr.msk.f32.gmra.mrb[30].mxu1 %vm215_vm0, %v1567_v4 }
 0x80f   : > { %v4279_v61 = vpop.f32.mrb[16].mxu1 }
 0x810   : > { %v4281_v37 = vpop.f32.mrb[17].mxu1 }
 0x843   : > { %v4283_v45 = vpop.f32.mrb[18].mxu1 }
 0x844   : > { %v4285_v55 = vpop.f32.mrb[19].mxu1 }
 0x84b   : > { %v4287_v30 = vpop.f32.mrb[20].mxu1 }
 0x84c   : > { %v4289_v63 = vpop.f32.mrb[21].mxu1 }
 0x850   : > { %v4291_v40 = vpop.f32.mrb[22].mxu1 }
 0x851   : > { %v4293_v34 = vpop.f32.mrb[23].mxu1 }
 0x855   : > { %v2696_v38 = vpop.f32.mrb[24].mxu1 }
 0x856   : > { %v1754_v1 = vsel %vm206_vm2, %v2696_v38, -1e+30  ;;  %v1714_v56 = vpop.f32.mrb[25].mxu1 }
 0x857   : > { %v1753_v58 = vsel %vm206_vm2, %v1714_v56, -1e+30  ;;  %1763 = vmax.xlane.f32.xlu1 %v1754_v1 }
 0x858   : > { %1761 = vmax.xlane.f32.xlu0 %v1753_v58 }
 0x859   : > { %v2699_v22 = vpop.f32.mrb[26].mxu1 }
 0x85a   : > { %v1756_v7 = vsel %vm206_vm2, %v2699_v22, -1e+30  ;;  %v1724_v12 = vpop.f32.mrb[27].mxu1 }
 0x85b   : > { %v1755_v53 = vsel %vm206_vm2, %v1724_v12, -1e+30 }
 0x85c   : > { %1767 = vmax.xlane.f32.xlu0 %v1756_v7 }
 0x85d   : > { %v2702_v9 = vpop.f32.mrb[28].mxu1 }
 0x85e   : > { %v1758_v14 = vsel %vm206_vm2, %v2702_v9, -1e+30  ;;  %v1734_v60 = vpop.f32.mrb[29].mxu1 }
 0x85f   : > { %1771 = vmax.xlane.f32.xlu1 %v1758_v14  ;;  %v1757_v54 = vsel %vm206_vm2, %v1734_v60, -1e+30 }
 0x860   : > { %1765 = vmax.xlane.f32.xlu0 %v1755_v53 }
 0x861   : > { %v2705_v46 = vpop.f32.mrb[30].mxu1 }
 0x862   : > { %v1760_v48 = vsel %vm206_vm2, %v2705_v46, -1e+30  ;;  %v1744_v27 = vpop.f32.mrb[31].mxu1 }
 0x863   : > { %1775 = vmax.xlane.f32.xlu1 %v1760_v48  ;;  %v1759_v32 = vsel %vm206_vm2, %v1744_v27, -1e+30 }
 0x864   : > { %1769 = vmax.xlane.f32.xlu0 %v1757_v54 }
 0x868   : > { %1773 = vmax.xlane.f32.xlu0 %v1759_v32 }
 0x874   : > { %3287 = vrot.lane.b32.xlu1 %v3286_v41, %s3491_s24 }
 0x878   : > { %3297 = vrot.lane.b32.xlu1 %v3296_v31, %s3491_s24 }
 0x87e   : > { %3282 = vrot.lane.b32.xlu0 %v3281_v5, %s3491_s24 }
 0x882   : > { %3292 = vrot.lane.b32.xlu0 %v3291_v17, %s3491_s24 }
 0x886   : > { %3302 = vrot.lane.b32.xlu0 %v3301_v51, %s3491_s24 }
 0x8e4   : > { %v1764_v26 = vpop.xlane.xlu1 %1763 }
 0x8e5   : > { %v1778_v29 = vsub.f32 %v1754_v1, %v1764_v26  ;;  %v1762_v36 = vpop.xlane.xlu0 %1761 }
 0x8e6   : > { %v1777_v21 = vsub.f32 %v1753_v58, %v1762_v36 }
 0x8e7   : > { %v1787_v24 = vmul.f32 1.442695, %v1778_v29 }
 0x8e8   : > { %v1785_v23 = vmul.f32 1.442695, %v1777_v21 }
 0x8e9   : > { %3417 = vpow2.f32 %v1787_v24  ;;  %v1768_v6 = vpop.xlane.xlu0 %1767  ;;  %v3475_v24 = vld [vmem:[%s3521_s14 + $0xc8] sm:$0xff] }
 0x8ea   : > { %3419 = vpow2.f32 %v1785_v23  ;;  %v1780_v52 = vsub.f32 %v1756_v7, %v1768_v6  ;;  %v3476_v23 = vld [vmem:[%s3521_s14 + $0xd8] sm:$0xff] }
 0x8eb   : > { %v3311_v6 = vpack.i.bf16 %v3476_v23, %v3475_v24 }
 0x8ec   : > { %v1791_v8 = vmul.f32 1.442695, %v1780_v52  ;;  %v1772_v33 = vpop.xlane.xlu1 %1771  ;;  %v3477_v52 = vld [vmem:[%s3521_s14 + $0xa8] sm:$0xff] }
 0x8ed   : > { %v1782_v44 = vsub.f32 %v1758_v14, %v1772_v33  ;;  %v1766_v57 = vpop.xlane.xlu0 %1765 }
 0x8ee   : > { %3421 = vpow2.f32 %v1791_v8  ;;  %v1779_v50 = vsub.f32 %v1755_v53, %v1766_v57  ;;  %v3478_v8 = vld [vmem:[%s3521_s14 + $0xb8] sm:$0xff] }
 0x8ef   : > { %v1795_v0 = vmul.f32 1.442695, %v1782_v44  ;;  %v3306_v33 = vpack.i.bf16 %v3478_v8, %v3477_v52  ;;  %v3479_v44 = vld [vmem:[%s3521_s14 + $0xe8] sm:$0xff]  ;;  %v3480_v57 = vld [vmem:[%s3521_s14 + $0xf8] sm:$0xff] }
 0x8f0   : > { %v1789_v13 = vmul.f32 1.442695, %v1779_v50  ;;  %v1776_v10 = vpop.xlane.xlu1 %1775  ;;  %v3316_v50 = vpack.i.bf16 %v3480_v57, %v3479_v44 }
 0x8f1   : > { %v1770_v4 = vpop.xlane.xlu0 %1769  ;;  %v1784_v38 = vsub.f32 %v1760_v48, %v1776_v10 }
 0x8f2   : > { %3423 = vpow2.f32 %v1789_v13  ;;  %v1781_v1 = vsub.f32 %v1757_v54, %v1770_v4 }
 0x8f3   : > { %v4326_v56 = vpop.eup %3417  ;;  %3425 = vpow2.f32 %v1795_v0  ;;  %v1799_v9 = vmul.f32 1.442695, %v1784_v38 }
 0x8f4   : > { %v4328_v58 = vpop.eup %3419  ;;  %v1793_v22 = vmul.f32 1.442695, %v1781_v1  ;;  %1803 = vadd.xlane.f32.xlu0 %v4326_v56  ;;  %v3288_v12 = vpop.permute.xlu1 %3287 }
 0x8f5   : > { %1801 = vadd.xlane.f32.xlu1 %v4328_v58  ;;  %v1774_v7 = vpop.xlane.xlu0 %1773  ;;  %v3290_v53 = vunpack.i.h.bf16 %v3288_v12  ;;  %v3289_v46 = vunpack.i.l.bf16 %v3288_v12 }
 0x8f6   : > { %3427 = vpow2.f32 %v1793_v22  ;;  %v1783_v14 = vsub.f32 %v1759_v32, %v1774_v7 }
 0x8f7   : > { %3429 = vpow2.f32 %v1799_v9  ;;  %v3042_v28 = vpack.c.bf16 %v3290_v53, %v3289_v46 }
 0x8f8   : > { %v4332_v60 = vpop.eup %3421  ;;  %v1797_v48 = vmul.f32 1.442695, %v1783_v14  ;;  %v3298_v31 = vpop.permute.xlu1 %3297 }
 0x8f9   : > { %1807 = vadd.xlane.f32.xlu1 %v4332_v60  ;;  %v3283_v54 = vpop.permute.xlu0 %3282  ;;  %v3300_v11 = vunpack.i.h.bf16 %v3298_v31  ;;  %v3299_v17 = vunpack.i.l.bf16 %v3298_v31 }
 0x8fa   : > { %v3285_v27 = vunpack.i.h.bf16 %v3283_v54  ;;  %v3284_v3 = vunpack.i.l.bf16 %v3283_v54  ;;  %3431 = vpow2.f32 %v1797_v48 }
 0x8fb   : > { %v3050_v51 = vpack.c.bf16 %v3300_v11, %v3299_v17 }
 0x8fc   : > { %v4335_v35 = vpop.eup %3423  ;;  %v3038_v41 = vpack.c.bf16 %v3285_v27, %v3284_v3 }
 0x8fd   : > { %1805 = vadd.xlane.f32.xlu1 %v4335_v35  ;;  %v3293_v43 = vpop.permute.xlu0 %3292  ;;  %v4338_v59 = vpop.eup %3425 }
 0x8fe   : > { %3039 = vmatprep.subr.bf16.mxu0 %v3038_v41  ;;  %v3295_v32 = vunpack.i.h.bf16 %v3293_v43  ;;  %v3294_v39 = vunpack.i.l.bf16 %v3293_v43 }
 0x8ff   : > { %3041 = vmatpush3.bf16.msra.mxu0 %v3038_v41 }
 0x900   : > { %v4340_v5 = vpop.eup %3427  ;;  %v3046_v42 = vpack.c.bf16 %v3295_v32, %v3294_v39  ;;  %3043 = vmatprep.subr.bf16.mxu0 %v3042_v28 }
 0x901   : > { %1811 = vadd.xlane.f32.xlu1 %v4338_v59  ;;  %1809 = vadd.xlane.f32.xlu0 %v4340_v5  ;;  %v3303_v20 = vpop.permute.xlu0 %3302  ;;  %v4344_v2 = vpop.eup %3429 }
 0x902   : > { %v3305_v26 = vunpack.i.h.bf16 %v3303_v20  ;;  %v3304_v29 = vunpack.i.l.bf16 %v3303_v20 }
 0x903   : > { %3045 = vmatpush3.bf16.msra.mxu0 %v3042_v28 }
 0x904   : > { %3047 = vmatprep.subr.bf16.mxu0 %v3046_v42  ;;  %v4347_v36 = vpop.eup %3431  ;;  %v3054_v21 = vpack.c.bf16 %v3305_v26, %v3304_v29 }
 0x905   : > { %1815 = vadd.xlane.f32.xlu1 %v4344_v2 }
 0x907   : > { %3049 = vmatpush3.bf16.msra.mxu0 %v3046_v42 }
 0x908   : > { %3051 = vmatprep.subr.bf16.mxu0 %v3050_v51 }
 0x909   : > { %1813 = vadd.xlane.f32.xlu1 %v4347_v36 }
 0x90b   : > { %3053 = vmatpush3.bf16.msra.mxu0 %v3050_v51 }
 0x90c   : > { %3055 = vmatprep.subr.bf16.mxu0 %v3054_v21 }
 0x90f   : > { %3057 = vmatpush3.bf16.msra.mxu0 %v3054_v21 }
 0x917   : > { %3312 = vrot.lane.b32.xlu0 %v3311_v6, %s3491_s24 }
 0x91a   : > { %3307 = vrot.lane.b32.xlu1 %v3306_v33, %s3491_s24 }
 0x91b   : > { %3317 = vrot.lane.b32.xlu0 %v3316_v50, %s3491_s24 }
 0x91e   : > { %1046 = vrot.lane.b32.xlu1 %v4126_v25, %s3491_s24 }
 0x91f   : > { %1044 = vrot.lane.b32.xlu0 %v4128_v47, %s3491_s24 }
 0x922   : > { %1050 = vrot.lane.b32.xlu1 %v4135_v18, %s3491_s24 }
 0x923   : > { %1048 = vrot.lane.b32.xlu0 %v4137_v62, %s3491_s24 }
 0x926   : > { %1054 = vrot.lane.b32.xlu1 %v4139_v19, %s3491_s24 }
 0x927   : > { %1052 = vrot.lane.b32.xlu0 %v4141_v15, %s3491_s24 }
 0x92a   : > { %1058 = vrot.lane.b32.xlu1 %v4143_v16, %s3491_s24 }
 0x92b   : > { %1056 = vrot.lane.b32.xlu0 %v4145_v49, %s3491_s24 }
 0x92e   : > { %1521 = vrot.lane.b32.xlu1 %v4279_v61, %s3490_s20 }
 0x92f   : > { %1519 = vrot.lane.b32.xlu0 %v4281_v37, %s3490_s20 }
 0x932   : > { %1525 = vrot.lane.b32.xlu1 %v4283_v45, %s3490_s20 }
 0x933   : > { %1523 = vrot.lane.b32.xlu0 %v4285_v55, %s3490_s20 }
 0x936   : > { %1529 = vrot.lane.b32.xlu1 %v4287_v30, %s3490_s20 }
 0x937   : > { %1527 = vrot.lane.b32.xlu0 %v4289_v63, %s3490_s20 }
 0x93a   : > { %1533 = vrot.lane.b32.xlu1 %v4291_v40, %s3490_s20 }
 0x93b   : > { %1531 = vrot.lane.b32.xlu0 %v4293_v34, %s3490_s20 }
 0x981   : > { %v1804_v18 = vpop.xlane.xlu0 %1803 }
 0x982   : > { %v1802_v25 = vpop.xlane.xlu1 %1801 }
 0x983   : > { %3433 = vrcp.f32 %v1802_v25 }
 0x984   : > { %3435 = vrcp.f32 %v1804_v18 }
 0x986   : > { %v1808_v47 = vpop.xlane.xlu1 %1807 }
 0x98a   : > { %v1806_v62 = vpop.xlane.xlu1 %1805 }
 0x98b   : > { %3437 = vrcp.f32 %v1806_v62 }
 0x98c   : > { %3439 = vrcp.f32 %v1808_v47 }
 0x98d   : > { %v3434_v19 = vpop.eup %3433 }
 0x98e   : > { %v1812_v15 = vpop.xlane.xlu1 %1811  ;;  %v1810_v16 = vpop.xlane.xlu0 %1809  ;;  %v1825_v49 = vmul.f32 %v3434_v19, %v4328_v58 }
 0x98f   : > { %3441 = vrcp.f32 %v1810_v16  ;;  %v3436_v14 = vpop.eup %3435 }
 0x990   : > { %2738 = vmatprep.mubr.f32.mxu0 %v1825_v49  ;;  %3443 = vrcp.f32 %v1812_v15  ;;  %v1826_v48 = vmul.f32 %v3436_v14, %v4326_v56 }
 0x992   : > { %v1816_v61 = vpop.xlane.xlu1 %1815  ;;  %v3313_v37 = vpop.permute.xlu0 %3312 }
 0x993   : > { %v3315_v30 = vunpack.i.h.bf16 %v3313_v37  ;;  %v3314_v63 = vunpack.i.l.bf16 %v3313_v37 }
 0x995   : > { %v3062_v0 = vpack.c.bf16 %v3315_v30, %v3314_v63  ;;  %v3438_v53 = vpop.eup %3437 }
 0x996   : > { %v1814_v45 = vpop.xlane.xlu1 %1813  ;;  %v3318_v55 = vpop.permute.xlu0 %3317  ;;  %v1827_v28 = vmul.f32 %v3438_v53, %v4335_v35 }
 0x997   : > { %v3320_v4 = vunpack.i.h.bf16 %v3318_v55  ;;  %v3319_v38 = vunpack.i.l.bf16 %v3318_v55  ;;  %3445 = vrcp.f32 %v1814_v45  ;;  %v3440_v27 = vpop.eup %3439 }
 0x998   : > { %3447 = vrcp.f32 %v1816_v61  ;;  %v1828_v31 = vmul.f32 %v3440_v27, %v4332_v60 }
 0x999   : > { %v3066_v7 = vpack.c.bf16 %v3320_v4, %v3319_v38  ;;  %v3442_v43 = vpop.eup %3441 }
 0x99a   : > { %v3308_v40 = vpop.permute.xlu1 %3307  ;;  %v1045_v34 = vpop.permute.xlu0 %1044  ;;  %v1829_v42 = vmul.f32 %v3442_v43, %v4340_v5 }
 0x99b   : > { %v3310_v13 = vunpack.i.h.bf16 %v3308_v40  ;;  %v3309_v10 = vunpack.i.l.bf16 %v3308_v40  ;;  %1069 = vst.msk [vmem:[%s3975_s23] sm:$0xff] %vm1068_vm3, %v1045_v34  ;;  %v3444_v32 = vpop.eup %3443 }
 0x99c   : > { %v1830_v35 = vmul.f32 %v3444_v32, %v4338_v59 }
 0x99d   : > { %v3058_v1 = vpack.c.bf16 %v3310_v13, %v3309_v10 }
 0x99e   : > { %v1047_v58 = vpop.permute.xlu1 %1046  ;;  %v1049_v22 = vpop.permute.xlu0 %1048 }
 0x99f   : > { %1070 = vst.msk [vmem:[%s3975_s23 + $0x8] sm:$0xff] %vm1068_vm3, %v1047_v58  ;;  %1071 = vst.msk [vmem:[%s3975_s23 + $0x10] sm:$0xff] %vm1068_vm3, %v1049_v22  ;;  %3059 = vmatprep.subr.bf16.mxu0 %v3058_v1 }
 0x9a0   : > { %3061 = vmatpush3.bf16.msra.mxu0 %v3058_v1 }
 0x9a1   : > { %3063 = vmatprep.subr.bf16.mxu0 %v3062_v0  ;;  %v3446_v11 = vpop.eup %3445 }
 0x9a2   : > { %v1051_v12 = vpop.permute.xlu1 %1050  ;;  %v1053_v9 = vpop.permute.xlu0 %1052  ;;  %v1831_v51 = vmul.f32 %v3446_v11, %v4347_v36 }
 0x9a3   : > { %1072 = vst.msk [vmem:[%s3975_s23 + $0x18] sm:$0xff] %vm1068_vm3, %v1051_v12  ;;  %1073 = vst.msk [vmem:[%s3975_s23 + $0x20] sm:$0xff] %vm1068_vm3, %v1053_v9  ;;  %v3448_v17 = vpop.eup %3447 }
 0x9a4   : > { %3065 = vmatpush3.bf16.msra.mxu0 %v3062_v0  ;;  %v1832_v5 = vmul.f32 %v3448_v17, %v4344_v2 }
 0x9a5   : > { %3067 = vmatprep.subr.bf16.mxu0 %v3066_v7 }
 0x9a6   : > { %v1055_v46 = vpop.permute.xlu1 %1054  ;;  %v1057_v54 = vpop.permute.xlu0 %1056 }
 0x9a7   : > { %1074 = vst.msk [vmem:[%s3975_s23 + $0x28] sm:$0xff] %vm1068_vm3, %v1055_v46  ;;  %1075 = vst.msk [vmem:[%s3975_s23 + $0x30] sm:$0xff] %vm1068_vm3, %v1057_v54 }
 0x9a8   : > { %3069 = vmatpush3.bf16.msra.mxu0 %v3066_v7 }
 0x9aa   : > { %v1059_v3 = vpop.permute.xlu1 %1058  ;;  %v1520_v41 = vpop.permute.xlu0 %1519 }
 0x9ab   : > { %1076 = vst.msk [vmem:[%s3975_s23 + $0x38] sm:$0xff] %vm1068_vm3, %v1059_v3  ;;  %2739 = vmatmul.mubr.f32.vlgmr.msra.gmra.mrb[24].mxu0 %v1826_v48 }
 0x9ac   : > { %1544 = vst.msk [vmem:[%s3975_s23] sm:$0xff] %vm1543_vm4, %v1520_v41  ;;  %2741 = vmatprep.mubr.f32.mxu0 %v1827_v28 }
 0x9ae   : > { %v1522_v56 = vpop.permute.xlu1 %1521  ;;  %v1524_v39 = vpop.permute.xlu0 %1523 }
 0x9af   : > { %1545 = vst.msk [vmem:[%s3975_s23 + $0x8] sm:$0xff] %vm1543_vm4, %v1522_v56  ;;  %1546 = vst.msk [vmem:[%s3975_s23 + $0x10] sm:$0xff] %vm1543_vm4, %v1524_v39  ;;  %2742 = vmatmul.mubr.f32.gmra.mrb[26].mxu0 %v1828_v31 }
 0x9b0   : > { %2744 = vmatprep.mubr.f32.mxu0 %v1829_v42 }
 0x9b2   : > { %v1526_v60 = vpop.permute.xlu1 %1525  ;;  %v1528_v20 = vpop.permute.xlu0 %1527 }
 0x9b3   : > { %1547 = vst.msk [vmem:[%s3975_s23 + $0x18] sm:$0xff] %vm1543_vm4, %v1526_v60  ;;  %1548 = vst.msk [vmem:[%s3975_s23 + $0x20] sm:$0xff] %vm1543_vm4, %v1528_v20  ;;  %2745 = vmatmul.mubr.f32.gmra.mrb[28].mxu0 %v1830_v35 }
 0x9b4   : > { %2747 = vmatprep.mubr.f32.mxu0 %v1831_v51 }
 0x9b6   : > { %v1530_v26 = vpop.permute.xlu1 %1529  ;;  %v1532_v29 = vpop.permute.xlu0 %1531 }
 0x9b7   : > { %1549 = vst.msk [vmem:[%s3975_s23 + $0x28] sm:$0xff] %vm1543_vm4, %v1530_v26  ;;  %1550 = vst.msk [vmem:[%s3975_s23 + $0x30] sm:$0xff] %vm1543_vm4, %v1532_v29  ;;  %2748 = vmatmul.mubr.f32.gmra.mrb[30].mxu0 %v1832_v5 }
 0x9ba   : > { %v1534_v59 = vpop.permute.xlu1 %1533 }
 0x9bb   : > { %1551 = vst.msk [vmem:[%s3975_s23 + $0x38] sm:$0xff] %vm1543_vm4, %v1534_v59 }
 0xa7e   : > { %v2740_v21 = vpop.f32.mrb[24].mxu0 }
 0xa7f   : > { %1996 = vrot.lane.b32.xlu1 %v2740_v21, %s3489_s19  ;;  %v1947_v36 = vpop.f32.mrb[25].mxu0 }
 0xa80   : > { %1994 = vrot.lane.b32.xlu0 %v1947_v36, %s3489_s19 }
 0xa82   : > { %v2743_v24 = vpop.f32.mrb[26].mxu0 }
 0xa83   : > { %2000 = vrot.lane.b32.xlu1 %v2743_v24, %s3489_s19  ;;  %v1957_v2 = vpop.f32.mrb[27].mxu0 }
 0xa84   : > { %1998 = vrot.lane.b32.xlu0 %v1957_v2, %s3489_s19 }
 0xa86   : > { %v2746_v23 = vpop.f32.mrb[28].mxu0 }
 0xa87   : > { %2004 = vrot.lane.b32.xlu1 %v2746_v23, %s3489_s19  ;;  %v1967_v6 = vpop.f32.mrb[29].mxu0 }
 0xa88   : > { %2002 = vrot.lane.b32.xlu0 %v1967_v6, %s3489_s19 }
 0xa8a   : > { %v2749_v52 = vpop.f32.mrb[30].mxu0 }
 0xa8b   : > { %2008 = vrot.lane.b32.xlu1 %v2749_v52, %s3489_s19  ;;  %v1977_v8 = vpop.f32.mrb[31].mxu0 }
 0xa8c   : > { %2006 = vrot.lane.b32.xlu0 %v1977_v8, %s3489_s19 }
 0xaf1   : > { %v1997_v33 = vpop.permute.xlu1 %1996 }
 0xaf2   : > { %2020 = vst.msk [vmem:[%s3975_s23 + $0x8] sm:$0xff] %vm2018_vm5, %v1997_v33  ;;  %v1995_v44 = vpop.permute.xlu0 %1994 }
 0xaf3   : > { %2019 = vst.msk [vmem:[%s3975_s23] sm:$0xff] %vm2018_vm5, %v1995_v44 }
 0xaf5   : > { %v2001_v57 = vpop.permute.xlu1 %2000 }
 0xaf6   : > { %2022 = vst.msk [vmem:[%s3975_s23 + $0x18] sm:$0xff] %vm2018_vm5, %v2001_v57  ;;  %v1999_v50 = vpop.permute.xlu0 %1998 }
 0xaf7   : > { %2021 = vst.msk [vmem:[%s3975_s23 + $0x10] sm:$0xff] %vm2018_vm5, %v1999_v50 }
 0xaf9   : > { %v2005_v25 = vpop.permute.xlu1 %2004 }
 0xafa   : > { %2024 = vst.msk [vmem:[%s3975_s23 + $0x28] sm:$0xff] %vm2018_vm5, %v2005_v25  ;;  %v2003_v47 = vpop.permute.xlu0 %2002 }
 0xafb   : > { %2023 = vst.msk [vmem:[%s3975_s23 + $0x20] sm:$0xff] %vm2018_vm5, %v2003_v47 }
 0xafd   : > { %v2009_v18 = vpop.permute.xlu1 %2008 }
 0xafe   : > { %2026 = vst.msk [vmem:[%s3975_s23 + $0x38] sm:$0xff] %vm2018_vm5, %v2009_v18  ;;  %v2007_v62 = vpop.permute.xlu0 %2006 }
 0xaff   : > { %2025 = vst.msk [vmem:[%s3975_s23 + $0x30] sm:$0xff] %vm2018_vm5, %v2007_v62 }
 0xb00 PF: > { %s12_s9 = sadd.s32 1, %s3487_s9  }
 0xb01   : > { %p9_p4 = scmp.ge.s32.totalorder %s12_s9, 4  }
 0xb03   :  { %11 = sbr.rel (!%p9_p4) target bundleno = 1 (0x1), region = 61 }

// kernel: spatial_transformer_forward.20
= control target key start
LH: loop header
LB: loop body
LE: loop exit
PB: predicated region body
PF: predicated region fallthrough
CT: control target
= control target key end

     0   :  { %s1009_s15 = smov 0   ;;  %s1011_s16 = smov 0   ;;  %s1321_s0 = inlined_call_operand.vmem [shape: f32[128,512], index: 0, kind: input, shape index: {}]   ;;  %s1322_s1 = inlined_call_operand.vmem [shape: f32[512,128], index: 1, kind: input, shape index: {}]   ;;  %s1323_s2 = inlined_call_operand.vmem [shape: f32[1,128], index: 2, kind: input, shape index: {}]   ;;  %s1324_s3 = inlined_call_operand.vmem [shape: f32[128,128], index: 3, kind: input, shape index: {}]   ;;  %s1325_s4 = inlined_call_operand.vmem [shape: f32[128,128], index: 4, kind: output, shape index: {}]  }
   0x1   :  { %s1013_s17 = smov 0  }
   0x2 LB: > { %s26_s18 = sadd.s32 1, %s978_s16  ;;  %p748_p0 = scmp.ge.s32.totalorder %s982_s17, 1  ;;  %s982_s17 = sphi %s1013_s17, %s14_s17   ;;  %s978_s16 = sphi %s1011_s16, %s1328_s16   ;;  %s974_s15 = sphi %s1009_s15, %s1327_s15  }
   0x3   : > { %p28_p1 = scmp.ge.s32.totalorder %s26_s18, 2  ;;  %p211_p2 = scmp.lt.s32.totalorder %s982_s17, 3 }
   0x5   : > { %s1330_s18 = smov (%p28_p1, %s26_s18), 0  ;;  %p212_p3 = pnand %p748_p0, %p211_p2 }
   0x6   : > { %v336_v0 = vld [vmem:[%s1322_s1 + $0x80] sm:$0xff] (!%p212_p3)  ;;  %v337_v1 = vld [vmem:[%s1322_s1 + $0x88] sm:$0xff] (!%p212_p3)  ;;  %v338_v11 = vld [vmem:[%s1322_s1 + $0x90] sm:$0xff] (!%p212_p3)  ;;  %s749_s27 = sshll.u32 (!%p212_p3), %s974_s15, 3 }
   0x7   : > { %215 = sbr.rel (%p212_p3) target bundleno = 291 (0x123), region = 36  ;;  %v320_v2 = vld [vmem:[%s1322_s1] sm:$0xff] (!%p212_p3)  ;;  %v872_v3 = vpack.c.bf16 (!%p212_p3), %v337_v1, %v336_v0  ;;  %v321_v4 = vld [vmem:[%s1322_s1 + $0x8] sm:$0xff] (!%p212_p3)  ;;  %v339_v13 = vld [vmem:[%s1322_s1 + $0x98] sm:$0xff] (!%p212_p3)  ;;  %p1104_p4 = scmp.lt.s32.totalorder (!%p212_p3), %s749_s27, 15 }
   0x8   : > { %v368_v5 = vld [vmem:[%s1322_s1 + $0x180] sm:$0xff] (!%p212_p3)  ;;  %v369_v6 = vld [vmem:[%s1322_s1 + $0x188] sm:$0xff] (!%p212_p3)  ;;  %v874_v7 = vpack.c.bf16 (!%p212_p3), %v321_v4, %v320_v2  ;;  %v322_v14 = vld [vmem:[%s1322_s1 + $0x10] sm:$0xff] (!%p212_p3)  ;;  %v876_v16 = vpack.c.bf16 (!%p212_p3), %v339_v13, %v338_v11 }
   0x9   : > { %v904_v8 = vpack.c.bf16 (!%p212_p3), %v369_v6, %v368_v5  ;;  %v352_v9 = vld [vmem:[%s1322_s1 + $0x100] sm:$0xff] (!%p212_p3)  ;;  %v353_v10 = vld [vmem:[%s1322_s1 + $0x108] sm:$0xff] (!%p212_p3)  ;;  %873 = vmatprep.subr.bf16.mxu0 (!%p212_p3), %v872_v3  ;;  %v323_v15 = vld [vmem:[%s1322_s1 + $0x18] sm:$0xff] (!%p212_p3) }
   0xa   : > { %v906_v12 = vpack.c.bf16 (!%p212_p3), %v353_v10, %v352_v9  ;;  %875 = vmatpush3.bf16.msra.mxu0 (!%p212_p3), %v874_v7  ;;  %v878_v17 = vpack.c.bf16 (!%p212_p3), %v323_v15, %v322_v14  ;;  %v370_v18 = vld [vmem:[%s1322_s1 + $0x190] sm:$0xff] (!%p212_p3)  ;;  %v371_v19 = vld [vmem:[%s1322_s1 + $0x198] sm:$0xff] (!%p212_p3)  ;;  %v340_v23 = vld [vmem:[%s1322_s1 + $0xa0] sm:$0xff] (!%p212_p3) }
   0xb   : > { %905 = vmatprep.subr.bf16.mxu1 (!%p212_p3), %v904_v8  ;;  %v354_v20 = vld [vmem:[%s1322_s1 + $0x110] sm:$0xff] (!%p212_p3)  ;;  %v908_v21 = vpack.c.bf16 (!%p212_p3), %v371_v19, %v370_v18  ;;  %v355_v22 = vld [vmem:[%s1322_s1 + $0x118] sm:$0xff] (!%p212_p3)  ;;  %v341_v24 = vld [vmem:[%s1322_s1 + $0xa8] sm:$0xff] (!%p212_p3)  ;;  %877 = vmatprep.subr.bf16.mxu0 (!%p212_p3), %v876_v16 }
   0xc   : > { %907 = vmatpush3.bf16.msra.mxu1 (!%p212_p3), %v906_v12  ;;  %v910_v25 = vpack.c.bf16 (!%p212_p3), %v355_v22, %v354_v20  ;;  %v880_v26 = vpack.c.bf16 (!%p212_p3), %v341_v24, %v340_v23  ;;  %v324_v27 = vld [vmem:[%s1322_s1 + $0x20] sm:$0xff] (!%p212_p3)  ;;  %v325_v28 = vld [vmem:[%s1322_s1 + $0x28] sm:$0xff] (!%p212_p3)  ;;  %v342_v35 = vld [vmem:[%s1322_s1 + $0xb0] sm:$0xff] (!%p212_p3) }
   0xd   : > { %v372_v29 = vld [vmem:[%s1322_s1 + $0x1a0] sm:$0xff] (!%p212_p3)  ;;  %909 = vmatprep.subr.bf16.mxu1 (!%p212_p3), %v908_v21  ;;  %v373_v30 = vld [vmem:[%s1322_s1 + $0x1a8] sm:$0xff] (!%p212_p3)  ;;  %v882_v33 = vpack.c.bf16 (!%p212_p3), %v325_v28, %v324_v27  ;;  %v343_v36 = vld [vmem:[%s1322_s1 + $0xb8] sm:$0xff] (!%p212_p3) }
   0xe   : > { %v356_v31 = vld [vmem:[%s1322_s1 + $0x120] sm:$0xff]  ;;  %v357_v32 = vld [vmem:[%s1322_s1 + $0x128] sm:$0xff]  ;;  %879 = vmatpush3.bf16.msra.mxu0 %v878_v17  ;;  %v912_v34 = vpack.c.bf16 %v373_v30, %v372_v29  ;;  %v326_v37 = vld [vmem:[%s1322_s1 + $0x30] sm:$0xff]  ;;  %v884_v39 = vpack.c.bf16 %v343_v36, %v342_v35  ;;  %s1332_s27 = smov (!%p1104_p4, %s749_s27), 15 }
   0xf   : > { %881 = vmatprep.subr.bf16.mxu0 %v880_v26  ;;  %v914_v38 = vpack.c.bf16 %v357_v32, %v356_v31  ;;  %v327_v40 = vld [vmem:[%s1322_s1 + $0x38] sm:$0xff]  ;;  %v374_v41 = vld [vmem:[%s1322_s1 + $0x1b0] sm:$0xff]  ;;  %v344_v46 = vld [vmem:[%s1322_s1 + $0xc0] sm:$0xff]  ;;  %s759_s22 = sshll.u32 %s1332_s27, 5  ;;  %s753_s25 = sshll.u32 %s1332_s27, 3 }
  0x10   : > { %911 = vmatpush3.bf16.msra.mxu1 %v910_v25  ;;  %v375_v42 = vld [vmem:[%s1322_s1 + $0x1b8] sm:$0xff]  ;;  %v358_v44 = vld [vmem:[%s1322_s1 + $0x130] sm:$0xff]  ;;  %v345_v47 = vld [vmem:[%s1322_s1 + $0xc8] sm:$0xff]  ;;  %v886_v48 = vpack.c.bf16 %v327_v40, %v326_v37  ;;  %s1196_s11 = scalar_lea.vmem %s1321_s0, %s759_s22  ;;  %s1281_s30 = scalar_lea.vmem %s1324_s3, %s753_s25 }
  0x11   : > { %913 = vmatprep.subr.bf16.mxu1 %v912_v34  ;;  %v916_v43 = vpack.c.bf16 %v375_v42, %v374_v41  ;;  %v359_v45 = vld [vmem:[%s1322_s1 + $0x138] sm:$0xff]  ;;  %v376_v49 = vld [vmem:[%s1322_s1 + $0x1c0] sm:$0xff]  ;;  %v377_v50 = vld [vmem:[%s1322_s1 + $0x1c8] sm:$0xff]  ;;  %v888_v52 = vpack.c.bf16 %v345_v47, %v344_v46  ;;  %s1288_s15 = scalar_lea.vmem %s1325_s4, %s753_s25 }
  0x12   : > { %883 = vmatpush3.bf16.msra.mxu0 %v882_v33  ;;  %v918_v51 = vpack.c.bf16 %v359_v45, %v358_v44  ;;  %v328_v53 = vld [vmem:[%s1322_s1 + $0x40] sm:$0xff]  ;;  %v329_v54 = vld [vmem:[%s1322_s1 + $0x48] sm:$0xff]  ;;  %v920_v56 = vpack.c.bf16 %v377_v50, %v376_v49  ;;  %v346_v58 = vld [vmem:[%s1322_s1 + $0xd0] sm:$0xff] }
  0x13   : > { %885 = vmatprep.subr.bf16.mxu0 %v884_v39  ;;  %v360_v55 = vld [vmem:[%s1322_s1 + $0x140] sm:$0xff]  ;;  %v361_v57 = vld [vmem:[%s1322_s1 + $0x148] sm:$0xff]  ;;  %v347_v59 = vld [vmem:[%s1322_s1 + $0xd8] sm:$0xff]  ;;  %v890_v62 = vpack.c.bf16 %v329_v54, %v328_v53 }
  0x14   : > { %915 = vmatpush3.bf16.msra.mxu1 %v914_v38  ;;  %v378_v60 = vld [vmem:[%s1322_s1 + $0x1d0] sm:$0xff]  ;;  %v379_v61 = vld [vmem:[%s1322_s1 + $0x1d8] sm:$0xff]  ;;  %v922_v63 = vpack.c.bf16 %v361_v57, %v360_v55  ;;  %v892_v0 = vpack.c.bf16 %v347_v59, %v346_v58  ;;  %v348_v6 = vld [vmem:[%s1322_s1 + $0xe0] sm:$0xff] }
  0x15   : > { %917 = vmatprep.subr.bf16.mxu1 %v916_v43  ;;  %v330_v1 = vld [vmem:[%s1322_s1 + $0x50] sm:$0xff]  ;;  %v331_v2 = vld [vmem:[%s1322_s1 + $0x58] sm:$0xff]  ;;  %v924_v4 = vpack.c.bf16 %v379_v61, %v378_v60  ;;  %v349_v7 = vld [vmem:[%s1322_s1 + $0xe8] sm:$0xff] }
  0x16   : > { %887 = vmatpush3.bf16.msra.mxu0 %v886_v48  ;;  %v362_v3 = vld [vmem:[%s1322_s1 + $0x150] sm:$0xff]  ;;  %v363_v5 = vld [vmem:[%s1322_s1 + $0x158] sm:$0xff]  ;;  %v380_v8 = vld [vmem:[%s1322_s1 + $0x1e0] sm:$0xff]  ;;  %v894_v10 = vpack.c.bf16 %v331_v2, %v330_v1  ;;  %v896_v14 = vpack.c.bf16 %v349_v7, %v348_v6 }
  0x17   : > { %889 = vmatprep.subr.bf16.mxu0 %v888_v52  ;;  %v381_v9 = vld [vmem:[%s1322_s1 + $0x1e8] sm:$0xff]  ;;  %v332_v11 = vld [vmem:[%s1322_s1 + $0x60] sm:$0xff]  ;;  %v926_v13 = vpack.c.bf16 %v363_v5, %v362_v3  ;;  %v350_v19 = vld [vmem:[%s1322_s1 + $0xf0] sm:$0xff] }
  0x18   : > { %919 = vmatpush3.bf16.msra.mxu1 %v918_v51  ;;  %v333_v12 = vld [vmem:[%s1322_s1 + $0x68] sm:$0xff]  ;;  %v364_v15 = vld [vmem:[%s1322_s1 + $0x160] sm:$0xff]  ;;  %v928_v18 = vpack.c.bf16 %v381_v9, %v380_v8  ;;  %v351_v20 = vld [vmem:[%s1322_s1 + $0xf8] sm:$0xff] }
  0x19   : > { %921 = vmatprep.subr.bf16.mxu1 %v920_v56  ;;  %v365_v16 = vld [vmem:[%s1322_s1 + $0x168] sm:$0xff]  ;;  %v291_v21 = vld [vmem:[%s1196_s11 + $0x18] sm:$0xff]  ;;  %v382_v22 = vld [vmem:[%s1322_s1 + $0x1f0] sm:$0xff]  ;;  %v898_v24 = vpack.c.bf16 %v333_v12, %v332_v11  ;;  %v900_v26 = vpack.c.bf16 %v351_v20, %v350_v19 }
  0x1a   : > { %891 = vmatpush3.bf16.msra.mxu0 %v890_v62  ;;  %v289_v17 = vld [vmem:[%s1196_s11 + $0x8] sm:$0xff]  ;;  %v383_v23 = vld [vmem:[%s1322_s1 + $0x1f8] sm:$0xff]  ;;  %560 = vmatprep.mubr.f32.mxu1 %v291_v21  ;;  %v930_v25 = vpack.c.bf16 %v365_v16, %v364_v15  ;;  %v334_v27 = vld [vmem:[%s1322_s1 + $0x70] sm:$0xff] }
  0x1b   : > { %893 = vmatprep.subr.bf16.mxu0 %v892_v0  ;;  %455 = vmatprep.mubr.f32.mxu0 %v289_v17  ;;  %v335_v28 = vld [vmem:[%s1322_s1 + $0x78] sm:$0xff]  ;;  %v932_v29 = vpack.c.bf16 %v383_v23, %v382_v22  ;;  %v366_v30 = vld [vmem:[%s1322_s1 + $0x170] sm:$0xff]  ;;  %v288_v34 = vld [vmem:[%s1196_s11] sm:$0xff] }
  0x1c   : > { %923 = vmatpush3.bf16.msra.mxu1 %v922_v63  ;;  %v367_v31 = vld [vmem:[%s1322_s1 + $0x178] sm:$0xff]  ;;  %v902_v32 = vpack.c.bf16 %v335_v28, %v334_v27  ;;  %v290_v35 = vld [vmem:[%s1196_s11 + $0x10] sm:$0xff]  ;;  %v293_v36 = vld [vmem:[%s1196_s11 + $0x28] sm:$0xff] }
  0x1d   : > { %925 = vmatprep.subr.bf16.mxu1 %v924_v4  ;;  %v934_v33 = vpack.c.bf16 %v367_v31, %v366_v30  ;;  %v295_v37 = vld [vmem:[%s1196_s11 + $0x38] sm:$0xff]  ;;  %v292_v38 = vld [vmem:[%s1196_s11 + $0x20] sm:$0xff]  ;;  %v294_v39 = vld [vmem:[%s1196_s11 + $0x30] sm:$0xff] }
  0x1e   : > { %895 = vmatpush3.bf16.msra.mxu0 %v894_v10  ;;  %v297_v40 = vld [vmem:[%s1196_s11 + $0x48] sm:$0xff]  ;;  %v299_v41 = vld [vmem:[%s1196_s11 + $0x58] sm:$0xff]  ;;  %v296_v42 = vld [vmem:[%s1196_s11 + $0x40] sm:$0xff] }
  0x1f   : > { %897 = vmatprep.subr.bf16.mxu0 %v896_v14  ;;  %v298_v43 = vld [vmem:[%s1196_s11 + $0x50] sm:$0xff]  ;;  %v301_v44 = vld [vmem:[%s1196_s11 + $0x68] sm:$0xff]  ;;  %v303_v45 = vld [vmem:[%s1196_s11 + $0x78] sm:$0xff] }
  0x20   : > { %927 = vmatpush3.bf16.msra.mxu1 %v926_v13  ;;  %v300_v46 = vld [vmem:[%s1196_s11 + $0x60] sm:$0xff]  ;;  %v302_v47 = vld [vmem:[%s1196_s11 + $0x70] sm:$0xff]  ;;  %v305_v48 = vld [vmem:[%s1196_s11 + $0x88] sm:$0xff] }
  0x21   : > { %929 = vmatprep.subr.bf16.mxu1 %v928_v18  ;;  %v307_v49 = vld [vmem:[%s1196_s11 + $0x98] sm:$0xff]  ;;  %v304_v50 = vld [vmem:[%s1196_s11 + $0x80] sm:$0xff]  ;;  %v306_v51 = vld [vmem:[%s1196_s11 + $0x90] sm:$0xff] }
  0x22   : > { %899 = vmatpush3.bf16.msra.mxu0 %v898_v24  ;;  %v309_v52 = vld [vmem:[%s1196_s11 + $0xa8] sm:$0xff]  ;;  %v311_v53 = vld [vmem:[%s1196_s11 + $0xb8] sm:$0xff]  ;;  %v308_v54 = vld [vmem:[%s1196_s11 + $0xa0] sm:$0xff] }
  0x23   : > { %901 = vmatprep.subr.bf16.mxu0 %v900_v26  ;;  %v310_v55 = vld [vmem:[%s1196_s11 + $0xb0] sm:$0xff]  ;;  %v313_v56 = vld [vmem:[%s1196_s11 + $0xc8] sm:$0xff]  ;;  %v315_v57 = vld [vmem:[%s1196_s11 + $0xd8] sm:$0xff] }
  0x24   : > { %931 = vmatpush3.bf16.msra.mxu1 %v930_v25  ;;  %v312_v58 = vld [vmem:[%s1196_s11 + $0xc0] sm:$0xff]  ;;  %v314_v59 = vld [vmem:[%s1196_s11 + $0xd0] sm:$0xff]  ;;  %v317_v60 = vld [vmem:[%s1196_s11 + $0xe8] sm:$0xff] }
  0x25   : > { %933 = vmatprep.subr.bf16.mxu1 %v932_v29  ;;  %v319_v61 = vld [vmem:[%s1196_s11 + $0xf8] sm:$0xff]  ;;  %v316_v62 = vld [vmem:[%s1196_s11 + $0xe0] sm:$0xff]  ;;  %v318_v63 = vld [vmem:[%s1196_s11 + $0xf0] sm:$0xff] }
  0x26   : > { %903 = vmatpush3.bf16.msra.mxu0 %v902_v32  ;;  %v1276_v1 = vld [vmem:[%s1323_s2] ss:$0 sm:$0xff]  ;;  %v602_v19 = vld [vmem:[%s1281_s30 + $0x8] sm:$0xff]  ;;  %v603_v29 = vld [vmem:[%s1281_s30 + $0x10] sm:$0xff] }
  0x27   : > { %v601_v9 = vld [vmem:[%s1281_s30] sm:$0xff] }
  0x28   : > { %935 = vmatpush3.bf16.msra.mxu1 %v934_v33 }
  0x29   : > { %456 = vmatmul.mubr.f32.vlgmr.msra.gmra.mrb[0].mxu0 %v288_v34 }
  0x2a   : > { %460 = vmatprep.mubr.f32.mxu0 %v293_v36 }
  0x2b   : > { %561 = vmatmul.mubr.f32.vlgmr.msra.gmra.mrb[0].mxu1 %v290_v35 }
  0x2c   : > { %565 = vmatprep.mubr.f32.mxu1 %v295_v37 }
  0x2d   : > { %461 = vmatmul.mubr.f32.gmra.mrb[2].mxu0 %v292_v38 }
  0x2e   : > { %465 = vmatprep.mubr.f32.mxu0 %v297_v40 }
  0x2f   : > { %566 = vmatmul.mubr.f32.gmra.mrb[2].mxu1 %v294_v39  ;;  %v604_v39 = vld [vmem:[%s1281_s30 + $0x18] sm:$0xff] }
  0x30   : > { %570 = vmatprep.mubr.f32.mxu1 %v299_v41 }
  0x31   : > { %466 = vmatmul.mubr.f32.gmra.mrb[4].mxu0 %v296_v42 }
  0x32   : > { %470 = vmatprep.mubr.f32.mxu0 %v301_v44 }
  0x33   : > { %571 = vmatmul.mubr.f32.gmra.mrb[4].mxu1 %v298_v43 }
  0x34   : > { %575 = vmatprep.mubr.f32.mxu1 %v303_v45 }
  0x35   : > { %471 = vmatmul.mubr.f32.gmra.mrb[6].mxu0 %v300_v46 }
  0x36   : > { %475 = vmatprep.mubr.f32.mxu0 %v305_v48 }
  0x37   : > { %576 = vmatmul.mubr.f32.gmra.mrb[6].mxu1 %v302_v47 }
  0x38   : > { %580 = vmatprep.mubr.f32.mxu1 %v307_v49  ;;  %v605_v49 = vld [vmem:[%s1281_s30 + $0x20] sm:$0xff] }
  0x39   : > { %476 = vmatmul.mubr.f32.gmra.mrb[8].mxu0 %v304_v50 }
  0x3a   : > { %480 = vmatprep.mubr.f32.mxu0 %v309_v52 }
  0x3b   : > { %581 = vmatmul.mubr.f32.gmra.mrb[8].mxu1 %v306_v51 }
  0x3c   : > { %585 = vmatprep.mubr.f32.mxu1 %v311_v53 }
  0x3d   : > { %481 = vmatmul.mubr.f32.gmra.mrb[10].mxu0 %v308_v54 }
  0x3e   : > { %485 = vmatprep.mubr.f32.mxu0 %v313_v56 }
  0x3f   : > { %586 = vmatmul.mubr.f32.gmra.mrb[10].mxu1 %v310_v55 }
  0x40   : > { %590 = vmatprep.mubr.f32.mxu1 %v315_v57 }
  0x41   : > { %486 = vmatmul.mubr.f32.gmra.mrb[12].mxu0 %v312_v58 }
  0x42   : > { %490 = vmatprep.mubr.f32.mxu0 %v317_v60 }
  0x43   : > { %591 = vmatmul.mubr.f32.gmra.mrb[12].mxu1 %v314_v59  ;;  %v606_v59 = vld [vmem:[%s1281_s30 + $0x28] sm:$0xff] }
  0x44   : > { %595 = vmatprep.mubr.f32.mxu1 %v319_v61 }
  0x45   : > { %491 = vmatmul.mubr.f32.gmra.mrb[14].mxu0 %v316_v62 }
  0x47   : > { %596 = vmatmul.mubr.f32.gmra.mrb[14].mxu1 %v318_v63 }
  0xfc   : > { %v792_v0 = vpop.f32.mrb[0].mxu0 }
  0xfd   : > { %v793_v2 = vpop.f32.mrb[1].mxu0 }
  0xfe   : > { %v848_v3 = vpop.f32.mrb[0].mxu1  ;;  %v794_v4 = vadd.f32 %v793_v2, %v792_v0 }
  0xff   : > { %v849_v5 = vpop.f32.mrb[1].mxu1 }
 0x100   : > { %v850_v6 = vadd.f32 %v849_v5, %v848_v3  ;;  %v458_v7 = vadd.f32 %v794_v4, %v1276_v1  ;;  %v795_v8 = vpop.f32.mrb[2].mxu0 }
 0x101   : > { %v796_v10 = vpop.f32.mrb[3].mxu0 }
 0x102   : > { %v851_v11 = vpop.f32.mrb[2].mxu1  ;;  %v563_v12 = vadd.f32 %v850_v6, %v458_v7  ;;  %v797_v13 = vadd.f32 %v796_v10, %v795_v8  ;;  %v607_v6 = vld [vmem:[%s1281_s30 + $0x30] sm:$0xff] }
 0x103   : > { %v852_v14 = vpop.f32.mrb[3].mxu1 }
 0x104   : > { %v853_v15 = vadd.f32 %v852_v14, %v851_v11  ;;  %v609_v16 = vadd.f32 %v601_v9, %v563_v12  ;;  %v463_v17 = vadd.f32 %v797_v13, %v1276_v1  ;;  %v798_v18 = vpop.f32.mrb[4].mxu0 }
 0x105   : > { %v799_v20 = vpop.f32.mrb[5].mxu0 }
 0x106   : > { %v854_v21 = vpop.f32.mrb[4].mxu1  ;;  %617 = vst [vmem:[%s1288_s15] sm:$0xff] %v609_v16  ;;  %v568_v22 = vadd.f32 %v853_v15, %v463_v17  ;;  %v800_v23 = vadd.f32 %v799_v20, %v798_v18  ;;  %v608_v15 = vld [vmem:[%s1281_s30 + $0x38] sm:$0xff] }
 0x107   : > { %v855_v24 = vpop.f32.mrb[5].mxu1 }
 0x108   : > { %v856_v25 = vadd.f32 %v855_v24, %v854_v21  ;;  %v610_v26 = vadd.f32 %v602_v19, %v568_v22  ;;  %v468_v27 = vadd.f32 %v800_v23, %v1276_v1  ;;  %v801_v28 = vpop.f32.mrb[6].mxu0 }
 0x109   : > { %v802_v30 = vpop.f32.mrb[7].mxu0 }
 0x10a   : > { %v857_v31 = vpop.f32.mrb[6].mxu1  ;;  %618 = vst [vmem:[%s1288_s15 + $0x8] sm:$0xff] %v610_v26  ;;  %v573_v32 = vadd.f32 %v856_v25, %v468_v27  ;;  %v803_v33 = vadd.f32 %v802_v30, %v801_v28 }
 0x10b   : > { %v858_v34 = vpop.f32.mrb[7].mxu1 }
 0x10c   : > { %v859_v35 = vadd.f32 %v858_v34, %v857_v31  ;;  %v611_v36 = vadd.f32 %v603_v29, %v573_v32  ;;  %v473_v37 = vadd.f32 %v803_v33, %v1276_v1  ;;  %v804_v38 = vpop.f32.mrb[8].mxu0 }
 0x10d   : > { %v805_v40 = vpop.f32.mrb[9].mxu0 }
 0x10e   : > { %v860_v41 = vpop.f32.mrb[8].mxu1  ;;  %619 = vst [vmem:[%s1288_s15 + $0x10] sm:$0xff] %v611_v36  ;;  %v578_v42 = vadd.f32 %v859_v35, %v473_v37  ;;  %v806_v43 = vadd.f32 %v805_v40, %v804_v38 }
 0x10f   : > { %v861_v44 = vpop.f32.mrb[9].mxu1 }
 0x110   : > { %v862_v45 = vadd.f32 %v861_v44, %v860_v41  ;;  %v612_v46 = vadd.f32 %v604_v39, %v578_v42  ;;  %v478_v47 = vadd.f32 %v806_v43, %v1276_v1  ;;  %v807_v48 = vpop.f32.mrb[10].mxu0 }
 0x111   : > { %v808_v50 = vpop.f32.mrb[11].mxu0 }
 0x112   : > { %v863_v51 = vpop.f32.mrb[10].mxu1  ;;  %620 = vst [vmem:[%s1288_s15 + $0x18] sm:$0xff] %v612_v46  ;;  %v583_v52 = vadd.f32 %v862_v45, %v478_v47  ;;  %v809_v53 = vadd.f32 %v808_v50, %v807_v48 }
 0x113   : > { %v864_v54 = vpop.f32.mrb[11].mxu1 }
 0x114   : > { %v865_v55 = vadd.f32 %v864_v54, %v863_v51  ;;  %v613_v56 = vadd.f32 %v605_v49, %v583_v52  ;;  %v483_v57 = vadd.f32 %v809_v53, %v1276_v1  ;;  %v810_v58 = vpop.f32.mrb[12].mxu0 }
 0x115   : > { %v811_v60 = vpop.f32.mrb[13].mxu0 }
 0x116   : > { %v866_v61 = vpop.f32.mrb[12].mxu1  ;;  %621 = vst [vmem:[%s1288_s15 + $0x20] sm:$0xff] %v613_v56  ;;  %v588_v62 = vadd.f32 %v865_v55, %v483_v57  ;;  %v812_v63 = vadd.f32 %v811_v60, %v810_v58 }
 0x117   : > { %v867_v0 = vpop.f32.mrb[13].mxu1 }
 0x118   : > { %v868_v2 = vadd.f32 %v867_v0, %v866_v61  ;;  %v614_v3 = vadd.f32 %v606_v59, %v588_v62  ;;  %v488_v4 = vadd.f32 %v812_v63, %v1276_v1  ;;  %v813_v5 = vpop.f32.mrb[14].mxu0 }
 0x119   : > { %v814_v7 = vpop.f32.mrb[15].mxu0 }
 0x11a   : > { %v869_v8 = vpop.f32.mrb[14].mxu1  ;;  %622 = vst [vmem:[%s1288_s15 + $0x28] sm:$0xff] %v614_v3  ;;  %v593_v9 = vadd.f32 %v868_v2, %v488_v4  ;;  %v815_v10 = vadd.f32 %v814_v7, %v813_v5 }
 0x11b   : > { %v870_v11 = vpop.f32.mrb[15].mxu1 }
 0x11c   : > { %v871_v12 = vadd.f32 %v870_v11, %v869_v8  ;;  %v615_v13 = vadd.f32 %v607_v6, %v593_v9  ;;  %v493_v14 = vadd.f32 %v815_v10, %v1276_v1 }
 0x11e   : > { %623 = vst [vmem:[%s1288_s15 + $0x30] sm:$0xff] %v615_v13  ;;  %v598_v16 = vadd.f32 %v871_v12, %v493_v14 }
 0x120   : > { %v616_v17 = vadd.f32 %v608_v15, %v598_v16 }
 0x122   : > { %624 = vst [vmem:[%s1288_s15 + $0x38] sm:$0xff] %v616_v17 }
 0x123 PF: > { %s14_s17 = sadd.s32 1, %s982_s17   ;;  %s1327_s15 = smov %s978_s16 }
 0x124   : > { %p11_p5 = scmp.ge.s32.totalorder %s14_s17, 4   ;;  %s1328_s16 = smov %s1330_s18 }
 0x126   :  { %13 = sbr.rel (!%p11_p5) target bundleno = 2 (0x2), region = 75 }

// kernel: spatial_transformer_forward.21
= control target key start
LH: loop header
LB: loop body
LE: loop exit
PB: predicated region body
PF: predicated region fallthrough
CT: control target
= control target key end

     0   :  { %9 = vsyncpa [#allocation3], 0  ;;  %s1074_s0 = inlined_call_operand.vmem [shape: f32[128,128], index: 0, kind: input, shape index: {}]   ;;  %s1075_s1 = inlined_call_operand.vmem [shape: f32[128,64], index: 1, kind: input, shape index: {}]   ;;  %s1076_s2 = inlined_call_operand.vmem [shape: f32[1,64], index: 2, kind: input, shape index: {}]   ;;  %s1077_s3 = inlined_call_operand.vmem [shape: f32[128,64], index: 3, kind: input, shape index: {}]   ;;  %s1078_s4 = inlined_call_operand.hbm [shape: f32[128,64], index: 4, kind: output, shape index: {}]  }
   0x1   :  { %11 = vsyncpa [#allocation3 + $0x1], 0  ;;  %s867_s15 = smov 0   ;;  %s869_s16 = smov 0  }
   0x2   :  { %s871_s17 = smov 0   ;;  %s873_s18 = smov 0  }
   0x3   :  { %s875_s19 = smov 0   ;;  %s877_s20 = smov 0  }
   0x4 LB: > { %s567_s21 = sadd.s32 4294967295, %s837_s20   ;;  %s568_s22 = sadd.s32 4294967294, %s837_s20   ;;  %s837_s20 = sphi %s877_s20, %s17_s20   ;;  %s833_s19 = sphi %s875_s19, %s1085_s19   ;;  %s829_s18 = sphi %s873_s18, %s1084_s18   ;;  %s825_s17 = sphi %s871_s17, %s1083_s17   ;;  %s821_s16 = sphi %s869_s16, %s1082_s16   ;;  %s817_s15 = sphi %s867_s15, %s1081_s15  }
   0x5   : > { %s29_s23 = sadd.s32 1, %s833_s19  ;;  %s144_s24 = sadd.s32 1, %s825_s17 }
   0x6   : > { %p31_p0 = scmp.ge.s32.totalorder %s29_s23, 2  ;;  %p154_p1 = scmp.ne.s32.totalorder %s825_s17, %s821_s16 }
   0x7   : > { %p155_p2 = scmp.eq.s32.totalorder %s567_s21, 1  ;;  %p160_p3 = scmp.ne.s32.totalorder %s821_s16, %s817_s15 }
   0x8   : > { %s1087_s23 = smov (%p31_p0, %s29_s23), 0  ;;  %p161_p5 = scmp.eq.s32.totalorder %s568_s22, 1 }
   0x9   : > { %p907_p4 = por %p155_p2, %p154_p1  ;;  %s139_s26 = ssub.s32 %s833_s19, %s1087_s23 }
   0xa   : > { %p573_p6 = scmp.ge.s32.totalorder %s837_s20, 1  ;;  %p142_p7 = scmp.eq.s32.totalorder %s139_s26, 0 }
   0xb   : > { %p914_p8 = por %p161_p5, %p160_p3  ;;  %p213_p9 = scmp.lt.s32.totalorder %s837_s20, 3 }
   0xc   : > { %s920_s28 = scalar_select %p142_p7, %s825_s17, %s144_s24  }
   0xd   : > { %p214_p10 = pnand %p573_p6, %p213_p9 }
   0xe   : > { %v285_v0 = vld [vmem:[%s1075_s1] sm:$0xff] (!%p214_p10)  ;;  %v286_v1 = vld [vmem:[%s1075_s1 + $0x8] sm:$0xff] (!%p214_p10)  ;;  %v287_v2 = vld [vmem:[%s1075_s1 + $0x10] sm:$0xff] (!%p214_p10)  ;;  %s575_s9 = sshll.u32 (!%p214_p10), %s829_s18, 3  ;;  %s251_s12 = sand.u32 (!%p214_p10), 1, %s821_s16   ;;  %vm429_vm0 = vcmask (!%p214_p10), 523264  }
   0xf   : > { %217 = sbr.rel (%p214_p10) target bundleno = 286 (0x11e), region = 36  ;;  %v654_v3 = vpack.c.bf16 (!%p214_p10), %v286_v1, %v285_v0  ;;  %v288_v4 = vld [vmem:[%s1075_s1 + $0x18] sm:$0xff] (!%p214_p10)  ;;  %p255_p11 = scmp.lt.s32.totalorder (!%p214_p10), %s575_s9, 15  ;;  %v289_v6 = vld [vmem:[%s1075_s1 + $0x20] sm:$0xff] (!%p214_p10)  ;;  %v290_v7 = vld [vmem:[%s1075_s1 + $0x28] sm:$0xff] (!%p214_p10) }
  0x10   : > { %v658_v5 = vpack.c.bf16 (!%p214_p10), %v288_v4, %v287_v2  ;;  %v662_v8 = vpack.c.bf16 (!%p214_p10), %v290_v7, %v289_v6  ;;  %v291_v9 = vld [vmem:[%s1075_s1 + $0x30] sm:$0xff] (!%p214_p10)  ;;  %v292_v10 = vld [vmem:[%s1075_s1 + $0x38] sm:$0xff] (!%p214_p10)  ;;  %v293_v14 = vld [vmem:[%s1075_s1 + $0x40] sm:$0xff] (!%p214_p10)  ;;  %s574_s29 = sshll.u32 (!%p214_p10), %s251_s12, 6  ;;  %s1028_s6 = scalar_lea.sflag (!%p214_p10), [#allocation3], %s251_s12 }
  0x11   : > { %655 = vmatprep.subr.bf16.mxu0 (!%p214_p10), %v654_v3  ;;  %686 = vmatprep.subr.bf16.mxu1 (!%p214_p10), %v654_v3  ;;  %v666_v13 = vpack.c.bf16 (!%p214_p10), %v292_v10, %v291_v9  ;;  %v294_v15 = vld [vmem:[%s1075_s1 + $0x48] sm:$0xff] (!%p214_p10)  ;;  %v295_v17 = vld [vmem:[%s1075_s1 + $0x50] sm:$0xff] (!%p214_p10)  ;;  %v296_v18 = vld [vmem:[%s1075_s1 + $0x58] sm:$0xff] (!%p214_p10)  ;;  %s839_s10 = smov (!%p214_p10), [#allocation2]  }
  0x12   : > { %657 = vmatpush3.bf16.msra.mxu0 (!%p214_p10), %v654_v3  ;;  %694 = vmatpush3.bf16.msra.mxu1 (!%p214_p10), %v654_v3  ;;  %v670_v16 = vpack.c.bf16 (!%p214_p10), %v294_v15, %v293_v14  ;;  %v674_v19 = vpack.c.bf16 (!%p214_p10), %v296_v18, %v295_v17  ;;  %v297_v20 = vld [vmem:[%s1075_s1 + $0x60] sm:$0xff] (!%p214_p10)  ;;  %v298_v21 = vld [vmem:[%s1075_s1 + $0x68] sm:$0xff] (!%p214_p10)  ;;  %v299_v23 = vld [vmem:[%s1075_s1 + $0x70] sm:$0xff] (!%p214_p10)  ;;  %s763_s11 = sshll.u32 (!%p214_p10), %s839_s10, 4  ;;  %s764_s11 = int_to_ptr.vmem [resolvable:$false] %s763_s11 }
  0x13   : > { %659 = vmatprep.subr.bf16.mxu0 (!%p214_p10), %v658_v5  ;;  %687 = vmatprep.subr.bf16.mxu1 (!%p214_p10), %v658_v5  ;;  %v678_v22 = vpack.c.bf16 (!%p214_p10), %v298_v21, %v297_v20  ;;  %v300_v24 = vld [vmem:[%s1075_s1 + $0x78] sm:$0xff] (!%p214_p10)  ;;  %v579_v32 = vld [vmem:[%s1076_s2] ss:$0 sm:$0xff] (!%p214_p10)  ;;  %s765_s13 = scalar_lea.vmem (!%p214_p10), %s764_s11, 2048 }
  0x14   : > { %v682_v25 = vpack.c.bf16 (!%p214_p10), %v300_v24, %v299_v23 }
  0x16   : > { %s1089_s9 = smov (!%p255_p11, %s575_s9), 15  ;;  %661 = vmatpush3.bf16.msra.mxu0 %v658_v5  ;;  %695 = vmatpush3.bf16.msra.mxu1 %v658_v5 }
  0x17   : > { %s576_s22 = sshll.u32 %s1089_s9, 3  ;;  %663 = vmatprep.subr.bf16.mxu0 %v662_v8  ;;  %688 = vmatprep.subr.bf16.mxu1 %v662_v8  ;;  %s585_s9 = sshll.u32 %s829_s18, 10 }
  0x18   : > { %s955_s7 = scalar_lea.vmem %s1074_s0, %s576_s22  ;;  %s995_s21 = scalar_lea.vmem %s1077_s3, %s576_s22 }
  0x19   : > { %v277_v11 = vld [vmem:[%s955_s7] sm:$0xff]  ;;  %v278_v26 = vld [vmem:[%s955_s7 + $0x8] sm:$0xff]  ;;  %v279_v28 = vld [vmem:[%s955_s7 + $0x10] sm:$0xff]  ;;  %s253_s22 = scalar_lea.vmem [#allocation2], %s574_s29  ;;  %s1018_s5 = scalar_lea.hbm %s1078_s4, %s585_s9 }
  0x1a   : > { %v281_v12 = vld [vmem:[%s955_s7 + $0x20] sm:$0xff]  ;;  %642 = vmatprep.mubr.f32.mxu0 %v277_v11  ;;  %665 = vmatpush3.bf16.msra.mxu0 %v662_v8  ;;  %v282_v27 = vld [vmem:[%s955_s7 + $0x28] sm:$0xff]  ;;  %v283_v29 = vld [vmem:[%s955_s7 + $0x30] sm:$0xff] }
  0x1b   : > { %648 = vmatprep.mubr.f32.mxu1 %v281_v12  ;;  %696 = vmatpush3.bf16.msra.mxu1 %v662_v8  ;;  %v280_v30 = vld [vmem:[%s955_s7 + $0x18] sm:$0xff]  ;;  %v414_v34 = vld [vmem:[%s995_s21 + $0x8] sm:$0xff]  ;;  %v413_v40 = vld [vmem:[%s995_s21] sm:$0xff] }
  0x1c   : > { %667 = vmatprep.subr.bf16.mxu0 %v666_v13  ;;  %689 = vmatprep.subr.bf16.mxu1 %v666_v13  ;;  %v284_v31 = vld [vmem:[%s955_s7 + $0x38] sm:$0xff]  ;;  %v418_v36 = vld [vmem:[%s995_s21 + $0x28] sm:$0xff]  ;;  %v417_v42 = vld [vmem:[%s995_s21 + $0x20] sm:$0xff]  ;;  %s453_s7 = sshll.u32 %s253_s22, 4  ;;  %s1020_s7 = int_to_ptr.vmem [resolvable:$true] %s453_s7 }
  0x1d   : > { %v416_v50 = vld [vmem:[%s995_s21 + $0x18] sm:$0xff]  ;;  %v415_v56 = vld [vmem:[%s995_s21 + $0x10] sm:$0xff]  ;;  %s759_s8 = scalar_lea.vmem %s1020_s7, 1024  ;;  %p766_p1 = scmp.lt.s32.totalorder %s1020_s7, %s764_s11 }
  0x1e   : > { %669 = vmatpush3.bf16.msra.mxu0 %v666_v13  ;;  %v420_v52 = vld [vmem:[%s995_s21 + $0x38] sm:$0xff]  ;;  %v419_v58 = vld [vmem:[%s995_s21 + $0x30] sm:$0xff]  ;;  %p760_p12 = scmp.ne.s32.totalorder %s1020_s7, %s759_s8  ;;  %p767_p2 = scmp.lt.s32.totalorder %s765_s13, %s759_s8 }
  0x1f   : > { %697 = vmatpush3.bf16.msra.mxu1 %v666_v13  ;;  %671 = vmatprep.subr.bf16.mxu0 %v670_v16 }
  0x20   : > { %690 = vmatprep.subr.bf16.mxu1 %v670_v16  ;;  %p761_p13 = pnand %p760_p12, %p907_p4  ;;  %p768_p3 = por %p767_p2, %p766_p1 }
  0x22   : > { %673 = vmatpush3.bf16.msra.mxu0 %v670_v16  ;;  %p762_p0 = pneg %p761_p13 }
  0x23   : > { %698 = vmatpush3.bf16.msra.mxu1 %v670_v16  ;;  %675 = vmatprep.subr.bf16.mxu0 %v674_v19 }
  0x24   : > { %691 = vmatprep.subr.bf16.mxu1 %v674_v19  ;;  %p769_p5 = pnand %p768_p3, %p762_p0 }
  0x26   : > { %677 = vmatpush3.bf16.msra.mxu0 %v674_v19 }
  0x27   : > { %699 = vmatpush3.bf16.msra.mxu1 %v674_v19  ;;  %679 = vmatprep.subr.bf16.mxu0 %v678_v22 }
  0x28   : > { %692 = vmatprep.subr.bf16.mxu1 %v678_v22 }
  0x2a   : > { %681 = vmatpush3.bf16.msra.mxu0 %v678_v22 }
  0x2b   : > { %700 = vmatpush3.bf16.msra.mxu1 %v678_v22  ;;  %683 = vmatprep.subr.bf16.mxu0 %v682_v25 }
  0x2c   : > { %693 = vmatprep.subr.bf16.mxu1 %v682_v25 }
  0x2e   : > { %685 = vmatpush3.bf16.msra.mxu0 %v682_v25 }
  0x2f   : > { %701 = vmatpush3.bf16.msra.mxu1 %v682_v25 }
  0x31   : > { %643 = vmatmul.mubr.f32.vlgmr.msra.gmra.mrb[0].mxu0 %v278_v26 }
  0x32   : > { %649 = vmatmul.mubr.f32.vlgmr.msra.gmra.mrb[0].mxu1 %v282_v27  ;;  %645 = vmatprep.mubr.f32.mxu0 %v279_v28 }
  0x33   : > { %651 = vmatprep.mubr.f32.mxu1 %v283_v29 }
  0x35   : > { %646 = vmatmul.mubr.f32.gmra.mrb[2].mxu0 %v280_v30 }
  0x36   : > { %652 = vmatmul.mubr.f32.gmra.mrb[2].mxu1 %v284_v31 }
 0x104   : > { %v644_v33 = vpop.f32.mrb[0].mxu0 }
 0x105   : > { %v650_v35 = vpop.f32.mrb[0].mxu1  ;;  %v380_v37 = vadd.f32 %v644_v33, %v579_v32  ;;  %v374_v39 = vpop.f32.mrb[1].mxu0 }
 0x106   : > { %v400_v38 = vadd.f32 %v650_v35, %v579_v32  ;;  %v394_v41 = vpop.f32.mrb[1].mxu1  ;;  %v375_v43 = vadd.f32 %v579_v32, %v374_v39 }
 0x107   : > { %v395_v44 = vadd.f32 %v579_v32, %v394_v41  ;;  %v422_v45 = vadd.f32 %v414_v34, %v380_v37 }
 0x108   : > { %v426_v46 = vadd.f32 %v418_v36, %v400_v38  ;;  %v421_v47 = vadd.f32 %v413_v40, %v375_v43  ;;  %v647_v49 = vpop.f32.mrb[2].mxu0 }
 0x109   : > { %v425_v48 = vadd.f32 %v417_v42, %v395_v44  ;;  %v653_v51 = vpop.f32.mrb[2].mxu1  ;;  %431 = vst.msk [vmem:[%s253_s22 + $0x8] sm:$0xff] %vm429_vm0, %v422_v45  ;;  %v390_v53 = vadd.f32 %v647_v49, %v579_v32  ;;  %v384_v55 = vpop.f32.mrb[3].mxu0 }
 0x10a   : > { %435 = vst.msk [vmem:[%s253_s22 + $0x28] sm:$0xff] %vm429_vm0, %v426_v46  ;;  %v410_v54 = vadd.f32 %v653_v51, %v579_v32  ;;  %v404_v57 = vpop.f32.mrb[3].mxu1  ;;  %430 = vst.msk [vmem:[%s253_s22] sm:$0xff] %vm429_vm0, %v421_v47  ;;  %v385_v59 = vadd.f32 %v579_v32, %v384_v55 }
 0x10b   : > { %434 = vst.msk [vmem:[%s253_s22 + $0x20] sm:$0xff] %vm429_vm0, %v425_v48  ;;  %v405_v60 = vadd.f32 %v579_v32, %v404_v57  ;;  %v424_v61 = vadd.f32 %v416_v50, %v390_v53 }
 0x10c   : > { %v428_v62 = vadd.f32 %v420_v52, %v410_v54  ;;  %v423_v63 = vadd.f32 %v415_v56, %v385_v59 }
 0x10d   : > { %v427_v0 = vadd.f32 %v419_v58, %v405_v60  ;;  %433 = vst.msk [vmem:[%s253_s22 + $0x18] sm:$0xff] %vm429_vm0, %v424_v61 }
 0x10e   : > { %437 = vst.msk [vmem:[%s253_s22 + $0x38] sm:$0xff] %vm429_vm0, %v428_v62  ;;  %432 = vst.msk [vmem:[%s253_s22 + $0x10] sm:$0xff] %vm429_vm0, %v423_v63 }
 0x10f   : > { %436 = vst.msk [vmem:[%s253_s22 + $0x30] sm:$0xff] %vm429_vm0, %v427_v0 }
 0x110   : > { %772 = shalt.err (!%p769_p5)
}
 0x111   : > { %s773_s12 = scalar_lea.hbm %s1018_s5, 1024  ;;  %s777_s24 = scalar_lea.hbm %s1078_s4, 2048 }
 0x112   : > { %p774_p6 = scmp.ne.s32.totalorder %s1018_s5, %s773_s12  ;;  %p778_p10 = scmp.lt.u32.totalorder %s1018_s5, %s1078_s4 }
 0x113   : > { %p779_p11 = scmp.lt.u32.totalorder %s777_s24, %s773_s12  ;;  %p781_p13 = scmp.lt.u32.totalorder %s773_s12, %s1018_s5 }
 0x114   : > { %p775_p7 = pnand %p774_p6, %p907_p4 }
 0x115   : > { %p780_p12 = por %p779_p11, %p778_p10 }
 0x116   : > { %p776_p9 = pneg %p775_p7 }
 0x117   : > { %p782_p0 = por %p781_p13, %p780_p12 }
 0x119   : > { %p783_p1 = pnand %p782_p0, %p776_p9 }
 0x11b   : > { %786 = shalt.err (!%p783_p1)
}
 0x11c   : > { %s840_s9 = smov 128   ;;  %s841_s22 = smov 8  }
 0x11d   : > { %702 = dma.vmem_to_hbm [thread:$0]  (%p907_p4), %s1020_s7, 1024, %s1018_s5, %s1028_s6, %s840_s9, %s840_s9, %s841_s22  }
 0x11e PF: > { %p708_p2 = scmp.ge.s32.totalorder %s837_s20, 2  ;;  %s468_s18 = sand.u32 1, %s817_s15  }
 0x11f   : > { %s469_s30 = scalar_lea.sflag [#allocation3], %s468_s18 }
 0x120   : > { %p705_p3 = pnand %p708_p2, %p914_p8 }
 0x122   : > { %812 = dma.done.wait (!%p705_p3), %s469_s30, 1024  }
 0x123   : > { %814 = vsyncadd (!%p705_p3), %s469_s30, 4294966272  ;;  %s17_s20 = sadd.s32 1, %s837_s20   ;;  %s1081_s15 = smov %s821_s16 }
 0x124   : > { %p14_p5 = scmp.ge.s32.totalorder %s17_s20, 4   ;;  %s1082_s16 = smov %s825_s17 }
 0x125   : > { %s1083_s17 = smov %s920_s28  ;;  %s1084_s18 = smov %s833_s19 }
 0x126   : > { %s1085_s19 = smov %s1087_s23  ;;  %16 = sbr.rel (!%p14_p5) target bundleno = 4 (0x4), region = 80 }
 0x12d   :  { %474 = vsyncpa [#allocation3], 1 }
 0x12e   :  { %476 = vsyncpa [#allocation3 + $0x1], 1 }

// kernel: spatial_transformer_forward.19
= control target key start
LH: loop header
LB: loop body
LE: loop exit
PB: predicated region body
PF: predicated region fallthrough
CT: control target
= control target key end

     0   :  { %s1947_s24 = smov 0   ;;  %s1949_s25 = smov 0   ;;  %s3021_s0 = inlined_call_operand.vmem [shape: f32[128,128], index: 0, kind: input, shape index: {}]   ;;  %s3022_s1 = inlined_call_operand.vmem [shape: f32[1,128], index: 1, kind: input, shape index: {}]   ;;  %s3023_s2 = inlined_call_operand.vmem [shape: f32[1,128], index: 2, kind: input, shape index: {}]   ;;  %s3024_s3 = inlined_call_operand.vmem [shape: f32[128,512], index: 3, kind: input, shape index: {}]   ;;  %s3025_s4 = inlined_call_operand.vmem [shape: f32[1,512], index: 4, kind: input, shape index: {}]   ;;  %s3026_s5 = inlined_call_operand.vmem [shape: f32[128,512], index: 5, kind: input, shape index: {}]   ;;  %s3027_s6 = inlined_call_operand.vmem [shape: f32[1,512], index: 6, kind: input, shape index: {}]   ;;  %s3028_s7 = inlined_call_operand.vmem [shape: f32[128,512], index: 7, kind: output, shape index: {}]  }
   0x1   :  { %s1951_s26 = smov 0  }
   0x2 LB: > { %s29_s27 = sadd.s32 1, %s1900_s25  ;;  %p1638_p0 = scmp.ge.s32.totalorder %s1904_s26, 1  ;;  %s1904_s26 = sphi %s1951_s26, %s17_s26   ;;  %s1900_s25 = sphi %s1949_s25, %s3094_s25   ;;  %s1896_s24 = sphi %s1947_s24, %s3093_s24  }
   0x3   : > { %p31_p1 = scmp.ge.s32.totalorder %s29_s27, 2  ;;  %p294_p2 = scmp.lt.s32.totalorder %s1904_s26, 3 }
   0x5   : > { %s3096_s27 = smov (%p31_p1, %s29_s27), 0  ;;  %p295_p3 = pnand %p1638_p0, %p294_p2 }
   0x7   : > { %298 = sbr.rel (%p295_p3) target bundleno = 686 (0x2ae), region = 48 }
   0xe   : > { %s1639_s28 = sshll.u32 %s1896_s24, 3  ;;  %v517_v8 = vld [vmem:[%s3024_s3 + $0x8] sm:$0xff]  ;;  %v519_v10 = vld [vmem:[%s3024_s3 + $0x18] sm:$0xff]  ;;  %v516_v13 = vld [vmem:[%s3024_s3] sm:$0xff] }
   0xf   : > { %p350_p4 = scmp.lt.s32.totalorder %s1639_s28, 15  ;;  %v521_v9 = vld [vmem:[%s3024_s3 + $0x28] sm:$0xff]  ;;  %v523_v12 = vld [vmem:[%s3024_s3 + $0x38] sm:$0xff]  ;;  %v520_v14 = vld [vmem:[%s3024_s3 + $0x20] sm:$0xff] }
  0x10   : > { %v1649_v11 = vpack.c.bf16 %v521_v9, %v517_v8  ;;  %v1681_v15 = vpack.c.bf16 %v523_v12, %v519_v10  ;;  %v1651_v16 = vpack.c.bf16 %v520_v14, %v516_v13  ;;  %v518_v17 = vld [vmem:[%s3024_s3 + $0x10] sm:$0xff]  ;;  %v525_v19 = vld [vmem:[%s3024_s3 + $0x48] sm:$0xff]  ;;  %v527_v22 = vld [vmem:[%s3024_s3 + $0x58] sm:$0xff] }
  0x11   : > { %s3098_s28 = smov (!%p350_p4, %s1639_s28), 15  ;;  %v522_v18 = vld [vmem:[%s3024_s3 + $0x30] sm:$0xff]  ;;  %v529_v21 = vld [vmem:[%s3024_s3 + $0x68] sm:$0xff]  ;;  %v531_v23 = vld [vmem:[%s3024_s3 + $0x78] sm:$0xff] }
  0x12   : > { %s1640_s29 = sshll.u32 %s3098_s28, 3  ;;  %1650 = vmatprep.subr.bf16.mxu0 %v1649_v11  ;;  %v1683_v20 = vpack.c.bf16 %v522_v18, %v518_v17  ;;  %1682 = vmatprep.subr.bf16.mxu1 %v1681_v15  ;;  %v1653_v24 = vpack.c.bf16 %v529_v21, %v525_v19  ;;  %v1685_v25 = vpack.c.bf16 %v531_v23, %v527_v22  ;;  %v524_v26 = vld [vmem:[%s3024_s3 + $0x40] sm:$0xff]  ;;  %v526_v28 = vld [vmem:[%s3024_s3 + $0x50] sm:$0xff]  ;;  %v533_v31 = vld [vmem:[%s3024_s3 + $0x88] sm:$0xff]  ;;  %s1648_s8 = sshll.u32 %s3098_s28, 5 }
  0x13   : > { %s353_s9 = scalar_lea.vmem %s3021_s0, %s1640_s29  ;;  %1652 = vmatpush1.bf16.msra.mxu0 %v1651_v16  ;;  %v528_v27 = vld [vmem:[%s3024_s3 + $0x60] sm:$0xff]  ;;  %v530_v30 = vld [vmem:[%s3024_s3 + $0x70] sm:$0xff]  ;;  %v537_v32 = vld [vmem:[%s3024_s3 + $0xa8] sm:$0xff]  ;;  %s2779_s10 = scalar_lea.vmem %s3028_s7, %s1648_s8 }
  0x14   : > { %v1971_v0 = vld [vmem:[%s353_s9] sm:$0xff]  ;;  %v1973_v1 = vld [vmem:[%s353_s9 + $0x10] sm:$0xff]  ;;  %v1977_v2 = vld [vmem:[%s353_s9 + $0x8] sm:$0xff]  ;;  %1684 = vmatpush1.bf16.msra.mxu1 %v1683_v20  ;;  %v1655_v29 = vpack.c.bf16 %v528_v27, %v524_v26  ;;  %1654 = vmatprep.subr.bf16.mxu0 %v1653_v24  ;;  %v1687_v33 = vpack.c.bf16 %v530_v30, %v526_v28  ;;  %v1657_v34 = vpack.c.bf16 %v537_v32, %v533_v31 }
  0x15   : > { %397 = vadd.xlane.f32.xlu0 %v1971_v0  ;;  %401 = vadd.xlane.f32.xlu1 %v1973_v1  ;;  %v1979_v3 = vld [vmem:[%s353_s9 + $0x18] sm:$0xff]  ;;  %v1983_v4 = vld [vmem:[%s353_s9 + $0x20] sm:$0xff]  ;;  %v1985_v5 = vld [vmem:[%s353_s9 + $0x28] sm:$0xff] }
  0x16   : > { %v1989_v6 = vld [vmem:[%s353_s9 + $0x30] sm:$0xff]  ;;  %v1991_v7 = vld [vmem:[%s353_s9 + $0x38] sm:$0xff]  ;;  %1686 = vmatprep.subr.bf16.mxu1 %v1685_v25  ;;  %v532_v37 = vld [vmem:[%s3024_s3 + $0x80] sm:$0xff] }
  0x17   : > { %v535_v35 = vld [vmem:[%s3024_s3 + $0x98] sm:$0xff]  ;;  %v536_v39 = vld [vmem:[%s3024_s3 + $0xa0] sm:$0xff]  ;;  %v534_v40 = vld [vmem:[%s3024_s3 + $0x90] sm:$0xff]  ;;  %1656 = vmatpush1.bf16.msra.mxu0 %v1655_v29 }
  0x18   : > { %v539_v36 = vld [vmem:[%s3024_s3 + $0xb8] sm:$0xff]  ;;  %v538_v41 = vld [vmem:[%s3024_s3 + $0xb0] sm:$0xff]  ;;  %v1659_v42 = vpack.c.bf16 %v536_v39, %v532_v37  ;;  %1688 = vmatpush1.bf16.msra.mxu1 %v1687_v33  ;;  %1658 = vmatprep.subr.bf16.mxu0 %v1657_v34  ;;  %v540_v17 = vld [vmem:[%s3024_s3 + $0xc0] sm:$0xff] }
  0x19   : > { %399 = vadd.xlane.f32.xlu0 %v1977_v2  ;;  %403 = vadd.xlane.f32.xlu1 %v1979_v3  ;;  %v1689_v38 = vpack.c.bf16 %v539_v36, %v535_v35  ;;  %v1691_v43 = vpack.c.bf16 %v538_v41, %v534_v40  ;;  %v543_v14 = vld [vmem:[%s3024_s3 + $0xd8] sm:$0xff]  ;;  %v544_v18 = vld [vmem:[%s3024_s3 + $0xe0] sm:$0xff]  ;;  %v542_v21 = vld [vmem:[%s3024_s3 + $0xd0] sm:$0xff] }
  0x1a   : > { %v547_v16 = vld [vmem:[%s3024_s3 + $0xf8] sm:$0xff]  ;;  %v1663_v20 = vpack.c.bf16 %v544_v18, %v540_v17  ;;  %v546_v22 = vld [vmem:[%s3024_s3 + $0xf0] sm:$0xff]  ;;  %v549_v24 = vld [vmem:[%s3024_s3 + $0x108] sm:$0xff] }
  0x1b   : > { %1690 = vmatprep.subr.bf16.mxu1 %v1689_v38  ;;  %1660 = vmatpush1.bf16.msra.mxu0 %v1659_v42  ;;  %v1693_v19 = vpack.c.bf16 %v547_v16, %v543_v14  ;;  %v1695_v23 = vpack.c.bf16 %v546_v22, %v542_v21  ;;  %v553_v25 = vld [vmem:[%s3024_s3 + $0x128] sm:$0xff]  ;;  %v551_v26 = vld [vmem:[%s3024_s3 + $0x118] sm:$0xff]  ;;  %v548_v29 = vld [vmem:[%s3024_s3 + $0x100] sm:$0xff]  ;;  %v1906_v21 = vmov 0.0  }
  0x1c   : > { %1692 = vmatpush1.bf16.msra.mxu1 %v1691_v43  ;;  %v1665_v27 = vpack.c.bf16 %v553_v25, %v549_v24  ;;  %v555_v28 = vld [vmem:[%s3024_s3 + $0x138] sm:$0xff]  ;;  %v552_v30 = vld [vmem:[%s3024_s3 + $0x120] sm:$0xff]  ;;  %v550_v33 = vld [vmem:[%s3024_s3 + $0x110] sm:$0xff]  ;;  %666 = vmatprep.mubr.f32.mxu0 %v1906_v21 }
  0x1d   : > { %405 = vadd.xlane.f32.xlu0 %v1983_v4  ;;  %407 = vadd.xlane.f32.xlu1 %v1985_v5  ;;  %v1697_v31 = vpack.c.bf16 %v555_v28, %v551_v26  ;;  %v1667_v32 = vpack.c.bf16 %v552_v30, %v548_v29  ;;  %v554_v34 = vld [vmem:[%s3024_s3 + $0x130] sm:$0xff]  ;;  %v557_v36 = vld [vmem:[%s3024_s3 + $0x148] sm:$0xff]  ;;  %v559_v38 = vld [vmem:[%s3024_s3 + $0x158] sm:$0xff] }
  0x1e   : > { %1694 = vmatprep.subr.bf16.mxu1 %v1693_v19  ;;  %v1699_v35 = vpack.c.bf16 %v554_v34, %v550_v33  ;;  %v561_v37 = vld [vmem:[%s3024_s3 + $0x168] sm:$0xff]  ;;  %v563_v40 = vld [vmem:[%s3024_s3 + $0x178] sm:$0xff]  ;;  %v556_v41 = vld [vmem:[%s3024_s3 + $0x140] sm:$0xff]  ;;  %779 = vmatprep.mubr.f32.mxu1 %v1906_v21 }
  0x1f   : > { %v1669_v39 = vpack.c.bf16 %v561_v37, %v557_v36  ;;  %v560_v42 = vld [vmem:[%s3024_s3 + $0x160] sm:$0xff]  ;;  %v1701_v43 = vpack.c.bf16 %v563_v40, %v559_v38  ;;  %v578_v14 = vld [vmem:[%s3024_s3 + $0x1f0] sm:$0xff]  ;;  %v829_v16 = vld [vmem:[%s3026_s5 + $0x8] sm:$0xff] }
  0x20   : > { %1696 = vmatpush1.bf16.msra.mxu1 %v1695_v23  ;;  %v833_v17 = vld [vmem:[%s3026_s5 + $0x28] sm:$0xff]  ;;  %v831_v18 = vld [vmem:[%s3026_s5 + $0x18] sm:$0xff] }
  0x21   : > { %409 = vadd.xlane.f32.xlu0 %v1989_v6  ;;  %411 = vadd.xlane.f32.xlu1 %v1991_v7  ;;  %v1713_v19 = vpack.c.bf16 %v833_v17, %v829_v16  ;;  %v849_v16 = vld [vmem:[%s3026_s5 + $0xa8] sm:$0xff]  ;;  %v847_v17 = vld [vmem:[%s3026_s5 + $0x98] sm:$0xff] }
  0x22   : > { %1698 = vmatprep.subr.bf16.mxu1 %v1697_v31 }
  0x24   : > { %1700 = vmatpush1.bf16.msra.mxu1 %v1699_v35 }
  0x25   : > { %1702 = vmatprep.subr.bf16.mxu1 %v1701_v43 }
  0xa2   : > { %v398_v44 = vpop.xlane.xlu0 %397  ;;  %v402_v45 = vpop.xlane.xlu1 %401 }
  0xa3   : > { %v414_v46 = vmul.f32 0.0078125, %v398_v44  ;;  %v416_v47 = vmul.f32 0.0078125, %v402_v45  ;;  %v1671_v44 = vpack.c.bf16 %v560_v42, %v556_v41  ;;  %v558_v45 = vld [vmem:[%s3024_s3 + $0x150] sm:$0xff]  ;;  %v2244_v41 = vld [vmem:[%s3022_s1] ss:$0 sm:$0xff] }
  0xa5   : > { %v2068_v48 = vsub.f32 %v1971_v0, %v414_v46  ;;  %v2071_v49 = vsub.f32 %v1973_v1, %v416_v47  ;;  %v562_v46 = vld [vmem:[%s3024_s3 + $0x170] sm:$0xff] }
  0xa6   : > { %v400_v50 = vpop.xlane.xlu0 %399  ;;  %v404_v51 = vpop.xlane.xlu1 %403  ;;  %v1703_v47 = vpack.c.bf16 %v562_v46, %v558_v45  ;;  %v828_v45 = vld [vmem:[%s3026_s5] sm:$0xff] }
  0xa7   : > { %v415_v52 = vmul.f32 0.0078125, %v400_v50  ;;  %v430_v53 = vmul.f32 %v2068_v48, %v2068_v48  ;;  %v417_v54 = vmul.f32 0.0078125, %v404_v51  ;;  %v432_v57 = vmul.f32 %v2071_v49, %v2071_v49  ;;  %v565_v50 = vld [vmem:[%s3024_s3 + $0x188] sm:$0xff]  ;;  %v832_v46 = vld [vmem:[%s3026_s5 + $0x20] sm:$0xff] }
  0xa8   : > { %v569_v51 = vld [vmem:[%s3024_s3 + $0x1a8] sm:$0xff]  ;;  %1704 = vmatpush1.bf16.msra.mxu1 %v1703_v47 }
  0xa9   : > { %v2076_v55 = vsub.f32 %v1977_v2, %v415_v52  ;;  %438 = vadd.xlane.f32.xlu0 %v430_v53  ;;  %v2079_v56 = vsub.f32 %v1979_v3, %v417_v54  ;;  %v567_v52 = vld [vmem:[%s3024_s3 + $0x198] sm:$0xff]  ;;  %v1673_v53 = vpack.c.bf16 %v569_v51, %v565_v50  ;;  %v830_v51 = vld [vmem:[%s3026_s5 + $0x10] sm:$0xff] }
  0xaa   : > { %v406_v58 = vpop.xlane.xlu0 %405  ;;  %v408_v59 = vpop.xlane.xlu1 %407  ;;  %v571_v54 = vld [vmem:[%s3024_s3 + $0x1b8] sm:$0xff] }
  0xab   : > { %v418_v60 = vmul.f32 0.0078125, %v406_v58  ;;  %v431_v61 = vmul.f32 %v2076_v55, %v2076_v55  ;;  %v419_v62 = vmul.f32 0.0078125, %v408_v59  ;;  %v433_v1 = vmul.f32 %v2079_v56, %v2079_v56  ;;  %v568_v58 = vld [vmem:[%s3024_s3 + $0x1a0] sm:$0xff] }
  0xac   : > { %v1705_v59 = vpack.c.bf16 %v571_v54, %v567_v52  ;;  %v834_v52 = vld [vmem:[%s3026_s5 + $0x30] sm:$0xff]  ;;  %v837_v54 = vld [vmem:[%s3026_s5 + $0x48] sm:$0xff] }
  0xad   : > { %v2086_v63 = vsub.f32 %v1983_v4, %v418_v60  ;;  %442 = vadd.xlane.f32.xlu0 %v432_v57  ;;  %440 = vadd.xlane.f32.xlu1 %v431_v61  ;;  %v2089_v0 = vsub.f32 %v1985_v5, %v419_v62  ;;  %v564_v57 = vld [vmem:[%s3024_s3 + $0x180] sm:$0xff]  ;;  %v566_v61 = vld [vmem:[%s3024_s3 + $0x190] sm:$0xff] }
  0xae   : > { %v410_v2 = vpop.xlane.xlu0 %409  ;;  %v412_v3 = vpop.xlane.xlu1 %411  ;;  %v1675_v60 = vpack.c.bf16 %v568_v58, %v564_v57  ;;  %v570_v62 = vld [vmem:[%s3024_s3 + $0x1b0] sm:$0xff]  ;;  %1706 = vmatprep.subr.bf16.mxu1 %v1705_v59  ;;  %v841_v58 = vld [vmem:[%s3026_s5 + $0x68] sm:$0xff]  ;;  %v839_v59 = vld [vmem:[%s3026_s5 + $0x58] sm:$0xff] }
  0xaf   : > { %v420_v8 = vmul.f32 0.0078125, %v410_v2  ;;  %v434_v9 = vmul.f32 %v2086_v63, %v2086_v63  ;;  %v421_v10 = vmul.f32 0.0078125, %v412_v3  ;;  %v435_v5 = vmul.f32 %v2089_v0, %v2089_v0  ;;  %v573_v2 = vld [vmem:[%s3024_s3 + $0x1c8] sm:$0xff] }
  0xb0   : > { %v577_v3 = vld [vmem:[%s3024_s3 + $0x1e8] sm:$0xff] }
  0xb1   : > { %v2096_v11 = vsub.f32 %v1989_v6, %v420_v8  ;;  %444 = vadd.xlane.f32.xlu1 %v433_v1  ;;  %446 = vadd.xlane.f32.xlu0 %v434_v9  ;;  %v2099_v4 = vsub.f32 %v1991_v7, %v421_v10  ;;  %v541_v6 = vld [vmem:[%s3024_s3 + $0xc8] sm:$0xff]  ;;  %v1707_v1 = vpack.c.bf16 %v570_v62, %v566_v61  ;;  %v575_v8 = vld [vmem:[%s3024_s3 + $0x1d8] sm:$0xff] }
  0xb2   : > { %v545_v7 = vld [vmem:[%s3024_s3 + $0xe8] sm:$0xff]  ;;  %v1677_v9 = vpack.c.bf16 %v577_v3, %v573_v2  ;;  %v579_v10 = vld [vmem:[%s3024_s3 + $0x1f8] sm:$0xff]  ;;  %v1747_v2 = vpack.c.bf16 %v834_v52, %v830_v51  ;;  %v836_v3 = vld [vmem:[%s3026_s5 + $0x40] sm:$0xff] }
  0xb3   : > { %v436_v12 = vmul.f32 %v2096_v11, %v2096_v11  ;;  %v437_v13 = vmul.f32 %v2099_v4, %v2099_v4  ;;  %v1661_v15 = vpack.c.bf16 %v545_v7, %v541_v6  ;;  %1708 = vmatpush1.bf16.msra.mxu1 %v1707_v1  ;;  %v574_v7 = vld [vmem:[%s3024_s3 + $0x1d0] sm:$0xff]  ;;  %v861_v51 = vld [vmem:[%s3026_s5 + $0x108] sm:$0xff] }
  0xb4   : > { %v865_v52 = vld [vmem:[%s3026_s5 + $0x128] sm:$0xff] }
  0xb5   : > { %448 = vadd.xlane.f32.xlu1 %v435_v5  ;;  %450 = vadd.xlane.f32.xlu0 %v436_v12  ;;  %v572_v5 = vld [vmem:[%s3024_s3 + $0x1c0] sm:$0xff] }
  0xb6   : > { %1662 = vmatprep.subr.bf16.mxu0 %v1661_v15  ;;  %v576_v12 = vld [vmem:[%s3024_s3 + $0x1e0] sm:$0xff]  ;;  %v1711_v15 = vpack.c.bf16 %v578_v14, %v574_v7  ;;  %v845_v14 = vld [vmem:[%s3026_s5 + $0x88] sm:$0xff] }
  0xb7   : > { %1664 = vmatpush1.bf16.msra.mxu0 %v1663_v20  ;;  %v1679_v6 = vpack.c.bf16 %v576_v12, %v572_v5  ;;  %v835_v20 = vld [vmem:[%s3026_s5 + $0x38] sm:$0xff]  ;;  %v840_v5 = vld [vmem:[%s3026_s5 + $0x60] sm:$0xff]  ;;  %v838_v12 = vld [vmem:[%s3026_s5 + $0x50] sm:$0xff] }
  0xb8   : > { %1666 = vmatprep.subr.bf16.mxu0 %v1665_v27  ;;  %v1745_v22 = vpack.c.bf16 %v835_v20, %v831_v18  ;;  %v851_v18 = vld [vmem:[%s3026_s5 + $0xb8] sm:$0xff]  ;;  %v1719_v20 = vpack.c.bf16 %v840_v5, %v836_v3  ;;  %v869_v5 = vld [vmem:[%s3026_s5 + $0x148] sm:$0xff] }
  0xb9   : > { %452 = vadd.xlane.f32.xlu1 %v437_v13  ;;  %v1709_v13 = vpack.c.bf16 %v579_v10, %v575_v8 }
  0xbb   : > { %1668 = vmatpush1.bf16.msra.mxu0 %v1667_v32  ;;  %1710 = vmatprep.subr.bf16.mxu1 %v1709_v13  ;;  %v842_v13 = vld [vmem:[%s3026_s5 + $0x70] sm:$0xff] }
  0xbc   : > { %1670 = vmatprep.subr.bf16.mxu0 %v1669_v39  ;;  %1712 = vmatpush1.bf16.msra.mxu1 %v1711_v15 }
  0xbd   : > { %1746 = vmatprep.subr.bf16.mxu1 %v1745_v22  ;;  %v1751_v22 = vpack.c.bf16 %v842_v13, %v838_v12  ;;  %v873_v12 = vld [vmem:[%s3026_s5 + $0x168] sm:$0xff]  ;;  %v875_v13 = vld [vmem:[%s3026_s5 + $0x178] sm:$0xff] }
  0xbf   : > { %1672 = vmatpush1.bf16.msra.mxu0 %v1671_v44 }
  0xc0   : > { %1674 = vmatprep.subr.bf16.mxu0 %v1673_v53  ;;  %v2262_v53 = vld [vmem:[%s3023_s2] ss:$0 sm:$0xff] }
  0xc3   : > { %1676 = vmatpush1.bf16.msra.mxu0 %v1675_v60  ;;  %v843_v60 = vld [vmem:[%s3026_s5 + $0x78] sm:$0xff] }
  0xc4   : > { %1678 = vmatprep.subr.bf16.mxu0 %v1677_v9  ;;  %v1749_v7 = vpack.c.bf16 %v843_v60, %v839_v59 }
  0xc7   : > { %1680 = vmatpush1.bf16.msra.mxu0 %v1679_v6  ;;  %v1717_v6 = vpack.c.bf16 %v841_v58, %v837_v54  ;;  %v867_v54 = vld [vmem:[%s3026_s5 + $0x138] sm:$0xff]  ;;  %v860_v58 = vld [vmem:[%s3026_s5 + $0x100] sm:$0xff] }
  0xc8   : > { %1714 = vmatprep.subr.bf16.mxu0 %v1713_v19 }
 0x136   : > { %v439_v23 = vpop.xlane.xlu0 %438 }
 0x137   : > { %v454_v24 = vmul.f32 0.0078125, %v439_v23  ;;  %v844_v23 = vld [vmem:[%s3026_s5 + $0x80] sm:$0xff] }
 0x139   : > { %v462_v25 = vadd.f32 1e-05, %v454_v24 }
 0x13a   : > { %v441_v26 = vpop.xlane.xlu1 %440  ;;  %v443_v27 = vpop.xlane.xlu0 %442 }
 0x13b   : > { %1802 = vrsqrt.f32 %v462_v25  ;;  %v455_v28 = vmul.f32 0.0078125, %v441_v26  ;;  %v456_v29 = vmul.f32 0.0078125, %v443_v27  ;;  %v848_v26 = vld [vmem:[%s3026_s5 + $0xa0] sm:$0xff]  ;;  %v846_v27 = vld [vmem:[%s3026_s5 + $0x90] sm:$0xff] }
 0x13d   : > { %v463_v30 = vadd.f32 1e-05, %v455_v28  ;;  %v464_v31 = vadd.f32 1e-05, %v456_v29  ;;  %v850_v28 = vld [vmem:[%s3026_s5 + $0xb0] sm:$0xff] }
 0x13e   : > { %v445_v32 = vpop.xlane.xlu1 %444  ;;  %v447_v33 = vpop.xlane.xlu0 %446 }
 0x13f   : > { %1804 = vrsqrt.f32 %v463_v30  ;;  %v457_v34 = vmul.f32 0.0078125, %v445_v32  ;;  %v458_v35 = vmul.f32 0.0078125, %v447_v33  ;;  %v1753_v32 = vpack.c.bf16 %v851_v18, %v847_v17  ;;  %v853_v33 = vld [vmem:[%s3026_s5 + $0xc8] sm:$0xff]  ;;  %v870_v17 = vld [vmem:[%s3026_s5 + $0x150] sm:$0xff] }
 0x140   : > { %1806 = vrsqrt.f32 %v464_v31  ;;  %v1721_v31 = vpack.c.bf16 %v849_v16, %v845_v14  ;;  %v868_v14 = vld [vmem:[%s3026_s5 + $0x140] sm:$0xff]  ;;  %v874_v18 = vld [vmem:[%s3026_s5 + $0x170] sm:$0xff] }
 0x141   : > { %v465_v36 = vadd.f32 1e-05, %v457_v34  ;;  %v466_v37 = vadd.f32 1e-05, %v458_v35  ;;  %v857_v34 = vld [vmem:[%s3026_s5 + $0xe8] sm:$0xff]  ;;  %v859_v35 = vld [vmem:[%s3026_s5 + $0xf8] sm:$0xff] }
 0x142   : > { %v449_v38 = vpop.xlane.xlu1 %448  ;;  %v451_v39 = vpop.xlane.xlu0 %450  ;;  %v872_v16 = vld [vmem:[%s3026_s5 + $0x160] sm:$0xff] }
 0x143   : > { %1808 = vrsqrt.f32 %v465_v36  ;;  %v459_v40 = vmul.f32 0.0078125, %v449_v38  ;;  %v460_v44 = vmul.f32 0.0078125, %v451_v39  ;;  %v1723_v36 = vpack.c.bf16 %v848_v26, %v844_v23  ;;  %v852_v38 = vld [vmem:[%s3026_s5 + $0xc0] sm:$0xff]  ;;  %v877_v23 = vld [vmem:[%s3026_s5 + $0x188] sm:$0xff]  ;;  %v883_v26 = vld [vmem:[%s3026_s5 + $0x1b8] sm:$0xff] }
 0x144   : > { %1810 = vrsqrt.f32 %v466_v37  ;;  %v1755_v37 = vpack.c.bf16 %v850_v28, %v846_v27  ;;  %v1735_v27 = vpack.c.bf16 %v872_v16, %v868_v14  ;;  %v1767_v28 = vpack.c.bf16 %v874_v18, %v870_v17 }
 0x145   : > { %v1803_v42 = vpop.eup %1802  ;;  %v467_v43 = vadd.f32 1e-05, %v459_v40  ;;  %v468_v62 = vadd.f32 1e-05, %v460_v44  ;;  %v858_v44 = vld [vmem:[%s3026_s5 + $0xf0] sm:$0xff] }
 0x146   : > { %v453_v47 = vpop.xlane.xlu1 %452  ;;  %v478_v50 = vmul.f32 %v1803_v42, %v2068_v48  ;;  %v1715_v48 = vpack.c.bf16 %v832_v46, %v828_v45  ;;  %v856_v42 = vld [vmem:[%s3026_s5 + $0xe0] sm:$0xff] }
 0x147   : > { %1812 = vrsqrt.f32 %v467_v43  ;;  %v461_v1 = vmul.f32 0.0078125, %v453_v47  ;;  %v854_v43 = vld [vmem:[%s3026_s5 + $0xd0] sm:$0xff]  ;;  %v1725_v47 = vpack.c.bf16 %v857_v34, %v853_v33 }
 0x148   : > { %v493_v57 = vmul.f32 %v2244_v41, %v478_v50  ;;  %1814 = vrsqrt.f32 %v468_v62  ;;  %v862_v62 = vld [vmem:[%s3026_s5 + $0x110] sm:$0xff] }
 0x149   : > { %v1805_v61 = vpop.eup %1804  ;;  %v878_v33 = vld [vmem:[%s3026_s5 + $0x190] sm:$0xff] }
 0x14a   : > { %v1807_v8 = vpop.eup %1806  ;;  %v2281_v9 = vadd.f32 %v2262_v53, %v493_v57  ;;  %v479_v10 = vmul.f32 %v1805_v61, %v2076_v55  ;;  %v1727_v57 = vpack.c.bf16 %v856_v42, %v852_v38  ;;  %v864_v61 = vld [vmem:[%s3026_s5 + $0x120] sm:$0xff]  ;;  %v882_v34 = vld [vmem:[%s3026_s5 + $0x1b0] sm:$0xff]  ;;  %v889_v38 = vld [vmem:[%s3026_s5 + $0x1e8] sm:$0xff] }
 0x14b   : > { %v480_v55 = vmul.f32 %v1807_v8, %v2071_v49  ;;  %v469_v49 = vadd.f32 1e-05, %v461_v1  ;;  %v866_v1 = vld [vmem:[%s3026_s5 + $0x130] sm:$0xff]  ;;  %v1729_v8 = vpack.c.bf16 %v865_v52, %v861_v51 }
 0x14c   : > { %667 = vmatmul.mubr.f32.vlgmr.msra.gmra.mrb[0].mxu0 %v2281_v9  ;;  %780 = vmatmul.mubr.f32.vlgmr.msra.gmra.mrb[0].mxu1 %v2281_v9  ;;  %v494_v15 = vmul.f32 %v2244_v41, %v479_v10  ;;  %v890_v51 = vld [vmem:[%s3026_s5 + $0x1f0] sm:$0xff] }
 0x14d   : > { %v1809_v19 = vpop.eup %1808  ;;  %1716 = vmatpush1.bf16.msra.mxu0 %v1715_v48  ;;  %1748 = vmatpush1.bf16.msra.mxu1 %v1747_v2  ;;  %v495_v25 = vmul.f32 %v2244_v41, %v480_v55  ;;  %1816 = vrsqrt.f32 %v469_v49  ;;  %v1759_v48 = vpack.c.bf16 %v858_v44, %v854_v43  ;;  %v1771_v43 = vpack.c.bf16 %v882_v34, %v878_v33  ;;  %v884_v44 = vld [vmem:[%s3026_s5 + $0x1c0] sm:$0xff] }
 0x14e   : > { %672 = vmatprep.mubr.f32.mxu0 %v1906_v21  ;;  %785 = vmatprep.mubr.f32.mxu1 %v1906_v21  ;;  %v2315_v24 = vadd.f32 %v2262_v53, %v494_v15  ;;  %v481_v29 = vmul.f32 %v1809_v19, %v2079_v56  ;;  %v1811_v30 = vpop.eup %1810  ;;  %v855_v56 = vld [vmem:[%s3026_s5 + $0xd8] sm:$0xff] }
 0x14f   : > { %1718 = vmatprep.subr.bf16.mxu0 %v1717_v6  ;;  %1750 = vmatprep.subr.bf16.mxu1 %v1749_v7  ;;  %v2348_v39 = vadd.f32 %v2262_v53, %v495_v25  ;;  %v482_v45 = vmul.f32 %v1811_v30, %v2086_v63  ;;  %v1757_v50 = vpack.c.bf16 %v859_v35, %v855_v56  ;;  %v863_v63 = vld [vmem:[%s3026_s5 + $0x118] sm:$0xff]  ;;  %v881_v25 = vld [vmem:[%s3026_s5 + $0x1a8] sm:$0xff] }
 0x150   : > { %673 = vmatmul.mubr.f32.gmra.mrb[2].mxu0 %v2315_v24  ;;  %786 = vmatmul.mubr.f32.gmra.mrb[2].mxu1 %v2315_v24  ;;  %v496_v40 = vmul.f32 %v2244_v41, %v481_v29  ;;  %v1761_v10 = vpack.c.bf16 %v867_v54, %v863_v63  ;;  %v1731_v6 = vpack.c.bf16 %v864_v61, %v860_v58  ;;  %v876_v29 = vld [vmem:[%s3026_s5 + $0x180] sm:$0xff] }
 0x151   : > { %1720 = vmatpush1.bf16.msra.mxu0 %v1719_v20  ;;  %1752 = vmatpush1.bf16.msra.mxu1 %v1751_v22  ;;  %v1813_v46 = vpop.eup %1812  ;;  %v497_v60 = vmul.f32 %v2244_v41, %v482_v45  ;;  %v1763_v7 = vpack.c.bf16 %v866_v1, %v862_v62  ;;  %v1733_v20 = vpack.c.bf16 %v873_v12, %v869_v5 }
 0x152   : > { %678 = vmatprep.mubr.f32.mxu0 %v1906_v21  ;;  %791 = vmatprep.mubr.f32.mxu1 %v1906_v21  ;;  %v2381_v59 = vadd.f32 %v2262_v53, %v496_v40  ;;  %v483_v2 = vmul.f32 %v1813_v46, %v2089_v0  ;;  %v1815_v3 = vpop.eup %1814  ;;  %v871_v0 = vld [vmem:[%s3026_s5 + $0x158] sm:$0xff]  ;;  %v1737_v35 = vpack.c.bf16 %v881_v25, %v877_v23 }
 0x153   : > { %1722 = vmatprep.subr.bf16.mxu0 %v1721_v31  ;;  %1754 = vmatprep.subr.bf16.mxu1 %v1753_v32  ;;  %v2414_v55 = vadd.f32 %v2262_v53, %v497_v60  ;;  %v484_v19 = vmul.f32 %v1815_v3, %v2096_v11  ;;  %v1765_v22 = vpack.c.bf16 %v875_v13, %v871_v0  ;;  %v879_v11 = vld [vmem:[%s3026_s5 + $0x198] sm:$0xff]  ;;  %v880_v32 = vld [vmem:[%s3026_s5 + $0x1a0] sm:$0xff]  ;;  %v582_v3 = vlaneseq }
 0x154   : > { %679 = vmatmul.mubr.f32.gmra.mrb[4].mxu0 %v2348_v39  ;;  %792 = vmatmul.mubr.f32.gmra.mrb[4].mxu1 %v2348_v39  ;;  %v498_v15 = vmul.f32 %v2244_v41, %v483_v2  ;;  %v891_v40 = vld [vmem:[%s3026_s5 + $0x1f8] sm:$0xff]  ;;  %v1739_v42 = vpack.c.bf16 %v880_v32, %v876_v29 }
 0x155   : > { %1724 = vmatpush1.bf16.msra.mxu0 %v1723_v36  ;;  %1756 = vmatpush1.bf16.msra.mxu1 %v1755_v37  ;;  %v499_v31 = vmul.f32 %v2244_v41, %v484_v19  ;;  %v1769_v36 = vpack.c.bf16 %v883_v26, %v879_v11  ;;  %v885_v37 = vld [vmem:[%s3026_s5 + $0x1c8] sm:$0xff]  ;;  %v580_v19 = vld [vmem:[%s3025_s4] sm:$0xf] }
 0x156   : > { %684 = vmatprep.mubr.f32.mxu0 %v1906_v21  ;;  %797 = vmatprep.mubr.f32.mxu1 %v1906_v21  ;;  %v2447_v30 = vadd.f32 %v2262_v53, %v498_v15  ;;  %v1741_v52 = vpack.c.bf16 %v889_v38, %v885_v37 }
 0x157   : > { %1726 = vmatprep.subr.bf16.mxu0 %v1725_v47  ;;  %1758 = vmatprep.subr.bf16.mxu1 %v1757_v50  ;;  %v1817_v49 = vpop.eup %1816  ;;  %v514_v45 = vadd.f32 %v2262_v53, %v499_v31  ;;  %v888_v47 = vld [vmem:[%s3026_s5 + $0x1e0] sm:$0xff]  ;;  %v886_v50 = vld [vmem:[%s3026_s5 + $0x1d0] sm:$0xff] }
 0x158   : > { %685 = vmatmul.mubr.f32.gmra.mrb[6].mxu0 %v2381_v59  ;;  %798 = vmatmul.mubr.f32.gmra.mrb[6].mxu1 %v2381_v59  ;;  %v485_v56 = vmul.f32 %v1817_v49, %v2099_v4  ;;  %v887_v4 = vld [vmem:[%s3026_s5 + $0x1d8] sm:$0xff]  ;;  %v1775_v54 = vpack.c.bf16 %v890_v51, %v886_v50 }
 0x159   : > { %1728 = vmatpush1.bf16.msra.mxu0 %v1727_v57  ;;  %1760 = vmatpush1.bf16.msra.mxu1 %v1759_v48  ;;  %v1773_v63 = vpack.c.bf16 %v891_v40, %v887_v4 }
 0x15a   : > { %690 = vmatprep.mubr.f32.mxu0 %v1906_v21  ;;  %803 = vmatprep.mubr.f32.mxu1 %v1906_v21  ;;  %v500_v46 = vmul.f32 %v2244_v41, %v485_v56  ;;  %v1743_v41 = vpack.c.bf16 %v888_v47, %v884_v44 }
 0x15b   : > { %1730 = vmatprep.subr.bf16.mxu0 %v1729_v8  ;;  %1762 = vmatprep.subr.bf16.mxu1 %v1761_v10 }
 0x15c   : > { %691 = vmatmul.mubr.f32.gmra.mrb[8].mxu0 %v2414_v55  ;;  %804 = vmatmul.mubr.f32.gmra.mrb[8].mxu1 %v2414_v55  ;;  %v515_v57 = vadd.f32 %v2262_v53, %v500_v46 }
 0x15d   : > { %1732 = vmatpush1.bf16.msra.mxu0 %v1731_v6  ;;  %1764 = vmatpush1.bf16.msra.mxu1 %v1763_v7 }
 0x15e   : > { %696 = vmatprep.mubr.f32.mxu0 %v1906_v21  ;;  %809 = vmatprep.mubr.f32.mxu1 %v1906_v21 }
 0x15f   : > { %1734 = vmatprep.subr.bf16.mxu0 %v1733_v20  ;;  %1766 = vmatprep.subr.bf16.mxu1 %v1765_v22 }
 0x160   : > { %697 = vmatmul.mubr.f32.gmra.mrb[10].mxu0 %v2447_v30  ;;  %810 = vmatmul.mubr.f32.gmra.mrb[10].mxu1 %v2447_v30 }
 0x161   : > { %1736 = vmatpush1.bf16.msra.mxu0 %v1735_v27  ;;  %1768 = vmatpush1.bf16.msra.mxu1 %v1767_v28  ;;  %v892_v28 = vld [vmem:[%s3027_s6] sm:$0xf] }
 0x162   : > { %702 = vmatprep.mubr.f32.mxu0 %v1906_v21  ;;  %815 = vmatprep.mubr.f32.mxu1 %v1906_v21 }
 0x163   : > { %1738 = vmatprep.subr.bf16.mxu0 %v1737_v35  ;;  %1770 = vmatprep.subr.bf16.mxu1 %v1769_v36 }
 0x164   : > { %703 = vmatmul.mubr.f32.gmra.mrb[12].mxu0 %v514_v45  ;;  %816 = vmatmul.mubr.f32.gmra.mrb[12].mxu1 %v514_v45 }
 0x165   : > { %1740 = vmatpush1.bf16.msra.mxu0 %v1739_v42  ;;  %1772 = vmatpush1.bf16.msra.mxu1 %v1771_v43 }
 0x166   : > { %708 = vmatprep.mubr.f32.mxu0 %v1906_v21  ;;  %821 = vmatprep.mubr.f32.mxu1 %v1906_v21 }
 0x167   : > { %1742 = vmatprep.subr.bf16.mxu0 %v1741_v52  ;;  %1774 = vmatprep.subr.bf16.mxu1 %v1773_v63 }
 0x168   : > { %709 = vmatmul.mubr.f32.gmra.mrb[14].mxu0 %v515_v57  ;;  %822 = vmatmul.mubr.f32.gmra.mrb[14].mxu1 %v515_v57 }
 0x169   : > { %1744 = vmatpush1.bf16.msra.mxu0 %v1743_v41  ;;  %1776 = vmatpush1.bf16.msra.mxu1 %v1775_v54 }
 0x16a   : > { %978 = vmatprep.mubr.f32.mxu0 %v1906_v21  ;;  %1091 = vmatprep.mubr.f32.mxu1 %v1906_v21 }
 0x16c   : > { %979 = vmatmul.mubr.f32.vlgmr.msra.gmra.mrb[16].mxu0 %v2281_v9  ;;  %1092 = vmatmul.mubr.f32.vlgmr.msra.gmra.mrb[16].mxu1 %v2281_v9 }
 0x16d   : > { %984 = vmatprep.mubr.f32.mxu0 %v1906_v21  ;;  %1097 = vmatprep.mubr.f32.mxu1 %v1906_v21 }
 0x170   : > { %985 = vmatmul.mubr.f32.gmra.mrb[18].mxu0 %v2315_v24  ;;  %1098 = vmatmul.mubr.f32.gmra.mrb[18].mxu1 %v2315_v24 }
 0x171   : > { %990 = vmatprep.mubr.f32.mxu0 %v1906_v21  ;;  %1103 = vmatprep.mubr.f32.mxu1 %v1906_v21 }
 0x174   : > { %991 = vmatmul.mubr.f32.gmra.mrb[20].mxu0 %v2348_v39  ;;  %1104 = vmatmul.mubr.f32.gmra.mrb[20].mxu1 %v2348_v39 }
 0x175   : > { %996 = vmatprep.mubr.f32.mxu0 %v1906_v21  ;;  %1109 = vmatprep.mubr.f32.mxu1 %v1906_v21 }
 0x178   : > { %997 = vmatmul.mubr.f32.gmra.mrb[22].mxu0 %v2381_v59  ;;  %1110 = vmatmul.mubr.f32.gmra.mrb[22].mxu1 %v2381_v59 }
 0x179   : > { %1002 = vmatprep.mubr.f32.mxu0 %v1906_v21  ;;  %1115 = vmatprep.mubr.f32.mxu1 %v1906_v21 }
 0x17c   : > { %1003 = vmatmul.mubr.f32.gmra.mrb[24].mxu0 %v2414_v55  ;;  %1116 = vmatmul.mubr.f32.gmra.mrb[24].mxu1 %v2414_v55 }
 0x17d   : > { %1008 = vmatprep.mubr.f32.mxu0 %v1906_v21  ;;  %1121 = vmatprep.mubr.f32.mxu1 %v1906_v21 }
 0x180   : > { %1009 = vmatmul.mubr.f32.gmra.mrb[26].mxu0 %v2447_v30  ;;  %1122 = vmatmul.mubr.f32.gmra.mrb[26].mxu1 %v2447_v30 }
 0x181   : > { %1014 = vmatprep.mubr.f32.mxu0 %v1906_v21  ;;  %1127 = vmatprep.mubr.f32.mxu1 %v1906_v21 }
 0x184   : > { %1015 = vmatmul.mubr.f32.gmra.mrb[28].mxu0 %v514_v45  ;;  %1128 = vmatmul.mubr.f32.gmra.mrb[28].mxu1 %v514_v45 }
 0x185   : > { %1020 = vmatprep.mubr.f32.mxu0 %v1906_v21  ;;  %1133 = vmatprep.mubr.f32.mxu1 %v1906_v21  ;;  %v583_v21 = vshrl.u32 %v582_v3, 7 }
 0x187   : > { %v584_v14 = vsub.s32 0, %v583_v21  ;;  %v592_v55 = vsub.s32 2, %v583_v21  ;;  %v588_v15 = vsub.s32 1, %v583_v21  ;;  %v596_v16 = vsub.s32 3, %v583_v21 }
 0x188   : > { %1021 = vmatmul.mubr.f32.gmra.mrb[30].mxu0 %v515_v57  ;;  %1134 = vmatmul.mubr.f32.gmra.mrb[30].mxu1 %v515_v57 }
 0x189   : > { %v2524_v22 = vrot.slane %v580_v19, %v584_v14  ;;  %v2526_v23 = vrot.slane %v580_v19, %v592_v55  ;;  %v2528_v25 = vrot.slane %v580_v19, %v588_v15  ;;  %v2530_v11 = vrot.slane %v580_v19, %v596_v16 }
 0x18a   : > { %v2543_v31 = vrot.slane %v892_v28, %v584_v14  ;;  %v2545_v32 = vrot.slane %v892_v28, %v592_v55  ;;  %v2547_v33 = vrot.slane %v892_v28, %v588_v15  ;;  %v2549_v34 = vrot.slane %v892_v28, %v596_v16 }
 0x18b   : > { %3033 = vst [vmem:[#allocation2_spill] sm:$0xff] %v2524_v22  ;;  %3034 = vst [vmem:[#allocation3_spill] sm:$0xff] %v2526_v23 }
 0x18c   : > { %3035 = vst [vmem:[#allocation4_spill] sm:$0xff] %v2528_v25  ;;  %3036 = vst [vmem:[#allocation5_spill] sm:$0xff] %v2530_v11 }
 0x21f   : > { %v668_v53 = vpop.f32.mrb[0].mxu0  ;;  %v781_v9 = vpop.f32.mrb[0].mxu1 }
 0x220   : > { %v670_v24 = vpop.f32.mrb[1].mxu0  ;;  %v783_v39 = vpop.f32.mrb[1].mxu1  ;;  %v2552_v56 = vadd.f32 %v668_v53, %v2524_v22  ;;  %v2555_v35 = vadd.f32 %v781_v9, %v2526_v23 }
 0x221   : > { %v2558_v36 = vadd.f32 %v670_v24, %v2528_v25  ;;  %v2561_v37 = vadd.f32 %v783_v39, %v2530_v11 }
 0x223   : > { %v674_v48 = vpop.f32.mrb[2].mxu0  ;;  %v787_v58 = vpop.f32.mrb[2].mxu1 }
 0x224   : > { %v676_v59 = vpop.f32.mrb[3].mxu0  ;;  %v789_v60 = vpop.f32.mrb[3].mxu1  ;;  %v2564_v40 = vadd.f32 %v674_v48, %v2524_v22  ;;  %v2567_v42 = vadd.f32 %v787_v58, %v2526_v23 }
 0x225   : > { %v2576_v47 = vadd.f32 %v676_v59, %v2528_v25  ;;  %v2579_v50 = vadd.f32 %v789_v60, %v2530_v11 }
 0x227   : > { %v680_v61 = vpop.f32.mrb[4].mxu0  ;;  %v793_v62 = vpop.f32.mrb[4].mxu1 }
 0x228   : > { %v682_v1 = vpop.f32.mrb[5].mxu0  ;;  %v795_v2 = vpop.f32.mrb[5].mxu1  ;;  %v2588_v63 = vadd.f32 %v680_v61, %v2524_v22  ;;  %v2591_v41 = vadd.f32 %v793_v62, %v2526_v23 }
 0x229   : > { %v2594_v54 = vadd.f32 %v682_v1, %v2528_v25  ;;  %v2597_v57 = vadd.f32 %v795_v2, %v2530_v11 }
 0x22b   : > { %v686_v8 = vpop.f32.mrb[6].mxu0  ;;  %v799_v10 = vpop.f32.mrb[6].mxu1 }
 0x22c   : > { %v688_v5 = vpop.f32.mrb[7].mxu0  ;;  %v801_v12 = vpop.f32.mrb[7].mxu1  ;;  %v2600_v53 = vadd.f32 %v686_v8, %v2524_v22  ;;  %v2603_v9 = vadd.f32 %v799_v10, %v2526_v23 }
 0x22d   : > { %v2606_v24 = vadd.f32 %v688_v5, %v2528_v25  ;;  %v2609_v39 = vadd.f32 %v801_v12, %v2530_v11 }
 0x22e   : > { %3045 = vst [vmem:[#allocation14_spill] sm:$0xff] %v2600_v53  ;;  %3046 = vst [vmem:[#allocation15_spill] sm:$0xff] %v2603_v9 }
 0x22f   : > { %v692_v0 = vpop.f32.mrb[8].mxu0  ;;  %v805_v13 = vpop.f32.mrb[8].mxu1  ;;  %3047 = vst [vmem:[#allocation16_spill] sm:$0xff] %v2606_v24  ;;  %3048 = vst [vmem:[#allocation17_spill] sm:$0xff] %v2609_v39 }
 0x230   : > { %v694_v6 = vpop.f32.mrb[9].mxu0  ;;  %v807_v7 = vpop.f32.mrb[9].mxu1  ;;  %v2612_v59 = vadd.f32 %v692_v0, %v2524_v22  ;;  %v2615_v60 = vadd.f32 %v805_v13, %v2526_v23 }
 0x231   : > { %v2624_v3 = vadd.f32 %v694_v6, %v2528_v25  ;;  %v2627_v8 = vadd.f32 %v807_v7, %v2530_v11 }
 0x232   : > { %3049 = vst [vmem:[#allocation18_spill] sm:$0xff] %v2612_v59  ;;  %3050 = vst [vmem:[#allocation19_spill] sm:$0xff] %v2615_v60 }
 0x233   : > { %v698_v17 = vpop.f32.mrb[10].mxu0  ;;  %v811_v18 = vpop.f32.mrb[10].mxu1  ;;  %3051 = vst [vmem:[#allocation20_spill] sm:$0xff] %v2624_v3  ;;  %3052 = vst [vmem:[#allocation21_spill] sm:$0xff] %v2627_v8 }
 0x234   : > { %v700_v49 = vpop.f32.mrb[11].mxu0  ;;  %v813_v20 = vpop.f32.mrb[11].mxu1  ;;  %v2636_v12 = vadd.f32 %v698_v17, %v2524_v22  ;;  %v2639_v21 = vadd.f32 %v811_v18, %v2526_v23 }
 0x235   : > { %v2646_v6 = vadd.f32 %v700_v49, %v2528_v25  ;;  %v2649_v7 = vadd.f32 %v813_v20, %v2530_v11 }
 0x236   : > { %3053 = vst [vmem:[#allocation22_spill] sm:$0xff] %v2636_v12  ;;  %3054 = vst [vmem:[#allocation23_spill] sm:$0xff] %v2639_v21 }
 0x237   : > { %v2532_v26 = vpop.f32.mrb[12].mxu0  ;;  %v2534_v27 = vpop.f32.mrb[12].mxu1  ;;  %3055 = vst [vmem:[#allocation24_spill] sm:$0xff] %v2646_v6  ;;  %3056 = vst [vmem:[#allocation25_spill] sm:$0xff] %v2649_v7 }
 0x238   : > { %3037 = vst [vmem:[#allocation6_spill] sm:$0xff] %v2532_v26  ;;  %3038 = vst [vmem:[#allocation7_spill] sm:$0xff] %v2534_v27  ;;  %v2539_v29 = vpop.f32.mrb[13].mxu0  ;;  %v2541_v30 = vpop.f32.mrb[13].mxu1 }
 0x239   : > { %3039 = vst [vmem:[#allocation8_spill] sm:$0xff] %v2539_v29  ;;  %3040 = vst [vmem:[#allocation9_spill] sm:$0xff] %v2541_v30 }
 0x23b   : > { %v710_v38 = vpop.f32.mrb[14].mxu0  ;;  %v823_v4 = vpop.f32.mrb[14].mxu1 }
 0x23c   : > { %v2570_v43 = vadd.f32 %v710_v38, %v2524_v22  ;;  %v2573_v44 = vadd.f32 %v823_v4, %v2526_v23  ;;  %v712_v45 = vpop.f32.mrb[15].mxu0  ;;  %v825_v46 = vpop.f32.mrb[15].mxu1 }
 0x23d   : > { %v2582_v51 = vadd.f32 %v712_v45, %v2528_v25  ;;  %v2585_v52 = vadd.f32 %v825_v46, %v2530_v11 }
 0x23e   : > { %3041 = vst [vmem:[#allocation10_spill] sm:$0xff] %v2570_v43  ;;  %3042 = vst [vmem:[#allocation11_spill] sm:$0xff] %v2573_v44 }
 0x23f   : > { %3043 = vst [vmem:[#allocation12_spill] sm:$0xff] %v2582_v51  ;;  %3044 = vst [vmem:[#allocation13_spill] sm:$0xff] %v2585_v52  ;;  %v980_v48 = vpop.f32.mrb[16].mxu0  ;;  %v1093_v58 = vpop.f32.mrb[16].mxu1 }
 0x240   : > { %v2618_v61 = vadd.f32 %v980_v48, %v2543_v31  ;;  %v2621_v62 = vadd.f32 %v1093_v58, %v2545_v32  ;;  %v982_v1 = vpop.f32.mrb[17].mxu0  ;;  %v1095_v2 = vpop.f32.mrb[17].mxu1 }
 0x241   : > { %v2630_v10 = vadd.f32 %v982_v1, %v2547_v33  ;;  %v2633_v5 = vadd.f32 %v1095_v2, %v2549_v34 }
 0x242   : > { %v1140_v0 = vmul.f32 %v2618_v61, %v2618_v61  ;;  %v1142_v13 = vmul.f32 %v2621_v62, %v2621_v62 }
 0x243   : > { %v1141_v14 = vmul.f32 %v2630_v10, %v2630_v10  ;;  %v1143_v55 = vmul.f32 %v2633_v5, %v2633_v5  ;;  %v986_v15 = vpop.f32.mrb[18].mxu0  ;;  %v1099_v16 = vpop.f32.mrb[18].mxu1 }
 0x244   : > { %v1172_v17 = vmul.f32 %v1140_v0, %v2618_v61  ;;  %v1174_v18 = vmul.f32 %v1142_v13, %v2621_v62  ;;  %v2658_v19 = vadd.f32 %v986_v15, %v2543_v31  ;;  %v2661_v49 = vadd.f32 %v1099_v16, %v2545_v32  ;;  %v988_v20 = vpop.f32.mrb[19].mxu0  ;;  %v1101_v28 = vpop.f32.mrb[19].mxu1 }
 0x245   : > { %v1173_v38 = vmul.f32 %v1141_v14, %v2630_v10  ;;  %v1175_v4 = vmul.f32 %v1143_v55, %v2633_v5  ;;  %v2666_v45 = vadd.f32 %v988_v20, %v2547_v33  ;;  %v2669_v46 = vadd.f32 %v1101_v28, %v2549_v34 }
 0x246   : > { %v1204_v48 = vmul.f32 0.044715, %v1172_v17  ;;  %v1206_v58 = vmul.f32 0.044715, %v1174_v18  ;;  %v1144_v1 = vmul.f32 %v2658_v19, %v2658_v19  ;;  %v1146_v2 = vmul.f32 %v2661_v49, %v2661_v49 }
 0x247   : > { %v1205_v0 = vmul.f32 0.044715, %v1173_v38  ;;  %v1207_v13 = vmul.f32 0.044715, %v1175_v4  ;;  %v1145_v14 = vmul.f32 %v2666_v45, %v2666_v45  ;;  %v1147_v55 = vmul.f32 %v2669_v46, %v2669_v46  ;;  %v992_v15 = vpop.f32.mrb[20].mxu0  ;;  %v1105_v16 = vpop.f32.mrb[20].mxu1 }
 0x248   : > { %v1236_v20 = vadd.f32 %v1204_v48, %v2618_v61  ;;  %v1238_v17 = vadd.f32 %v1206_v58, %v2621_v62  ;;  %v1176_v18 = vmul.f32 %v1144_v1, %v2658_v19  ;;  %v1178_v28 = vmul.f32 %v1146_v2, %v2661_v49  ;;  %v994_v52 = vpop.f32.mrb[21].mxu0  ;;  %v1107_v51 = vpop.f32.mrb[21].mxu1 }
 0x249   : > { %v1237_v38 = vadd.f32 %v1205_v0, %v2630_v10  ;;  %v1239_v4 = vadd.f32 %v1207_v13, %v2633_v5  ;;  %v1177_v44 = vmul.f32 %v1145_v14, %v2666_v45  ;;  %v1179_v43 = vmul.f32 %v1147_v55, %v2669_v46 }
 0x24a   : > { %v1268_v30 = vmul.f32 0.7978846, %v1236_v20  ;;  %v1270_v11 = vmul.f32 0.7978846, %v1238_v17  ;;  %v1208_v29 = vmul.f32 0.044715, %v1176_v18  ;;  %v2688_v48 = vadd.f32 %v992_v15, %v2543_v31 }
 0x24b   : > { %v1269_v58 = vmul.f32 0.7978846, %v1237_v38  ;;  %v1271_v1 = vmul.f32 0.7978846, %v1239_v4  ;;  %v1210_v25 = vmul.f32 0.044715, %v1178_v28  ;;  %v2691_v2 = vadd.f32 %v1105_v16, %v2545_v32 }
 0x24c   : > { %1818 = vtanh.f32 %v1268_v30  ;;  %v1240_v0 = vadd.f32 %v1208_v29, %v2658_v19  ;;  %v1209_v13 = vmul.f32 0.044715, %v1177_v44  ;;  %v1211_v27 = vmul.f32 0.044715, %v1179_v43  ;;  %v998_v14 = vpop.f32.mrb[22].mxu0  ;;  %v1111_v23 = vpop.f32.mrb[22].mxu1 }
 0x24d   : > { %1820 = vtanh.f32 %v1270_v11  ;;  %v1242_v55 = vadd.f32 %v1210_v25, %v2661_v49  ;;  %v1148_v15 = vmul.f32 %v2688_v48, %v2688_v48  ;;  %v1150_v20 = vmul.f32 %v2691_v2, %v2691_v2  ;;  %v1000_v17 = vpop.f32.mrb[23].mxu0  ;;  %v1113_v18 = vpop.f32.mrb[23].mxu1 }
 0x24e   : > { %1822 = vtanh.f32 %v1269_v58  ;;  %v1272_v16 = vmul.f32 0.7978846, %v1240_v0  ;;  %v1241_v30 = vadd.f32 %v1209_v13, %v2666_v45  ;;  %v1243_v29 = vadd.f32 %v1211_v27, %v2669_v46 }
 0x24f   : > { %1824 = vtanh.f32 %v1271_v1  ;;  %v1274_v43 = vmul.f32 0.7978846, %v1242_v55  ;;  %v1180_v11 = vmul.f32 %v1148_v15, %v2688_v48  ;;  %v1182_v25 = vmul.f32 %v1150_v20, %v2691_v2  ;;  %v2703_v44 = vpop.f32.mrb[24].mxu0  ;;  %v2705_v28 = vpop.f32.mrb[24].mxu1 }
 0x250   : > { %1826 = vtanh.f32 %v1272_v16  ;;  %v1273_v38 = vmul.f32 0.7978846, %v1241_v30  ;;  %v1275_v4 = vmul.f32 0.7978846, %v1243_v29  ;;  %v2708_v58 = vadd.f32 %v994_v52, %v2547_v33  ;;  %v2710_v0 = vpop.f32.mrb[25].mxu0  ;;  %v2712_v13 = vpop.f32.mrb[25].mxu1 }
 0x251   : > { %1828 = vtanh.f32 %v1274_v43  ;;  %v1212_v27 = vmul.f32 0.044715, %v1180_v11  ;;  %v1214_v1 = vmul.f32 0.044715, %v1182_v25  ;;  %v2715_v55 = vadd.f32 %v1107_v51, %v2549_v34 }
 0x252   : > { %1830 = vtanh.f32 %v1273_v38  ;;  %v1149_v15 = vmul.f32 %v2708_v58, %v2708_v58  ;;  %v2720_v20 = vadd.f32 %v998_v14, %v2543_v31  ;;  %v2723_v52 = vadd.f32 %v1111_v23, %v2545_v32 }
 0x253   : > { %1832 = vtanh.f32 %v1275_v4  ;;  %v1244_v16 = vadd.f32 %v1212_v27, %v2688_v48  ;;  %v1246_v30 = vadd.f32 %v1214_v1, %v2691_v2  ;;  %v1151_v29 = vmul.f32 %v2715_v55, %v2715_v55  ;;  %v2729_v51 = vpop.f32.mrb[26].mxu0  ;;  %v2731_v43 = vpop.f32.mrb[26].mxu1 }
 0x254   : > { %v1181_v11 = vmul.f32 %v1149_v15, %v2708_v58  ;;  %v1152_v14 = vmul.f32 %v2720_v20, %v2720_v20  ;;  %v1154_v23 = vmul.f32 %v2723_v52, %v2723_v52  ;;  %v2739_v25 = vadd.f32 %v1000_v17, %v2547_v33  ;;  %v2741_v38 = vpop.f32.mrb[27].mxu0  ;;  %v2743_v4 = vpop.f32.mrb[27].mxu1 }
 0x255   : > { %3057 = vst [vmem:[#allocation26_spill] sm:$0xff] %v2741_v38  ;;  %3058 = vst [vmem:[#allocation27_spill] sm:$0xff] %v2743_v4  ;;  %v1276_v27 = vmul.f32 0.7978846, %v1244_v16  ;;  %v1278_v1 = vmul.f32 0.7978846, %v1246_v30  ;;  %v1183_v26 = vmul.f32 %v1151_v29, %v2715_v55  ;;  %v2747_v22 = vadd.f32 %v1113_v18, %v2549_v34 }
 0x256   : > { %v1819_v15 = vpop.eup %1818  ;;  %v1213_v7 = vmul.f32 0.044715, %v1181_v11  ;;  %v1184_v6 = vmul.f32 %v1152_v14, %v2720_v20  ;;  %v1186_v21 = vmul.f32 %v1154_v23, %v2723_v52  ;;  %v2753_v17 = vmul.f32 %v2739_v25, %v2739_v25 }
 0x257   : > { %v1821_v12 = vpop.eup %1820  ;;  %v1332_v8 = vadd.f32 1.0, %v1819_v15  ;;  %1834 = vtanh.f32 %v1276_v27  ;;  %v1215_v16 = vmul.f32 0.044715, %v1183_v26  ;;  %v2757_v30 = vmul.f32 %v2747_v22, %v2747_v22  ;;  %v2759_v18 = vpop.f32.mrb[28].mxu0 }
 0x258   : > { %3059 = vst [vmem:[#allocation28_spill] sm:$0xff] %v2759_v18  ;;  %v2761_v29 = vpop.f32.mrb[28].mxu1  ;;  %v1823_v11 = vpop.eup %1822  ;;  %v1334_v14 = vadd.f32 1.0, %v1821_v12  ;;  %1836 = vtanh.f32 %v1278_v1  ;;  %v1245_v23 = vadd.f32 %v1213_v7, %v2708_v58  ;;  %v1216_v3 = vmul.f32 0.044715, %v1184_v6 }
 0x259   : > { %3060 = vst [vmem:[#allocation29_spill] sm:$0xff] %v2761_v29  ;;  %v2764_v60 = vpop.f32.mrb[29].mxu0  ;;  %v2766_v59 = vpop.f32.mrb[29].mxu1  ;;  %v1364_v26 = vmul.f32 0.5, %v1332_v8  ;;  %v1333_v15 = vadd.f32 1.0, %v1823_v11  ;;  %v1247_v39 = vadd.f32 %v1215_v16, %v2715_v55 }
 0x25a   : > { %3061 = vst [vmem:[#allocation30_spill] sm:$0xff] %v2764_v60  ;;  %3062 = vst [vmem:[#allocation31_spill] sm:$0xff] %v2766_v59  ;;  %v1825_v27 = vpop.eup %1824  ;;  %v1218_v24 = vmul.f32 0.044715, %v1186_v21  ;;  %v1366_v18 = vmul.f32 0.5, %v1334_v14  ;;  %v1248_v12 = vadd.f32 %v1216_v3, %v2720_v20 }
 0x25b   : > { %v1827_v9 = vpop.eup %1826  ;;  %v1335_v29 = vadd.f32 1.0, %v1825_v27  ;;  %v1277_v4 = vmul.f32 0.7978846, %v1245_v23  ;;  %v1396_v6 = vmul.f32 %v1364_v26, %v2618_v61  ;;  %v1365_v7 = vmul.f32 0.5, %v1333_v15  ;;  %v2772_v59 = vpop.f32.mrb[30].mxu0 }
 0x25c   : > { %v1829_v1 = vpop.eup %1828  ;;  %v1336_v60 = vadd.f32 1.0, %v1827_v9  ;;  %v1279_v53 = vmul.f32 0.7978846, %v1247_v39  ;;  %v2774_v38 = vpop.f32.mrb[30].mxu1  ;;  %v1398_v21 = vmul.f32 %v1366_v18, %v2621_v62 }
 0x25d   : > { %v1831_v8 = vpop.eup %1830  ;;  %v1367_v3 = vmul.f32 0.5, %v1335_v29  ;;  %v1338_v16 = vadd.f32 1.0, %v1829_v1  ;;  %1838 = vtanh.f32 %v1277_v4  ;;  %v2782_v61 = vpop.f32.mrb[31].mxu0  ;;  %v1428_v11 = vmul.f32 %v1396_v6, %v2552_v56 }
 0x25e   : > { %v2784_v9 = vpop.f32.mrb[31].mxu1  ;;  %v1833_v39 = vpop.eup %1832  ;;  %v1397_v14 = vmul.f32 %v1365_v7, %v2630_v10  ;;  %v1368_v23 = vmul.f32 0.5, %v1336_v60  ;;  %v1337_v27 = vadd.f32 1.0, %v1831_v8  ;;  %v1430_v26 = vmul.f32 %v1398_v21, %v2555_v35 }
 0x25f   : > { %v1399_v62 = vmul.f32 %v1367_v3, %v2633_v5  ;;  %v1370_v18 = vmul.f32 0.5, %v1338_v16  ;;  %v1339_v29 = vadd.f32 1.0, %v1833_v39  ;;  %1460 = vst [vmem:[%s2779_s10] sm:$0xff] %v1428_v11  ;;  %1840 = vtanh.f32 %v1279_v53 }
 0x260   : > { %v1429_v4 = vmul.f32 %v1397_v14, %v2558_v36  ;;  %v1400_v15 = vmul.f32 %v1368_v23, %v2658_v19  ;;  %v1369_v1 = vmul.f32 0.5, %v1337_v27  ;;  %1462 = vst [vmem:[%s2779_s10 + $0x10] sm:$0xff] %v1430_v26  ;;  %v1280_v35 = vmul.f32 0.7978846, %v1248_v12 }
 0x261   : > { %v1431_v56 = vmul.f32 %v1399_v62, %v2561_v37  ;;  %v1402_v60 = vmul.f32 %v1370_v18, %v2661_v49  ;;  %v1371_v10 = vmul.f32 0.5, %v1339_v29  ;;  %v1835_v6 = vpop.eup %1834  ;;  %v1250_v7 = vadd.f32 %v1218_v24, %v2723_v52 }
 0x262   : > { %1461 = vst [vmem:[%s2779_s10 + $0x8] sm:$0xff] %v1429_v4  ;;  %v1432_v5 = vmul.f32 %v1400_v15, %v2564_v40  ;;  %v1401_v36 = vmul.f32 %v1369_v1, %v2666_v45  ;;  %v1185_v53 = vmul.f32 %v2753_v17, %v2739_v25  ;;  %v1837_v19 = vpop.eup %1836  ;;  %v1340_v12 = vadd.f32 1.0, %v1835_v6 }
 0x263   : > { %1463 = vst [vmem:[%s2779_s10 + $0x18] sm:$0xff] %v1431_v56  ;;  %v1434_v37 = vmul.f32 %v1402_v60, %v2567_v42  ;;  %v1403_v49 = vmul.f32 %v1371_v10, %v2669_v46  ;;  %1842 = vtanh.f32 %v1280_v35  ;;  %v1342_v8 = vadd.f32 1.0, %v1837_v19 }
 0x264   : > { %1464 = vst [vmem:[%s2779_s10 + $0x20] sm:$0xff] %v1432_v5  ;;  %v1433_v40 = vmul.f32 %v1401_v36, %v2576_v47  ;;  %v1282_v45 = vmul.f32 0.7978846, %v1250_v7  ;;  %v1217_v21 = vmul.f32 0.044715, %v1185_v53  ;;  %v1372_v17 = vmul.f32 0.5, %v1340_v12 }
 0x265   : > { %1466 = vst [vmem:[%s2779_s10 + $0x30] sm:$0xff] %v1434_v37  ;;  %v1435_v24 = vmul.f32 %v1403_v49, %v2579_v50  ;;  %v1187_v3 = vmul.f32 %v2757_v30, %v2747_v22  ;;  %v2813_v42 = vadd.f32 %v2703_v44, %v2543_v31  ;;  %v1374_v46 = vmul.f32 0.5, %v1342_v8 }
 0x266   : > { %1465 = vst [vmem:[%s2779_s10 + $0x28] sm:$0xff] %v1433_v40  ;;  %1844 = vtanh.f32 %v1282_v45  ;;  %v1249_v16 = vadd.f32 %v1217_v21, %v2739_v25  ;;  %v2819_v47 = vadd.f32 %v2705_v28, %v2545_v32  ;;  %v1404_v50 = vmul.f32 %v1372_v17, %v2688_v48 }
 0x267   : > { %v1839_v39 = vpop.eup %1838  ;;  %1467 = vst [vmem:[%s2779_s10 + $0x38] sm:$0xff] %v1435_v24  ;;  %v1219_v11 = vmul.f32 0.044715, %v1187_v3  ;;  %v1156_v30 = vmul.f32 %v2813_v42, %v2813_v42  ;;  %v2827_v44 = vadd.f32 %v2710_v0, %v2547_v33  ;;  %v1406_v14 = vmul.f32 %v1374_v46, %v2691_v2 }
 0x268   : > { %v1341_v23 = vadd.f32 1.0, %v1839_v39  ;;  %v1281_v27 = vmul.f32 0.7978846, %v1249_v16  ;;  %v1158_v28 = vmul.f32 %v2819_v47, %v2819_v47  ;;  %v1436_v26 = vmul.f32 %v1404_v50, %v2588_v63 }
 0x269   : > { %v1251_v48 = vadd.f32 %v1219_v11, %v2747_v22  ;;  %v1188_v62 = vmul.f32 %v1156_v30, %v2813_v42  ;;  %v1157_v18 = vmul.f32 %v2827_v44, %v2827_v44  ;;  %v1841_v29 = vpop.eup %1840  ;;  %v1438_v0 = vmul.f32 %v1406_v14, %v2591_v41  ;;  %v3064_v30 = vld [vmem:[#allocation14_spill] sm:$0xff] }
 0x26a   : > { %v1373_v4 = vmul.f32 0.5, %v1341_v23  ;;  %1846 = vtanh.f32 %v1281_v27  ;;  %v1190_v2 = vmul.f32 %v1158_v28, %v2819_v47  ;;  %1468 = vst [vmem:[%s2779_s10 + $0x40] sm:$0xff] %v1436_v26  ;;  %v1343_v15 = vadd.f32 1.0, %v1841_v29  ;;  %v3065_v27 = vld [vmem:[#allocation27_spill] sm:$0xff] }
 0x26b   : > { %v1283_v1 = vmul.f32 0.7978846, %v1251_v48  ;;  %v1220_v56 = vmul.f32 0.044715, %v1188_v62  ;;  %v1189_v63 = vmul.f32 %v1157_v18, %v2827_v44  ;;  %1470 = vst [vmem:[%s2779_s10 + $0x50] sm:$0xff] %v1438_v0  ;;  %v2845_v35 = vadd.f32 %v2712_v13, %v2549_v34 }
 0x26c   : > { %v1405_v60 = vmul.f32 %v1373_v4, %v2708_v58  ;;  %v1222_v10 = vmul.f32 0.044715, %v1190_v2  ;;  %v2849_v41 = vadd.f32 %v2729_v51, %v2543_v31  ;;  %v1375_v5 = vmul.f32 0.5, %v1343_v15  ;;  %v3066_v2 = vld [vmem:[#allocation28_spill] sm:$0xff] }
 0x26d   : > { %v1843_v6 = vpop.eup %1842  ;;  %1848 = vtanh.f32 %v1283_v1  ;;  %v1252_v36 = vadd.f32 %v1220_v56, %v2813_v42  ;;  %v1221_v7 = vmul.f32 0.044715, %v1189_v63  ;;  %v1159_v13 = vmul.f32 %v2845_v35, %v2845_v35 }
 0x26e   : > { %v1437_v53 = vmul.f32 %v1405_v60, %v2594_v54  ;;  %v1344_v19 = vadd.f32 1.0, %v1843_v6  ;;  %v1254_v58 = vadd.f32 %v1222_v10, %v2819_v47  ;;  %v1407_v37 = vmul.f32 %v1375_v5, %v2715_v55 }
 0x26f   : > { %v1284_v49 = vmul.f32 0.7978846, %v1252_v36  ;;  %v1253_v51 = vadd.f32 %v1221_v7, %v2827_v44  ;;  %v1160_v12 = vmul.f32 %v2849_v41, %v2849_v41  ;;  %v1191_v54 = vmul.f32 %v1159_v13, %v2845_v35 }
 0x270   : > { %v1845_v40 = vpop.eup %1844  ;;  %1469 = vst [vmem:[%s2779_s10 + $0x48] sm:$0xff] %v1437_v53  ;;  %v1376_v8 = vmul.f32 0.5, %v1344_v19  ;;  %v1286_v45 = vmul.f32 0.7978846, %v1254_v58  ;;  %v2864_v21 = vadd.f32 %v2731_v43, %v2545_v32  ;;  %v1439_v24 = vmul.f32 %v1407_v37, %v2597_v57  ;;  %v3063_v43 = vld [vmem:[#allocation26_spill] sm:$0xff] }
 0x271   : > { %v1346_v55 = vadd.f32 1.0, %v1845_v40  ;;  %1850 = vtanh.f32 %v1284_v49  ;;  %v1285_v17 = vmul.f32 0.7978846, %v1253_v51  ;;  %v1223_v46 = vmul.f32 0.044715, %v1191_v54  ;;  %v3068_v49 = vld [vmem:[#allocation29_spill] sm:$0xff] }
 0x272   : > { %v1408_v3 = vmul.f32 %v1376_v8, %v2720_v20  ;;  %1852 = vtanh.f32 %v1286_v45  ;;  %v1192_v16 = vmul.f32 %v1160_v12, %v2849_v41  ;;  %1471 = vst [vmem:[%s2779_s10 + $0x58] sm:$0xff] %v1439_v24  ;;  %v1162_v50 = vmul.f32 %v2864_v21, %v2864_v21  ;;  %v3069_v40 = vld [vmem:[#allocation16_spill] sm:$0xff] }
 0x273   : > { %v1378_v39 = vmul.f32 0.5, %v1346_v55  ;;  %1854 = vtanh.f32 %v1285_v17  ;;  %v2874_v11 = vadd.f32 %v3063_v43, %v2547_v33  ;;  %v1255_v20 = vadd.f32 %v1223_v46, %v2845_v35 }
 0x274   : > { %v1847_v57 = vpop.eup %1846  ;;  %v1440_v14 = vmul.f32 %v1408_v3, %v3064_v30  ;;  %v1224_v23 = vmul.f32 0.044715, %v1192_v16  ;;  %v2880_v28 = vadd.f32 %v3065_v27, %v2549_v34  ;;  %v1194_v62 = vmul.f32 %v1162_v50, %v2864_v21 }
 0x275   : > { %v1410_v26 = vmul.f32 %v1378_v39, %v2723_v52  ;;  %v1345_v48 = vadd.f32 1.0, %v1847_v57  ;;  %v1161_v18 = vmul.f32 %v2874_v11, %v2874_v11  ;;  %v1287_v29 = vmul.f32 0.7978846, %v1255_v20  ;;  %v3067_v52 = vld [vmem:[#allocation15_spill] sm:$0xff]  ;;  %v3070_v57 = vld [vmem:[#allocation17_spill] sm:$0xff] }
 0x276   : > { %1472 = vst [vmem:[%s2779_s10 + $0x60] sm:$0xff] %v1440_v14  ;;  %v1256_v0 = vadd.f32 %v1224_v23, %v2849_v41  ;;  %v1163_v4 = vmul.f32 %v2880_v28, %v2880_v28  ;;  %v2892_v15 = vadd.f32 %v3066_v2, %v2543_v31  ;;  %v1226_v60 = vmul.f32 0.044715, %v1194_v62 }
 0x277   : > { %v1849_v1 = vpop.eup %1848  ;;  %v1442_v56 = vmul.f32 %v1410_v26, %v3067_v52  ;;  %v1377_v63 = vmul.f32 0.5, %v1345_v48  ;;  %v1193_v10 = vmul.f32 %v1161_v18, %v2874_v11  ;;  %1856 = vtanh.f32 %v1287_v29  ;;  %v3071_v18 = vld [vmem:[#allocation30_spill] sm:$0xff] }
 0x278   : > { %v1347_v6 = vadd.f32 1.0, %v1849_v1  ;;  %v1288_v5 = vmul.f32 0.7978846, %v1256_v0  ;;  %v1195_v36 = vmul.f32 %v1163_v4, %v2880_v28  ;;  %v1258_v53 = vadd.f32 %v1226_v60, %v2864_v21  ;;  %v3072_v1 = vld [vmem:[#allocation31_spill] sm:$0xff] }
 0x279   : > { %1474 = vst [vmem:[%s2779_s10 + $0x70] sm:$0xff] %v1442_v56  ;;  %v1409_v7 = vmul.f32 %v1377_v63, %v2739_v25  ;;  %v1225_v19 = vmul.f32 0.044715, %v1193_v10  ;;  %v1164_v58 = vmul.f32 %v2892_v15, %v2892_v15  ;;  %v2904_v51 = vadd.f32 %v3068_v49, %v2545_v32  ;;  %v3073_v63 = vld [vmem:[#allocation18_spill] sm:$0xff] }
 0x27a   : > { %v1379_v13 = vmul.f32 0.5, %v1347_v6  ;;  %1858 = vtanh.f32 %v1288_v5  ;;  %v1227_v37 = vmul.f32 0.044715, %v1195_v36  ;;  %v1290_v45 = vmul.f32 0.7978846, %v1258_v53 }
 0x27b   : > { %v1851_v12 = vpop.eup %1850  ;;  %v1441_v8 = vmul.f32 %v1409_v7, %v3069_v40  ;;  %v1257_v25 = vadd.f32 %v1225_v19, %v2874_v11  ;;  %v1196_v54 = vmul.f32 %v1164_v58, %v2892_v15  ;;  %v1166_v46 = vmul.f32 %v2904_v51, %v2904_v51  ;;  %v3075_v19 = vld [vmem:[#allocation20_spill] sm:$0xff] }
 0x27c   : > { %v1853_v24 = vpop.eup %1852  ;;  %v1411_v55 = vmul.f32 %v1379_v13, %v2747_v22  ;;  %v1348_v17 = vadd.f32 1.0, %v1851_v12  ;;  %v1259_v3 = vadd.f32 %v1227_v37, %v2880_v28  ;;  %1860 = vtanh.f32 %v1290_v45 }
 0x27d   : > { %v1855_v16 = vpop.eup %1854  ;;  %1473 = vst [vmem:[%s2779_s10 + $0x68] sm:$0xff] %v1441_v8  ;;  %v1350_v39 = vadd.f32 1.0, %v1853_v24  ;;  %v1289_v50 = vmul.f32 0.7978846, %v1257_v25  ;;  %v1228_v43 = vmul.f32 0.044715, %v1196_v54  ;;  %v1198_v26 = vmul.f32 %v1166_v46, %v2904_v51 }
 0x27e   : > { %v1443_v30 = vmul.f32 %v1411_v55, %v3070_v57  ;;  %v1380_v14 = vmul.f32 0.5, %v1348_v17  ;;  %v1349_v20 = vadd.f32 1.0, %v1855_v16  ;;  %v1291_v23 = vmul.f32 0.7978846, %v1259_v3 }
 0x27f   : > { %v1382_v27 = vmul.f32 0.5, %v1350_v39  ;;  %1862 = vtanh.f32 %v1289_v50  ;;  %v1260_v22 = vadd.f32 %v1228_v43, %v2892_v15  ;;  %v2921_v29 = vadd.f32 %v3071_v18, %v2547_v33  ;;  %v3076_v39 = vld [vmem:[#allocation21_spill] sm:$0xff] }
 0x280   : > { %1475 = vst [vmem:[%s2779_s10 + $0x78] sm:$0xff] %v1443_v30  ;;  %v1412_v48 = vmul.f32 %v1380_v14, %v2813_v42  ;;  %v1381_v62 = vmul.f32 0.5, %v1349_v20  ;;  %1864 = vtanh.f32 %v1291_v23  ;;  %v1230_v2 = vmul.f32 0.044715, %v1198_v26  ;;  %v3077_v23 = vld [vmem:[#allocation22_spill] sm:$0xff] }
 0x281   : > { %v1414_v0 = vmul.f32 %v1382_v27, %v2819_v47  ;;  %v1292_v4 = vmul.f32 0.7978846, %v1260_v22  ;;  %v2926_v52 = vadd.f32 %v3072_v1, %v2549_v34  ;;  %v1857_v56 = vpop.eup %1856  ;;  %v1165_v10 = vmul.f32 %v2921_v29, %v2921_v29  ;;  %v3074_v47 = vld [vmem:[#allocation19_spill] sm:$0xff] }
 0x282   : > { %v1444_v60 = vmul.f32 %v1412_v48, %v3073_v63  ;;  %v1413_v42 = vmul.f32 %v1381_v62, %v2827_v44  ;;  %v2934_v6 = vadd.f32 %v2772_v59, %v2543_v31  ;;  %v1351_v36 = vadd.f32 1.0, %v1857_v56  ;;  %v3078_v63 = vld [vmem:[#allocation23_spill] sm:$0xff] }
 0x283   : > { %v1446_v5 = vmul.f32 %v1414_v0, %v3074_v47  ;;  %1866 = vtanh.f32 %v1292_v4  ;;  %v1262_v7 = vadd.f32 %v1230_v2, %v2904_v51  ;;  %v1197_v44 = vmul.f32 %v1165_v10, %v2921_v29 }
 0x284   : > { %v1859_v53 = vpop.eup %1858  ;;  %1476 = vst [vmem:[%s2779_s10 + $0x80] sm:$0xff] %v1444_v60  ;;  %v1445_v58 = vmul.f32 %v1413_v42, %v3075_v19  ;;  %v1167_v13 = vmul.f32 %v2926_v52, %v2926_v52  ;;  %v1168_v31 = vmul.f32 %v2934_v6, %v2934_v6  ;;  %v1383_v59 = vmul.f32 0.5, %v1351_v36  ;;  %v3079_v36 = vld [vmem:[#allocation24_spill] sm:$0xff] }
 0x285   : > { %1478 = vst [vmem:[%s2779_s10 + $0x90] sm:$0xff] %v1446_v5  ;;  %v1352_v37 = vadd.f32 1.0, %v1859_v53  ;;  %v1294_v49 = vmul.f32 0.7978846, %v1262_v7  ;;  %v2948_v12 = vadd.f32 %v2774_v38, %v2545_v32  ;;  %v1229_v40 = vmul.f32 0.044715, %v1197_v44 }
 0x286   : > { %1477 = vst [vmem:[%s2779_s10 + $0x88] sm:$0xff] %v1445_v58  ;;  %v1199_v8 = vmul.f32 %v1167_v13, %v2926_v52  ;;  %v1200_v45 = vmul.f32 %v1168_v31, %v2934_v6  ;;  %v2955_v25 = vadd.f32 %v2782_v61, %v2547_v33  ;;  %v1861_v54 = vpop.eup %1860  ;;  %v1415_v24 = vmul.f32 %v1383_v59, %v2845_v35  ;;  %v3080_v44 = vld [vmem:[#allocation25_spill] sm:$0xff]  ;;  %v3081_v31 = vld [vmem:[#allocation2_spill] sm:$0xff] }
 0x287   : > { %v1384_v55 = vmul.f32 0.5, %v1352_v37  ;;  %1868 = vtanh.f32 %v1294_v49  ;;  %v1170_v32 = vmul.f32 %v2948_v12, %v2948_v12  ;;  %v1354_v38 = vadd.f32 1.0, %v1861_v54 }
 0x288   : > { %v1261_v17 = vadd.f32 %v1229_v40, %v2921_v29  ;;  %v1231_v3 = vmul.f32 0.044715, %v1199_v8  ;;  %v1232_v46 = vmul.f32 0.044715, %v1200_v45  ;;  %v1447_v50 = vmul.f32 %v1415_v24, %v3076_v39  ;;  %v3083_v24 = vld [vmem:[#allocation3_spill] sm:$0xff] }
 0x289   : > { %v1863_v16 = vpop.eup %1862  ;;  %v1416_v33 = vmul.f32 %v1384_v55, %v2849_v41  ;;  %v1202_v61 = vmul.f32 %v1170_v32, %v2948_v12  ;;  %v1169_v35 = vmul.f32 %v2955_v25, %v2955_v25  ;;  %v1386_v57 = vmul.f32 0.5, %v1354_v38  ;;  %v3084_v55 = vld [vmem:[#allocation7_spill] sm:$0xff] }
 0x28a   : > { %v1865_v43 = vpop.eup %1864  ;;  %v1353_v30 = vadd.f32 1.0, %v1863_v16  ;;  %v1293_v14 = vmul.f32 0.7978846, %v1261_v17  ;;  %v1263_v20 = vadd.f32 %v1231_v3, %v2926_v52  ;;  %1479 = vst [vmem:[%s2779_s10 + $0x98] sm:$0xff] %v1447_v50  ;;  %v1264_v26 = vadd.f32 %v1232_v46, %v2934_v6 }
 0x28b   : > { %v1448_v27 = vmul.f32 %v1416_v33, %v3077_v23  ;;  %v1355_v22 = vadd.f32 1.0, %v1865_v43  ;;  %v1234_v48 = vmul.f32 0.044715, %v1202_v61  ;;  %v1418_v41 = vmul.f32 %v1386_v57, %v2864_v21  ;;  %v3085_v57 = vld [vmem:[#allocation4_spill] sm:$0xff] }
 0x28c   : > { %v1385_v62 = vmul.f32 0.5, %v1353_v30  ;;  %1870 = vtanh.f32 %v1293_v14  ;;  %v1295_v18 = vmul.f32 0.7978846, %v1263_v20  ;;  %v1296_v2 = vmul.f32 0.7978846, %v1264_v26  ;;  %v3086_v30 = vld [vmem:[#allocation8_spill] sm:$0xff] }
 0x28d   : > { %v1867_v0 = vpop.eup %1866  ;;  %1480 = vst [vmem:[%s2779_s10 + $0xa0] sm:$0xff] %v1448_v27  ;;  %v1387_v4 = vmul.f32 0.5, %v1355_v22  ;;  %v1266_v1 = vadd.f32 %v1234_v48, %v2948_v12  ;;  %v1201_v56 = vmul.f32 %v1169_v35, %v2955_v25  ;;  %v1450_v60 = vmul.f32 %v1418_v41, %v3078_v63  ;;  %v3087_v22 = vld [vmem:[#allocation5_spill] sm:$0xff] }
 0x28e   : > { %v1417_v42 = vmul.f32 %v1385_v62, %v2874_v11  ;;  %v1356_v10 = vadd.f32 1.0, %v1867_v0  ;;  %1872 = vtanh.f32 %v1295_v18  ;;  %v1138_v19 = vadd.f32 %v2784_v9, %v2549_v34  ;;  %v3088_v26 = vld [vmem:[#allocation9_spill] sm:$0xff] }
 0x28f   : > { %v1419_v21 = vmul.f32 %v1387_v4, %v2880_v28  ;;  %1874 = vtanh.f32 %v1296_v2  ;;  %v1298_v47 = vmul.f32 0.7978846, %v1266_v1  ;;  %v1233_v5 = vmul.f32 0.044715, %v1201_v56  ;;  %1482 = vst [vmem:[%s2779_s10 + $0xb0] sm:$0xff] %v1450_v60  ;;  %v3082_v28 = vld [vmem:[#allocation6_spill] sm:$0xff] }
 0x290   : > { %v1449_v7 = vmul.f32 %v1417_v42, %v3079_v36  ;;  %v1388_v53 = vmul.f32 0.5, %v1356_v10  ;;  %v705_v59 = vadd.f32 %v3082_v28, %v3081_v31  ;;  %v1171_v40 = vmul.f32 %v1138_v19, %v1138_v19  ;;  %v3089_v2 = vld [vmem:[#allocation10_spill] sm:$0xff]  ;;  %v3090_v60 = vld [vmem:[#allocation11_spill] sm:$0xff] }
 0x291   : > { %v1869_v58 = vpop.eup %1868  ;;  %v1451_v13 = vmul.f32 %v1419_v21, %v3080_v44  ;;  %1876 = vtanh.f32 %v1298_v47  ;;  %v1265_v11 = vadd.f32 %v1233_v5, %v2955_v25  ;;  %v818_v32 = vadd.f32 %v3084_v55, %v3083_v24  ;;  %v3091_v21 = vld [vmem:[#allocation12_spill] sm:$0xff] }
 0x292   : > { %1481 = vst [vmem:[%s2779_s10 + $0xa8] sm:$0xff] %v1449_v7  ;;  %v1420_v37 = vmul.f32 %v1388_v53, %v2892_v15  ;;  %v1358_v49 = vadd.f32 1.0, %v1869_v58  ;;  %v1203_v9 = vmul.f32 %v1171_v40, %v1138_v19  ;;  %v707_v14 = vadd.f32 %v3086_v30, %v3085_v57  ;;  %v3092_v53 = vld [vmem:[#allocation13_spill] sm:$0xff] }
 0x293   : > { %1483 = vst [vmem:[%s2779_s10 + $0xb8] sm:$0xff] %v1451_v13  ;;  %v1297_v8 = vmul.f32 0.7978846, %v1265_v11  ;;  %v820_v48 = vadd.f32 %v3088_v26, %v3087_v22 }
 0x294   : > { %v1452_v45 = vmul.f32 %v1420_v37, %v705_v59  ;;  %v1390_v34 = vmul.f32 0.5, %v1358_v49  ;;  %v1235_v17 = vmul.f32 0.044715, %v1203_v9 }
 0x295   : > { %1878 = vtanh.f32 %v1297_v8 }
 0x296   : > { %v1871_v54 = vpop.eup %1870  ;;  %1484 = vst [vmem:[%s2779_s10 + $0xc0] sm:$0xff] %v1452_v45  ;;  %v1422_v38 = vmul.f32 %v1390_v34, %v2904_v51  ;;  %v1267_v16 = vadd.f32 %v1235_v17, %v1138_v19 }
 0x297   : > { %v1357_v3 = vadd.f32 1.0, %v1871_v54 }
 0x298   : > { %v1873_v46 = vpop.eup %1872  ;;  %v1454_v15 = vmul.f32 %v1422_v38, %v818_v32  ;;  %v1299_v35 = vmul.f32 0.7978846, %v1267_v16 }
 0x299   : > { %v1875_v39 = vpop.eup %1874  ;;  %v1389_v50 = vmul.f32 0.5, %v1357_v3  ;;  %v1359_v33 = vadd.f32 1.0, %v1873_v46 }
 0x29a   : > { %1486 = vst [vmem:[%s2779_s10 + $0xd0] sm:$0xff] %v1454_v15  ;;  %v1360_v61 = vadd.f32 1.0, %v1875_v39  ;;  %1880 = vtanh.f32 %v1299_v35 }
 0x29b   : > { %v1877_v43 = vpop.eup %1876  ;;  %v1421_v20 = vmul.f32 %v1389_v50, %v2921_v29  ;;  %v1391_v51 = vmul.f32 0.5, %v1359_v33 }
 0x29c   : > { %v1392_v23 = vmul.f32 0.5, %v1360_v61  ;;  %v1362_v27 = vadd.f32 1.0, %v1877_v43 }
 0x29d   : > { %v1453_v41 = vmul.f32 %v1421_v20, %v707_v14  ;;  %v1423_v62 = vmul.f32 %v1391_v51, %v2926_v52 }
 0x29e   : > { %v1424_v18 = vmul.f32 %v1392_v23, %v2934_v6  ;;  %v1394_v0 = vmul.f32 0.5, %v1362_v27 }
 0x29f   : > { %v1879_v4 = vpop.eup %1878  ;;  %1485 = vst [vmem:[%s2779_s10 + $0xc8] sm:$0xff] %v1453_v41  ;;  %v1455_v29 = vmul.f32 %v1423_v62, %v820_v48 }
 0x2a0   : > { %v1456_v1 = vmul.f32 %v1424_v18, %v3089_v2  ;;  %v1426_v56 = vmul.f32 %v1394_v0, %v2948_v12  ;;  %v1361_v63 = vadd.f32 1.0, %v1879_v4 }
 0x2a1   : > { %1487 = vst [vmem:[%s2779_s10 + $0xd8] sm:$0xff] %v1455_v29 }
 0x2a2   : > { %1488 = vst [vmem:[%s2779_s10 + $0xe0] sm:$0xff] %v1456_v1  ;;  %v1458_v42 = vmul.f32 %v1426_v56, %v3090_v60  ;;  %v1393_v10 = vmul.f32 0.5, %v1361_v63 }
 0x2a4   : > { %1490 = vst [vmem:[%s2779_s10 + $0xf0] sm:$0xff] %v1458_v42  ;;  %v1425_v52 = vmul.f32 %v1393_v10, %v2955_v25  ;;  %v1881_v6 = vpop.eup %1880 }
 0x2a5   : > { %v1363_v5 = vadd.f32 1.0, %v1881_v6 }
 0x2a6   : > { %v1457_v47 = vmul.f32 %v1425_v52, %v3091_v21 }
 0x2a7   : > { %v1395_v36 = vmul.f32 0.5, %v1363_v5 }
 0x2a8   : > { %1489 = vst [vmem:[%s2779_s10 + $0xe8] sm:$0xff] %v1457_v47 }
 0x2a9   : > { %v1427_v7 = vmul.f32 %v1395_v36, %v1138_v19 }
 0x2ab   : > { %v1459_v58 = vmul.f32 %v1427_v7, %v3092_v53 }
 0x2ad   : > { %1491 = vst [vmem:[%s2779_s10 + $0xf8] sm:$0xff] %v1459_v58 }
 0x2ae PF: > { %s17_s26 = sadd.s32 1, %s1904_s26   ;;  %s3093_s24 = smov %s1900_s25 }
 0x2af   : > { %p14_p5 = scmp.ge.s32.totalorder %s17_s26, 4   ;;  %s3094_s25 = smov %s3096_s27 }
 0x2b1   :  { %16 = sbr.rel (!%p14_p5) target bundleno = 2 (0x2), region = 90 }

</bundles_post_ra>
